<compile_context>
chip_gen: v7x
topology: tpu7x:2x2x1
jax: 0.10.0
libtpu: 0.0.40
codegen_flags: <defaults>
</compile_context>

<pallas_src>
import functools
import numpy as np

import jax
import jax.numpy as jnp
from jax import lax
from jax.experimental import pallas as pl
from jax.experimental.pallas import tpu as pltpu


# ----------------------------------------------------------------------------- utils
def _round_up(x, m):
    return ((x + m - 1) // m) * m


def _cdiv(a, b):
    return (a + b - 1) // b


def _num_tensorcores():
    """Best-effort TensorCore count (2 on v7x megacore, 1 on v5e/v6e)."""
    try:
        info = pltpu.get_tpu_info()
        for attr in ("num_cores", "core_count", "cores_per_chip", "num_tensorcores"):
            v = getattr(info, attr, None)
            if isinstance(v, int) and v > 0:
                return max(1, min(2, v))
    except Exception:
        pass
    return 2   # "parallel" with a single core is harmless on v5e/v6e


def _hann_window_padded(win_length, n_fft):
    """Periodic Hann window of win_length, centre-padded to n_fft (torch.stft)."""
    n = np.arange(win_length, dtype=np.float64)
    w = 0.5 - 0.5 * np.cos(2.0 * np.pi * n / win_length)
    left = (n_fft - win_length) // 2
    out = np.zeros((n_fft,), dtype=np.float64)
    out[left:left + win_length] = w
    return out.astype(np.float32)


def _melscale_fbanks(n_freqs, n_mels, sample_rate, f_min=0.0, f_max=None):
    """torchaudio.functional.melscale_fbanks (mel_scale='htk', norm='slaney').

    Returns (n_freqs, n_mels)."""
    if f_max is None:
        f_max = sample_rate / 2.0

    def hz_to_mel(f):
        return 2595.0 * np.log10(1.0 + f / 700.0)

    def mel_to_hz(m):
        return 700.0 * (10.0 ** (m / 2595.0) - 1.0)

    all_freqs = np.linspace(0.0, sample_rate / 2.0, n_freqs)
    m_min, m_max = hz_to_mel(f_min), hz_to_mel(f_max)
    m_pts = np.linspace(m_min, m_max, n_mels + 2)
    f_pts = mel_to_hz(m_pts)
    f_diff = f_pts[1:] - f_pts[:-1]                            # (n_mels+1,)
    slopes = f_pts[None, :] - all_freqs[:, None]               # (n_freqs, n_mels+2)
    down = -slopes[:, :-2] / f_diff[:-1]
    up = slopes[:, 2:] / f_diff[1:]
    fb = np.maximum(0.0, np.minimum(down, up))                 # (n_freqs, n_mels)
    enorm = 2.0 / (f_pts[2:n_mels + 2] - f_pts[:n_mels])       # slaney norm
    fb = fb * enorm[None, :]
    return fb.astype(np.float32)


def _dft_matrices(n_fft, n_freqs):
    """Real/imag DFT bases: re = frames @ cos, im = frames @ sin."""
    n = np.arange(n_fft, dtype=np.float64)[:, None]
    k = np.arange(n_freqs, dtype=np.float64)[None, :]
    ang = 2.0 * np.pi * n * k / n_fft
    return np.cos(ang).astype(np.float32), (-np.sin(ang)).astype(np.float32)


def _frame_signal(sig, n_fft, hop):
    """torch.stft framing semantics: center=True, reflect padding. No window
    multiply (the Hann window is folded into the DFT bases)."""
    B, C, T = sig.shape
    pad = n_fft // 2
    xp = jnp.pad(sig, ((0, 0), (0, 0), (pad, pad)), mode="reflect")
    Tp = xp.shape[-1]
    n_frames = 1 + (Tp - n_fft) // hop
    idx = jnp.arange(n_frames)[:, None] * hop + jnp.arange(n_fft)[None, :]
    frames = xp[:, :, idx]                                 # (B, C, n_frames, n_fft)
    return frames.reshape(B * C * n_frames, n_fft)


def _choose_tiling(n_rows, *, target_tn=256, n_chunks=2, min_tiles_per_chunk=2):
    """Per-resolution tile geometry: minimal row padding, >=2 tiles per chunk
    (DMA/compute overlap), tn a multiple of 8."""
    if n_rows < 8 * n_chunks * min_tiles_per_chunk:
        n_chunks = 1
    total_tiles = max(n_chunks * min_tiles_per_chunk, _cdiv(n_rows, target_tn))
    total_tiles = _round_up(total_tiles, n_chunks)
    tn = _round_up(_cdiv(n_rows, total_tiles), 8)
    return tn, n_chunks, total_tiles // n_chunks


# ----------------------------------------------------------------------------- kernel
def _stft_mel_loss_kernel(xf_ref, yf_ref, trig_ref, fbT_ref, cpad_ref,
                          abs_ref, sqd_ref, sqy_ref,
                          *, tn, tiles_per_chunk, n_valid_rows, eps, approx_recip):
    c = pl.program_id(0)   # "parallel" chunk axis (megacore split on v7x)
    i = pl.program_id(1)   # "arbitrary" row-tile axis (accumulation)

    @pl.when(i == 0)
    def _init():
        abs_ref[...] = jnp.zeros_like(abs_ref)
        sqd_ref[...] = jnp.zeros_like(sqd_ref)
        sqy_ref[...] = jnp.zeros_like(sqy_ref)

    row0 = (c * tiles_per_chunk + i) * tn

    # Skip all compute (both matmuls, magnitude, accumulation) on tiles made
    # entirely of zero-padded rows.
    @pl.when(row0 < n_valid_rows)
    def _compute():
        trig = trig_ref[...]                                        # (Kf, 2K)
        # One DFT matmul per signal: lanes [0:K] give re, [K:2K] give im.
        spec_x = jnp.dot(xf_ref[...], trig, preferred_element_type=jnp.float32)
        spec_y = jnp.dot(yf_ref[...], trig, preferred_element_type=jnp.float32)
        K = spec_x.shape[1] // 2

        def _mag(spec):                                             # (tn, K) f32
            re = spec[:, :K]
            im = spec[:, K:]
            return jnp.sqrt(jnp.maximum(re * re + im * im, eps))

        fbT = fbT_ref[...]                                          # (K, M)
        x_mel = jnp.dot(_mag(spec_x).astype(fbT.dtype), fbT,
                        preferred_element_type=jnp.float32)         # (tn, M) f32
        y_mel = jnp.dot(_mag(spec_y).astype(fbT.dtype), fbT,
                        preferred_element_type=jnp.float32)
        M = x_mel.shape[1]

        cpad = cpad_ref[...]        # (1, M): 1.0 on padded / degenerate mel cols
        cvalid = 1.0 - cpad

        diff = y_mel - x_mel        # padded mel columns are exactly 0 -> contribute 0
        sq_diff = diff * diff
        sq_y = y_mel * y_mel

        def _fold(z):
            # (tn, M) -> (8, M) partial sums via a tree of sublane-group adds
            # (VPU only, no per-step XLU full reduction).
            parts = [z[g * 8:(g + 1) * 8, :] for g in range(tn // 8)]
            while len(parts) > 1:
                nxt = [a + b for a, b in zip(parts[::2], parts[1::2])]
                if len(parts) % 2:
                    nxt.append(parts[-1])
                parts = nxt
            return parts[0]

        def _log_l1(xs, ys):
            if approx_recip:
                return jnp.abs(jnp.log(xs * pl.reciprocal(ys, approx=True)))
            return jnp.abs(jnp.log(xs) - jnp.log(ys))

        has_pad_rows = row0 + tn > n_valid_rows

        @pl.when(jnp.logical_not(has_pad_rows))
        def _fast():
            # Fast path: no padded rows in this tile.  +cpad keeps log() finite
            # on padded mel columns; *cvalid makes their contribution exactly 0.
            logdiff = _log_l1(x_mel + cpad, y_mel + cpad) * cvalid
            abs_ref[...] += _fold(logdiff)
            sqd_ref[...] += _fold(sq_diff)
            sqy_ref[...] += _fold(sq_y)

        @pl.when(has_pad_rows)
        def _masked():
            # Slow path: only on the tile that overlaps the zero-padded tail rows.
            row = lax.broadcasted_iota(jnp.int32, (tn, M), 0) + row0
            sel = row < n_valid_rows
            rmask = sel.astype(jnp.float32)
            xs = jnp.where(sel, x_mel, 1.0) + cpad
            ys = jnp.where(sel, y_mel, 1.0) + cpad
            logdiff = _log_l1(xs, ys) * (rmask * cvalid)
            abs_ref[...] += _fold(logdiff)
            sqd_ref[...] += _fold(sq_diff * rmask)
            sqy_ref[...] += _fold(sq_y * rmask)


def _stft_mel_sums(xf, yf, trig, fbT, cpad, *, tn, n_chunks, tiles_per_chunk,
                   n_valid_rows, eps, approx_recip):
    Kf = xf.shape[1]
    K2 = trig.shape[1]
    Kr, M = fbT.shape
    kernel = functools.partial(
        _stft_mel_loss_kernel, tn=tn, tiles_per_chunk=tiles_per_chunk,
        n_valid_rows=n_valid_rows, eps=eps, approx_recip=approx_recip)
    acc_shape = jax.ShapeDtypeStruct((n_chunks * 8, M), jnp.float32)
    acc_spec = pl.BlockSpec((8, M), lambda c, i: (c, 0))       # lane-dense partials
    row_map = lambda c, i: (c * tiles_per_chunk + i, 0)
    const_map = lambda c, i: (0, 0)
    return pl.pallas_call(
        kernel,
        out_shape=(acc_shape, acc_shape, acc_shape),
        grid=(n_chunks, tiles_per_chunk),
        in_specs=[
            pl.BlockSpec((tn, Kf), row_map),     # x frame tile
            pl.BlockSpec((tn, Kf), row_map),     # y frame tile
            pl.BlockSpec((Kf, K2), const_map),   # windowed [cos | sin] DFT basis
            pl.BlockSpec((Kr, M), const_map),    # mel filterbank^T
            pl.BlockSpec((1, M), const_map),     # padded-mel-column indicator
        ],
        out_specs=(acc_spec, acc_spec, acc_spec),
        compiler_params=pltpu.CompilerParams(
            dimension_semantics=("parallel", "arbitrary"),
            vmem_limit_bytes=32 * 1024 * 1024),
    )(xf, yf, trig, fbT, cpad)


# ----------------------------------------------------------------------------- module
class MultiResolutionMelSTFTLossPallas:
    """Pallas implementation of MultiResolutionMelSTFTLoss forward.

    lambda_lin_mag = lambda_phase = 0 (module defaults), so only the spectral
    convergence and log-magnitude L1 terms are active; reduction='mean',
    mag_distance='L1', scale='mel', scale_invariance=False.
    """

    def __init__(self, n_ffts, hop_lengths, win_lengths, sample_rate, n_bins,
                 lambda_sc=1.0, lambda_log_mag=1.0, lambda_lin_mag=0.0,
                 lambda_phase=0.0, eps=1e-8, target_tn=256, high_precision=False):
        assert len(n_ffts) == len(hop_lengths) == len(win_lengths)
        self.lambda_sc = lambda_sc
        self.lambda_log_mag = lambda_log_mag
        self.lambda_lin_mag = lambda_lin_mag  # zero -> term skipped
        self.lambda_phase = lambda_phase      # zero -> term skipped
        # TODO(synk): phase (torch.angle) + lin-mag terms are inactive with the
        # module defaults (weights 0.0) and are not lowered to Pallas here.
        self.eps = eps
        self.target_tn = target_tn
        self.n_bins = n_bins
        self.high_precision = high_precision
        self.compute_dtype = jnp.float32 if high_precision else jnp.bfloat16
        self.approx_recip = not high_precision
        self.n_cores = _num_tensorcores()

        M = _round_up(n_bins, 128)
        self.resolutions = []
        for n_fft, hop, win in zip(n_ffts, hop_lengths, win_lengths):
            # Drop the Nyquist bin: its mel filter weight (f = sr/2 = f_max,
            # the upper edge of the last triangular filter) is identically 0,
            # so the mel projection is exact without it and K shrinks.
            n_freqs_full = n_fft // 2 + 1
            n_freqs = n_fft // 2
            K = _round_up(n_freqs, 128)
            Kf = _round_up(n_fft, 128)
            window = _hann_window_padded(win, n_fft)               # (n_fft,)
            cos_np, sin_np = _dft_matrices(n_fft, n_freqs)         # (n_fft, n_freqs)
            # Fold the analysis window into the DFT bases and pack [cos | sin]
            # so the kernel does a single DFT matmul per signal per tile.
            trig = np.zeros((Kf, 2 * K), np.float32)
            trig[:n_fft, :n_freqs] = window[:, None] * cos_np
            trig[:n_fft, K:K + n_freqs] = window[:, None] * sin_np
            fb_full = _melscale_fbanks(n_freqs_full, n_bins, sample_rate)
            fb = fb_full[:n_freqs, :]            # Nyquist row is exactly zero
            fbT = np.zeros((K, M), np.float32)
            fbT[:n_freqs, :n_bins] = fb
            # 1.0 on mel columns that must be excluded from the log term
            # (zero-padded columns, plus any degenerate all-zero filter).
            cpad = np.ones((1, M), np.float32)
            cpad[0, :n_bins] = (fb.sum(axis=0) <= 0.0).astype(np.float32)
            self.resolutions.append(dict(
                n_fft=n_fft, hop=hop, Kf=Kf,
                window=jnp.asarray(window),            # kept for the f32 reference
                fb32=jnp.asarray(fb_full),             # kept for the f32 reference
                trig=jnp.asarray(trig, dtype=self.compute_dtype),
                fbT=jnp.asarray(fbT, dtype=self.compute_dtype),
                cpad=jnp.asarray(cpad)))
        # jit the whole forward: pad+gather+cast fuse and the per-resolution
        # pallas_calls dispatch back-to-back.
        self._jit_forward = jax.jit(self._forward)

    def _forward(self, x, y):
        total, scs, logs = [], [], []
        # Cast BEFORE framing: numerically identical (framing only copies
        # samples) but halves the HBM traffic of the expanded framed arrays.
        xc = x.astype(self.compute_dtype)
        yc = y.astype(self.compute_dtype)
        for res in self.resolutions:
            n_fft, hop, Kf = res["n_fft"], res["hop"], res["Kf"]
            xf = _frame_signal(xc, n_fft, hop)
            yf = _frame_signal(yc, n_fft, hop)
            n_rows = xf.shape[0]
            tn, n_chunks, tiles_per_chunk = _choose_tiling(
                n_rows, target_tn=self.target_tn, n_chunks=self.n_cores)
            npad = n_chunks * tiles_per_chunk * tn

            def prep(f):
                return jnp.pad(f, ((0, npad - n_rows), (0, Kf - n_fft)))

            abs_o, sqd_o, sqy_o = _stft_mel_sums(
                prep(xf), prep(yf), res["trig"], res["fbT"], res["cpad"],
                tn=tn, n_chunks=n_chunks, tiles_per_chunk=tiles_per_chunk,
                n_valid_rows=n_rows, eps=self.eps, approx_recip=self.approx_recip)

            s_abs = jnp.sum(abs_o)
            s_sqd = jnp.sum(sqd_o)
            s_sqy = jnp.sum(sqy_o)
            n_elems = n_rows * self.n_bins
            log_mag_loss = s_abs / n_elems                        # L1, mean
            sc_loss = jnp.sqrt(s_sqd) / jnp.sqrt(s_sqy)           # Frobenius ratio
            loss = self.lambda_sc * sc_loss + self.lambda_log_mag * log_mag_loss
            total.append(loss)
            scs.append(sc_loss)
            logs.append(log_mag_loss)
        total_loss = jnp.mean(jnp.stack(total))
        losses = {
            "sc_mag_loss": jnp.mean(jnp.stack(scs)),
            "log_mag_loss": jnp.mean(jnp.stack(logs)),
            "lin_mag_loss": jnp.zeros((), jnp.float32),
            "phs_loss": jnp.zeros((), jnp.float32),
        }
        return total_loss, losses

    def __call__(self, x, y):
        return self._jit_forward(x, y)


# ----------------------------------------------------------------------------- pure-JAX reference
def _reference_total(x, y, mod: MultiResolutionMelSTFTLossPallas):
    totals = []
    for res in mod.resolutions:
        n_fft = res["n_fft"]

        def mel_mag(sig):
            fr = _frame_signal(sig, n_fft, res["hop"]) * res["window"][None, :]
            spec = jnp.fft.rfft(fr, n=n_fft, axis=-1)
            mag = jnp.sqrt(jnp.maximum(jnp.real(spec) ** 2 + jnp.imag(spec) ** 2,
                                       mod.eps))
            return mag @ res["fb32"]

        xm, ym = mel_mag(x), mel_mag(y)
        sc = jnp.linalg.norm(ym - xm) / jnp.linalg.norm(ym)
        lg = jnp.mean(jnp.abs(jnp.log(xm) - jnp.log(ym)))
        totals.append(mod.lambda_sc * sc + mod.lambda_log_mag * lg)
    return jnp.mean(jnp.stack(totals))


# ----------------------------------------------------------------------------- main
if __name__ == "__main__":
    key = jax.random.PRNGKey(0)
    kx, ky = jax.random.split(key)
    B, C, T = 2, 1, 8192                     # ~0.5 s of 16 kHz audio
    x = jax.random.normal(kx, (B, C, T), dtype=jnp.float32)
    y = jax.random.normal(ky, (B, C, T), dtype=jnp.float32)

    loss_mod = MultiResolutionMelSTFTLossPallas(
        n_ffts=[256, 512, 128],
        hop_lengths=[64, 128, 32],
        win_lengths=[192, 384, 96],
        sample_rate=16000.0,
        n_bins=8,
    )

    total_loss, losses = loss_mod(x, y)
    total_loss = jax.block_until_ready(total_loss)

    ref = jax.block_until_ready(_reference_total(x, y, loss_mod))
    np.testing.assert_allclose(float(total_loss), float(ref), rtol=5e-2)

    print("KERNEL_OK")
</pallas_src>

<mosaic_0001>
module attributes {stable_mosaic.version = 11 : i64} {
  func.func @_stft_mel_loss_kernel(%arg0: i32, %arg1: i32, %arg2: memref<40x512xbf16, #tpu.memory_space<vmem>>, %arg3: memref<40x512xbf16, #tpu.memory_space<vmem>>, %arg4: memref<512x512xbf16, #tpu.memory_space<vmem>>, %arg5: memref<256x128xbf16, #tpu.memory_space<vmem>>, %arg6: memref<1x128xf32, #tpu.memory_space<vmem>>, %arg7: memref<8x128xf32, #tpu.memory_space<vmem>>, %arg8: memref<8x128xf32, #tpu.memory_space<vmem>>, %arg9: memref<8x128xf32, #tpu.memory_space<vmem>>) attributes {dimension_semantics = [#tpu.dimension_semantics<parallel>, #tpu.dimension_semantics<arbitrary>], iteration_bounds = array<i64: 2, 2>, scalar_prefetch = 0 : i64, scratch_operands = 0 : i64, tpu.core_type = #tpu.core_type<tc>, window_params = [{transform_indices = @transform_0, window_bounds = array<i64: 40, 512>}, {transform_indices = @transform_1, window_bounds = array<i64: 40, 512>}, {pipeline_mode = #tpu.pipeline_mode<synchronous>, transform_indices = @transform_2, window_bounds = array<i64: 512, 512>}, {pipeline_mode = #tpu.pipeline_mode<synchronous>, transform_indices = @transform_3, window_bounds = array<i64: 256, 128>}, {pipeline_mode = #tpu.pipeline_mode<synchronous>, transform_indices = @transform_4, window_bounds = array<i64: 1, 128>}, {transform_indices = @transform_5, window_bounds = array<i64: 8, 128>}, {transform_indices = @transform_6, window_bounds = array<i64: 8, 128>}, {transform_indices = @transform_7, window_bounds = array<i64: 8, 128>}]} {
    %c0_i32 = arith.constant 0 : i32
    %0 = arith.cmpi eq, %arg1, %c0_i32 : i32
    %1 = arith.extui %0 : i1 to i32
    %c0_i32_0 = arith.constant 0 : i32
    %2 = arith.cmpi ne, %1, %c0_i32_0 : i32
    scf.if %2 {
      %cst = arith.constant 0.000000e+00 : f32
      %9 = vector.broadcast %cst : f32 to vector<8x128xf32>
      %c0 = arith.constant 0 : index
      %c0_2 = arith.constant 0 : index
      %10 = vector.load %arg7[%c0, %c0_2] : memref<8x128xf32, #tpu.memory_space<vmem>>, vector<8x128xf32>
      tpu.vector_store %arg7[%c0, %c0_2], %9 {strides = array<i32>} : memref<8x128xf32, #tpu.memory_space<vmem>>, vector<8x128xf32>,
      %cst_3 = arith.constant 0.000000e+00 : f32
      %11 = vector.broadcast %cst_3 : f32 to vector<8x128xf32>
      %c0_4 = arith.constant 0 : index
      %c0_5 = arith.constant 0 : index
      %12 = vector.load %arg8[%c0_4, %c0_5] : memref<8x128xf32, #tpu.memory_space<vmem>>, vector<8x128xf32>
      tpu.vector_store %arg8[%c0_4, %c0_5], %11 {strides = array<i32>} : memref<8x128xf32, #tpu.memory_space<vmem>>, vector<8x128xf32>,
      %cst_6 = arith.constant 0.000000e+00 : f32
      %13 = vector.broadcast %cst_6 : f32 to vector<8x128xf32>
      %c0_7 = arith.constant 0 : index
      %c0_8 = arith.constant 0 : index
      %14 = vector.load %arg9[%c0_7, %c0_8] : memref<8x128xf32, #tpu.memory_space<vmem>>, vector<8x128xf32>
      tpu.vector_store %arg9[%c0_7, %c0_8], %13 {strides = array<i32>} : memref<8x128xf32, #tpu.memory_space<vmem>>, vector<8x128xf32>,
    } else {
    }
    %c2_i32 = arith.constant 2 : i32
    %3 = arith.muli %arg0, %c2_i32 : i32
    %4 = arith.addi %3, %arg1 : i32
    %c40_i32 = arith.constant 40 : i32
    %5 = arith.muli %4, %c40_i32 : i32
    %c130_i32 = arith.constant 130 : i32
    %6 = arith.cmpi slt, %5, %c130_i32 : i32
    %7 = arith.extui %6 : i1 to i32
    %c0_i32_1 = arith.constant 0 : i32
    %8 = arith.cmpi ne, %7, %c0_i32_1 : i32
    scf.if %8 {
      %c0 = arith.constant 0 : index
      %c0_2 = arith.constant 0 : index
      %9 = vector.load %arg4[%c0, %c0_2] : memref<512x512xbf16, #tpu.memory_space<vmem>>, vector<512x512xbf16>
      %c0_3 = arith.constant 0 : index
      %c0_4 = arith.constant 0 : index
      %10 = vector.load %arg2[%c0_3, %c0_4] : memref<40x512xbf16, #tpu.memory_space<vmem>>, vector<40x512xbf16>
      %cst = arith.constant dense<0.000000e+00> : vector<40x512xf32>
      %11 = tpu.matmul %10, %9, %cst {dimension_numbers = #tpu.dot_dimension_numbers<[1], [0], [0], [1], [0, 0, 1, 1], [], []>} : vector<40x512xbf16>, vector<512x512xbf16>, vector<40x512xf32> -> vector<40x512xf32>
      %c0_5 = arith.constant 0 : index
      %c0_6 = arith.constant 0 : index
      %12 = vector.load %arg3[%c0_5, %c0_6] : memref<40x512xbf16, #tpu.memory_space<vmem>>, vector<40x512xbf16>
      %cst_7 = arith.constant dense<0.000000e+00> : vector<40x512xf32>
      %13 = tpu.matmul %12, %9, %cst_7 {dimension_numbers = #tpu.dot_dimension_numbers<[1], [0], [0], [1], [0, 0, 1, 1], [], []>} : vector<40x512xbf16>, vector<512x512xbf16>, vector<40x512xf32> -> vector<40x512xf32>
      %c0_8 = arith.constant 0 : index
      %c0_9 = arith.constant 0 : index
      %14 = vector.load %arg5[%c0_8, %c0_9] : memref<256x128xbf16, #tpu.memory_space<vmem>>, vector<256x128xbf16>
      %15 = vector.extract_strided_slice %11 {offsets = [0, 0], sizes = [40, 256], strides = [1, 1]} : vector<40x512xf32> to vector<40x256xf32>
      %16 = vector.extract_strided_slice %11 {offsets = [0, 256], sizes = [40, 256], strides = [1, 1]} : vector<40x512xf32> to vector<40x256xf32>
      %17 = arith.mulf %15, %15 : vector<40x256xf32>
      %18 = arith.mulf %16, %16 : vector<40x256xf32>
      %19 = arith.addf %17, %18 : vector<40x256xf32>
      %cst_10 = arith.constant 9.99999993E-9 : f32
      %20 = vector.broadcast %cst_10 : f32 to vector<40x256xf32>
      %21 = arith.maximumf %19, %20 : vector<40x256xf32>
      %22 = math.sqrt %21 : vector<40x256xf32>
      %23 = arith.truncf %22 : vector<40x256xf32> to vector<40x256xbf16>
      %cst_11 = arith.constant dense<0.000000e+00> : vector<40x128xf32>
      %24 = tpu.matmul %23, %14, %cst_11 {dimension_numbers = #tpu.dot_dimension_numbers<[1], [0], [0], [1], [0, 0, 1, 1], [], []>} : vector<40x256xbf16>, vector<256x128xbf16>, vector<40x128xf32> -> vector<40x128xf32>
      %25 = vector.extract_strided_slice %13 {offsets = [0, 0], sizes = [40, 256], strides = [1, 1]} : vector<40x512xf32> to vector<40x256xf32>
      %26 = vector.extract_strided_slice %13 {offsets = [0, 256], sizes = [40, 256], strides = [1, 1]} : vector<40x512xf32> to vector<40x256xf32>
      %27 = arith.mulf %25, %25 : vector<40x256xf32>
      %28 = arith.mulf %26, %26 : vector<40x256xf32>
      %29 = arith.addf %27, %28 : vector<40x256xf32>
      %cst_12 = arith.constant 9.99999993E-9 : f32
      %30 = vector.broadcast %cst_12 : f32 to vector<40x256xf32>
      %31 = arith.maximumf %29, %30 : vector<40x256xf32>
      %32 = math.sqrt %31 : vector<40x256xf32>
      %33 = arith.truncf %32 : vector<40x256xf32> to vector<40x256xbf16>
      %cst_13 = arith.constant dense<0.000000e+00> : vector<40x128xf32>
      %34 = tpu.matmul %33, %14, %cst_13 {dimension_numbers = #tpu.dot_dimension_numbers<[1], [0], [0], [1], [0, 0, 1, 1], [], []>} : vector<40x256xbf16>, vector<256x128xbf16>, vector<40x128xf32> -> vector<40x128xf32>
      %c0_14 = arith.constant 0 : index
      %c0_15 = arith.constant 0 : index
      %35 = vector.load %arg6[%c0_14, %c0_15] : memref<1x128xf32, #tpu.memory_space<vmem>>, vector<1x128xf32>
      %cst_16 = arith.constant 1.000000e+00 : f32
      %36 = vector.broadcast %cst_16 : f32 to vector<1x128xf32>
      %37 = arith.subf %36, %35 : vector<1x128xf32>
      %38 = arith.subf %34, %24 : vector<40x128xf32>
      %39 = arith.mulf %38, %38 : vector<40x128xf32>
      %40 = arith.mulf %34, %34 : vector<40x128xf32>
      %c40_i32_17 = arith.constant 40 : i32
      %41 = arith.addi %5, %c40_i32_17 : i32
      %c130_i32_18 = arith.constant 130 : i32
      %42 = arith.cmpi sgt, %41, %c130_i32_18 : i32
      %true = arith.constant true
      %43 = arith.xori %42, %true : i1
      %44 = arith.extui %43 : i1 to i32
      %c0_i32_19 = arith.constant 0 : i32
      %45 = arith.cmpi ne, %44, %c0_i32_19 : i32
      scf.if %45 {
        %48 = vector.broadcast %35 : vector<1x128xf32> to vector<40x128xf32>
        %49 = arith.addf %24, %48 : vector<40x128xf32>
        %50 = vector.broadcast %35 : vector<1x128xf32> to vector<40x128xf32>
        %51 = arith.addf %34, %50 : vector<40x128xf32>
        %52 = tpu.reciprocal %51 {approx = true} : vector<40x128xf32> -> vector<40x128xf32>
        %53 = arith.mulf %49, %52 : vector<40x128xf32>
        %54 = math.log %53 : vector<40x128xf32>
        %55 = math.absf %54 : vector<40x128xf32>
        %56 = vector.broadcast %37 : vector<1x128xf32> to vector<40x128xf32>
        %57 = arith.mulf %55, %56 : vector<40x128xf32>
        %c0_21 = arith.constant 0 : index
        %c0_22 = arith.constant 0 : index
        %58 = vector.load %arg7[%c0_21, %c0_22] : memref<8x128xf32, #tpu.memory_space<vmem>>, vector<8x128xf32>
        %59 = vector.extract_strided_slice %57 {offsets = [0, 0], sizes = [8, 128], strides = [1, 1]} : vector<40x128xf32> to vector<8x128xf32>
        %60 = vector.extract_strided_slice %57 {offsets = [8, 0], sizes = [8, 128], strides = [1, 1]} : vector<40x128xf32> to vector<8x128xf32>
        %61 = vector.extract_strided_slice %57 {offsets = [16, 0], sizes = [8, 128], strides = [1, 1]} : vector<40x128xf32> to vector<8x128xf32>
        %62 = vector.extract_strided_slice %57 {offsets = [24, 0], sizes = [8, 128], strides = [1, 1]} : vector<40x128xf32> to vector<8x128xf32>
        %63 = vector.extract_strided_slice %57 {offsets = [32, 0], sizes = [8, 128], strides = [1, 1]} : vector<40x128xf32> to vector<8x128xf32>
        %64 = arith.addf %59, %60 : vector<8x128xf32>
        %65 = arith.addf %61, %62 : vector<8x128xf32>
        %66 = arith.addf %64, %65 : vector<8x128xf32>
        %67 = arith.addf %66, %63 : vector<8x128xf32>
        %68 = arith.addf %58, %67 : vector<8x128xf32>
        %c0_23 = arith.constant 0 : index
        %c0_24 = arith.constant 0 : index
        %69 = vector.load %arg7[%c0_23, %c0_24] : memref<8x128xf32, #tpu.memory_space<vmem>>, vector<8x128xf32>
        tpu.vector_store %arg7[%c0_23, %c0_24], %68 {strides = array<i32>} : memref<8x128xf32, #tpu.memory_space<vmem>>, vector<8x128xf32>,
        %c0_25 = arith.constant 0 : index
        %c0_26 = arith.constant 0 : index
        %70 = vector.load %arg8[%c0_25, %c0_26] : memref<8x128xf32, #tpu.memory_space<vmem>>, vector<8x128xf32>
        %71 = vector.extract_strided_slice %39 {offsets = [0, 0], sizes = [8, 128], strides = [1, 1]} : vector<40x128xf32> to vector<8x128xf32>
        %72 = vector.extract_strided_slice %39 {offsets = [8, 0], sizes = [8, 128], strides = [1, 1]} : vector<40x128xf32> to vector<8x128xf32>
        %73 = vector.extract_strided_slice %39 {offsets = [16, 0], sizes = [8, 128], strides = [1, 1]} : vector<40x128xf32> to vector<8x128xf32>
        %74 = vector.extract_strided_slice %39 {offsets = [24, 0], sizes = [8, 128], strides = [1, 1]} : vector<40x128xf32> to vector<8x128xf32>
        %75 = vector.extract_strided_slice %39 {offsets = [32, 0], sizes = [8, 128], strides = [1, 1]} : vector<40x128xf32> to vector<8x128xf32>
        %76 = arith.addf %71, %72 : vector<8x128xf32>
        %77 = arith.addf %73, %74 : vector<8x128xf32>
        %78 = arith.addf %76, %77 : vector<8x128xf32>
        %79 = arith.addf %78, %75 : vector<8x128xf32>
        %80 = arith.addf %70, %79 : vector<8x128xf32>
        %c0_27 = arith.constant 0 : index
        %c0_28 = arith.constant 0 : index
        %81 = vector.load %arg8[%c0_27, %c0_28] : memref<8x128xf32, #tpu.memory_space<vmem>>, vector<8x128xf32>
        tpu.vector_store %arg8[%c0_27, %c0_28], %80 {strides = array<i32>} : memref<8x128xf32, #tpu.memory_space<vmem>>, vector<8x128xf32>,
        %c0_29 = arith.constant 0 : index
        %c0_30 = arith.constant 0 : index
        %82 = vector.load %arg9[%c0_29, %c0_30] : memref<8x128xf32, #tpu.memory_space<vmem>>, vector<8x128xf32>
        %83 = vector.extract_strided_slice %40 {offsets = [0, 0], sizes = [8, 128], strides = [1, 1]} : vector<40x128xf32> to vector<8x128xf32>
        %84 = vector.extract_strided_slice %40 {offsets = [8, 0], sizes = [8, 128], strides = [1, 1]} : vector<40x128xf32> to vector<8x128xf32>
        %85 = vector.extract_strided_slice %40 {offsets = [16, 0], sizes = [8, 128], strides = [1, 1]} : vector<40x128xf32> to vector<8x128xf32>
        %86 = vector.extract_strided_slice %40 {offsets = [24, 0], sizes = [8, 128], strides = [1, 1]} : vector<40x128xf32> to vector<8x128xf32>
        %87 = vector.extract_strided_slice %40 {offsets = [32, 0], sizes = [8, 128], strides = [1, 1]} : vector<40x128xf32> to vector<8x128xf32>
        %88 = arith.addf %83, %84 : vector<8x128xf32>
        %89 = arith.addf %85, %86 : vector<8x128xf32>
        %90 = arith.addf %88, %89 : vector<8x128xf32>
        %91 = arith.addf %90, %87 : vector<8x128xf32>
        %92 = arith.addf %82, %91 : vector<8x128xf32>
        %c0_31 = arith.constant 0 : index
        %c0_32 = arith.constant 0 : index
        %93 = vector.load %arg9[%c0_31, %c0_32] : memref<8x128xf32, #tpu.memory_space<vmem>>, vector<8x128xf32>
        tpu.vector_store %arg9[%c0_31, %c0_32], %92 {strides = array<i32>} : memref<8x128xf32, #tpu.memory_space<vmem>>, vector<8x128xf32>,
      } else {
      }
      %46 = arith.extui %42 : i1 to i32
      %c0_i32_20 = arith.constant 0 : i32
      %47 = arith.cmpi ne, %46, %c0_i32_20 : i32
      scf.if %47 {
        %48 = tpu.iota {dimensions = array<i32: 0>} : vector<40x128xi32>
        %49 = vector.broadcast %5 : i32 to vector<40x128xi32>
        %50 = arith.addi %48, %49 : vector<40x128xi32>
        %c130_i32_21 = arith.constant 130 : i32
        %51 = vector.broadcast %c130_i32_21 : i32 to vector<40x128xi32>
        %52 = arith.cmpi slt, %50, %51 : vector<40x128xi32>
        %53 = arith.extui %52 : vector<40x128xi1> to vector<40x128xi32>
        %54 = arith.sitofp %53 : vector<40x128xi32> to vector<40x128xf32>
        %cst_22 = arith.constant 1.000000e+00 : f32
        %55 = vector.broadcast %cst_22 : f32 to vector<40x128xf32>
        %56 = arith.select %52, %24, %55 : vector<40x128xi1>, vector<40x128xf32>
        %57 = vector.broadcast %35 : vector<1x128xf32> to vector<40x128xf32>
        %58 = arith.addf %56, %57 : vector<40x128xf32>
        %cst_23 = arith.constant 1.000000e+00 : f32
        %59 = vector.broadcast %cst_23 : f32 to vector<40x128xf32>
        %60 = arith.select %52, %34, %59 : vector<40x128xi1>, vector<40x128xf32>
        %61 = vector.broadcast %35 : vector<1x128xf32> to vector<40x128xf32>
        %62 = arith.addf %60, %61 : vector<40x128xf32>
        %63 = tpu.reciprocal %62 {approx = true} : vector<40x128xf32> -> vector<40x128xf32>
        %64 = arith.mulf %58, %63 : vector<40x128xf32>
        %65 = math.log %64 : vector<40x128xf32>
        %66 = math.absf %65 : vector<40x128xf32>
        %67 = vector.broadcast %37 : vector<1x128xf32> to vector<40x128xf32>
        %68 = arith.mulf %54, %67 : vector<40x128xf32>
        %69 = arith.mulf %66, %68 : vector<40x128xf32>
        %c0_24 = arith.constant 0 : index
        %c0_25 = arith.constant 0 : index
        %70 = vector.load %arg7[%c0_24, %c0_25] : memref<8x128xf32, #tpu.memory_space<vmem>>, vector<8x128xf32>
        %71 = vector.extract_strided_slice %69 {offsets = [0, 0], sizes = [8, 128], strides = [1, 1]} : vector<40x128xf32> to vector<8x128xf32>
        %72 = vector.extract_strided_slice %69 {offsets = [8, 0], sizes = [8, 128], strides = [1, 1]} : vector<40x128xf32> to vector<8x128xf32>
        %73 = vector.extract_strided_slice %69 {offsets = [16, 0], sizes = [8, 128], strides = [1, 1]} : vector<40x128xf32> to vector<8x128xf32>
        %74 = vector.extract_strided_slice %69 {offsets = [24, 0], sizes = [8, 128], strides = [1, 1]} : vector<40x128xf32> to vector<8x128xf32>
        %75 = vector.extract_strided_slice %69 {offsets = [32, 0], sizes = [8, 128], strides = [1, 1]} : vector<40x128xf32> to vector<8x128xf32>
        %76 = arith.addf %71, %72 : vector<8x128xf32>
        %77 = arith.addf %73, %74 : vector<8x128xf32>
        %78 = arith.addf %76, %77 : vector<8x128xf32>
        %79 = arith.addf %78, %75 : vector<8x128xf32>
        %80 = arith.addf %70, %79 : vector<8x128xf32>
        %c0_26 = arith.constant 0 : index
        %c0_27 = arith.constant 0 : index
        %81 = vector.load %arg7[%c0_26, %c0_27] : memref<8x128xf32, #tpu.memory_space<vmem>>, vector<8x128xf32>
        tpu.vector_store %arg7[%c0_26, %c0_27], %80 {strides = array<i32>} : memref<8x128xf32, #tpu.memory_space<vmem>>, vector<8x128xf32>,
        %c0_28 = arith.constant 0 : index
        %c0_29 = arith.constant 0 : index
        %82 = vector.load %arg8[%c0_28, %c0_29] : memref<8x128xf32, #tpu.memory_space<vmem>>, vector<8x128xf32>
        %83 = arith.mulf %39, %54 : vector<40x128xf32>
        %84 = vector.extract_strided_slice %83 {offsets = [0, 0], sizes = [8, 128], strides = [1, 1]} : vector<40x128xf32> to vector<8x128xf32>
        %85 = vector.extract_strided_slice %83 {offsets = [8, 0], sizes = [8, 128], strides = [1, 1]} : vector<40x128xf32> to vector<8x128xf32>
        %86 = vector.extract_strided_slice %83 {offsets = [16, 0], sizes = [8, 128], strides = [1, 1]} : vector<40x128xf32> to vector<8x128xf32>
        %87 = vector.extract_strided_slice %83 {offsets = [24, 0], sizes = [8, 128], strides = [1, 1]} : vector<40x128xf32> to vector<8x128xf32>
        %88 = vector.extract_strided_slice %83 {offsets = [32, 0], sizes = [8, 128], strides = [1, 1]} : vector<40x128xf32> to vector<8x128xf32>
        %89 = arith.addf %84, %85 : vector<8x128xf32>
        %90 = arith.addf %86, %87 : vector<8x128xf32>
        %91 = arith.addf %89, %90 : vector<8x128xf32>
        %92 = arith.addf %91, %88 : vector<8x128xf32>
        %93 = arith.addf %82, %92 : vector<8x128xf32>
        %c0_30 = arith.constant 0 : index
        %c0_31 = arith.constant 0 : index
        %94 = vector.load %arg8[%c0_30, %c0_31] : memref<8x128xf32, #tpu.memory_space<vmem>>, vector<8x128xf32>
        tpu.vector_store %arg8[%c0_30, %c0_31], %93 {strides = array<i32>} : memref<8x128xf32, #tpu.memory_space<vmem>>, vector<8x128xf32>,
        %c0_32 = arith.constant 0 : index
        %c0_33 = arith.constant 0 : index
        %95 = vector.load %arg9[%c0_32, %c0_33] : memref<8x128xf32, #tpu.memory_space<vmem>>, vector<8x128xf32>
        %96 = arith.mulf %40, %54 : vector<40x128xf32>
        %97 = vector.extract_strided_slice %96 {offsets = [0, 0], sizes = [8, 128], strides = [1, 1]} : vector<40x128xf32> to vector<8x128xf32>
        %98 = vector.extract_strided_slice %96 {offsets = [8, 0], sizes = [8, 128], strides = [1, 1]} : vector<40x128xf32> to vector<8x128xf32>
        %99 = vector.extract_strided_slice %96 {offsets = [16, 0], sizes = [8, 128], strides = [1, 1]} : vector<40x128xf32> to vector<8x128xf32>
        %100 = vector.extract_strided_slice %96 {offsets = [24, 0], sizes = [8, 128], strides = [1, 1]} : vector<40x128xf32> to vector<8x128xf32>
        %101 = vector.extract_strided_slice %96 {offsets = [32, 0], sizes = [8, 128], strides = [1, 1]} : vector<40x128xf32> to vector<8x128xf32>
        %102 = arith.addf %97, %98 : vector<8x128xf32>
        %103 = arith.addf %99, %100 : vector<8x128xf32>
        %104 = arith.addf %102, %103 : vector<8x128xf32>
        %105 = arith.addf %104, %101 : vector<8x128xf32>
        %106 = arith.addf %95, %105 : vector<8x128xf32>
        %c0_34 = arith.constant 0 : index
        %c0_35 = arith.constant 0 : index
        %107 = vector.load %arg9[%c0_34, %c0_35] : memref<8x128xf32, #tpu.memory_space<vmem>>, vector<8x128xf32>
        tpu.vector_store %arg9[%c0_34, %c0_35], %106 {strides = array<i32>} : memref<8x128xf32, #tpu.memory_space<vmem>>, vector<8x128xf32>,
      } else {
      }
    } else {
    }
    return
  }
  func.func @transform_0(%arg0: i32, %arg1: i32) -> (i32, i32) {
    %c2_i32 = arith.constant 2 : i32
    %0 = arith.muli %arg0, %c2_i32 : i32
    %1 = arith.addi %0, %arg1 : i32
    %c0_i32 = arith.constant 0 : i32
    %c0_i32_0 = arith.constant 0 : i32
    return %1, %c0_i32 : i32, i32
  }
  func.func @transform_1(%arg0: i32, %arg1: i32) -> (i32, i32) {
    %c2_i32 = arith.constant 2 : i32
    %0 = arith.muli %arg0, %c2_i32 : i32
    %1 = arith.addi %0, %arg1 : i32
    %c0_i32 = arith.constant 0 : i32
    %c0_i32_0 = arith.constant 0 : i32
    return %1, %c0_i32 : i32, i32
  }
  func.func @transform_2(%arg0: i32, %arg1: i32) -> (i32, i32) {
    %c0_i32 = arith.constant 0 : i32
    %c0_i32_0 = arith.constant 0 : i32
    %c0_i32_1 = arith.constant 0 : i32
    return %c0_i32, %c0_i32_0 : i32, i32
  }
  func.func @transform_3(%arg0: i32, %arg1: i32) -> (i32, i32) {
    %c0_i32 = arith.constant 0 : i32
    %c0_i32_0 = arith.constant 0 : i32
    %c0_i32_1 = arith.constant 0 : i32
    return %c0_i32, %c0_i32_0 : i32, i32
  }
  func.func @transform_4(%arg0: i32, %arg1: i32) -> (i32, i32) {
    %c0_i32 = arith.constant 0 : i32
    %c0_i32_0 = arith.constant 0 : i32
    %c0_i32_1 = arith.constant 0 : i32
    return %c0_i32, %c0_i32_0 : i32, i32
  }
  func.func @transform_5(%arg0: i32, %arg1: i32) -> (i32, i32) {
    %c0_i32 = arith.constant 0 : i32
    %c0_i32_0 = arith.constant 0 : i32
    return %arg0, %c0_i32 : i32, i32
  }
  func.func @transform_6(%arg0: i32, %arg1: i32) -> (i32, i32) {
    %c0_i32 = arith.constant 0 : i32
    %c0_i32_0 = arith.constant 0 : i32
    return %arg0, %c0_i32 : i32, i32
  }
  func.func @transform_7(%arg0: i32, %arg1: i32) -> (i32, i32) {
    %c0_i32 = arith.constant 0 : i32
    %c0_i32_0 = arith.constant 0 : i32
    return %arg0, %c0_i32 : i32, i32
  }
}

module attributes {stable_mosaic.version = 11 : i64} {
  func.func @_stft_mel_loss_kernel(%arg0: i32, %arg1: i32, %arg2: memref<72x256xbf16, #tpu.memory_space<vmem>>, %arg3: memref<72x256xbf16, #tpu.memory_space<vmem>>, %arg4: memref<256x256xbf16, #tpu.memory_space<vmem>>, %arg5: memref<128x128xbf16, #tpu.memory_space<vmem>>, %arg6: memref<1x128xf32, #tpu.memory_space<vmem>>, %arg7: memref<8x128xf32, #tpu.memory_space<vmem>>, %arg8: memref<8x128xf32, #tpu.memory_space<vmem>>, %arg9: memref<8x128xf32, #tpu.memory_space<vmem>>) attributes {dimension_semantics = [#tpu.dimension_semantics<parallel>, #tpu.dimension_semantics<arbitrary>], iteration_bounds = array<i64: 2, 2>, scalar_prefetch = 0 : i64, scratch_operands = 0 : i64, tpu.core_type = #tpu.core_type<tc>, window_params = [{transform_indices = @transform_0, window_bounds = array<i64: 72, 256>}, {transform_indices = @transform_1, window_bounds = array<i64: 72, 256>}, {pipeline_mode = #tpu.pipeline_mode<synchronous>, transform_indices = @transform_2, window_bounds = array<i64: 256, 256>}, {pipeline_mode = #tpu.pipeline_mode<synchronous>, transform_indices = @transform_3, window_bounds = array<i64: 128, 128>}, {pipeline_mode = #tpu.pipeline_mode<synchronous>, transform_indices = @transform_4, window_bounds = array<i64: 1, 128>}, {transform_indices = @transform_5, window_bounds = array<i64: 8, 128>}, {transform_indices = @transform_6, window_bounds = array<i64: 8, 128>}, {transform_indices = @transform_7, window_bounds = array<i64: 8, 128>}]} {
    %c0_i32 = arith.constant 0 : i32
    %0 = arith.cmpi eq, %arg1, %c0_i32 : i32
    %1 = arith.extui %0 : i1 to i32
    %c0_i32_0 = arith.constant 0 : i32
    %2 = arith.cmpi ne, %1, %c0_i32_0 : i32
    scf.if %2 {
      %cst = arith.constant 0.000000e+00 : f32
      %9 = vector.broadcast %cst : f32 to vector<8x128xf32>
      %c0 = arith.constant 0 : index
      %c0_2 = arith.constant 0 : index
      %10 = vector.load %arg7[%c0, %c0_2] : memref<8x128xf32, #tpu.memory_space<vmem>>, vector<8x128xf32>
      tpu.vector_store %arg7[%c0, %c0_2], %9 {strides = array<i32>} : memref<8x128xf32, #tpu.memory_space<vmem>>, vector<8x128xf32>,
      %cst_3 = arith.constant 0.000000e+00 : f32
      %11 = vector.broadcast %cst_3 : f32 to vector<8x128xf32>
      %c0_4 = arith.constant 0 : index
      %c0_5 = arith.constant 0 : index
      %12 = vector.load %arg8[%c0_4, %c0_5] : memref<8x128xf32, #tpu.memory_space<vmem>>, vector<8x128xf32>
      tpu.vector_store %arg8[%c0_4, %c0_5], %11 {strides = array<i32>} : memref<8x128xf32, #tpu.memory_space<vmem>>, vector<8x128xf32>,
      %cst_6 = arith.constant 0.000000e+00 : f32
      %13 = vector.broadcast %cst_6 : f32 to vector<8x128xf32>
      %c0_7 = arith.constant 0 : index
      %c0_8 = arith.constant 0 : index
      %14 = vector.load %arg9[%c0_7, %c0_8] : memref<8x128xf32, #tpu.memory_space<vmem>>, vector<8x128xf32>
      tpu.vector_store %arg9[%c0_7, %c0_8], %13 {strides = array<i32>} : memref<8x128xf32, #tpu.memory_space<vmem>>, vector<8x128xf32>,
    } else {
    }
    %c2_i32 = arith.constant 2 : i32
    %3 = arith.muli %arg0, %c2_i32 : i32
    %4 = arith.addi %3, %arg1 : i32
    %c72_i32 = arith.constant 72 : i32
    %5 = arith.muli %4, %c72_i32 : i32
    %c258_i32 = arith.constant 258 : i32
    %6 = arith.cmpi slt, %5, %c258_i32 : i32
    %7 = arith.extui %6 : i1 to i32
    %c0_i32_1 = arith.constant 0 : i32
    %8 = arith.cmpi ne, %7, %c0_i32_1 : i32
    scf.if %8 {
      %c0 = arith.constant 0 : index
      %c0_2 = arith.constant 0 : index
      %9 = vector.load %arg4[%c0, %c0_2] : memref<256x256xbf16, #tpu.memory_space<vmem>>, vector<256x256xbf16>
      %c0_3 = arith.constant 0 : index
      %c0_4 = arith.constant 0 : index
      %10 = vector.load %arg2[%c0_3, %c0_4] : memref<72x256xbf16, #tpu.memory_space<vmem>>, vector<72x256xbf16>
      %cst = arith.constant dense<0.000000e+00> : vector<72x256xf32>
      %11 = tpu.matmul %10, %9, %cst {dimension_numbers = #tpu.dot_dimension_numbers<[1], [0], [0], [1], [0, 0, 1, 1], [], []>} : vector<72x256xbf16>, vector<256x256xbf16>, vector<72x256xf32> -> vector<72x256xf32>
      %c0_5 = arith.constant 0 : index
      %c0_6 = arith.constant 0 : index
      %12 = vector.load %arg3[%c0_5, %c0_6] : memref<72x256xbf16, #tpu.memory_space<vmem>>, vector<72x256xbf16>
      %cst_7 = arith.constant dense<0.000000e+00> : vector<72x256xf32>
      %13 = tpu.matmul %12, %9, %cst_7 {dimension_numbers = #tpu.dot_dimension_numbers<[1], [0], [0], [1], [0, 0, 1, 1], [], []>} : vector<72x256xbf16>, vector<256x256xbf16>, vector<72x256xf32> -> vector<72x256xf32>
      %c0_8 = arith.constant 0 : index
      %c0_9 = arith.constant 0 : index
      %14 = vector.load %arg5[%c0_8, %c0_9] : memref<128x128xbf16, #tpu.memory_space<vmem>>, vector<128x128xbf16>
      %15 = vector.extract_strided_slice %11 {offsets = [0, 0], sizes = [72, 128], strides = [1, 1]} : vector<72x256xf32> to vector<72x128xf32>
      %16 = vector.extract_strided_slice %11 {offsets = [0, 128], sizes = [72, 128], strides = [1, 1]} : vector<72x256xf32> to vector<72x128xf32>
      %17 = arith.mulf %15, %15 : vector<72x128xf32>
      %18 = arith.mulf %16, %16 : vector<72x128xf32>
      %19 = arith.addf %17, %18 : vector<72x128xf32>
      %cst_10 = arith.constant 9.99999993E-9 : f32
      %20 = vector.broadcast %cst_10 : f32 to vector<72x128xf32>
      %21 = arith.maximumf %19, %20 : vector<72x128xf32>
      %22 = math.sqrt %21 : vector<72x128xf32>
      %23 = arith.truncf %22 : vector<72x128xf32> to vector<72x128xbf16>
      %cst_11 = arith.constant dense<0.000000e+00> : vector<72x128xf32>
      %24 = tpu.matmul %23, %14, %cst_11 {dimension_numbers = #tpu.dot_dimension_numbers<[1], [0], [0], [1], [0, 0, 1, 1], [], []>} : vector<72x128xbf16>, vector<128x128xbf16>, vector<72x128xf32> -> vector<72x128xf32>
      %25 = vector.extract_strided_slice %13 {offsets = [0, 0], sizes = [72, 128], strides = [1, 1]} : vector<72x256xf32> to vector<72x128xf32>
      %26 = vector.extract_strided_slice %13 {offsets = [0, 128], sizes = [72, 128], strides = [1, 1]} : vector<72x256xf32> to vector<72x128xf32>
      %27 = arith.mulf %25, %25 : vector<72x128xf32>
      %28 = arith.mulf %26, %26 : vector<72x128xf32>
      %29 = arith.addf %27, %28 : vector<72x128xf32>
      %cst_12 = arith.constant 9.99999993E-9 : f32
      %30 = vector.broadcast %cst_12 : f32 to vector<72x128xf32>
      %31 = arith.maximumf %29, %30 : vector<72x128xf32>
      %32 = math.sqrt %31 : vector<72x128xf32>
      %33 = arith.truncf %32 : vector<72x128xf32> to vector<72x128xbf16>
      %cst_13 = arith.constant dense<0.000000e+00> : vector<72x128xf32>
      %34 = tpu.matmul %33, %14, %cst_13 {dimension_numbers = #tpu.dot_dimension_numbers<[1], [0], [0], [1], [0, 0, 1, 1], [], []>} : vector<72x128xbf16>, vector<128x128xbf16>, vector<72x128xf32> -> vector<72x128xf32>
      %c0_14 = arith.constant 0 : index
      %c0_15 = arith.constant 0 : index
      %35 = vector.load %arg6[%c0_14, %c0_15] : memref<1x128xf32, #tpu.memory_space<vmem>>, vector<1x128xf32>
      %cst_16 = arith.constant 1.000000e+00 : f32
      %36 = vector.broadcast %cst_16 : f32 to vector<1x128xf32>
      %37 = arith.subf %36, %35 : vector<1x128xf32>
      %38 = arith.subf %34, %24 : vector<72x128xf32>
      %39 = arith.mulf %38, %38 : vector<72x128xf32>
      %40 = arith.mulf %34, %34 : vector<72x128xf32>
      %c72_i32_17 = arith.constant 72 : i32
      %41 = arith.addi %5, %c72_i32_17 : i32
      %c258_i32_18 = arith.constant 258 : i32
      %42 = arith.cmpi sgt, %41, %c258_i32_18 : i32
      %true = arith.constant true
      %43 = arith.xori %42, %true : i1
      %44 = arith.extui %43 : i1 to i32
      %c0_i32_19 = arith.constant 0 : i32
      %45 = arith.cmpi ne, %44, %c0_i32_19 : i32
      scf.if %45 {
        %48 = vector.broadcast %35 : vector<1x128xf32> to vector<72x128xf32>
        %49 = arith.addf %24, %48 : vector<72x128xf32>
        %50 = vector.broadcast %35 : vector<1x128xf32> to vector<72x128xf32>
        %51 = arith.addf %34, %50 : vector<72x128xf32>
        %52 = tpu.reciprocal %51 {approx = true} : vector<72x128xf32> -> vector<72x128xf32>
        %53 = arith.mulf %49, %52 : vector<72x128xf32>
        %54 = math.log %53 : vector<72x128xf32>
        %55 = math.absf %54 : vector<72x128xf32>
        %56 = vector.broadcast %37 : vector<1x128xf32> to vector<72x128xf32>
        %57 = arith.mulf %55, %56 : vector<72x128xf32>
        %c0_21 = arith.constant 0 : index
        %c0_22 = arith.constant 0 : index
        %58 = vector.load %arg7[%c0_21, %c0_22] : memref<8x128xf32, #tpu.memory_space<vmem>>, vector<8x128xf32>
        %59 = vector.extract_strided_slice %57 {offsets = [0, 0], sizes = [8, 128], strides = [1, 1]} : vector<72x128xf32> to vector<8x128xf32>
        %60 = vector.extract_strided_slice %57 {offsets = [8, 0], sizes = [8, 128], strides = [1, 1]} : vector<72x128xf32> to vector<8x128xf32>
        %61 = vector.extract_strided_slice %57 {offsets = [16, 0], sizes = [8, 128], strides = [1, 1]} : vector<72x128xf32> to vector<8x128xf32>
        %62 = vector.extract_strided_slice %57 {offsets = [24, 0], sizes = [8, 128], strides = [1, 1]} : vector<72x128xf32> to vector<8x128xf32>
        %63 = vector.extract_strided_slice %57 {offsets = [32, 0], sizes = [8, 128], strides = [1, 1]} : vector<72x128xf32> to vector<8x128xf32>
        %64 = vector.extract_strided_slice %57 {offsets = [40, 0], sizes = [8, 128], strides = [1, 1]} : vector<72x128xf32> to vector<8x128xf32>
        %65 = vector.extract_strided_slice %57 {offsets = [48, 0], sizes = [8, 128], strides = [1, 1]} : vector<72x128xf32> to vector<8x128xf32>
        %66 = vector.extract_strided_slice %57 {offsets = [56, 0], sizes = [8, 128], strides = [1, 1]} : vector<72x128xf32> to vector<8x128xf32>
        %67 = vector.extract_strided_slice %57 {offsets = [64, 0], sizes = [8, 128], strides = [1, 1]} : vector<72x128xf32> to vector<8x128xf32>
        %68 = arith.addf %59, %60 : vector<8x128xf32>
        %69 = arith.addf %61, %62 : vector<8x128xf32>
        %70 = arith.addf %63, %64 : vector<8x128xf32>
        %71 = arith.addf %65, %66 : vector<8x128xf32>
        %72 = arith.addf %68, %69 : vector<8x128xf32>
        %73 = arith.addf %70, %71 : vector<8x128xf32>
        %74 = arith.addf %72, %73 : vector<8x128xf32>
        %75 = arith.addf %74, %67 : vector<8x128xf32>
        %76 = arith.addf %58, %75 : vector<8x128xf32>
        %c0_23 = arith.constant 0 : index
        %c0_24 = arith.constant 0 : index
        %77 = vector.load %arg7[%c0_23, %c0_24] : memref<8x128xf32, #tpu.memory_space<vmem>>, vector<8x128xf32>
        tpu.vector_store %arg7[%c0_23, %c0_24], %76 {strides = array<i32>} : memref<8x128xf32, #tpu.memory_space<vmem>>, vector<8x128xf32>,
        %c0_25 = arith.constant 0 : index
        %c0_26 = arith.constant 0 : index
        %78 = vector.load %arg8[%c0_25, %c0_26] : memref<8x128xf32, #tpu.memory_space<vmem>>, vector<8x128xf32>
        %79 = vector.extract_strided_slice %39 {offsets = [0, 0], sizes = [8, 128], strides = [1, 1]} : vector<72x128xf32> to vector<8x128xf32>
        %80 = vector.extract_strided_slice %39 {offsets = [8, 0], sizes = [8, 128], strides = [1, 1]} : vector<72x128xf32> to vector<8x128xf32>
        %81 = vector.extract_strided_slice %39 {offsets = [16, 0], sizes = [8, 128], strides = [1, 1]} : vector<72x128xf32> to vector<8x128xf32>
        %82 = vector.extract_strided_slice %39 {offsets = [24, 0], sizes = [8, 128], strides = [1, 1]} : vector<72x128xf32> to vector<8x128xf32>
        %83 = vector.extract_strided_slice %39 {offsets = [32, 0], sizes = [8, 128], strides = [1, 1]} : vector<72x128xf32> to vector<8x128xf32>
        %84 = vector.extract_strided_slice %39 {offsets = [40, 0], sizes = [8, 128], strides = [1, 1]} : vector<72x128xf32> to vector<8x128xf32>
        %85 = vector.extract_strided_slice %39 {offsets = [48, 0], sizes = [8, 128], strides = [1, 1]} : vector<72x128xf32> to vector<8x128xf32>
        %86 = vector.extract_strided_slice %39 {offsets = [56, 0], sizes = [8, 128], strides = [1, 1]} : vector<72x128xf32> to vector<8x128xf32>
        %87 = vector.extract_strided_slice %39 {offsets = [64, 0], sizes = [8, 128], strides = [1, 1]} : vector<72x128xf32> to vector<8x128xf32>
        %88 = arith.addf %79, %80 : vector<8x128xf32>
        %89 = arith.addf %81, %82 : vector<8x128xf32>
        %90 = arith.addf %83, %84 : vector<8x128xf32>
        %91 = arith.addf %85, %86 : vector<8x128xf32>
        %92 = arith.addf %88, %89 : vector<8x128xf32>
        %93 = arith.addf %90, %91 : vector<8x128xf32>
        %94 = arith.addf %92, %93 : vector<8x128xf32>
        %95 = arith.addf %94, %87 : vector<8x128xf32>
        %96 = arith.addf %78, %95 : vector<8x128xf32>
        %c0_27 = arith.constant 0 : index
        %c0_28 = arith.constant 0 : index
        %97 = vector.load %arg8[%c0_27, %c0_28] : memref<8x128xf32, #tpu.memory_space<vmem>>, vector<8x128xf32>
        tpu.vector_store %arg8[%c0_27, %c0_28], %96 {strides = array<i32>} : memref<8x128xf32, #tpu.memory_space<vmem>>, vector<8x128xf32>,
        %c0_29 = arith.constant 0 : index
        %c0_30 = arith.constant 0 : index
        %98 = vector.load %arg9[%c0_29, %c0_30] : memref<8x128xf32, #tpu.memory_space<vmem>>, vector<8x128xf32>
        %99 = vector.extract_strided_slice %40 {offsets = [0, 0], sizes = [8, 128], strides = [1, 1]} : vector<72x128xf32> to vector<8x128xf32>
        %100 = vector.extract_strided_slice %40 {offsets = [8, 0], sizes = [8, 128], strides = [1, 1]} : vector<72x128xf32> to vector<8x128xf32>
        %101 = vector.extract_strided_slice %40 {offsets = [16, 0], sizes = [8, 128], strides = [1, 1]} : vector<72x128xf32> to vector<8x128xf32>
        %102 = vector.extract_strided_slice %40 {offsets = [24, 0], sizes = [8, 128], strides = [1, 1]} : vector<72x128xf32> to vector<8x128xf32>
        %103 = vector.extract_strided_slice %40 {offsets = [32, 0], sizes = [8, 128], strides = [1, 1]} : vector<72x128xf32> to vector<8x128xf32>
        %104 = vector.extract_strided_slice %40 {offsets = [40, 0], sizes = [8, 128], strides = [1, 1]} : vector<72x128xf32> to vector<8x128xf32>
        %105 = vector.extract_strided_slice %40 {offsets = [48, 0], sizes = [8, 128], strides = [1, 1]} : vector<72x128xf32> to vector<8x128xf32>
        %106 = vector.extract_strided_slice %40 {offsets = [56, 0], sizes = [8, 128], strides = [1, 1]} : vector<72x128xf32> to vector<8x128xf32>
        %107 = vector.extract_strided_slice %40 {offsets = [64, 0], sizes = [8, 128], strides = [1, 1]} : vector<72x128xf32> to vector<8x128xf32>
        %108 = arith.addf %99, %100 : vector<8x128xf32>
        %109 = arith.addf %101, %102 : vector<8x128xf32>
        %110 = arith.addf %103, %104 : vector<8x128xf32>
        %111 = arith.addf %105, %106 : vector<8x128xf32>
        %112 = arith.addf %108, %109 : vector<8x128xf32>
        %113 = arith.addf %110, %111 : vector<8x128xf32>
        %114 = arith.addf %112, %113 : vector<8x128xf32>
        %115 = arith.addf %114, %107 : vector<8x128xf32>
        %116 = arith.addf %98, %115 : vector<8x128xf32>
        %c0_31 = arith.constant 0 : index
        %c0_32 = arith.constant 0 : index
        %117 = vector.load %arg9[%c0_31, %c0_32] : memref<8x128xf32, #tpu.memory_space<vmem>>, vector<8x128xf32>
        tpu.vector_store %arg9[%c0_31, %c0_32], %116 {strides = array<i32>} : memref<8x128xf32, #tpu.memory_space<vmem>>, vector<8x128xf32>,
      } else {
      }
      %46 = arith.extui %42 : i1 to i32
      %c0_i32_20 = arith.constant 0 : i32
      %47 = arith.cmpi ne, %46, %c0_i32_20 : i32
      scf.if %47 {
        %48 = tpu.iota {dimensions = array<i32: 0>} : vector<72x128xi32>
        %49 = vector.broadcast %5 : i32 to vector<72x128xi32>
        %50 = arith.addi %48, %49 : vector<72x128xi32>
        %c258_i32_21 = arith.constant 258 : i32
        %51 = vector.broadcast %c258_i32_21 : i32 to vector<72x128xi32>
        %52 = arith.cmpi slt, %50, %51 : vector<72x128xi32>
        %53 = arith.extui %52 : vector<72x128xi1> to vector<72x128xi32>
        %54 = arith.sitofp %53 : vector<72x128xi32> to vector<72x128xf32>
        %cst_22 = arith.constant 1.000000e+00 : f32
        %55 = vector.broadcast %cst_22 : f32 to vector<72x128xf32>
        %56 = arith.select %52, %24, %55 : vector<72x128xi1>, vector<72x128xf32>
        %57 = vector.broadcast %35 : vector<1x128xf32> to vector<72x128xf32>
        %58 = arith.addf %56, %57 : vector<72x128xf32>
        %cst_23 = arith.constant 1.000000e+00 : f32
        %59 = vector.broadcast %cst_23 : f32 to vector<72x128xf32>
        %60 = arith.select %52, %34, %59 : vector<72x128xi1>, vector<72x128xf32>
        %61 = vector.broadcast %35 : vector<1x128xf32> to vector<72x128xf32>
        %62 = arith.addf %60, %61 : vector<72x128xf32>
        %63 = tpu.reciprocal %62 {approx = true} : vector<72x128xf32> -> vector<72x128xf32>
        %64 = arith.mulf %58, %63 : vector<72x128xf32>
        %65 = math.log %64 : vector<72x128xf32>
        %66 = math.absf %65 : vector<72x128xf32>
        %67 = vector.broadcast %37 : vector<1x128xf32> to vector<72x128xf32>
        %68 = arith.mulf %54, %67 : vector<72x128xf32>
        %69 = arith.mulf %66, %68 : vector<72x128xf32>
        %c0_24 = arith.constant 0 : index
        %c0_25 = arith.constant 0 : index
        %70 = vector.load %arg7[%c0_24, %c0_25] : memref<8x128xf32, #tpu.memory_space<vmem>>, vector<8x128xf32>
        %71 = vector.extract_strided_slice %69 {offsets = [0, 0], sizes = [8, 128], strides = [1, 1]} : vector<72x128xf32> to vector<8x128xf32>
        %72 = vector.extract_strided_slice %69 {offsets = [8, 0], sizes = [8, 128], strides = [1, 1]} : vector<72x128xf32> to vector<8x128xf32>
        %73 = vector.extract_strided_slice %69 {offsets = [16, 0], sizes = [8, 128], strides = [1, 1]} : vector<72x128xf32> to vector<8x128xf32>
        %74 = vector.extract_strided_slice %69 {offsets = [24, 0], sizes = [8, 128], strides = [1, 1]} : vector<72x128xf32> to vector<8x128xf32>
        %75 = vector.extract_strided_slice %69 {offsets = [32, 0], sizes = [8, 128], strides = [1, 1]} : vector<72x128xf32> to vector<8x128xf32>
        %76 = vector.extract_strided_slice %69 {offsets = [40, 0], sizes = [8, 128], strides = [1, 1]} : vector<72x128xf32> to vector<8x128xf32>
        %77 = vector.extract_strided_slice %69 {offsets = [48, 0], sizes = [8, 128], strides = [1, 1]} : vector<72x128xf32> to vector<8x128xf32>
        %78 = vector.extract_strided_slice %69 {offsets = [56, 0], sizes = [8, 128], strides = [1, 1]} : vector<72x128xf32> to vector<8x128xf32>
        %79 = vector.extract_strided_slice %69 {offsets = [64, 0], sizes = [8, 128], strides = [1, 1]} : vector<72x128xf32> to vector<8x128xf32>
        %80 = arith.addf %71, %72 : vector<8x128xf32>
        %81 = arith.addf %73, %74 : vector<8x128xf32>
        %82 = arith.addf %75, %76 : vector<8x128xf32>
        %83 = arith.addf %77, %78 : vector<8x128xf32>
        %84 = arith.addf %80, %81 : vector<8x128xf32>
        %85 = arith.addf %82, %83 : vector<8x128xf32>
        %86 = arith.addf %84, %85 : vector<8x128xf32>
        %87 = arith.addf %86, %79 : vector<8x128xf32>
        %88 = arith.addf %70, %87 : vector<8x128xf32>
        %c0_26 = arith.constant 0 : index
        %c0_27 = arith.constant 0 : index
        %89 = vector.load %arg7[%c0_26, %c0_27] : memref<8x128xf32, #tpu.memory_space<vmem>>, vector<8x128xf32>
        tpu.vector_store %arg7[%c0_26, %c0_27], %88 {strides = array<i32>} : memref<8x128xf32, #tpu.memory_space<vmem>>, vector<8x128xf32>,
        %c0_28 = arith.constant 0 : index
        %c0_29 = arith.constant 0 : index
        %90 = vector.load %arg8[%c0_28, %c0_29] : memref<8x128xf32, #tpu.memory_space<vmem>>, vector<8x128xf32>
        %91 = arith.mulf %39, %54 : vector<72x128xf32>
        %92 = vector.extract_strided_slice %91 {offsets = [0, 0], sizes = [8, 128], strides = [1, 1]} : vector<72x128xf32> to vector<8x128xf32>
        %93 = vector.extract_strided_slice %91 {offsets = [8, 0], sizes = [8, 128], strides = [1, 1]} : vector<72x128xf32> to vector<8x128xf32>
        %94 = vector.extract_strided_slice %91 {offsets = [16, 0], sizes = [8, 128], strides = [1, 1]} : vector<72x128xf32> to vector<8x128xf32>
        %95 = vector.extract_strided_slice %91 {offsets = [24, 0], sizes = [8, 128], strides = [1, 1]} : vector<72x128xf32> to vector<8x128xf32>
        %96 = vector.extract_strided_slice %91 {offsets = [32, 0], sizes = [8, 128], strides = [1, 1]} : vector<72x128xf32> to vector<8x128xf32>
        %97 = vector.extract_strided_slice %91 {offsets = [40, 0], sizes = [8, 128], strides = [1, 1]} : vector<72x128xf32> to vector<8x128xf32>
        %98 = vector.extract_strided_slice %91 {offsets = [48, 0], sizes = [8, 128], strides = [1, 1]} : vector<72x128xf32> to vector<8x128xf32>
        %99 = vector.extract_strided_slice %91 {offsets = [56, 0], sizes = [8, 128], strides = [1, 1]} : vector<72x128xf32> to vector<8x128xf32>
        %100 = vector.extract_strided_slice %91 {offsets = [64, 0], sizes = [8, 128], strides = [1, 1]} : vector<72x128xf32> to vector<8x128xf32>
        %101 = arith.addf %92, %93 : vector<8x128xf32>
        %102 = arith.addf %94, %95 : vector<8x128xf32>
        %103 = arith.addf %96, %97 : vector<8x128xf32>
        %104 = arith.addf %98, %99 : vector<8x128xf32>
        %105 = arith.addf %101, %102 : vector<8x128xf32>
        %106 = arith.addf %103, %104 : vector<8x128xf32>
        %107 = arith.addf %105, %106 : vector<8x128xf32>
        %108 = arith.addf %107, %100 : vector<8x128xf32>
        %109 = arith.addf %90, %108 : vector<8x128xf32>
        %c0_30 = arith.constant 0 : index
        %c0_31 = arith.constant 0 : index
        %110 = vector.load %arg8[%c0_30, %c0_31] : memref<8x128xf32, #tpu.memory_space<vmem>>, vector<8x128xf32>
        tpu.vector_store %arg8[%c0_30, %c0_31], %109 {strides = array<i32>} : memref<8x128xf32, #tpu.memory_space<vmem>>, vector<8x128xf32>,
        %c0_32 = arith.constant 0 : index
        %c0_33 = arith.constant 0 : index
        %111 = vector.load %arg9[%c0_32, %c0_33] : memref<8x128xf32, #tpu.memory_space<vmem>>, vector<8x128xf32>
        %112 = arith.mulf %40, %54 : vector<72x128xf32>
        %113 = vector.extract_strided_slice %112 {offsets = [0, 0], sizes = [8, 128], strides = [1, 1]} : vector<72x128xf32> to vector<8x128xf32>
        %114 = vector.extract_strided_slice %112 {offsets = [8, 0], sizes = [8, 128], strides = [1, 1]} : vector<72x128xf32> to vector<8x128xf32>
        %115 = vector.extract_strided_slice %112 {offsets = [16, 0], sizes = [8, 128], strides = [1, 1]} : vector<72x128xf32> to vector<8x128xf32>
        %116 = vector.extract_strided_slice %112 {offsets = [24, 0], sizes = [8, 128], strides = [1, 1]} : vector<72x128xf32> to vector<8x128xf32>
        %117 = vector.extract_strided_slice %112 {offsets = [32, 0], sizes = [8, 128], strides = [1, 1]} : vector<72x128xf32> to vector<8x128xf32>
        %118 = vector.extract_strided_slice %112 {offsets = [40, 0], sizes = [8, 128], strides = [1, 1]} : vector<72x128xf32> to vector<8x128xf32>
        %119 = vector.extract_strided_slice %112 {offsets = [48, 0], sizes = [8, 128], strides = [1, 1]} : vector<72x128xf32> to vector<8x128xf32>
        %120 = vector.extract_strided_slice %112 {offsets = [56, 0], sizes = [8, 128], strides = [1, 1]} : vector<72x128xf32> to vector<8x128xf32>
        %121 = vector.extract_strided_slice %112 {offsets = [64, 0], sizes = [8, 128], strides = [1, 1]} : vector<72x128xf32> to vector<8x128xf32>
        %122 = arith.addf %113, %114 : vector<8x128xf32>
        %123 = arith.addf %115, %116 : vector<8x128xf32>
        %124 = arith.addf %117, %118 : vector<8x128xf32>
        %125 = arith.addf %119, %120 : vector<8x128xf32>
        %126 = arith.addf %122, %123 : vector<8x128xf32>
        %127 = arith.addf %124, %125 : vector<8x128xf32>
        %128 = arith.addf %126, %127 : vector<8x128xf32>
        %129 = arith.addf %128, %121 : vector<8x128xf32>
        %130 = arith.addf %111, %129 : vector<8x128xf32>
        %c0_34 = arith.constant 0 : index
        %c0_35 = arith.constant 0 : index
        %131 = vector.load %arg9[%c0_34, %c0_35] : memref<8x128xf32, #tpu.memory_space<vmem>>, vector<8x128xf32>
        tpu.vector_store %arg9[%c0_34, %c0_35], %130 {strides = array<i32>} : memref<8x128xf32, #tpu.memory_space<vmem>>, vector<8x128xf32>,
      } else {
      }
    } else {
    }
    return
  }
  func.func @transform_0(%arg0: i32, %arg1: i32) -> (i32, i32) {
    %c2_i32 = arith.constant 2 : i32
    %0 = arith.muli %arg0, %c2_i32 : i32
    %1 = arith.addi %0, %arg1 : i32
    %c0_i32 = arith.constant 0 : i32
    %c0_i32_0 = arith.constant 0 : i32
    return %1, %c0_i32 : i32, i32
  }
  func.func @transform_1(%arg0: i32, %arg1: i32) -> (i32, i32) {
    %c2_i32 = arith.constant 2 : i32
    %0 = arith.muli %arg0, %c2_i32 : i32
    %1 = arith.addi %0, %arg1 : i32
    %c0_i32 = arith.constant 0 : i32
    %c0_i32_0 = arith.constant 0 : i32
    return %1, %c0_i32 : i32, i32
  }
  func.func @transform_2(%arg0: i32, %arg1: i32) -> (i32, i32) {
    %c0_i32 = arith.constant 0 : i32
    %c0_i32_0 = arith.constant 0 : i32
    %c0_i32_1 = arith.constant 0 : i32
    return %c0_i32, %c0_i32_0 : i32, i32
  }
  func.func @transform_3(%arg0: i32, %arg1: i32) -> (i32, i32) {
    %c0_i32 = arith.constant 0 : i32
    %c0_i32_0 = arith.constant 0 : i32
    %c0_i32_1 = arith.constant 0 : i32
    return %c0_i32, %c0_i32_0 : i32, i32
  }
  func.func @transform_4(%arg0: i32, %arg1: i32) -> (i32, i32) {
    %c0_i32 = arith.constant 0 : i32
    %c0_i32_0 = arith.constant 0 : i32
    %c0_i32_1 = arith.constant 0 : i32
    return %c0_i32, %c0_i32_0 : i32, i32
  }
  func.func @transform_5(%arg0: i32, %arg1: i32) -> (i32, i32) {
    %c0_i32 = arith.constant 0 : i32
    %c0_i32_0 = arith.constant 0 : i32
    return %arg0, %c0_i32 : i32, i32
  }
  func.func @transform_6(%arg0: i32, %arg1: i32) -> (i32, i32) {
    %c0_i32 = arith.constant 0 : i32
    %c0_i32_0 = arith.constant 0 : i32
    return %arg0, %c0_i32 : i32, i32
  }
  func.func @transform_7(%arg0: i32, %arg1: i32) -> (i32, i32) {
    %c0_i32 = arith.constant 0 : i32
    %c0_i32_0 = arith.constant 0 : i32
    return %arg0, %c0_i32 : i32, i32
  }
}

module attributes {stable_mosaic.version = 11 : i64} {
  func.func @_stft_mel_loss_kernel(%arg0: i32, %arg1: i32, %arg2: memref<136x128xbf16, #tpu.memory_space<vmem>>, %arg3: memref<136x128xbf16, #tpu.memory_space<vmem>>, %arg4: memref<128x256xbf16, #tpu.memory_space<vmem>>, %arg5: memref<128x128xbf16, #tpu.memory_space<vmem>>, %arg6: memref<1x128xf32, #tpu.memory_space<vmem>>, %arg7: memref<8x128xf32, #tpu.memory_space<vmem>>, %arg8: memref<8x128xf32, #tpu.memory_space<vmem>>, %arg9: memref<8x128xf32, #tpu.memory_space<vmem>>) attributes {dimension_semantics = [#tpu.dimension_semantics<parallel>, #tpu.dimension_semantics<arbitrary>], iteration_bounds = array<i64: 2, 2>, scalar_prefetch = 0 : i64, scratch_operands = 0 : i64, tpu.core_type = #tpu.core_type<tc>, window_params = [{transform_indices = @transform_0, window_bounds = array<i64: 136, 128>}, {transform_indices = @transform_1, window_bounds = array<i64: 136, 128>}, {pipeline_mode = #tpu.pipeline_mode<synchronous>, transform_indices = @transform_2, window_bounds = array<i64: 128, 256>}, {pipeline_mode = #tpu.pipeline_mode<synchronous>, transform_indices = @transform_3, window_bounds = array<i64: 128, 128>}, {pipeline_mode = #tpu.pipeline_mode<synchronous>, transform_indices = @transform_4, window_bounds = array<i64: 1, 128>}, {transform_indices = @transform_5, window_bounds = array<i64: 8, 128>}, {transform_indices = @transform_6, window_bounds = array<i64: 8, 128>}, {transform_indices = @transform_7, window_bounds = array<i64: 8, 128>}]} {
    %c0_i32 = arith.constant 0 : i32
    %0 = arith.cmpi eq, %arg1, %c0_i32 : i32
    %1 = arith.extui %0 : i1 to i32
    %c0_i32_0 = arith.constant 0 : i32
    %2 = arith.cmpi ne, %1, %c0_i32_0 : i32
    scf.if %2 {
      %cst = arith.constant 0.000000e+00 : f32
      %9 = vector.broadcast %cst : f32 to vector<8x128xf32>
      %c0 = arith.constant 0 : index
      %c0_2 = arith.constant 0 : index
      %10 = vector.load %arg7[%c0, %c0_2] : memref<8x128xf32, #tpu.memory_space<vmem>>, vector<8x128xf32>
      tpu.vector_store %arg7[%c0, %c0_2], %9 {strides = array<i32>} : memref<8x128xf32, #tpu.memory_space<vmem>>, vector<8x128xf32>,
      %cst_3 = arith.constant 0.000000e+00 : f32
      %11 = vector.broadcast %cst_3 : f32 to vector<8x128xf32>
      %c0_4 = arith.constant 0 : index
      %c0_5 = arith.constant 0 : index
      %12 = vector.load %arg8[%c0_4, %c0_5] : memref<8x128xf32, #tpu.memory_space<vmem>>, vector<8x128xf32>
      tpu.vector_store %arg8[%c0_4, %c0_5], %11 {strides = array<i32>} : memref<8x128xf32, #tpu.memory_space<vmem>>, vector<8x128xf32>,
      %cst_6 = arith.constant 0.000000e+00 : f32
      %13 = vector.broadcast %cst_6 : f32 to vector<8x128xf32>
      %c0_7 = arith.constant 0 : index
      %c0_8 = arith.constant 0 : index
      %14 = vector.load %arg9[%c0_7, %c0_8] : memref<8x128xf32, #tpu.memory_space<vmem>>, vector<8x128xf32>
      tpu.vector_store %arg9[%c0_7, %c0_8], %13 {strides = array<i32>} : memref<8x128xf32, #tpu.memory_space<vmem>>, vector<8x128xf32>,
    } else {
    }
    %c2_i32 = arith.constant 2 : i32
    %3 = arith.muli %arg0, %c2_i32 : i32
    %4 = arith.addi %3, %arg1 : i32
    %c136_i32 = arith.constant 136 : i32
    %5 = arith.muli %4, %c136_i32 : i32
    %c514_i32 = arith.constant 514 : i32
    %6 = arith.cmpi slt, %5, %c514_i32 : i32
    %7 = arith.extui %6 : i1 to i32
    %c0_i32_1 = arith.constant 0 : i32
    %8 = arith.cmpi ne, %7, %c0_i32_1 : i32
    scf.if %8 {
      %c0 = arith.constant 0 : index
      %c0_2 = arith.constant 0 : index
      %9 = vector.load %arg4[%c0, %c0_2] : memref<128x256xbf16, #tpu.memory_space<vmem>>, vector<128x256xbf16>
      %c0_3 = arith.constant 0 : index
      %c0_4 = arith.constant 0 : index
      %10 = vector.load %arg2[%c0_3, %c0_4] : memref<136x128xbf16, #tpu.memory_space<vmem>>, vector<136x128xbf16>
      %cst = arith.constant dense<0.000000e+00> : vector<136x256xf32>
      %11 = tpu.matmul %10, %9, %cst {dimension_numbers = #tpu.dot_dimension_numbers<[1], [0], [0], [1], [0, 0, 1, 1], [], []>} : vector<136x128xbf16>, vector<128x256xbf16>, vector<136x256xf32> -> vector<136x256xf32>
      %c0_5 = arith.constant 0 : index
      %c0_6 = arith.constant 0 : index
      %12 = vector.load %arg3[%c0_5, %c0_6] : memref<136x128xbf16, #tpu.memory_space<vmem>>, vector<136x128xbf16>
      %cst_7 = arith.constant dense<0.000000e+00> : vector<136x256xf32>
      %13 = tpu.matmul %12, %9, %cst_7 {dimension_numbers = #tpu.dot_dimension_numbers<[1], [0], [0], [1], [0, 0, 1, 1], [], []>} : vector<136x128xbf16>, vector<128x256xbf16>, vector<136x256xf32> -> vector<136x256xf32>
      %c0_8 = arith.constant 0 : index
      %c0_9 = arith.constant 0 : index
      %14 = vector.load %arg5[%c0_8, %c0_9] : memref<128x128xbf16, #tpu.memory_space<vmem>>, vector<128x128xbf16>
      %15 = vector.extract_strided_slice %11 {offsets = [0, 0], sizes = [136, 128], strides = [1, 1]} : vector<136x256xf32> to vector<136x128xf32>
      %16 = vector.extract_strided_slice %11 {offsets = [0, 128], sizes = [136, 128], strides = [1, 1]} : vector<136x256xf32> to vector<136x128xf32>
      %17 = arith.mulf %15, %15 : vector<136x128xf32>
      %18 = arith.mulf %16, %16 : vector<136x128xf32>
      %19 = arith.addf %17, %18 : vector<136x128xf32>
      %cst_10 = arith.constant 9.99999993E-9 : f32
      %20 = vector.broadcast %cst_10 : f32 to vector<136x128xf32>
      %21 = arith.maximumf %19, %20 : vector<136x128xf32>
      %22 = math.sqrt %21 : vector<136x128xf32>
      %23 = arith.truncf %22 : vector<136x128xf32> to vector<136x128xbf16>
      %cst_11 = arith.constant dense<0.000000e+00> : vector<136x128xf32>
      %24 = tpu.matmul %23, %14, %cst_11 {dimension_numbers = #tpu.dot_dimension_numbers<[1], [0], [0], [1], [0, 0, 1, 1], [], []>} : vector<136x128xbf16>, vector<128x128xbf16>, vector<136x128xf32> -> vector<136x128xf32>
      %25 = vector.extract_strided_slice %13 {offsets = [0, 0], sizes = [136, 128], strides = [1, 1]} : vector<136x256xf32> to vector<136x128xf32>
      %26 = vector.extract_strided_slice %13 {offsets = [0, 128], sizes = [136, 128], strides = [1, 1]} : vector<136x256xf32> to vector<136x128xf32>
      %27 = arith.mulf %25, %25 : vector<136x128xf32>
      %28 = arith.mulf %26, %26 : vector<136x128xf32>
      %29 = arith.addf %27, %28 : vector<136x128xf32>
      %cst_12 = arith.constant 9.99999993E-9 : f32
      %30 = vector.broadcast %cst_12 : f32 to vector<136x128xf32>
      %31 = arith.maximumf %29, %30 : vector<136x128xf32>
      %32 = math.sqrt %31 : vector<136x128xf32>
      %33 = arith.truncf %32 : vector<136x128xf32> to vector<136x128xbf16>
      %cst_13 = arith.constant dense<0.000000e+00> : vector<136x128xf32>
      %34 = tpu.matmul %33, %14, %cst_13 {dimension_numbers = #tpu.dot_dimension_numbers<[1], [0], [0], [1], [0, 0, 1, 1], [], []>} : vector<136x128xbf16>, vector<128x128xbf16>, vector<136x128xf32> -> vector<136x128xf32>
      %c0_14 = arith.constant 0 : index
      %c0_15 = arith.constant 0 : index
      %35 = vector.load %arg6[%c0_14, %c0_15] : memref<1x128xf32, #tpu.memory_space<vmem>>, vector<1x128xf32>
      %cst_16 = arith.constant 1.000000e+00 : f32
      %36 = vector.broadcast %cst_16 : f32 to vector<1x128xf32>
      %37 = arith.subf %36, %35 : vector<1x128xf32>
      %38 = arith.subf %34, %24 : vector<136x128xf32>
      %39 = arith.mulf %38, %38 : vector<136x128xf32>
      %40 = arith.mulf %34, %34 : vector<136x128xf32>
      %c136_i32_17 = arith.constant 136 : i32
      %41 = arith.addi %5, %c136_i32_17 : i32
      %c514_i32_18 = arith.constant 514 : i32
      %42 = arith.cmpi sgt, %41, %c514_i32_18 : i32
      %true = arith.constant true
      %43 = arith.xori %42, %true : i1
      %44 = arith.extui %43 : i1 to i32
      %c0_i32_19 = arith.constant 0 : i32
      %45 = arith.cmpi ne, %44, %c0_i32_19 : i32
      scf.if %45 {
        %48 = vector.broadcast %35 : vector<1x128xf32> to vector<136x128xf32>
        %49 = arith.addf %24, %48 : vector<136x128xf32>
        %50 = vector.broadcast %35 : vector<1x128xf32> to vector<136x128xf32>
        %51 = arith.addf %34, %50 : vector<136x128xf32>
        %52 = tpu.reciprocal %51 {approx = true} : vector<136x128xf32> -> vector<136x128xf32>
        %53 = arith.mulf %49, %52 : vector<136x128xf32>
        %54 = math.log %53 : vector<136x128xf32>
        %55 = math.absf %54 : vector<136x128xf32>
        %56 = vector.broadcast %37 : vector<1x128xf32> to vector<136x128xf32>
        %57 = arith.mulf %55, %56 : vector<136x128xf32>
        %c0_21 = arith.constant 0 : index
        %c0_22 = arith.constant 0 : index
        %58 = vector.load %arg7[%c0_21, %c0_22] : memref<8x128xf32, #tpu.memory_space<vmem>>, vector<8x128xf32>
        %59 = vector.extract_strided_slice %57 {offsets = [0, 0], sizes = [8, 128], strides = [1, 1]} : vector<136x128xf32> to vector<8x128xf32>
        %60 = vector.extract_strided_slice %57 {offsets = [8, 0], sizes = [8, 128], strides = [1, 1]} : vector<136x128xf32> to vector<8x128xf32>
        %61 = vector.extract_strided_slice %57 {offsets = [16, 0], sizes = [8, 128], strides = [1, 1]} : vector<136x128xf32> to vector<8x128xf32>
        %62 = vector.extract_strided_slice %57 {offsets = [24, 0], sizes = [8, 128], strides = [1, 1]} : vector<136x128xf32> to vector<8x128xf32>
        %63 = vector.extract_strided_slice %57 {offsets = [32, 0], sizes = [8, 128], strides = [1, 1]} : vector<136x128xf32> to vector<8x128xf32>
        %64 = vector.extract_strided_slice %57 {offsets = [40, 0], sizes = [8, 128], strides = [1, 1]} : vector<136x128xf32> to vector<8x128xf32>
        %65 = vector.extract_strided_slice %57 {offsets = [48, 0], sizes = [8, 128], strides = [1, 1]} : vector<136x128xf32> to vector<8x128xf32>
        %66 = vector.extract_strided_slice %57 {offsets = [56, 0], sizes = [8, 128], strides = [1, 1]} : vector<136x128xf32> to vector<8x128xf32>
        %67 = vector.extract_strided_slice %57 {offsets = [64, 0], sizes = [8, 128], strides = [1, 1]} : vector<136x128xf32> to vector<8x128xf32>
        %68 = vector.extract_strided_slice %57 {offsets = [72, 0], sizes = [8, 128], strides = [1, 1]} : vector<136x128xf32> to vector<8x128xf32>
        %69 = vector.extract_strided_slice %57 {offsets = [80, 0], sizes = [8, 128], strides = [1, 1]} : vector<136x128xf32> to vector<8x128xf32>
        %70 = vector.extract_strided_slice %57 {offsets = [88, 0], sizes = [8, 128], strides = [1, 1]} : vector<136x128xf32> to vector<8x128xf32>
        %71 = vector.extract_strided_slice %57 {offsets = [96, 0], sizes = [8, 128], strides = [1, 1]} : vector<136x128xf32> to vector<8x128xf32>
        %72 = vector.extract_strided_slice %57 {offsets = [104, 0], sizes = [8, 128], strides = [1, 1]} : vector<136x128xf32> to vector<8x128xf32>
        %73 = vector.extract_strided_slice %57 {offsets = [112, 0], sizes = [8, 128], strides = [1, 1]} : vector<136x128xf32> to vector<8x128xf32>
        %74 = vector.extract_strided_slice %57 {offsets = [120, 0], sizes = [8, 128], strides = [1, 1]} : vector<136x128xf32> to vector<8x128xf32>
        %75 = vector.extract_strided_slice %57 {offsets = [128, 0], sizes = [8, 128], strides = [1, 1]} : vector<136x128xf32> to vector<8x128xf32>
        %76 = arith.addf %59, %60 : vector<8x128xf32>
        %77 = arith.addf %61, %62 : vector<8x128xf32>
        %78 = arith.addf %63, %64 : vector<8x128xf32>
        %79 = arith.addf %65, %66 : vector<8x128xf32>
        %80 = arith.addf %67, %68 : vector<8x128xf32>
        %81 = arith.addf %69, %70 : vector<8x128xf32>
        %82 = arith.addf %71, %72 : vector<8x128xf32>
        %83 = arith.addf %73, %74 : vector<8x128xf32>
        %84 = arith.addf %76, %77 : vector<8x128xf32>
        %85 = arith.addf %78, %79 : vector<8x128xf32>
        %86 = arith.addf %80, %81 : vector<8x128xf32>
        %87 = arith.addf %82, %83 : vector<8x128xf32>
        %88 = arith.addf %84, %85 : vector<8x128xf32>
        %89 = arith.addf %86, %87 : vector<8x128xf32>
        %90 = arith.addf %88, %89 : vector<8x128xf32>
        %91 = arith.addf %90, %75 : vector<8x128xf32>
        %92 = arith.addf %58, %91 : vector<8x128xf32>
        %c0_23 = arith.constant 0 : index
        %c0_24 = arith.constant 0 : index
        %93 = vector.load %arg7[%c0_23, %c0_24] : memref<8x128xf32, #tpu.memory_space<vmem>>, vector<8x128xf32>
        tpu.vector_store %arg7[%c0_23, %c0_24], %92 {strides = array<i32>} : memref<8x128xf32, #tpu.memory_space<vmem>>, vector<8x128xf32>,
        %c0_25 = arith.constant 0 : index
        %c0_26 = arith.constant 0 : index
        %94 = vector.load %arg8[%c0_25, %c0_26] : memref<8x128xf32, #tpu.memory_space<vmem>>, vector<8x128xf32>
        %95 = vector.extract_strided_slice %39 {offsets = [0, 0], sizes = [8, 128], strides = [1, 1]} : vector<136x128xf32> to vector<8x128xf32>
        %96 = vector.extract_strided_slice %39 {offsets = [8, 0], sizes = [8, 128], strides = [1, 1]} : vector<136x128xf32> to vector<8x128xf32>
        %97 = vector.extract_strided_slice %39 {offsets = [16, 0], sizes = [8, 128], strides = [1, 1]} : vector<136x128xf32> to vector<8x128xf32>
        %98 = vector.extract_strided_slice %39 {offsets = [24, 0], sizes = [8, 128], strides = [1, 1]} : vector<136x128xf32> to vector<8x128xf32>
        %99 = vector.extract_strided_slice %39 {offsets = [32, 0], sizes = [8, 128], strides = [1, 1]} : vector<136x128xf32> to vector<8x128xf32>
        %100 = vector.extract_strided_slice %39 {offsets = [40, 0], sizes = [8, 128], strides = [1, 1]} : vector<136x128xf32> to vector<8x128xf32>
        %101 = vector.extract_strided_slice %39 {offsets = [48, 0], sizes = [8, 128], strides = [1, 1]} : vector<136x128xf32> to vector<8x128xf32>
        %102 = vector.extract_strided_slice %39 {offsets = [56, 0], sizes = [8, 128], strides = [1, 1]} : vector<136x128xf32> to vector<8x128xf32>
        %103 = vector.extract_strided_slice %39 {offsets = [64, 0], sizes = [8, 128], strides = [1, 1]} : vector<136x128xf32> to vector<8x128xf32>
        %104 = vector.extract_strided_slice %39 {offsets = [72, 0], sizes = [8, 128], strides = [1, 1]} : vector<136x128xf32> to vector<8x128xf32>
        %105 = vector.extract_strided_slice %39 {offsets = [80, 0], sizes = [8, 128], strides = [1, 1]} : vector<136x128xf32> to vector<8x128xf32>
        %106 = vector.extract_strided_slice %39 {offsets = [88, 0], sizes = [8, 128], strides = [1, 1]} : vector<136x128xf32> to vector<8x128xf32>
        %107 = vector.extract_strided_slice %39 {offsets = [96, 0], sizes = [8, 128], strides = [1, 1]} : vector<136x128xf32> to vector<8x128xf32>
        %108 = vector.extract_strided_slice %39 {offsets = [104, 0], sizes = [8, 128], strides = [1, 1]} : vector<136x128xf32> to vector<8x128xf32>
        %109 = vector.extract_strided_slice %39 {offsets = [112, 0], sizes = [8, 128], strides = [1, 1]} : vector<136x128xf32> to vector<8x128xf32>
        %110 = vector.extract_strided_slice %39 {offsets = [120, 0], sizes = [8, 128], strides = [1, 1]} : vector<136x128xf32> to vector<8x128xf32>
        %111 = vector.extract_strided_slice %39 {offsets = [128, 0], sizes = [8, 128], strides = [1, 1]} : vector<136x128xf32> to vector<8x128xf32>
        %112 = arith.addf %95, %96 : vector<8x128xf32>
        %113 = arith.addf %97, %98 : vector<8x128xf32>
        %114 = arith.addf %99, %100 : vector<8x128xf32>
        %115 = arith.addf %101, %102 : vector<8x128xf32>
        %116 = arith.addf %103, %104 : vector<8x128xf32>
        %117 = arith.addf %105, %106 : vector<8x128xf32>
        %118 = arith.addf %107, %108 : vector<8x128xf32>
        %119 = arith.addf %109, %110 : vector<8x128xf32>
        %120 = arith.addf %112, %113 : vector<8x128xf32>
        %121 = arith.addf %114, %115 : vector<8x128xf32>
        %122 = arith.addf %116, %117 : vector<8x128xf32>
        %123 = arith.addf %118, %119 : vector<8x128xf32>
        %124 = arith.addf %120, %121 : vector<8x128xf32>
        %125 = arith.addf %122, %123 : vector<8x128xf32>
        %126 = arith.addf %124, %125 : vector<8x128xf32>
        %127 = arith.addf %126, %111 : vector<8x128xf32>
        %128 = arith.addf %94, %127 : vector<8x128xf32>
        %c0_27 = arith.constant 0 : index
        %c0_28 = arith.constant 0 : index
        %129 = vector.load %arg8[%c0_27, %c0_28] : memref<8x128xf32, #tpu.memory_space<vmem>>, vector<8x128xf32>
        tpu.vector_store %arg8[%c0_27, %c0_28], %128 {strides = array<i32>} : memref<8x128xf32, #tpu.memory_space<vmem>>, vector<8x128xf32>,
        %c0_29 = arith.constant 0 : index
        %c0_30 = arith.constant 0 : index
        %130 = vector.load %arg9[%c0_29, %c0_30] : memref<8x128xf32, #tpu.memory_space<vmem>>, vector<8x128xf32>
        %131 = vector.extract_strided_slice %40 {offsets = [0, 0], sizes = [8, 128], strides = [1, 1]} : vector<136x128xf32> to vector<8x128xf32>
        %132 = vector.extract_strided_slice %40 {offsets = [8, 0], sizes = [8, 128], strides = [1, 1]} : vector<136x128xf32> to vector<8x128xf32>
        %133 = vector.extract_strided_slice %40 {offsets = [16, 0], sizes = [8, 128], strides = [1, 1]} : vector<136x128xf32> to vector<8x128xf32>
        %134 = vector.extract_strided_slice %40 {offsets = [24, 0], sizes = [8, 128], strides = [1, 1]} : vector<136x128xf32> to vector<8x128xf32>
        %135 = vector.extract_strided_slice %40 {offsets = [32, 0], sizes = [8, 128], strides = [1, 1]} : vector<136x128xf32> to vector<8x128xf32>
        %136 = vector.extract_strided_slice %40 {offsets = [40, 0], sizes = [8, 128], strides = [1, 1]} : vector<136x128xf32> to vector<8x128xf32>
        %137 = vector.extract_strided_slice %40 {offsets = [48, 0], sizes = [8, 128], strides = [1, 1]} : vector<136x128xf32> to vector<8x128xf32>
        %138 = vector.extract_strided_slice %40 {offsets = [56, 0], sizes = [8, 128], strides = [1, 1]} : vector<136x128xf32> to vector<8x128xf32>
        %139 = vector.extract_strided_slice %40 {offsets = [64, 0], sizes = [8, 128], strides = [1, 1]} : vector<136x128xf32> to vector<8x128xf32>
        %140 = vector.extract_strided_slice %40 {offsets = [72, 0], sizes = [8, 128], strides = [1, 1]} : vector<136x128xf32> to vector<8x128xf32>
        %141 = vector.extract_strided_slice %40 {offsets = [80, 0], sizes = [8, 128], strides = [1, 1]} : vector<136x128xf32> to vector<8x128xf32>
        %142 = vector.extract_strided_slice %40 {offsets = [88, 0], sizes = [8, 128], strides = [1, 1]} : vector<136x128xf32> to vector<8x128xf32>
        %143 = vector.extract_strided_slice %40 {offsets = [96, 0], sizes = [8, 128], strides = [1, 1]} : vector<136x128xf32> to vector<8x128xf32>
        %144 = vector.extract_strided_slice %40 {offsets = [104, 0], sizes = [8, 128], strides = [1, 1]} : vector<136x128xf32> to vector<8x128xf32>
        %145 = vector.extract_strided_slice %40 {offsets = [112, 0], sizes = [8, 128], strides = [1, 1]} : vector<136x128xf32> to vector<8x128xf32>
        %146 = vector.extract_strided_slice %40 {offsets = [120, 0], sizes = [8, 128], strides = [1, 1]} : vector<136x128xf32> to vector<8x128xf32>
        %147 = vector.extract_strided_slice %40 {offsets = [128, 0], sizes = [8, 128], strides = [1, 1]} : vector<136x128xf32> to vector<8x128xf32>
        %148 = arith.addf %131, %132 : vector<8x128xf32>
        %149 = arith.addf %133, %134 : vector<8x128xf32>
        %150 = arith.addf %135, %136 : vector<8x128xf32>
        %151 = arith.addf %137, %138 : vector<8x128xf32>
        %152 = arith.addf %139, %140 : vector<8x128xf32>
        %153 = arith.addf %141, %142 : vector<8x128xf32>
        %154 = arith.addf %143, %144 : vector<8x128xf32>
        %155 = arith.addf %145, %146 : vector<8x128xf32>
        %156 = arith.addf %148, %149 : vector<8x128xf32>
        %157 = arith.addf %150, %151 : vector<8x128xf32>
        %158 = arith.addf %152, %153 : vector<8x128xf32>
        %159 = arith.addf %154, %155 : vector<8x128xf32>
        %160 = arith.addf %156, %157 : vector<8x128xf32>
        %161 = arith.addf %158, %159 : vector<8x128xf32>
        %162 = arith.addf %160, %161 : vector<8x128xf32>
        %163 = arith.addf %162, %147 : vector<8x128xf32>
        %164 = arith.addf %130, %163 : vector<8x128xf32>
        %c0_31 = arith.constant 0 : index
        %c0_32 = arith.constant 0 : index
        %165 = vector.load %arg9[%c0_31, %c0_32] : memref<8x128xf32, #tpu.memory_space<vmem>>, vector<8x128xf32>
        tpu.vector_store %arg9[%c0_31, %c0_32], %164 {strides = array<i32>} : memref<8x128xf32, #tpu.memory_space<vmem>>, vector<8x128xf32>,
      } else {
      }
      %46 = arith.extui %42 : i1 to i32
      %c0_i32_20 = arith.constant 0 : i32
      %47 = arith.cmpi ne, %46, %c0_i32_20 : i32
      scf.if %47 {
        %48 = tpu.iota {dimensions = array<i32: 0>} : vector<136x128xi32>
        %49 = vector.broadcast %5 : i32 to vector<136x128xi32>
        %50 = arith.addi %48, %49 : vector<136x128xi32>
        %c514_i32_21 = arith.constant 514 : i32
        %51 = vector.broadcast %c514_i32_21 : i32 to vector<136x128xi32>
        %52 = arith.cmpi slt, %50, %51 : vector<136x128xi32>
        %53 = arith.extui %52 : vector<136x128xi1> to vector<136x128xi32>
        %54 = arith.sitofp %53 : vector<136x128xi32> to vector<136x128xf32>
        %cst_22 = arith.constant 1.000000e+00 : f32
        %55 = vector.broadcast %cst_22 : f32 to vector<136x128xf32>
        %56 = arith.select %52, %24, %55 : vector<136x128xi1>, vector<136x128xf32>
        %57 = vector.broadcast %35 : vector<1x128xf32> to vector<136x128xf32>
        %58 = arith.addf %56, %57 : vector<136x128xf32>
        %cst_23 = arith.constant 1.000000e+00 : f32
        %59 = vector.broadcast %cst_23 : f32 to vector<136x128xf32>
        %60 = arith.select %52, %34, %59 : vector<136x128xi1>, vector<136x128xf32>
        %61 = vector.broadcast %35 : vector<1x128xf32> to vector<136x128xf32>
        %62 = arith.addf %60, %61 : vector<136x128xf32>
        %63 = tpu.reciprocal %62 {approx = true} : vector<136x128xf32> -> vector<136x128xf32>
        %64 = arith.mulf %58, %63 : vector<136x128xf32>
        %65 = math.log %64 : vector<136x128xf32>
        %66 = math.absf %65 : vector<136x128xf32>
        %67 = vector.broadcast %37 : vector<1x128xf32> to vector<136x128xf32>
        %68 = arith.mulf %54, %67 : vector<136x128xf32>
        %69 = arith.mulf %66, %68 : vector<136x128xf32>
        %c0_24 = arith.constant 0 : index
        %c0_25 = arith.constant 0 : index
        %70 = vector.load %arg7[%c0_24, %c0_25] : memref<8x128xf32, #tpu.memory_space<vmem>>, vector<8x128xf32>
        %71 = vector.extract_strided_slice %69 {offsets = [0, 0], sizes = [8, 128], strides = [1, 1]} : vector<136x128xf32> to vector<8x128xf32>
        %72 = vector.extract_strided_slice %69 {offsets = [8, 0], sizes = [8, 128], strides = [1, 1]} : vector<136x128xf32> to vector<8x128xf32>
        %73 = vector.extract_strided_slice %69 {offsets = [16, 0], sizes = [8, 128], strides = [1, 1]} : vector<136x128xf32> to vector<8x128xf32>
        %74 = vector.extract_strided_slice %69 {offsets = [24, 0], sizes = [8, 128], strides = [1, 1]} : vector<136x128xf32> to vector<8x128xf32>
        %75 = vector.extract_strided_slice %69 {offsets = [32, 0], sizes = [8, 128], strides = [1, 1]} : vector<136x128xf32> to vector<8x128xf32>
        %76 = vector.extract_strided_slice %69 {offsets = [40, 0], sizes = [8, 128], strides = [1, 1]} : vector<136x128xf32> to vector<8x128xf32>
        %77 = vector.extract_strided_slice %69 {offsets = [48, 0], sizes = [8, 128], strides = [1, 1]} : vector<136x128xf32> to vector<8x128xf32>
        %78 = vector.extract_strided_slice %69 {offsets = [56, 0], sizes = [8, 128], strides = [1, 1]} : vector<136x128xf32> to vector<8x128xf32>
        %79 = vector.extract_strided_slice %69 {offsets = [64, 0], sizes = [8, 128], strides = [1, 1]} : vector<136x128xf32> to vector<8x128xf32>
        %80 = vector.extract_strided_slice %69 {offsets = [72, 0], sizes = [8, 128], strides = [1, 1]} : vector<136x128xf32> to vector<8x128xf32>
        %81 = vector.extract_strided_slice %69 {offsets = [80, 0], sizes = [8, 128], strides = [1, 1]} : vector<136x128xf32> to vector<8x128xf32>
        %82 = vector.extract_strided_slice %69 {offsets = [88, 0], sizes = [8, 128], strides = [1, 1]} : vector<136x128xf32> to vector<8x128xf32>
        %83 = vector.extract_strided_slice %69 {offsets = [96, 0], sizes = [8, 128], strides = [1, 1]} : vector<136x128xf32> to vector<8x128xf32>
        %84 = vector.extract_strided_slice %69 {offsets = [104, 0], sizes = [8, 128], strides = [1, 1]} : vector<136x128xf32> to vector<8x128xf32>
        %85 = vector.extract_strided_slice %69 {offsets = [112, 0], sizes = [8, 128], strides = [1, 1]} : vector<136x128xf32> to vector<8x128xf32>
        %86 = vector.extract_strided_slice %69 {offsets = [120, 0], sizes = [8, 128], strides = [1, 1]} : vector<136x128xf32> to vector<8x128xf32>
        %87 = vector.extract_strided_slice %69 {offsets = [128, 0], sizes = [8, 128], strides = [1, 1]} : vector<136x128xf32> to vector<8x128xf32>
        %88 = arith.addf %71, %72 : vector<8x128xf32>
        %89 = arith.addf %73, %74 : vector<8x128xf32>
        %90 = arith.addf %75, %76 : vector<8x128xf32>
        %91 = arith.addf %77, %78 : vector<8x128xf32>
        %92 = arith.addf %79, %80 : vector<8x128xf32>
        %93 = arith.addf %81, %82 : vector<8x128xf32>
        %94 = arith.addf %83, %84 : vector<8x128xf32>
        %95 = arith.addf %85, %86 : vector<8x128xf32>
        %96 = arith.addf %88, %89 : vector<8x128xf32>
        %97 = arith.addf %90, %91 : vector<8x128xf32>
        %98 = arith.addf %92, %93 : vector<8x128xf32>
        %99 = arith.addf %94, %95 : vector<8x128xf32>
        %100 = arith.addf %96, %97 : vector<8x128xf32>
        %101 = arith.addf %98, %99 : vector<8x128xf32>
        %102 = arith.addf %100, %101 : vector<8x128xf32>
        %103 = arith.addf %102, %87 : vector<8x128xf32>
        %104 = arith.addf %70, %103 : vector<8x128xf32>
        %c0_26 = arith.constant 0 : index
        %c0_27 = arith.constant 0 : index
        %105 = vector.load %arg7[%c0_26, %c0_27] : memref<8x128xf32, #tpu.memory_space<vmem>>, vector<8x128xf32>
        tpu.vector_store %arg7[%c0_26, %c0_27], %104 {strides = array<i32>} : memref<8x128xf32, #tpu.memory_space<vmem>>, vector<8x128xf32>,
        %c0_28 = arith.constant 0 : index
        %c0_29 = arith.constant 0 : index
        %106 = vector.load %arg8[%c0_28, %c0_29] : memref<8x128xf32, #tpu.memory_space<vmem>>, vector<8x128xf32>
        %107 = arith.mulf %39, %54 : vector<136x128xf32>
        %108 = vector.extract_strided_slice %107 {offsets = [0, 0], sizes = [8, 128], strides = [1, 1]} : vector<136x128xf32> to vector<8x128xf32>
        %109 = vector.extract_strided_slice %107 {offsets = [8, 0], sizes = [8, 128], strides = [1, 1]} : vector<136x128xf32> to vector<8x128xf32>
        %110 = vector.extract_strided_slice %107 {offsets = [16, 0], sizes = [8, 128], strides = [1, 1]} : vector<136x128xf32> to vector<8x128xf32>
        %111 = vector.extract_strided_slice %107 {offsets = [24, 0], sizes = [8, 128], strides = [1, 1]} : vector<136x128xf32> to vector<8x128xf32>
        %112 = vector.extract_strided_slice %107 {offsets = [32, 0], sizes = [8, 128], strides = [1, 1]} : vector<136x128xf32> to vector<8x128xf32>
        %113 = vector.extract_strided_slice %107 {offsets = [40, 0], sizes = [8, 128], strides = [1, 1]} : vector<136x128xf32> to vector<8x128xf32>
        %114 = vector.extract_strided_slice %107 {offsets = [48, 0], sizes = [8, 128], strides = [1, 1]} : vector<136x128xf32> to vector<8x128xf32>
        %115 = vector.extract_strided_slice %107 {offsets = [56, 0], sizes = [8, 128], strides = [1, 1]} : vector<136x128xf32> to vector<8x128xf32>
        %116 = vector.extract_strided_slice %107 {offsets = [64, 0], sizes = [8, 128], strides = [1, 1]} : vector<136x128xf32> to vector<8x128xf32>
        %117 = vector.extract_strided_slice %107 {offsets = [72, 0], sizes = [8, 128], strides = [1, 1]} : vector<136x128xf32> to vector<8x128xf32>
        %118 = vector.extract_strided_slice %107 {offsets = [80, 0], sizes = [8, 128], strides = [1, 1]} : vector<136x128xf32> to vector<8x128xf32>
        %119 = vector.extract_strided_slice %107 {offsets = [88, 0], sizes = [8, 128], strides = [1, 1]} : vector<136x128xf32> to vector<8x128xf32>
        %120 = vector.extract_strided_slice %107 {offsets = [96, 0], sizes = [8, 128], strides = [1, 1]} : vector<136x128xf32> to vector<8x128xf32>
        %121 = vector.extract_strided_slice %107 {offsets = [104, 0], sizes = [8, 128], strides = [1, 1]} : vector<136x128xf32> to vector<8x128xf32>
        %122 = vector.extract_strided_slice %107 {offsets = [112, 0], sizes = [8, 128], strides = [1, 1]} : vector<136x128xf32> to vector<8x128xf32>
        %123 = vector.extract_strided_slice %107 {offsets = [120, 0], sizes = [8, 128], strides = [1, 1]} : vector<136x128xf32> to vector<8x128xf32>
        %124 = vector.extract_strided_slice %107 {offsets = [128, 0], sizes = [8, 128], strides = [1, 1]} : vector<136x128xf32> to vector<8x128xf32>
        %125 = arith.addf %108, %109 : vector<8x128xf32>
        %126 = arith.addf %110, %111 : vector<8x128xf32>
        %127 = arith.addf %112, %113 : vector<8x128xf32>
        %128 = arith.addf %114, %115 : vector<8x128xf32>
        %129 = arith.addf %116, %117 : vector<8x128xf32>
        %130 = arith.addf %118, %119 : vector<8x128xf32>
        %131 = arith.addf %120, %121 : vector<8x128xf32>
        %132 = arith.addf %122, %123 : vector<8x128xf32>
        %133 = arith.addf %125, %126 : vector<8x128xf32>
        %134 = arith.addf %127, %128 : vector<8x128xf32>
        %135 = arith.addf %129, %130 : vector<8x128xf32>
        %136 = arith.addf %131, %132 : vector<8x128xf32>
        %137 = arith.addf %133, %134 : vector<8x128xf32>
        %138 = arith.addf %135, %136 : vector<8x128xf32>
        %139 = arith.addf %137, %138 : vector<8x128xf32>
        %140 = arith.addf %139, %124 : vector<8x128xf32>
        %141 = arith.addf %106, %140 : vector<8x128xf32>
        %c0_30 = arith.constant 0 : index
        %c0_31 = arith.constant 0 : index
        %142 = vector.load %arg8[%c0_30, %c0_31] : memref<8x128xf32, #tpu.memory_space<vmem>>, vector<8x128xf32>
        tpu.vector_store %arg8[%c0_30, %c0_31], %141 {strides = array<i32>} : memref<8x128xf32, #tpu.memory_space<vmem>>, vector<8x128xf32>,
        %c0_32 = arith.constant 0 : index
        %c0_33 = arith.constant 0 : index
        %143 = vector.load %arg9[%c0_32, %c0_33] : memref<8x128xf32, #tpu.memory_space<vmem>>, vector<8x128xf32>
        %144 = arith.mulf %40, %54 : vector<136x128xf32>
        %145 = vector.extract_strided_slice %144 {offsets = [0, 0], sizes = [8, 128], strides = [1, 1]} : vector<136x128xf32> to vector<8x128xf32>
        %146 = vector.extract_strided_slice %144 {offsets = [8, 0], sizes = [8, 128], strides = [1, 1]} : vector<136x128xf32> to vector<8x128xf32>
        %147 = vector.extract_strided_slice %144 {offsets = [16, 0], sizes = [8, 128], strides = [1, 1]} : vector<136x128xf32> to vector<8x128xf32>
        %148 = vector.extract_strided_slice %144 {offsets = [24, 0], sizes = [8, 128], strides = [1, 1]} : vector<136x128xf32> to vector<8x128xf32>
        %149 = vector.extract_strided_slice %144 {offsets = [32, 0], sizes = [8, 128], strides = [1, 1]} : vector<136x128xf32> to vector<8x128xf32>
        %150 = vector.extract_strided_slice %144 {offsets = [40, 0], sizes = [8, 128], strides = [1, 1]} : vector<136x128xf32> to vector<8x128xf32>
        %151 = vector.extract_strided_slice %144 {offsets = [48, 0], sizes = [8, 128], strides = [1, 1]} : vector<136x128xf32> to vector<8x128xf32>
        %152 = vector.extract_strided_slice %144 {offsets = [56, 0], sizes = [8, 128], strides = [1, 1]} : vector<136x128xf32> to vector<8x128xf32>
        %153 = vector.extract_strided_slice %144 {offsets = [64, 0], sizes = [8, 128], strides = [1, 1]} : vector<136x128xf32> to vector<8x128xf32>
        %154 = vector.extract_strided_slice %144 {offsets = [72, 0], sizes = [8, 128], strides = [1, 1]} : vector<136x128xf32> to vector<8x128xf32>
        %155 = vector.extract_strided_slice %144 {offsets = [80, 0], sizes = [8, 128], strides = [1, 1]} : vector<136x128xf32> to vector<8x128xf32>
        %156 = vector.extract_strided_slice %144 {offsets = [88, 0], sizes = [8, 128], strides = [1, 1]} : vector<136x128xf32> to vector<8x128xf32>
        %157 = vector.extract_strided_slice %144 {offsets = [96, 0], sizes = [8, 128], strides = [1, 1]} : vector<136x128xf32> to vector<8x128xf32>
        %158 = vector.extract_strided_slice %144 {offsets = [104, 0], sizes = [8, 128], strides = [1, 1]} : vector<136x128xf32> to vector<8x128xf32>
        %159 = vector.extract_strided_slice %144 {offsets = [112, 0], sizes = [8, 128], strides = [1, 1]} : vector<136x128xf32> to vector<8x128xf32>
        %160 = vector.extract_strided_slice %144 {offsets = [120, 0], sizes = [8, 128], strides = [1, 1]} : vector<136x128xf32> to vector<8x128xf32>
        %161 = vector.extract_strided_slice %144 {offsets = [128, 0], sizes = [8, 128], strides = [1, 1]} : vector<136x128xf32> to vector<8x128xf32>
        %162 = arith.addf %145, %146 : vector<8x128xf32>
        %163 = arith.addf %147, %148 : vector<8x128xf32>
        %164 = arith.addf %149, %150 : vector<8x128xf32>
        %165 = arith.addf %151, %152 : vector<8x128xf32>
        %166 = arith.addf %153, %154 : vector<8x128xf32>
        %167 = arith.addf %155, %156 : vector<8x128xf32>
        %168 = arith.addf %157, %158 : vector<8x128xf32>
        %169 = arith.addf %159, %160 : vector<8x128xf32>
        %170 = arith.addf %162, %163 : vector<8x128xf32>
        %171 = arith.addf %164, %165 : vector<8x128xf32>
        %172 = arith.addf %166, %167 : vector<8x128xf32>
        %173 = arith.addf %168, %169 : vector<8x128xf32>
        %174 = arith.addf %170, %171 : vector<8x128xf32>
        %175 = arith.addf %172, %173 : vector<8x128xf32>
        %176 = arith.addf %174, %175 : vector<8x128xf32>
        %177 = arith.addf %176, %161 : vector<8x128xf32>
        %178 = arith.addf %143, %177 : vector<8x128xf32>
        %c0_34 = arith.constant 0 : index
        %c0_35 = arith.constant 0 : index
        %179 = vector.load %arg9[%c0_34, %c0_35] : memref<8x128xf32, #tpu.memory_space<vmem>>, vector<8x128xf32>
        tpu.vector_store %arg9[%c0_34, %c0_35], %178 {strides = array<i32>} : memref<8x128xf32, #tpu.memory_space<vmem>>, vector<8x128xf32>,
      } else {
      }
    } else {
    }
    return
  }
  func.func @transform_0(%arg0: i32, %arg1: i32) -> (i32, i32) {
    %c2_i32 = arith.constant 2 : i32
    %0 = arith.muli %arg0, %c2_i32 : i32
    %1 = arith.addi %0, %arg1 : i32
    %c0_i32 = arith.constant 0 : i32
    %c0_i32_0 = arith.constant 0 : i32
    return %1, %c0_i32 : i32, i32
  }
  func.func @transform_1(%arg0: i32, %arg1: i32) -> (i32, i32) {
    %c2_i32 = arith.constant 2 : i32
    %0 = arith.muli %arg0, %c2_i32 : i32
    %1 = arith.addi %0, %arg1 : i32
    %c0_i32 = arith.constant 0 : i32
    %c0_i32_0 = arith.constant 0 : i32
    return %1, %c0_i32 : i32, i32
  }
  func.func @transform_2(%arg0: i32, %arg1: i32) -> (i32, i32) {
    %c0_i32 = arith.constant 0 : i32
    %c0_i32_0 = arith.constant 0 : i32
    %c0_i32_1 = arith.constant 0 : i32
    return %c0_i32, %c0_i32_0 : i32, i32
  }
  func.func @transform_3(%arg0: i32, %arg1: i32) -> (i32, i32) {
    %c0_i32 = arith.constant 0 : i32
    %c0_i32_0 = arith.constant 0 : i32
    %c0_i32_1 = arith.constant 0 : i32
    return %c0_i32, %c0_i32_0 : i32, i32
  }
  func.func @transform_4(%arg0: i32, %arg1: i32) -> (i32, i32) {
    %c0_i32 = arith.constant 0 : i32
    %c0_i32_0 = arith.constant 0 : i32
    %c0_i32_1 = arith.constant 0 : i32
    return %c0_i32, %c0_i32_0 : i32, i32
  }
  func.func @transform_5(%arg0: i32, %arg1: i32) -> (i32, i32) {
    %c0_i32 = arith.constant 0 : i32
    %c0_i32_0 = arith.constant 0 : i32
    return %arg0, %c0_i32 : i32, i32
  }
  func.func @transform_6(%arg0: i32, %arg1: i32) -> (i32, i32) {
    %c0_i32 = arith.constant 0 : i32
    %c0_i32_0 = arith.constant 0 : i32
    return %arg0, %c0_i32 : i32, i32
  }
  func.func @transform_7(%arg0: i32, %arg1: i32) -> (i32, i32) {
    %c0_i32 = arith.constant 0 : i32
    %c0_i32_0 = arith.constant 0 : i32
    return %arg0, %c0_i32 : i32, i32
  }
}

</mosaic_0001>

<bundles_post_ra>
// kernel: _forward.4
= control target key start
LH: loop header
LB: loop body
LE: loop exit
PB: predicated region body
PF: predicated region fallthrough
CT: control target
= control target key end

     0   :  { %s3361_s24 = smov 0   ;;  %s3363_s25 = smov 0   ;;  %s4763_s0 = inlined_call_operand.vmem [shape: bf16[160,512], index: 0, kind: input, shape index: {}]   ;;  %s4764_s1 = inlined_call_operand.vmem [shape: bf16[160,512], index: 1, kind: input, shape index: {}]   ;;  %s4765_s2 = inlined_call_operand.vmem [shape: bf16[512,512], index: 2, kind: input, shape index: {}]   ;;  %s4766_s3 = inlined_call_operand.vmem [shape: bf16[256,128], index: 3, kind: input, shape index: {}]   ;;  %s4767_s4 = inlined_call_operand.vmem [shape: f32[1,128], index: 4, kind: input, shape index: {}]   ;;  %s4768_s5 = inlined_call_operand.vmem [shape: f32[16,128], index: 5, kind: output, shape index: {0}]   ;;  %s4769_s6 = inlined_call_operand.vmem [shape: f32[16,128], index: 6, kind: output, shape index: {1}]   ;;  %s4770_s7 = inlined_call_operand.vmem [shape: f32[16,128], index: 7, kind: output, shape index: {2}]  }
   0x1   :  { %s3365_s26 = smov 0   ;;  %s3367_s27 = smov 0  }
   0x2   :  { %s3369_s28 = smov 0  }
   0x3 LB: > { %s27_s29 = sadd.s32 1, %s3309_s26  ;;  %s30_s30 = sadd.s32 1, %s3313_s27  ;;  %s3317_s28 = sphi %s3369_s28, %s18_s28   ;;  %s3313_s27 = sphi %s3367_s27, %s4978_s27   ;;  %s3309_s26 = sphi %s3365_s26, %s4977_s26   ;;  %s3305_s25 = sphi %s3363_s25, %s4976_s25   ;;  %s3301_s24 = sphi %s3361_s24, %s4975_s24  }
   0x4   : > { %p28_p0 = scmp.ge.s32.totalorder %s27_s29, 2  ;;  %p2609_p1 = scmp.ge.s32.totalorder %s3317_s28, 1 }
   0x5   : > { %p284_p2 = scmp.lt.s32.totalorder %s3317_s28, 5 }
   0x6   : > { %s4980_s29 = smov (%p28_p0, %s27_s29), 0  ;;  %s4982_s30 = smov (!%p28_p0, %s30_s30), %s3313_s27 }
   0x7   : > { %p285_p3 = pnand %p2609_p1, %p284_p2  ;;  %p32_p4 = scmp.ge.s32.totalorder %s4982_s30, 2 }
   0x8   : > { %s2610_s8 = sshll.u32 (!%p285_p3), %s3305_s25, 1  ;;  %p356_p5 = scmp.lt.s32.totalorder (!%p285_p3), %s3305_s25, 1 }
   0x9   : > { %s4984_s30 = smov (%p32_p4, %s4982_s30), 0  ;;  %288 = sbr.rel (%p285_p3) target bundleno = 858 (0x35a), region = 40 }
   0xa   : > { %s335_s9 = sadd.s32 (!%p285_p3), %s3301_s24, %s2610_s8  ;;  %p2619_p7 = scmp.ne.s32.totalorder (!%p285_p3), %s3301_s24, 0 }
   0xb   : > { %s336_s10 = smul.u32 (!%p285_p3), 5, %s335_s9 }
   0xd   : > { %p337_p6 = scmp.lt.s32.totalorder (!%p285_p3), %s336_s10, 19 }
  0x10   : > { %s4986_s25 = smov (!%p356_p5, %s3305_s25), 1  ;;  %s4988_s10 = smov (!%p337_p6, %s336_s10), 19 }
  0x11   : > { %s2616_s11 = sshll.u32 %s4986_s25, 3  ;;  %s2799_s18 = sshll.u32 %s4988_s10, 4  ;;  %v3319_v0 = vmov (!%p2619_p7), 0.0  }
  0x12   : > { %s3397_s14 = scalar_lea.vmem %s4768_s5, %s2616_s11  ;;  %s3402_s17 = scalar_lea.vmem %s4769_s6, %s2616_s11 }
  0x13   : > { %s3407_s21 = scalar_lea.vmem %s4770_s7, %s2616_s11  ;;  %s3412_s25 = scalar_lea.vmem %s4763_s0, %s2799_s18  ;;  %373 = vst [vmem:[%s3397_s14] sm:$0xff] (!%p2619_p7), %v3319_v0  ;;  %374 = vst [vmem:[%s3402_s17] sm:$0xff] (!%p2619_p7), %v3319_v0 }
  0x14   : > { %s3417_s13 = scalar_lea.vmem %s4764_s1, %s2799_s18  ;;  %372 = sbr.rel (%p2619_p7) target bundleno = 27 (0x1b), region = 44  ;;  %375 = vst [vmem:[%s3407_s21] sm:$0xff] (!%p2619_p7), %v3319_v0 }
  0x1b PF: > { %s3423_s10 = smul.u32 40, %s335_s9 }
  0x1d   : > { %p2621_p8 = scmp.ge.s32.totalorder %s3423_s10, 130 }
  0x1f   : > { %382 = sbr.rel (%p2621_p8) target bundleno = 858 (0x35a), region = 48 }
  0x26   : > { %v3429_v1 = vld [vmem:[%s4765_s2 + $0x4] ss:$16 sps:$4 sm:$0xff]   ;;  %v3434_v2 = vld [vmem:[%s4765_s2 + $0xc] ss:$16 sps:$4 sm:$0xff]   ;;  %v3440_v3 = vld [vmem:[%s4765_s2] ss:$16 sps:$4 sm:$0xff]  }
  0x27   : > { %1215 = vmatprep.subr.bf16.mxu0 %v3429_v1  ;;  %v3445_v4 = vld [vmem:[%s4765_s2 + $0x8] ss:$16 sps:$4 sm:$0xff]   ;;  %1337 = vmatprep.subr.bf16.mxu1 %v3434_v2  ;;  %v3451_v5 = vld [vmem:[%s4765_s2 + $0x24] ss:$16 sps:$4 sm:$0xff]   ;;  %v3458_v6 = vld [vmem:[%s4765_s2 + $0x2c] ss:$16 sps:$4 sm:$0xff]  }
  0x28   : > { %1216 = vmatpush1.bf16.msra.mxu0 %v3440_v3  ;;  %1338 = vmatpush1.bf16.msra.mxu1 %v3445_v4  ;;  %v3463_v7 = vld [vmem:[%s4765_s2 + $0x20] ss:$16 sps:$4 sm:$0xff]   ;;  %v3469_v8 = vld [vmem:[%s4765_s2 + $0x28] ss:$16 sps:$4 sm:$0xff]   ;;  %v3475_v9 = vld [vmem:[%s4765_s2 + $0x44] ss:$16 sps:$4 sm:$0xff]  }
  0x29   : > { %1217 = vmatprep.subr.bf16.mxu0 %v3451_v5  ;;  %1339 = vmatprep.subr.bf16.mxu1 %v3458_v6  ;;  %v3480_v10 = vld [vmem:[%s4765_s2 + $0x4c] ss:$16 sps:$4 sm:$0xff]   ;;  %v3485_v11 = vld [vmem:[%s4765_s2 + $0x40] ss:$16 sps:$4 sm:$0xff]   ;;  %v3490_v12 = vld [vmem:[%s4765_s2 + $0x48] ss:$16 sps:$4 sm:$0xff]  }
  0x2a   : > { %v3497_v13 = vld [vmem:[%s4765_s2 + $0x64] ss:$16 sps:$4 sm:$0xff]   ;;  %v3504_v14 = vld [vmem:[%s4765_s2 + $0x6c] ss:$16 sps:$4 sm:$0xff]   ;;  %v3509_v15 = vld [vmem:[%s4765_s2 + $0x60] ss:$16 sps:$4 sm:$0xff]  }
  0x2b   : > { %v3516_v16 = vld [vmem:[%s4765_s2 + $0x68] ss:$16 sps:$4 sm:$0xff]   ;;  %v3521_v17 = vld [vmem:[%s4765_s2 + $0x84] ss:$16 sps:$4 sm:$0xff]   ;;  %v3528_v18 = vld [vmem:[%s4765_s2 + $0x8c] ss:$16 sps:$4 sm:$0xff]  }
  0x2c   : > { %1218 = vmatpush1.bf16.msra.mxu0 %v3463_v7  ;;  %1340 = vmatpush1.bf16.msra.mxu1 %v3469_v8  ;;  %v3533_v19 = vld [vmem:[%s4765_s2 + $0x80] ss:$16 sps:$4 sm:$0xff]   ;;  %v3538_v20 = vld [vmem:[%s4765_s2 + $0x88] ss:$16 sps:$4 sm:$0xff]   ;;  %v3545_v21 = vld [vmem:[%s4765_s2 + $0xa4] ss:$16 sps:$4 sm:$0xff]  }
  0x2d   : > { %1219 = vmatprep.subr.bf16.mxu0 %v3475_v9  ;;  %1341 = vmatprep.subr.bf16.mxu1 %v3480_v10  ;;  %v3552_v22 = vld [vmem:[%s4765_s2 + $0xac] ss:$16 sps:$4 sm:$0xff]   ;;  %v3557_v23 = vld [vmem:[%s4765_s2 + $0xa0] ss:$16 sps:$4 sm:$0xff]   ;;  %v3564_v24 = vld [vmem:[%s4765_s2 + $0xa8] ss:$16 sps:$4 sm:$0xff]  }
  0x2e   : > { %v3569_v25 = vld [vmem:[%s4765_s2 + $0xc4] ss:$16 sps:$4 sm:$0xff]   ;;  %v3576_v26 = vld [vmem:[%s4765_s2 + $0xcc] ss:$16 sps:$4 sm:$0xff]   ;;  %v3581_v27 = vld [vmem:[%s4765_s2 + $0xc0] ss:$16 sps:$4 sm:$0xff]  }
  0x2f   : > { %v3586_v28 = vld [vmem:[%s4765_s2 + $0xc8] ss:$16 sps:$4 sm:$0xff]   ;;  %v3593_v29 = vld [vmem:[%s4765_s2 + $0xe4] ss:$16 sps:$4 sm:$0xff]   ;;  %v3600_v30 = vld [vmem:[%s4765_s2 + $0xec] ss:$16 sps:$4 sm:$0xff]  }
  0x30   : > { %1220 = vmatpush1.bf16.msra.mxu0 %v3485_v11  ;;  %1342 = vmatpush1.bf16.msra.mxu1 %v3490_v12  ;;  %v3605_v31 = vld [vmem:[%s4765_s2 + $0xe0] ss:$16 sps:$4 sm:$0xff]   ;;  %v3612_v32 = vld [vmem:[%s4765_s2 + $0xe8] ss:$16 sps:$4 sm:$0xff]   ;;  %v3617_v33 = vld [vmem:[%s4765_s2 + $0x104] ss:$16 sps:$4 sm:$0xff]  }
  0x31   : > { %1221 = vmatprep.subr.bf16.mxu0 %v3497_v13  ;;  %1343 = vmatprep.subr.bf16.mxu1 %v3504_v14  ;;  %v3624_v34 = vld [vmem:[%s4765_s2 + $0x10c] ss:$16 sps:$4 sm:$0xff]   ;;  %v3629_v35 = vld [vmem:[%s4765_s2 + $0x100] ss:$16 sps:$4 sm:$0xff]   ;;  %v3634_v36 = vld [vmem:[%s4765_s2 + $0x108] ss:$16 sps:$4 sm:$0xff]  }
  0x32   : > { %v3641_v37 = vld [vmem:[%s4765_s2 + $0x124] ss:$16 sps:$4 sm:$0xff]   ;;  %v3648_v38 = vld [vmem:[%s4765_s2 + $0x12c] ss:$16 sps:$4 sm:$0xff]   ;;  %v3653_v39 = vld [vmem:[%s4765_s2 + $0x120] ss:$16 sps:$4 sm:$0xff]  }
  0x33   : > { %v3660_v40 = vld [vmem:[%s4765_s2 + $0x128] ss:$16 sps:$4 sm:$0xff]   ;;  %v3665_v41 = vld [vmem:[%s4765_s2 + $0x144] ss:$16 sps:$4 sm:$0xff]   ;;  %v3672_v42 = vld [vmem:[%s4765_s2 + $0x14c] ss:$16 sps:$4 sm:$0xff]  }
  0x34   : > { %1222 = vmatpush1.bf16.msra.mxu0 %v3509_v15  ;;  %1344 = vmatpush1.bf16.msra.mxu1 %v3516_v16  ;;  %v3677_v43 = vld [vmem:[%s4765_s2 + $0x140] ss:$16 sps:$4 sm:$0xff]   ;;  %v3682_v44 = vld [vmem:[%s4765_s2 + $0x148] ss:$16 sps:$4 sm:$0xff]   ;;  %v3689_v45 = vld [vmem:[%s4765_s2 + $0x164] ss:$16 sps:$4 sm:$0xff]  }
  0x35   : > { %1223 = vmatprep.subr.bf16.mxu0 %v3521_v17  ;;  %1345 = vmatprep.subr.bf16.mxu1 %v3528_v18  ;;  %v3696_v46 = vld [vmem:[%s4765_s2 + $0x16c] ss:$16 sps:$4 sm:$0xff]   ;;  %v3701_v47 = vld [vmem:[%s4765_s2 + $0x160] ss:$16 sps:$4 sm:$0xff]   ;;  %v3706_v48 = vld [vmem:[%s4765_s2 + $0x168] ss:$16 sps:$4 sm:$0xff]  }
  0x36   : > { %v3057_v49 = vld [vmem:[%s3412_s25 + $0x4] ss:$16 sps:$4 sm:$0xff]   ;;  %v3721_v51 = vld [vmem:[%s4765_s2 + $0x18c] ss:$16 sps:$4 sm:$0xff]   ;;  %v3726_v52 = vld [vmem:[%s4765_s2 + $0x180] ss:$16 sps:$4 sm:$0xff]  }
  0x37   : > { %v3714_v50 = vld [vmem:[%s4765_s2 + $0x184] ss:$16 sps:$4 sm:$0xff]   ;;  %1247 = vmatprep.mubr.bf16.mxu0 %v3057_v49  ;;  %1369 = vmatprep.mubr.bf16.mxu1 %v3057_v49  ;;  %v3731_v53 = vld [vmem:[%s4765_s2 + $0x188] ss:$16 sps:$4 sm:$0xff]   ;;  %v3745_v55 = vld [vmem:[%s4765_s2 + $0x1ac] ss:$16 sps:$4 sm:$0xff]  }
  0x38   : > { %1224 = vmatpush1.bf16.msra.mxu0 %v3533_v19  ;;  %1346 = vmatpush1.bf16.msra.mxu1 %v3538_v20  ;;  %v3738_v54 = vld [vmem:[%s4765_s2 + $0x1a4] ss:$16 sps:$4 sm:$0xff]   ;;  %4839 = vst [vmem:[#allocation2_spill] sm:$0xff] %v3745_v55  ;;  %v3750_v56 = vld [vmem:[%s4765_s2 + $0x1a0] ss:$16 sps:$4 sm:$0xff]   ;;  %s2256_s23 = sadd.s32 40, %s3423_s10 }
  0x39   : > { %1225 = vmatprep.subr.bf16.mxu0 %v3545_v21  ;;  %1347 = vmatprep.subr.bf16.mxu1 %v3552_v22  ;;  %4840 = vst [vmem:[#allocation3_spill] sm:$0xff] %v3750_v56  ;;  %v3755_v57 = vld [vmem:[%s4765_s2 + $0x1a8] ss:$16 sps:$4 sm:$0xff]   ;;  %v3762_v58 = vld [vmem:[%s4765_s2 + $0x1c4] ss:$16 sps:$4 sm:$0xff]   ;;  %p2790_p9 = scmp.gt.s32.totalorder %s2256_s23, 130 }
  0x3a   : > { %4841 = vst [vmem:[#allocation4_spill] sm:$0xff] %v3755_v57  ;;  %4842 = vst [vmem:[#allocation5_spill] sm:$0xff] %v3762_v58  ;;  %v3769_v59 = vld [vmem:[%s4765_s2 + $0x1cc] ss:$16 sps:$4 sm:$0xff]   ;;  %v3774_v60 = vld [vmem:[%s4765_s2 + $0x1c0] ss:$16 sps:$4 sm:$0xff]  }
  0x3b   : > { %4843 = vst [vmem:[#allocation6_spill] sm:$0xff] %v3769_v59  ;;  %4844 = vst [vmem:[#allocation7_spill] sm:$0xff] %v3774_v60  ;;  %v3779_v61 = vld [vmem:[%s4765_s2 + $0x1c8] ss:$16 sps:$4 sm:$0xff]   ;;  %v3786_v62 = vld [vmem:[%s4765_s2 + $0x1e4] ss:$16 sps:$4 sm:$0xff]  }
  0x3c   : > { %1226 = vmatpush1.bf16.msra.mxu0 %v3557_v23  ;;  %1348 = vmatpush1.bf16.msra.mxu1 %v3564_v24  ;;  %4845 = vst [vmem:[#allocation8_spill] sm:$0xff] %v3779_v61  ;;  %4846 = vst [vmem:[#allocation9_spill] sm:$0xff] %v3786_v62  ;;  %v3793_v63 = vld [vmem:[%s4765_s2 + $0x1ec] ss:$16 sps:$4 sm:$0xff]   ;;  %v3798_v0 = vld [vmem:[%s4765_s2 + $0x1e0] ss:$16 sps:$4 sm:$0xff]  }
  0x3d   : > { %1227 = vmatprep.subr.bf16.mxu0 %v3569_v25  ;;  %1349 = vmatprep.subr.bf16.mxu1 %v3576_v26  ;;  %4847 = vst [vmem:[#allocation10_spill] sm:$0xff] %v3793_v63  ;;  %4848 = vst [vmem:[#allocation11_spill] sm:$0xff] %v3798_v0  ;;  %v3803_v49 = vld [vmem:[%s4765_s2 + $0x1e8] ss:$16 sps:$4 sm:$0xff]  }
  0x3e   : > { %4849 = vst [vmem:[#allocation12_spill] sm:$0xff] %v3803_v49 }
  0x40   : > { %1228 = vmatpush1.bf16.msra.mxu0 %v3581_v27  ;;  %1350 = vmatpush1.bf16.msra.mxu1 %v3586_v28 }
  0x41   : > { %1229 = vmatprep.subr.bf16.mxu0 %v3593_v29  ;;  %1351 = vmatprep.subr.bf16.mxu1 %v3600_v30 }
  0x44   : > { %1230 = vmatpush1.bf16.msra.mxu0 %v3605_v31  ;;  %1352 = vmatpush1.bf16.msra.mxu1 %v3612_v32 }
  0x45   : > { %1231 = vmatprep.subr.bf16.mxu0 %v3617_v33  ;;  %1353 = vmatprep.subr.bf16.mxu1 %v3624_v34 }
  0x48   : > { %1232 = vmatpush1.bf16.msra.mxu0 %v3629_v35  ;;  %1354 = vmatpush1.bf16.msra.mxu1 %v3634_v36 }
  0x49   : > { %1233 = vmatprep.subr.bf16.mxu0 %v3641_v37  ;;  %1355 = vmatprep.subr.bf16.mxu1 %v3648_v38 }
  0x4c   : > { %1234 = vmatpush1.bf16.msra.mxu0 %v3653_v39  ;;  %1356 = vmatpush1.bf16.msra.mxu1 %v3660_v40 }
  0x4d   : > { %1235 = vmatprep.subr.bf16.mxu0 %v3665_v41  ;;  %1357 = vmatprep.subr.bf16.mxu1 %v3672_v42 }
  0x50   : > { %1236 = vmatpush1.bf16.msra.mxu0 %v3677_v43  ;;  %1358 = vmatpush1.bf16.msra.mxu1 %v3682_v44 }
  0x51   : > { %1237 = vmatprep.subr.bf16.mxu0 %v3689_v45  ;;  %1359 = vmatprep.subr.bf16.mxu1 %v3696_v46 }
  0x54   : > { %1238 = vmatpush1.bf16.msra.mxu0 %v3701_v47  ;;  %1360 = vmatpush1.bf16.msra.mxu1 %v3706_v48 }
  0x55   : > { %1239 = vmatprep.subr.bf16.mxu0 %v3714_v50  ;;  %1361 = vmatprep.subr.bf16.mxu1 %v3721_v51 }
  0x58   : > { %1240 = vmatpush1.bf16.msra.mxu0 %v3726_v52  ;;  %1362 = vmatpush1.bf16.msra.mxu1 %v3731_v53 }
  0x59   : > { %1241 = vmatprep.subr.bf16.mxu0 %v3738_v54  ;;  %1363 = vmatprep.subr.bf16.mxu1 %v3745_v55  ;;  %v3921_v55 = vld [vmem:[%s4765_s2 + $0x280] ss:$16 sps:$4 sm:$0xff]  }
  0x5a   : > { %4867 = vst [vmem:[#allocation30_spill] sm:$0xff] %v3921_v55 }
  0x5c   : > { %1242 = vmatpush1.bf16.msra.mxu0 %v3750_v56  ;;  %1364 = vmatpush1.bf16.msra.mxu1 %v3755_v57  ;;  %v3055_v57 = vld [vmem:[%s3412_s25] ss:$16 sps:$4 sm:$0xff]  }
  0x5d   : > { %1243 = vmatprep.subr.bf16.mxu0 %v3762_v58  ;;  %1365 = vmatprep.subr.bf16.mxu1 %v3769_v59  ;;  %v3810_v59 = vld [vmem:[%s4765_s2 + $0x204] ss:$16 sps:$4 sm:$0xff]   ;;  %v3817_v58 = vld [vmem:[%s4765_s2 + $0x20c] ss:$16 sps:$4 sm:$0xff]   ;;  %v3132_v56 = vld [vmem:[%s3412_s25 + $0x20] ss:$16 sps:$4 sm:$0xff]  }
  0x5e   : > { %4850 = vst [vmem:[#allocation13_spill] sm:$0xff] %v3810_v59  ;;  %4851 = vst [vmem:[#allocation14_spill] sm:$0xff] %v3817_v58 }
  0x60   : > { %1244 = vmatpush1.bf16.msra.mxu0 %v3774_v60  ;;  %1366 = vmatpush1.bf16.msra.mxu1 %v3779_v61  ;;  %v3823_v60 = vld [vmem:[%s4765_s2 + $0x200] ss:$16 sps:$4 sm:$0xff]   ;;  %v3828_v61 = vld [vmem:[%s4765_s2 + $0x208] ss:$16 sps:$4 sm:$0xff]  }
  0x61   : > { %1245 = vmatprep.subr.bf16.mxu0 %v3786_v62  ;;  %1367 = vmatprep.subr.bf16.mxu1 %v3793_v63  ;;  %4852 = vst [vmem:[#allocation15_spill] sm:$0xff] %v3823_v60  ;;  %4853 = vst [vmem:[#allocation16_spill] sm:$0xff] %v3828_v61  ;;  %v3835_v63 = vld [vmem:[%s4765_s2 + $0x224] ss:$16 sps:$4 sm:$0xff]   ;;  %v3842_v62 = vld [vmem:[%s4765_s2 + $0x22c] ss:$16 sps:$4 sm:$0xff]  }
  0x62   : > { %4854 = vst [vmem:[#allocation17_spill] sm:$0xff] %v3835_v63  ;;  %4855 = vst [vmem:[#allocation18_spill] sm:$0xff] %v3842_v62 }
  0x64   : > { %1246 = vmatpush1.bf16.msra.mxu0 %v3798_v0  ;;  %1368 = vmatpush1.bf16.msra.mxu1 %v3803_v49  ;;  %v3847_v49 = vld [vmem:[%s4765_s2 + $0x220] ss:$16 sps:$4 sm:$0xff]   ;;  %v3852_v0 = vld [vmem:[%s4765_s2 + $0x228] ss:$16 sps:$4 sm:$0xff]  }
  0x65   : > { %1276 = vmatprep.subr.bf16.mxu0 %v3810_v59  ;;  %1398 = vmatprep.subr.bf16.mxu1 %v3817_v58  ;;  %4856 = vst [vmem:[#allocation19_spill] sm:$0xff] %v3847_v49  ;;  %4857 = vst [vmem:[#allocation20_spill] sm:$0xff] %v3852_v0  ;;  %v3859_v58 = vld [vmem:[%s4765_s2 + $0x244] ss:$16 sps:$4 sm:$0xff]  }
  0x66   : > { %4858 = vst [vmem:[#allocation21_spill] sm:$0xff] %v3859_v58  ;;  %v3130_v59 = vld [vmem:[%s3412_s25 + $0x24] ss:$16 sps:$4 sm:$0xff]  }
  0x67   : > { %1248 = vmatmul.mubr.bf16.vlgmr.msra.gmra.mrb[0].mxu0 %v3055_v57  ;;  %1370 = vmatmul.mubr.bf16.vlgmr.msra.gmra.mrb[0].mxu1 %v3055_v57  ;;  %v3866_v57 = vld [vmem:[%s4765_s2 + $0x24c] ss:$16 sps:$4 sm:$0xff]  }
  0x68   : > { %1277 = vmatpush1.bf16.msra.mxu0 %v3823_v60  ;;  %1399 = vmatpush1.bf16.msra.mxu1 %v3828_v61  ;;  %4859 = vst [vmem:[#allocation22_spill] sm:$0xff] %v3866_v57  ;;  %v3871_v60 = vld [vmem:[%s4765_s2 + $0x240] ss:$16 sps:$4 sm:$0xff]   ;;  %v3876_v61 = vld [vmem:[%s4765_s2 + $0x248] ss:$16 sps:$4 sm:$0xff]  }
  0x69   : > { %1278 = vmatprep.subr.bf16.mxu0 %v3835_v63  ;;  %1400 = vmatprep.subr.bf16.mxu1 %v3842_v62  ;;  %4860 = vst [vmem:[#allocation23_spill] sm:$0xff] %v3871_v60  ;;  %v3883_v62 = vld [vmem:[%s4765_s2 + $0x264] ss:$16 sps:$4 sm:$0xff]   ;;  %v3890_v63 = vld [vmem:[%s4765_s2 + $0x26c] ss:$16 sps:$4 sm:$0xff]  }
  0x6a   : > { %4861 = vst [vmem:[#allocation24_spill] sm:$0xff] %v3883_v62  ;;  %4862 = vst [vmem:[#allocation25_spill] sm:$0xff] %v3890_v63  ;;  %1257 = vmatprep.mubr.bf16.mxu0 %v3130_v59  ;;  %1379 = vmatprep.mubr.bf16.mxu1 %v3130_v59  ;;  %v3933_v59 = vld [vmem:[%s4765_s2 + $0x2a4] ss:$16 sps:$4 sm:$0xff]  }
  0x6b   : > { %4869 = vst [vmem:[#allocation32_spill] sm:$0xff] %v3933_v59 }
  0x6c   : > { %1279 = vmatpush1.bf16.msra.mxu0 %v3847_v49  ;;  %1401 = vmatpush1.bf16.msra.mxu1 %v3852_v0  ;;  %v3895_v49 = vld [vmem:[%s4765_s2 + $0x260] ss:$16 sps:$4 sm:$0xff]   ;;  %v3900_v0 = vld [vmem:[%s4765_s2 + $0x268] ss:$16 sps:$4 sm:$0xff]  }
  0x6d   : > { %1280 = vmatprep.subr.bf16.mxu0 %v3859_v58  ;;  %1402 = vmatprep.subr.bf16.mxu1 %v3866_v57  ;;  %4863 = vst [vmem:[#allocation26_spill] sm:$0xff] %v3895_v49  ;;  %4864 = vst [vmem:[#allocation27_spill] sm:$0xff] %v3900_v0  ;;  %v3905_v58 = vld [vmem:[%s4765_s2 + $0x284] ss:$16 sps:$4 sm:$0xff]   ;;  %v3910_v57 = vld [vmem:[%s4765_s2 + $0x28c] ss:$16 sps:$4 sm:$0xff]  }
  0x6e   : > { %4865 = vst [vmem:[#allocation28_spill] sm:$0xff] %v3905_v58  ;;  %4866 = vst [vmem:[#allocation29_spill] sm:$0xff] %v3910_v57 }
  0x6f   : > { %1258 = vmatmul.mubr.bf16.gmra.mrb[4].mxu0 %v3132_v56  ;;  %1380 = vmatmul.mubr.bf16.gmra.mrb[4].mxu1 %v3132_v56  ;;  %v3946_v56 = vld [vmem:[%s4765_s2 + $0x2a0] ss:$16 sps:$4 sm:$0xff]  }
  0x70   : > { %1281 = vmatpush1.bf16.msra.mxu0 %v3871_v60  ;;  %1403 = vmatpush1.bf16.msra.mxu1 %v3876_v61  ;;  %v3926_v60 = vld [vmem:[%s4765_s2 + $0x288] ss:$16 sps:$4 sm:$0xff]   ;;  %4871 = vst [vmem:[#allocation34_spill] sm:$0xff] %v3946_v56 }
  0x71   : > { %1282 = vmatprep.subr.bf16.mxu0 %v3883_v62  ;;  %1404 = vmatprep.subr.bf16.mxu1 %v3890_v63  ;;  %4868 = vst [vmem:[#allocation31_spill] sm:$0xff] %v3926_v60  ;;  %v3940_v63 = vld [vmem:[%s4765_s2 + $0x2ac] ss:$16 sps:$4 sm:$0xff]   ;;  %v519_v62 = vld [vmem:[%s3412_s25 + $0x40] sm:$0xff] }
  0x72   : > { %4870 = vst [vmem:[#allocation33_spill] sm:$0xff] %v3940_v63 }
  0x74   : > { %1283 = vmatpush1.bf16.msra.mxu0 %v3895_v49  ;;  %1405 = vmatpush1.bf16.msra.mxu1 %v3900_v0  ;;  %v2631_v0 = vcombine.high %v519_v62, %v519_v62  ;;  %v2630_v49 = vcombine.low %v519_v62, %v519_v62  ;;  %v3965_v62 = vld [vmem:[%s4765_s2 + $0x2cc] ss:$16 sps:$4 sm:$0xff]  }
  0x75   : > { %1284 = vmatprep.subr.bf16.mxu0 %v3905_v58  ;;  %1406 = vmatprep.subr.bf16.mxu1 %v3910_v57  ;;  %v3953_v57 = vld [vmem:[%s4765_s2 + $0x2a8] ss:$16 sps:$4 sm:$0xff]   ;;  %v3960_v58 = vld [vmem:[%s4765_s2 + $0x2c4] ss:$16 sps:$4 sm:$0xff]   ;;  %4874 = vst [vmem:[#allocation37_spill] sm:$0xff] %v3965_v62 }
  0x76   : > { %4872 = vst [vmem:[#allocation35_spill] sm:$0xff] %v3953_v57  ;;  %4873 = vst [vmem:[#allocation36_spill] sm:$0xff] %v3960_v58  ;;  %1267 = vmatprep.mubr.bf16.mxu0 %v2631_v0  ;;  %1389 = vmatprep.mubr.bf16.mxu1 %v2631_v0  ;;  %v3989_v0 = vld [vmem:[%s4765_s2 + $0x2ec] ss:$16 sps:$4 sm:$0xff]  }
  0x77   : > { %1268 = vmatmul.mubr.bf16.gmra.mrb[8].mxu0 %v2630_v49  ;;  %1390 = vmatmul.mubr.bf16.gmra.mrb[8].mxu1 %v2630_v49  ;;  %4878 = vst [vmem:[#allocation41_spill] sm:$0xff] %v3989_v0  ;;  %v3995_v49 = vld [vmem:[%s4765_s2 + $0x2e0] ss:$16 sps:$4 sm:$0xff]  }
  0x78   : > { %1285 = vmatpush1.bf16.msra.mxu0 %v3921_v55  ;;  %1407 = vmatpush1.bf16.msra.mxu1 %v3926_v60  ;;  %v3970_v60 = vld [vmem:[%s4765_s2 + $0x2c0] ss:$16 sps:$4 sm:$0xff]   ;;  %v3161_v55 = vld [vmem:[%s3412_s25 + $0xc] ss:$16 sps:$4 sm:$0xff]   ;;  %4879 = vst [vmem:[#allocation42_spill] sm:$0xff] %v3995_v49 }
  0x79   : > { %1286 = vmatprep.subr.bf16.mxu0 %v3933_v59  ;;  %1408 = vmatprep.subr.bf16.mxu1 %v3940_v63  ;;  %4875 = vst [vmem:[#allocation38_spill] sm:$0xff] %v3970_v60  ;;  %v3975_v63 = vld [vmem:[%s4765_s2 + $0x2c8] ss:$16 sps:$4 sm:$0xff]   ;;  %v3982_v59 = vld [vmem:[%s4765_s2 + $0x2e4] ss:$16 sps:$4 sm:$0xff]  }
  0x7a   : > { %4876 = vst [vmem:[#allocation39_spill] sm:$0xff] %v3975_v63  ;;  %4877 = vst [vmem:[#allocation40_spill] sm:$0xff] %v3982_v59  ;;  %1308 = vmatprep.mubr.bf16.mxu0 %v3161_v55  ;;  %1430 = vmatprep.mubr.bf16.mxu1 %v3161_v55  ;;  %v4019_v55 = vld [vmem:[%s4765_s2 + $0x300] ss:$16 sps:$4 sm:$0xff]  }
  0x7c   : > { %1287 = vmatpush1.bf16.msra.mxu0 %v3946_v56  ;;  %1409 = vmatpush1.bf16.msra.mxu1 %v3953_v57  ;;  %v4000_v57 = vld [vmem:[%s4765_s2 + $0x2e8] ss:$16 sps:$4 sm:$0xff]  }
  0x7d   : > { %1288 = vmatprep.subr.bf16.mxu0 %v3960_v58  ;;  %1410 = vmatprep.subr.bf16.mxu1 %v3965_v62  ;;  %4880 = vst [vmem:[#allocation43_spill] sm:$0xff] %v4000_v57  ;;  %v4007_v62 = vld [vmem:[%s4765_s2 + $0x304] ss:$16 sps:$4 sm:$0xff]   ;;  %v4012_v58 = vld [vmem:[%s4765_s2 + $0x30c] ss:$16 sps:$4 sm:$0xff]  }
  0x7e   : > { %4881 = vst [vmem:[#allocation44_spill] sm:$0xff] %v4007_v62  ;;  %4882 = vst [vmem:[#allocation45_spill] sm:$0xff] %v4012_v58  ;;  %v4048_v56 = vld [vmem:[%s4765_s2 + $0x328] ss:$16 sps:$4 sm:$0xff]  }
  0x7f   : > { %4885 = vst [vmem:[#allocation48_spill] sm:$0xff] %v4048_v56 }
  0x80   : > { %1289 = vmatpush1.bf16.msra.mxu0 %v3970_v60  ;;  %1411 = vmatpush1.bf16.msra.mxu1 %v3975_v63  ;;  %v4024_v63 = vld [vmem:[%s4765_s2 + $0x308] ss:$16 sps:$4 sm:$0xff]   ;;  %v4029_v60 = vld [vmem:[%s4765_s2 + $0x324] ss:$16 sps:$4 sm:$0xff]  }
  0x81   : > { %1290 = vmatprep.subr.bf16.mxu0 %v3982_v59  ;;  %1412 = vmatprep.subr.bf16.mxu1 %v3989_v0  ;;  %4883 = vst [vmem:[#allocation46_spill] sm:$0xff] %v4029_v60  ;;  %v4034_v59 = vld [vmem:[%s4765_s2 + $0x32c] ss:$16 sps:$4 sm:$0xff]   ;;  %v4043_v0 = vld [vmem:[%s4765_s2 + $0x320] ss:$16 sps:$4 sm:$0xff]  }
  0x82   : > { %4884 = vst [vmem:[#allocation47_spill] sm:$0xff] %v4034_v59 }
  0x84   : > { %1291 = vmatpush1.bf16.msra.mxu0 %v3995_v49  ;;  %1413 = vmatpush1.bf16.msra.mxu1 %v4000_v57  ;;  %v4053_v49 = vld [vmem:[%s4765_s2 + $0x344] ss:$16 sps:$4 sm:$0xff]   ;;  %v4072_v57 = vld [vmem:[%s4765_s2 + $0x348] ss:$16 sps:$4 sm:$0xff]  }
  0x85   : > { %1292 = vmatprep.subr.bf16.mxu0 %v4007_v62  ;;  %1414 = vmatprep.subr.bf16.mxu1 %v4012_v58  ;;  %4886 = vst [vmem:[#allocation49_spill] sm:$0xff] %v4053_v49  ;;  %v4058_v62 = vld [vmem:[%s4765_s2 + $0x34c] ss:$16 sps:$4 sm:$0xff]   ;;  %v4067_v58 = vld [vmem:[%s4765_s2 + $0x340] ss:$16 sps:$4 sm:$0xff]   ;;  %4889 = vst [vmem:[#allocation52_spill] sm:$0xff] %v4072_v57 }
  0x86   : > { %4887 = vst [vmem:[#allocation50_spill] sm:$0xff] %v4058_v62  ;;  %4888 = vst [vmem:[#allocation51_spill] sm:$0xff] %v4067_v58 }
  0x88   : > { %1293 = vmatpush1.bf16.msra.mxu0 %v4019_v55  ;;  %1415 = vmatpush1.bf16.msra.mxu1 %v4024_v63 }
  0x89   : > { %1294 = vmatprep.subr.bf16.mxu0 %v4029_v60  ;;  %1416 = vmatprep.subr.bf16.mxu1 %v4034_v59  ;;  %v4081_v59 = vld [vmem:[%s4765_s2 + $0x364] ss:$16 sps:$4 sm:$0xff]   ;;  %v4086_v60 = vld [vmem:[%s4765_s2 + $0x36c] ss:$16 sps:$4 sm:$0xff]  }
  0x8a   : > { %4890 = vst [vmem:[#allocation53_spill] sm:$0xff] %v4081_v59  ;;  %4891 = vst [vmem:[#allocation54_spill] sm:$0xff] %v4086_v60 }
  0x8c   : > { %1295 = vmatpush1.bf16.msra.mxu0 %v4043_v0  ;;  %1417 = vmatpush1.bf16.msra.mxu1 %v4048_v56  ;;  %v3159_v56 = vld [vmem:[%s3412_s25 + $0x8] ss:$16 sps:$4 sm:$0xff]  }
  0x8d   : > { %1296 = vmatprep.subr.bf16.mxu0 %v4053_v49  ;;  %1418 = vmatprep.subr.bf16.mxu1 %v4058_v62  ;;  %v4093_v49 = vld [vmem:[%s4765_s2 + $0x360] ss:$16 sps:$4 sm:$0xff]   ;;  %v4098_v62 = vld [vmem:[%s4765_s2 + $0x368] ss:$16 sps:$4 sm:$0xff]  }
  0x8e   : > { %4892 = vst [vmem:[#allocation55_spill] sm:$0xff] %v4093_v49  ;;  %4893 = vst [vmem:[#allocation56_spill] sm:$0xff] %v4098_v62 }
  0x90   : > { %1297 = vmatpush1.bf16.msra.mxu0 %v4067_v58  ;;  %1419 = vmatpush1.bf16.msra.mxu1 %v4072_v57  ;;  %v4105_v58 = vld [vmem:[%s4765_s2 + $0x384] ss:$16 sps:$4 sm:$0xff]   ;;  %v4110_v57 = vld [vmem:[%s4765_s2 + $0x38c] ss:$16 sps:$4 sm:$0xff]  }
  0x91   : > { %1298 = vmatprep.subr.bf16.mxu0 %v4081_v59  ;;  %1420 = vmatprep.subr.bf16.mxu1 %v4086_v60  ;;  %4894 = vst [vmem:[#allocation57_spill] sm:$0xff] %v4105_v58  ;;  %4895 = vst [vmem:[#allocation58_spill] sm:$0xff] %v4110_v57  ;;  %v4117_v59 = vld [vmem:[%s4765_s2 + $0x380] ss:$16 sps:$4 sm:$0xff]   ;;  %v4122_v60 = vld [vmem:[%s4765_s2 + $0x388] ss:$16 sps:$4 sm:$0xff]  }
  0x92   : > { %4896 = vst [vmem:[#allocation59_spill] sm:$0xff] %v4117_v59  ;;  %4897 = vst [vmem:[#allocation60_spill] sm:$0xff] %v4122_v60 }
  0x94   : > { %1299 = vmatpush1.bf16.msra.mxu0 %v4093_v49  ;;  %1421 = vmatpush1.bf16.msra.mxu1 %v4098_v62  ;;  %v4129_v49 = vld [vmem:[%s4765_s2 + $0x3a4] ss:$16 sps:$4 sm:$0xff]   ;;  %v4134_v62 = vld [vmem:[%s4765_s2 + $0x3ac] ss:$16 sps:$4 sm:$0xff]  }
  0x95   : > { %1300 = vmatprep.subr.bf16.mxu0 %v4105_v58  ;;  %1422 = vmatprep.subr.bf16.mxu1 %v4110_v57  ;;  %4898 = vst [vmem:[#allocation61_spill] sm:$0xff] %v4129_v49  ;;  %4899 = vst [vmem:[#allocation62_spill] sm:$0xff] %v4134_v62  ;;  %v4141_v58 = vld [vmem:[%s4765_s2 + $0x3a0] ss:$16 sps:$4 sm:$0xff]   ;;  %v4146_v57 = vld [vmem:[%s4765_s2 + $0x3a8] ss:$16 sps:$4 sm:$0xff]  }
  0x96   : > { %4900 = vst [vmem:[#allocation63_spill] sm:$0xff] %v4141_v58  ;;  %4901 = vst [vmem:[#allocation64_spill] sm:$0xff] %v4146_v57 }
  0x98   : > { %1301 = vmatpush1.bf16.msra.mxu0 %v4117_v59  ;;  %1423 = vmatpush1.bf16.msra.mxu1 %v4122_v60  ;;  %v4153_v59 = vld [vmem:[%s4765_s2 + $0x3c4] ss:$16 sps:$4 sm:$0xff]   ;;  %v4158_v60 = vld [vmem:[%s4765_s2 + $0x3cc] ss:$16 sps:$4 sm:$0xff]  }
  0x99   : > { %1302 = vmatprep.subr.bf16.mxu0 %v4129_v49  ;;  %1424 = vmatprep.subr.bf16.mxu1 %v4134_v62  ;;  %4902 = vst [vmem:[#allocation65_spill] sm:$0xff] %v4153_v59  ;;  %4903 = vst [vmem:[#allocation66_spill] sm:$0xff] %v4158_v60  ;;  %v4165_v49 = vld [vmem:[%s4765_s2 + $0x3c0] ss:$16 sps:$4 sm:$0xff]   ;;  %v4170_v62 = vld [vmem:[%s4765_s2 + $0x3c8] ss:$16 sps:$4 sm:$0xff]  }
  0x9a   : > { %4904 = vst [vmem:[#allocation67_spill] sm:$0xff] %v4170_v62 }
  0x9c   : > { %1303 = vmatpush1.bf16.msra.mxu0 %v4141_v58  ;;  %1425 = vmatpush1.bf16.msra.mxu1 %v4146_v57  ;;  %v4177_v58 = vld [vmem:[%s4765_s2 + $0x3e4] ss:$16 sps:$4 sm:$0xff]   ;;  %v4182_v57 = vld [vmem:[%s4765_s2 + $0x3ec] ss:$16 sps:$4 sm:$0xff]  }
  0x9d   : > { %1304 = vmatprep.subr.bf16.mxu0 %v4153_v59  ;;  %1426 = vmatprep.subr.bf16.mxu1 %v4158_v60  ;;  %4905 = vst [vmem:[#allocation68_spill] sm:$0xff] %v4182_v57  ;;  %v4189_v59 = vld [vmem:[%s4765_s2 + $0x3e0] ss:$16 sps:$4 sm:$0xff]   ;;  %v4194_v60 = vld [vmem:[%s4765_s2 + $0x3e8] ss:$16 sps:$4 sm:$0xff]  }
  0x9e   : > { %4906 = vst [vmem:[#allocation69_spill] sm:$0xff] %v4189_v59 }
  0xa0   : > { %1305 = vmatpush1.bf16.msra.mxu0 %v4165_v49  ;;  %1427 = vmatpush1.bf16.msra.mxu1 %v4170_v62  ;;  %v3162_v62 = vld [vmem:[%s3412_s25 + $0x2c] ss:$16 sps:$4 sm:$0xff]  }
  0xa1   : > { %1306 = vmatprep.subr.bf16.mxu0 %v4177_v58  ;;  %1428 = vmatprep.subr.bf16.mxu1 %v4182_v57  ;;  %v520_v57 = vld [vmem:[%s3412_s25 + $0x48] sm:$0xff] }
  0xa4   : > { %1307 = vmatpush1.bf16.msra.mxu0 %v4189_v59  ;;  %1429 = vmatpush1.bf16.msra.mxu1 %v4194_v60  ;;  %v3164_v59 = vld [vmem:[%s3412_s25 + $0x28] ss:$16 sps:$4 sm:$0xff]  }
  0xa5   : > { %1523 = vmatprep.subr.bf16.mxu0 %v3429_v1  ;;  %1645 = vmatprep.subr.bf16.mxu1 %v3434_v2  ;;  %v2633_v1 = vcombine.high %v520_v57, %v520_v57  ;;  %v2632_v2 = vcombine.low %v520_v57, %v520_v57  ;;  %v4951_v57 = vld [vmem:[#allocation46_spill] sm:$0xff] }
  0xa7   : > { %1309 = vmatmul.mubr.bf16.vlgmr.msra.gmra.mrb[0].mxu0 %v3159_v56  ;;  %1431 = vmatmul.mubr.bf16.vlgmr.msra.gmra.mrb[0].mxu1 %v3159_v56  ;;  %v4953_v56 = vld [vmem:[#allocation48_spill] sm:$0xff] }
  0xa8   : > { %1524 = vmatpush1.bf16.msra.mxu0 %v3440_v3  ;;  %1646 = vmatpush1.bf16.msra.mxu1 %v3445_v4  ;;  %v3169_v3 = vld [vmem:[%s3417_s13 + $0x4] ss:$16 sps:$4 sm:$0xff]  }
  0xa9   : > { %1525 = vmatprep.subr.bf16.mxu0 %v3451_v5  ;;  %1647 = vmatprep.subr.bf16.mxu1 %v3458_v6  ;;  %v4907_v4 = vld [vmem:[#allocation2_spill] sm:$0xff]  ;;  %v4908_v5 = vld [vmem:[#allocation3_spill] sm:$0xff]  ;;  %v4909_v6 = vld [vmem:[#allocation4_spill] sm:$0xff] }
  0xaa   : > { %1318 = vmatprep.mubr.bf16.mxu0 %v3162_v62  ;;  %1440 = vmatprep.mubr.bf16.mxu1 %v3162_v62  ;;  %v4954_v62 = vld [vmem:[#allocation49_spill] sm:$0xff] }
  0xac   : > { %1526 = vmatpush1.bf16.msra.mxu0 %v3463_v7  ;;  %1648 = vmatpush1.bf16.msra.mxu1 %v3469_v8  ;;  %v4910_v7 = vld [vmem:[#allocation5_spill] sm:$0xff]  ;;  %v4911_v8 = vld [vmem:[#allocation6_spill] sm:$0xff] }
  0xad   : > { %1527 = vmatprep.subr.bf16.mxu0 %v3475_v9  ;;  %1649 = vmatprep.subr.bf16.mxu1 %v3480_v10  ;;  %v4912_v9 = vld [vmem:[#allocation7_spill] sm:$0xff]  ;;  %v4913_v10 = vld [vmem:[#allocation8_spill] sm:$0xff] }
  0xaf   : > { %1319 = vmatmul.mubr.bf16.gmra.mrb[4].mxu0 %v3164_v59  ;;  %1441 = vmatmul.mubr.bf16.gmra.mrb[4].mxu1 %v3164_v59  ;;  %v4952_v59 = vld [vmem:[#allocation47_spill] sm:$0xff] }
  0xb0   : > { %1528 = vmatpush1.bf16.msra.mxu0 %v3485_v11  ;;  %1650 = vmatpush1.bf16.msra.mxu1 %v3490_v12  ;;  %v4914_v11 = vld [vmem:[#allocation9_spill] sm:$0xff]  ;;  %v4915_v12 = vld [vmem:[#allocation10_spill] sm:$0xff] }
  0xb1   : > { %1529 = vmatprep.subr.bf16.mxu0 %v3497_v13  ;;  %1651 = vmatprep.subr.bf16.mxu1 %v3504_v14  ;;  %v3167_v13 = vld [vmem:[%s3417_s13] ss:$16 sps:$4 sm:$0xff]   ;;  %v4916_v14 = vld [vmem:[#allocation11_spill] sm:$0xff] }
  0xb2   : > { %1328 = vmatprep.mubr.bf16.mxu0 %v2633_v1  ;;  %1450 = vmatprep.mubr.bf16.mxu1 %v2633_v1  ;;  %v4955_v1 = vld [vmem:[#allocation50_spill] sm:$0xff] }
  0xb4   : > { %1530 = vmatpush1.bf16.msra.mxu0 %v3509_v15  ;;  %1652 = vmatpush1.bf16.msra.mxu1 %v3516_v16  ;;  %v4917_v15 = vld [vmem:[#allocation12_spill] sm:$0xff]  ;;  %v4918_v16 = vld [vmem:[#allocation13_spill] sm:$0xff] }
  0xb5   : > { %1531 = vmatprep.subr.bf16.mxu0 %v3521_v17  ;;  %1653 = vmatprep.subr.bf16.mxu1 %v3528_v18  ;;  %v4919_v17 = vld [vmem:[#allocation14_spill] sm:$0xff] }
  0xb6   : > { %v3170_v18 = vld [vmem:[%s3417_s13 + $0x24] ss:$16 sps:$4 sm:$0xff]  }
  0xb7   : > { %1329 = vmatmul.mubr.bf16.gmra.mrb[8].mxu0 %v2632_v2  ;;  %1451 = vmatmul.mubr.bf16.gmra.mrb[8].mxu1 %v2632_v2  ;;  %v4956_v2 = vld [vmem:[#allocation51_spill] sm:$0xff] }
  0xb8   : > { %1532 = vmatpush1.bf16.msra.mxu0 %v3533_v19  ;;  %1654 = vmatpush1.bf16.msra.mxu1 %v3538_v20  ;;  %v4920_v19 = vld [vmem:[#allocation15_spill] sm:$0xff]  ;;  %v4921_v20 = vld [vmem:[#allocation16_spill] sm:$0xff] }
  0xb9   : > { %1533 = vmatprep.subr.bf16.mxu0 %v3545_v21  ;;  %1655 = vmatprep.subr.bf16.mxu1 %v3552_v22  ;;  %v4922_v21 = vld [vmem:[#allocation17_spill] sm:$0xff]  ;;  %v4923_v22 = vld [vmem:[#allocation18_spill] sm:$0xff] }
  0xba   : > { %1555 = vmatprep.mubr.bf16.mxu0 %v3169_v3  ;;  %1677 = vmatprep.mubr.bf16.mxu1 %v3169_v3  ;;  %v4957_v3 = vld [vmem:[#allocation52_spill] sm:$0xff] }
  0xbc   : > { %1534 = vmatpush1.bf16.msra.mxu0 %v3557_v23  ;;  %1656 = vmatpush1.bf16.msra.mxu1 %v3564_v24  ;;  %v3172_v23 = vld [vmem:[%s3417_s13 + $0x20] ss:$16 sps:$4 sm:$0xff]  }
  0xbd   : > { %1535 = vmatprep.subr.bf16.mxu0 %v3569_v25  ;;  %1657 = vmatprep.subr.bf16.mxu1 %v3576_v26  ;;  %v1467_v24 = vld [vmem:[%s3417_s13 + $0x40] sm:$0xff]  ;;  %v4924_v25 = vld [vmem:[#allocation19_spill] sm:$0xff]  ;;  %v4925_v26 = vld [vmem:[#allocation20_spill] sm:$0xff] }
  0xc0   : > { %1536 = vmatpush1.bf16.msra.mxu0 %v3581_v27  ;;  %1658 = vmatpush1.bf16.msra.mxu1 %v3586_v28  ;;  %v4926_v27 = vld [vmem:[#allocation21_spill] sm:$0xff]  ;;  %v4927_v28 = vld [vmem:[#allocation22_spill] sm:$0xff] }
  0xc1   : > { %1537 = vmatprep.subr.bf16.mxu0 %v3593_v29  ;;  %1659 = vmatprep.subr.bf16.mxu1 %v3600_v30  ;;  %v2771_v29 = vcombine.high %v1467_v24, %v1467_v24  ;;  %v4928_v30 = vld [vmem:[#allocation23_spill] sm:$0xff] }
  0xc4   : > { %1538 = vmatpush1.bf16.msra.mxu0 %v3605_v31  ;;  %1660 = vmatpush1.bf16.msra.mxu1 %v3612_v32  ;;  %v4929_v31 = vld [vmem:[#allocation24_spill] sm:$0xff]  ;;  %v4930_v32 = vld [vmem:[#allocation25_spill] sm:$0xff] }
  0xc5   : > { %1539 = vmatprep.subr.bf16.mxu0 %v3617_v33  ;;  %1661 = vmatprep.subr.bf16.mxu1 %v3624_v34  ;;  %v2770_v33 = vcombine.low %v1467_v24, %v1467_v24  ;;  %v4931_v34 = vld [vmem:[#allocation26_spill] sm:$0xff] }
  0xc8   : > { %1540 = vmatpush1.bf16.msra.mxu0 %v3629_v35  ;;  %1662 = vmatpush1.bf16.msra.mxu1 %v3634_v36  ;;  %v4932_v35 = vld [vmem:[#allocation27_spill] sm:$0xff]  ;;  %v4933_v36 = vld [vmem:[#allocation28_spill] sm:$0xff] }
  0xc9   : > { %1541 = vmatprep.subr.bf16.mxu0 %v3641_v37  ;;  %1663 = vmatprep.subr.bf16.mxu1 %v3648_v38  ;;  %v4934_v37 = vld [vmem:[#allocation29_spill] sm:$0xff] }
  0xca   : > { %v3177_v38 = vld [vmem:[%s3417_s13 + $0xc] ss:$16 sps:$4 sm:$0xff]  }
  0xcc   : > { %1542 = vmatpush1.bf16.msra.mxu0 %v3653_v39  ;;  %1664 = vmatpush1.bf16.msra.mxu1 %v3660_v40  ;;  %v4935_v39 = vld [vmem:[#allocation30_spill] sm:$0xff]  ;;  %v4936_v40 = vld [vmem:[#allocation31_spill] sm:$0xff] }
  0xcd   : > { %1543 = vmatprep.subr.bf16.mxu0 %v3665_v41  ;;  %1665 = vmatprep.subr.bf16.mxu1 %v3672_v42  ;;  %v4937_v41 = vld [vmem:[#allocation32_spill] sm:$0xff]  ;;  %v4938_v42 = vld [vmem:[#allocation33_spill] sm:$0xff] }
  0xd0   : > { %1544 = vmatpush1.bf16.msra.mxu0 %v3677_v43  ;;  %1666 = vmatpush1.bf16.msra.mxu1 %v3682_v44  ;;  %v4939_v43 = vld [vmem:[#allocation34_spill] sm:$0xff]  ;;  %v4940_v44 = vld [vmem:[#allocation35_spill] sm:$0xff] }
  0xd1   : > { %1545 = vmatprep.subr.bf16.mxu0 %v3689_v45  ;;  %1667 = vmatprep.subr.bf16.mxu1 %v3696_v46  ;;  %v4941_v45 = vld [vmem:[#allocation36_spill] sm:$0xff]  ;;  %v4942_v46 = vld [vmem:[#allocation37_spill] sm:$0xff] }
  0xd4   : > { %1546 = vmatpush1.bf16.msra.mxu0 %v3701_v47  ;;  %1668 = vmatpush1.bf16.msra.mxu1 %v3706_v48  ;;  %v4943_v47 = vld [vmem:[#allocation38_spill] sm:$0xff]  ;;  %v4944_v48 = vld [vmem:[#allocation39_spill] sm:$0xff] }
  0xd5   : > { %1547 = vmatprep.subr.bf16.mxu0 %v3714_v50  ;;  %1669 = vmatprep.subr.bf16.mxu1 %v3721_v51  ;;  %v4945_v50 = vld [vmem:[#allocation40_spill] sm:$0xff]  ;;  %v4946_v51 = vld [vmem:[#allocation41_spill] sm:$0xff] }
  0xd8   : > { %1548 = vmatpush1.bf16.msra.mxu0 %v3726_v52  ;;  %1670 = vmatpush1.bf16.msra.mxu1 %v3731_v53  ;;  %v4947_v52 = vld [vmem:[#allocation42_spill] sm:$0xff]  ;;  %v4948_v53 = vld [vmem:[#allocation43_spill] sm:$0xff] }
  0xd9   : > { %1549 = vmatprep.subr.bf16.mxu0 %v3738_v54  ;;  %1671 = vmatprep.subr.bf16.mxu1 %v4907_v4  ;;  %v4949_v54 = vld [vmem:[#allocation44_spill] sm:$0xff]  ;;  %v4958_v4 = vld [vmem:[#allocation53_spill] sm:$0xff] }
  0xdc   : > { %1550 = vmatpush1.bf16.msra.mxu0 %v4908_v5  ;;  %1672 = vmatpush1.bf16.msra.mxu1 %v4909_v6  ;;  %v4961_v5 = vld [vmem:[#allocation56_spill] sm:$0xff]  ;;  %v4962_v6 = vld [vmem:[#allocation57_spill] sm:$0xff] }
  0xdd   : > { %1551 = vmatprep.subr.bf16.mxu0 %v4910_v7  ;;  %1673 = vmatprep.subr.bf16.mxu1 %v4911_v8  ;;  %v4964_v7 = vld [vmem:[#allocation59_spill] sm:$0xff]  ;;  %v4965_v8 = vld [vmem:[#allocation60_spill] sm:$0xff] }
  0xe0   : > { %1552 = vmatpush1.bf16.msra.mxu0 %v4912_v9  ;;  %1674 = vmatpush1.bf16.msra.mxu1 %v4913_v10  ;;  %v4966_v9 = vld [vmem:[#allocation61_spill] sm:$0xff]  ;;  %v4967_v10 = vld [vmem:[#allocation62_spill] sm:$0xff] }
  0xe1   : > { %1553 = vmatprep.subr.bf16.mxu0 %v4914_v11  ;;  %1675 = vmatprep.subr.bf16.mxu1 %v4915_v12  ;;  %v4968_v11 = vld [vmem:[#allocation63_spill] sm:$0xff]  ;;  %v4969_v12 = vld [vmem:[#allocation64_spill] sm:$0xff] }
  0xe4   : > { %1554 = vmatpush1.bf16.msra.mxu0 %v4916_v14  ;;  %1676 = vmatpush1.bf16.msra.mxu1 %v4917_v15  ;;  %v4971_v14 = vld [vmem:[#allocation66_spill] sm:$0xff]  ;;  %v4972_v15 = vld [vmem:[#allocation67_spill] sm:$0xff] }
  0xe5   : > { %1584 = vmatprep.subr.bf16.mxu0 %v4918_v16  ;;  %1706 = vmatprep.subr.bf16.mxu1 %v4919_v17  ;;  %v4973_v16 = vld [vmem:[#allocation68_spill] sm:$0xff]  ;;  %v3183_v17 = vld [vmem:[%s4766_s3 + $0x40] sm:$0xff]  }
  0xe7   : > { %1556 = vmatmul.mubr.bf16.vlgmr.msra.gmra.mrb[12].mxu0 %v3167_v13  ;;  %1678 = vmatmul.mubr.bf16.vlgmr.msra.gmra.mrb[12].mxu1 %v3167_v13  ;;  %v4970_v13 = vld [vmem:[#allocation65_spill] sm:$0xff] }
  0xe8   : > { %1585 = vmatpush1.bf16.msra.mxu0 %v4920_v19  ;;  %1707 = vmatpush1.bf16.msra.mxu1 %v4921_v20  ;;  %v4974_v19 = vld [vmem:[#allocation69_spill] sm:$0xff] }
  0xe9   : > { %1586 = vmatprep.subr.bf16.mxu0 %v4922_v21  ;;  %1708 = vmatprep.subr.bf16.mxu1 %v4923_v22  ;;  %v3178_v20 = vld [vmem:[%s3417_s13 + $0x2c] ss:$16 sps:$4 sm:$0xff]   ;;  %v3187_v22 = vld [vmem:[%s4766_s3 + $0x50] sm:$0xff]  }
  0xea   : > { %1565 = vmatprep.mubr.bf16.mxu0 %v3170_v18  ;;  %1687 = vmatprep.mubr.bf16.mxu1 %v3170_v18  ;;  %v3175_v18 = vld [vmem:[%s3417_s13 + $0x8] ss:$16 sps:$4 sm:$0xff]  }
  0xeb   : > { %v1468_v21 = vld [vmem:[%s3417_s13 + $0x48] sm:$0xff] }
  0xec   : > { %1587 = vmatpush1.bf16.msra.mxu0 %v4924_v25  ;;  %1709 = vmatpush1.bf16.msra.mxu1 %v4925_v26  ;;  %v2773_v24 = vcombine.high %v1468_v21, %v1468_v21  ;;  %v3188_v25 = vld [vmem:[%s4766_s3 + $0x10] sm:$0xff]   ;;  %v3189_v26 = vld [vmem:[%s4766_s3 + $0x58] sm:$0xff]  }
  0xed   : > { %1588 = vmatprep.subr.bf16.mxu0 %v4926_v27  ;;  %1710 = vmatprep.subr.bf16.mxu1 %v4927_v28  ;;  %v3190_v27 = vld [vmem:[%s4766_s3 + $0x18] sm:$0xff]   ;;  %v3191_v28 = vld [vmem:[%s4766_s3 + $0x60] sm:$0xff]  }
  0xef   : > { %1566 = vmatmul.mubr.bf16.gmra.mrb[16].mxu0 %v3172_v23  ;;  %1688 = vmatmul.mubr.bf16.gmra.mrb[16].mxu1 %v3172_v23  ;;  %v3180_v23 = vld [vmem:[%s3417_s13 + $0x28] ss:$16 sps:$4 sm:$0xff]  }
  0xf0   : > { %1589 = vmatpush1.bf16.msra.mxu0 %v4928_v30  ;;  %1711 = vmatpush1.bf16.msra.mxu1 %v3876_v61  ;;  %v4950_v61 = vld [vmem:[#allocation45_spill] sm:$0xff]  ;;  %v3192_v30 = vld [vmem:[%s4766_s3 + $0x20] sm:$0xff]  }
  0xf1   : > { %1590 = vmatprep.subr.bf16.mxu0 %v4929_v31  ;;  %1712 = vmatprep.subr.bf16.mxu1 %v4930_v32  ;;  %v3193_v31 = vld [vmem:[%s4766_s3 + $0x68] sm:$0xff]  }
  0xf2   : > { %1575 = vmatprep.mubr.bf16.mxu0 %v2771_v29  ;;  %1697 = vmatprep.mubr.bf16.mxu1 %v2771_v29  ;;  %v2772_v29 = vcombine.low %v1468_v21, %v1468_v21  ;;  %v3194_v32 = vld [vmem:[%s4766_s3 + $0x28] sm:$0xff]  }
  0xf4   : > { %1591 = vmatpush1.bf16.msra.mxu0 %v4931_v34  ;;  %1713 = vmatpush1.bf16.msra.mxu1 %v4932_v35  ;;  %v3196_v34 = vld [vmem:[%s4766_s3 + $0x30] sm:$0xff]   ;;  %v3197_v35 = vld [vmem:[%s4766_s3 + $0x78] sm:$0xff]  }
  0xf5   : > { %1592 = vmatprep.subr.bf16.mxu0 %v4933_v36  ;;  %1714 = vmatprep.subr.bf16.mxu1 %v4934_v37  ;;  %v3198_v36 = vld [vmem:[%s4766_s3 + $0x38] sm:$0xff]  }
  0xf7   : > { %1576 = vmatmul.mubr.bf16.gmra.mrb[20].mxu0 %v2770_v33  ;;  %1698 = vmatmul.mubr.bf16.gmra.mrb[20].mxu1 %v2770_v33  ;;  %v3195_v33 = vld [vmem:[%s4766_s3 + $0x70] sm:$0xff]  }
  0xf8   : > { %1593 = vmatpush1.bf16.msra.mxu0 %v4935_v39  ;;  %1715 = vmatpush1.bf16.msra.mxu1 %v4936_v40 }
  0xf9   : > { %1594 = vmatprep.subr.bf16.mxu0 %v4937_v41  ;;  %1716 = vmatprep.subr.bf16.mxu1 %v4938_v42 }
  0xfa   : > { %1616 = vmatprep.mubr.bf16.mxu0 %v3177_v38  ;;  %1738 = vmatprep.mubr.bf16.mxu1 %v3177_v38 }
  0xfc   : > { %1595 = vmatpush1.bf16.msra.mxu0 %v4939_v43  ;;  %1717 = vmatpush1.bf16.msra.mxu1 %v4940_v44 }
  0xfd   : > { %1596 = vmatprep.subr.bf16.mxu0 %v4941_v45  ;;  %1718 = vmatprep.subr.bf16.mxu1 %v4942_v46 }
 0x100   : > { %1597 = vmatpush1.bf16.msra.mxu0 %v4943_v47  ;;  %1719 = vmatpush1.bf16.msra.mxu1 %v4944_v48 }
 0x101   : > { %1598 = vmatprep.subr.bf16.mxu0 %v4945_v50  ;;  %1720 = vmatprep.subr.bf16.mxu1 %v4946_v51 }
 0x104   : > { %1599 = vmatpush1.bf16.msra.mxu0 %v4947_v52  ;;  %1721 = vmatpush1.bf16.msra.mxu1 %v4948_v53 }
 0x105   : > { %1600 = vmatprep.subr.bf16.mxu0 %v4949_v54  ;;  %1722 = vmatprep.subr.bf16.mxu1 %v4950_v61 }
 0x108   : > { %1601 = vmatpush1.bf16.msra.mxu0 %v4019_v55  ;;  %1723 = vmatpush1.bf16.msra.mxu1 %v4024_v63  ;;  %v4959_v55 = vld [vmem:[#allocation54_spill] sm:$0xff]  ;;  %v4960_v63 = vld [vmem:[#allocation55_spill] sm:$0xff] }
 0x109   : > { %1602 = vmatprep.subr.bf16.mxu0 %v4951_v57  ;;  %1724 = vmatprep.subr.bf16.mxu1 %v4952_v59 }
 0x10c   : > { %1603 = vmatpush1.bf16.msra.mxu0 %v4043_v0  ;;  %1725 = vmatpush1.bf16.msra.mxu1 %v4953_v56  ;;  %v4963_v0 = vld [vmem:[#allocation58_spill] sm:$0xff] }
 0x10d   : > { %1604 = vmatprep.subr.bf16.mxu0 %v4954_v62  ;;  %1726 = vmatprep.subr.bf16.mxu1 %v4955_v1 }
 0x110   : > { %1605 = vmatpush1.bf16.msra.mxu0 %v4956_v2  ;;  %1727 = vmatpush1.bf16.msra.mxu1 %v4957_v3 }
 0x111   : > { %1606 = vmatprep.subr.bf16.mxu0 %v4958_v4  ;;  %1728 = vmatprep.subr.bf16.mxu1 %v4959_v55 }
 0x114   : > { %1607 = vmatpush1.bf16.msra.mxu0 %v4960_v63  ;;  %1729 = vmatpush1.bf16.msra.mxu1 %v4961_v5 }
 0x115   : > { %1608 = vmatprep.subr.bf16.mxu0 %v4962_v6  ;;  %1730 = vmatprep.subr.bf16.mxu1 %v4963_v0 }
 0x118   : > { %1609 = vmatpush1.bf16.msra.mxu0 %v4964_v7  ;;  %1731 = vmatpush1.bf16.msra.mxu1 %v4965_v8 }
 0x119   : > { %1610 = vmatprep.subr.bf16.mxu0 %v4966_v9  ;;  %1732 = vmatprep.subr.bf16.mxu1 %v4967_v10 }
 0x11c   : > { %1611 = vmatpush1.bf16.msra.mxu0 %v4968_v11  ;;  %1733 = vmatpush1.bf16.msra.mxu1 %v4969_v12 }
 0x11d   : > { %1612 = vmatprep.subr.bf16.mxu0 %v4970_v13  ;;  %1734 = vmatprep.subr.bf16.mxu1 %v4971_v14 }
 0x120   : > { %1613 = vmatpush1.bf16.msra.mxu0 %v4165_v49  ;;  %1735 = vmatpush1.bf16.msra.mxu1 %v4972_v15  ;;  %v3184_v49 = vld [vmem:[%s4766_s3] sm:$0xff]  }
 0x121   : > { %1614 = vmatprep.subr.bf16.mxu0 %v4177_v58  ;;  %1736 = vmatprep.subr.bf16.mxu1 %v4973_v16  ;;  %v3185_v58 = vld [vmem:[%s4766_s3 + $0x48] sm:$0xff]  }
 0x124   : > { %1615 = vmatpush1.bf16.msra.mxu0 %v4974_v19  ;;  %1737 = vmatpush1.bf16.msra.mxu1 %v4194_v60  ;;  %v3186_v60 = vld [vmem:[%s4766_s3 + $0x8] sm:$0xff]  }
 0x125   : > { %2801 = vmatprep.subr.bf16.mxu0 %v3183_v17  ;;  %2835 = vmatprep.subr.bf16.mxu1 %v3183_v17 }
 0x127   : > { %1617 = vmatmul.mubr.bf16.vlgmr.msra.gmra.mrb[12].mxu0 %v3175_v18  ;;  %1739 = vmatmul.mubr.bf16.vlgmr.msra.gmra.mrb[12].mxu1 %v3175_v18 }
 0x128   : > { %1626 = vmatprep.mubr.bf16.mxu0 %v3178_v20  ;;  %1748 = vmatprep.mubr.bf16.mxu1 %v3178_v20 }
 0x129   : > { %2802 = vmatpush3.bf16.msra.mxu0 %v3184_v49  ;;  %2836 = vmatpush3.bf16.msra.mxu1 %v3184_v49 }
 0x12a   : > { %2803 = vmatprep.subr.bf16.mxu0 %v3185_v58  ;;  %2837 = vmatprep.subr.bf16.mxu1 %v3185_v58 }
 0x12d   : > { %2804 = vmatpush3.bf16.msra.mxu0 %v3186_v60  ;;  %2838 = vmatpush3.bf16.msra.mxu1 %v3186_v60 }
 0x12e   : > { %2805 = vmatprep.subr.bf16.mxu0 %v3187_v22  ;;  %2839 = vmatprep.subr.bf16.mxu1 %v3187_v22 }
 0x12f   : > { %1627 = vmatmul.mubr.bf16.gmra.mrb[16].mxu0 %v3180_v23  ;;  %1749 = vmatmul.mubr.bf16.gmra.mrb[16].mxu1 %v3180_v23 }
 0x130   : > { %1636 = vmatprep.mubr.bf16.mxu0 %v2773_v24  ;;  %1758 = vmatprep.mubr.bf16.mxu1 %v2773_v24 }
 0x131   : > { %2806 = vmatpush3.bf16.msra.mxu0 %v3188_v25  ;;  %2840 = vmatpush3.bf16.msra.mxu1 %v3188_v25 }
 0x132   : > { %2807 = vmatprep.subr.bf16.mxu0 %v3189_v26  ;;  %2841 = vmatprep.subr.bf16.mxu1 %v3189_v26 }
 0x135   : > { %2808 = vmatpush3.bf16.msra.mxu0 %v3190_v27  ;;  %2842 = vmatpush3.bf16.msra.mxu1 %v3190_v27 }
 0x136   : > { %2809 = vmatprep.subr.bf16.mxu0 %v3191_v28  ;;  %2843 = vmatprep.subr.bf16.mxu1 %v3191_v28 }
 0x137   : > { %1637 = vmatmul.mubr.bf16.gmra.mrb[20].mxu0 %v2772_v29  ;;  %1759 = vmatmul.mubr.bf16.gmra.mrb[20].mxu1 %v2772_v29 }
 0x139   : > { %2810 = vmatpush3.bf16.msra.mxu0 %v3192_v30  ;;  %2844 = vmatpush3.bf16.msra.mxu1 %v3192_v30 }
 0x13a   : > { %2811 = vmatprep.subr.bf16.mxu0 %v3193_v31  ;;  %2845 = vmatprep.subr.bf16.mxu1 %v3193_v31 }
 0x13d   : > { %2812 = vmatpush3.bf16.msra.mxu0 %v3194_v32  ;;  %2846 = vmatpush3.bf16.msra.mxu1 %v3194_v32 }
 0x13e   : > { %2813 = vmatprep.subr.bf16.mxu0 %v3195_v33  ;;  %2847 = vmatprep.subr.bf16.mxu1 %v3195_v33 }
 0x141   : > { %2814 = vmatpush3.bf16.msra.mxu0 %v3196_v34  ;;  %2848 = vmatpush3.bf16.msra.mxu1 %v3196_v34 }
 0x142   : > { %2815 = vmatprep.subr.bf16.mxu0 %v3197_v35  ;;  %2849 = vmatprep.subr.bf16.mxu1 %v3197_v35 }
 0x145   : > { %2816 = vmatpush3.bf16.msra.mxu0 %v3198_v36  ;;  %2850 = vmatpush3.bf16.msra.mxu1 %v3198_v36 }
 0x17a   : > { %v1310_v37 = vpop.f32.mrb[0].mxu0  ;;  %v1432_v38 = vpop.f32.mrb[0].mxu1 }
 0x17b   : > { %v1799_v39 = vmul.f32 %v1310_v37, %v1310_v37  ;;  %v1809_v40 = vmul.f32 %v1432_v38, %v1432_v38  ;;  %v1312_v41 = vpop.f32.mrb[1].mxu0  ;;  %v1434_v42 = vpop.f32.mrb[1].mxu1 }
 0x17c   : > { %v1800_v43 = vmul.f32 %v1312_v41, %v1312_v41  ;;  %v1810_v44 = vmul.f32 %v1434_v42, %v1434_v42  ;;  %v1314_v45 = vpop.f32.mrb[2].mxu0  ;;  %v1436_v46 = vpop.f32.mrb[2].mxu1 }
 0x17d   : > { %v1819_v47 = vadd.f32 %v1809_v40, %v1799_v39  ;;  %v1801_v48 = vmul.f32 %v1314_v45, %v1314_v45  ;;  %v1811_v50 = vmul.f32 %v1436_v46, %v1436_v46  ;;  %v1316_v51 = vpop.f32.mrb[3].mxu0  ;;  %v1438_v52 = vpop.f32.mrb[3].mxu1 }
 0x17e   : > { %v1820_v53 = vadd.f32 %v1810_v44, %v1800_v43  ;;  %v1802_v54 = vmul.f32 %v1316_v51, %v1316_v51  ;;  %v1812_v61 = vmul.f32 %v1438_v52, %v1438_v52 }
 0x17f   : > { %v4390_v57 = vmax.f32 %v1819_v47, 1e-08  ;;  %v1821_v59 = vadd.f32 %v1811_v50, %v1801_v48 }
 0x180   : > { %v4392_v56 = vmax.f32 %v1820_v53, 1e-08  ;;  %v1822_v62 = vadd.f32 %v1812_v61, %v1802_v54 }
 0x181   : > { %3199 = vrsqrt.f32 %v4390_v57  ;;  %v4395_v1 = vmax.f32 %v1821_v59, 1e-08  ;;  %vm1841_vm0 = vcmp.eq.f32.partialorder %v4390_v57, inf  ;;  %vm1843_vm2 = vcmp.eq.f32.partialorder %v4390_v57, 0.0 }
 0x182   : > { %3201 = vrsqrt.f32 %v4392_v56  ;;  %v4398_v2 = vmax.f32 %v1822_v62, 1e-08  ;;  %v1320_v3 = vpop.f32.mrb[4].mxu0  ;;  %v1442_v4 = vpop.f32.mrb[4].mxu1  ;;  %vm1848_vm1 = vcmp.eq.f32.partialorder %v4392_v56, inf  ;;  %vm1850_vm3 = vcmp.eq.f32.partialorder %v4392_v56, 0.0 }
 0x183   : > { %3203 = vrsqrt.f32 %v4395_v1  ;;  %v1803_v55 = vmul.f32 %v1320_v3, %v1320_v3  ;;  %v1813_v63 = vmul.f32 %v1442_v4, %v1442_v4  ;;  %v1322_v5 = vpop.f32.mrb[5].mxu0  ;;  %v1444_v6 = vpop.f32.mrb[5].mxu1  ;;  %v1851_v23 = vand.u32 2147483648, %v4392_v56 }
 0x184   : > { %3205 = vrsqrt.f32 %v4398_v2  ;;  %v1804_v0 = vmul.f32 %v1322_v5, %v1322_v5  ;;  %v1814_v7 = vmul.f32 %v1444_v6, %v1444_v6  ;;  %v1324_v8 = vpop.f32.mrb[6].mxu0  ;;  %v1446_v9 = vpop.f32.mrb[6].mxu1  ;;  %vm1862_vm4 = vcmp.eq.f32.partialorder %v4398_v2, inf }
 0x185   : > { %v1823_v10 = vadd.f32 %v1813_v63, %v1803_v55  ;;  %v1805_v11 = vmul.f32 %v1324_v8, %v1324_v8  ;;  %v1815_v12 = vmul.f32 %v1446_v9, %v1446_v9  ;;  %v1326_v13 = vpop.f32.mrb[7].mxu0  ;;  %v1448_v14 = vpop.f32.mrb[7].mxu1  ;;  %vm1864_vm5 = vcmp.eq.f32.partialorder %v4398_v2, 0.0 }
 0x186   : > { %v1824_v15 = vadd.f32 %v1814_v7, %v1804_v0  ;;  %v1806_v16 = vmul.f32 %v1326_v13, %v1326_v13  ;;  %v1816_v17 = vmul.f32 %v1448_v14, %v1448_v14  ;;  %v1844_v40 = vand.u32 2147483648, %v4390_v57 }
 0x187   : > { %v4402_v18 = vmax.f32 %v1823_v10, 1e-08  ;;  %v1825_v19 = vadd.f32 %v1815_v12, %v1805_v11  ;;  %vm1855_vm6 = vcmp.eq.f32.partialorder %v4395_v1, inf  ;;  %v1858_v48 = vand.u32 2147483648, %v4395_v1 }
 0x188   : > { %v4404_v20 = vmax.f32 %v1824_v15, 1e-08  ;;  %v1826_v49 = vadd.f32 %v1816_v17, %v1806_v16  ;;  %v1865_v51 = vand.u32 2147483648, %v4398_v2  ;;  %vm1857_vm7 = vcmp.eq.f32.partialorder %v4395_v1, 0.0 }
 0x189   : > { %3207 = vrsqrt.f32 %v4402_v18  ;;  %v4408_v58 = vmax.f32 %v1825_v19, 1e-08  ;;  %vm1869_vm8 = vcmp.eq.f32.partialorder %v4402_v18, inf  ;;  %vm1871_vm11 = vcmp.eq.f32.partialorder %v4402_v18, 0.0 }
 0x18a   : > { %3209 = vrsqrt.f32 %v4404_v20  ;;  %v4413_v21 = vmax.f32 %v1826_v49, 1e-08  ;;  %v1330_v60 = vpop.f32.mrb[8].mxu0  ;;  %v1452_v22 = vpop.f32.mrb[8].mxu1  ;;  %vm1876_vm9 = vcmp.eq.f32.partialorder %v4404_v20, inf  ;;  %vm1878_vm10 = vcmp.eq.f32.partialorder %v4404_v20, 0.0 }
 0x18b   : > { %v3200_v24 = vpop.eup %3199  ;;  %3211 = vrsqrt.f32 %v4408_v58  ;;  %v1807_v25 = vmul.f32 %v1330_v60, %v1330_v60  ;;  %v1817_v26 = vmul.f32 %v1452_v22, %v1452_v22  ;;  %v1332_v27 = vpop.f32.mrb[9].mxu0  ;;  %v1872_v0 = vand.u32 2147483648, %v4402_v18 }
 0x18c   : > { %v1454_v28 = vpop.f32.mrb[9].mxu1  ;;  %v3202_v29 = vpop.eup %3201  ;;  %3213 = vrsqrt.f32 %v4413_v21  ;;  %v1808_v30 = vmul.f32 %v1332_v27, %v1332_v27  ;;  %v1840_v34 = vmul.f32 %v3200_v24, %v4390_v57  ;;  %vm1883_vm12 = vcmp.eq.f32.partialorder %v4408_v58, inf }
 0x18d   : > { %v1818_v31 = vmul.f32 %v1454_v28, %v1454_v28  ;;  %v1334_v32 = vpop.f32.mrb[10].mxu0  ;;  %v1456_v33 = vpop.f32.mrb[10].mxu1  ;;  %v1827_v36 = vadd.f32 %v1817_v26, %v1807_v25  ;;  %v1847_v39 = vmul.f32 %v3202_v29, %v4392_v56  ;;  %v1886_v10 = vand.u32 2147483648, %v4408_v58 }
 0x18e   : > { %v3204_v35 = vpop.eup %3203  ;;  %v1335_v37 = vpop.f32.mrb[11].mxu0  ;;  %v1842_v43 = vsel %vm1841_vm0, %v4390_v57, %v1840_v34  ;;  %vm1890_vm13 = vcmp.eq.f32.partialorder %v4413_v21, inf  ;;  %v1893_v11 = vand.u32 2147483648, %v4413_v21  ;;  %vm1885_vm14 = vcmp.eq.f32.partialorder %v4408_v58, 0.0 }
 0x18f   : > { %v1457_v38 = vpop.f32.mrb[11].mxu1  ;;  %v3206_v41 = vpop.eup %3205  ;;  %v1828_v42 = vadd.f32 %v1818_v31, %v1808_v30  ;;  %v1854_v44 = vmul.f32 %v3204_v35, %v4395_v1  ;;  %v4429_v45 = vmax.f32 %v1827_v36, 1e-08  ;;  %v1849_v46 = vsel %vm1848_vm1, %v4392_v56, %v1847_v39 }
 0x190   : > { %v1861_v47 = vmul.f32 %v3206_v41, %v4398_v2  ;;  %v1845_v54 = vsel %vm1843_vm2, %v1844_v40, %v1842_v43  ;;  %v1852_v59 = vsel %vm1850_vm3, %v1851_v23, %v1849_v46  ;;  %vm1892_vm15 = vcmp.eq.f32.partialorder %v4413_v21, 0.0 }
 0x191   : > { %v1838_v50 = vmax.f32 %v1828_v42, 1e-08  ;;  %v1856_v52 = vsel %vm1855_vm6, %v4395_v1, %v1854_v44  ;;  %3215 = vrsqrt.f32 %v4429_v45  ;;  %vm1897_vm0 = vcmp.eq.f32.partialorder %v4429_v45, inf }
 0x192   : > { %v1863_v53 = vsel %vm1862_vm4, %v4398_v2, %v1861_v47  ;;  %v1859_v61 = vsel %vm1857_vm7, %v1858_v48, %v1856_v52  ;;  %v1879_v2 = vand.u32 2147483648, %v4404_v20  ;;  %vm1899_vm3 = vcmp.eq.f32.partialorder %v4429_v45, 0.0 }
 0x193   : > { %3217 = vrsqrt.f32 %v1838_v50  ;;  %v1866_v62 = vsel %vm1864_vm5, %v1865_v51, %v1863_v53  ;;  %v1909_v3 = vpack.c.bf16 %v1859_v61, %v1845_v54  ;;  %v3208_v4 = vpop.eup %3207  ;;  %vm1904_vm1 = vcmp.eq.f32.partialorder %v1838_v50, inf }
 0x194   : > { %v1910_v1 = vpack.c.bf16 %v1866_v62, %v1852_v59  ;;  %v3210_v55 = vpop.eup %3209  ;;  %v1868_v63 = vmul.f32 %v3208_v4, %v4402_v18  ;;  %vm1906_vm2 = vcmp.eq.f32.partialorder %v1838_v50, 0.0 }
 0x195   : > { %v3212_v5 = vpop.eup %3211  ;;  %v1875_v57 = vmul.f32 %v3210_v55, %v4404_v20 }
 0x196   : > { %2043 = vmatprep.mubr.bf16.mxu0 %v1910_v1  ;;  %v3214_v56 = vpop.eup %3213  ;;  %v1870_v6 = vsel %vm1869_vm8, %v4402_v18, %v1868_v63  ;;  %v1882_v7 = vmul.f32 %v3212_v5, %v4408_v58 }
 0x197   : > { %2044 = vmatmul.mubr.bf16.vlgmr.msra.gmra.mrb[24].mxu0 %v1909_v3  ;;  %v1877_v8 = vsel %vm1876_vm9, %v4404_v20, %v1875_v57  ;;  %v1889_v9 = vmul.f32 %v3214_v56, %v4413_v21  ;;  %v1873_v14 = vsel %vm1871_vm11, %v1872_v0, %v1870_v6  ;;  %v1900_v20 = vand.u32 2147483648, %v4429_v45 }
 0x198   : > { %v1884_v12 = vsel %vm1883_vm12, %v4408_v58, %v1882_v7  ;;  %v1880_v16 = vsel %vm1878_vm10, %v1879_v2, %v1877_v8 }
 0x199   : > { %v1891_v13 = vsel %vm1890_vm13, %v4413_v21, %v1889_v9  ;;  %v1887_v15 = vsel %vm1885_vm14, %v1886_v10, %v1884_v12  ;;  %v1907_v21 = vand.u32 2147483648, %v1838_v50 }
 0x19a   : > { %v1894_v17 = vsel %vm1892_vm15, %v1893_v11, %v1891_v13  ;;  %v1911_v19 = vpack.c.bf16 %v1887_v15, %v1873_v14 }
 0x19b   : > { %v3216_v49 = vpop.eup %3215  ;;  %v1912_v60 = vpack.c.bf16 %v1894_v17, %v1880_v16 }
 0x19c   : > { %v1896_v23 = vmul.f32 %v3216_v49, %v4429_v45 }
 0x19d   : > { %v3218_v22 = vpop.eup %3217  ;;  %2051 = vmatprep.mubr.bf16.mxu0 %v1912_v60 }
 0x19e   : > { %v1903_v58 = vmul.f32 %v3218_v22, %v1838_v50  ;;  %v1898_v18 = vsel %vm1897_vm0, %v4429_v45, %v1896_v23 }
 0x19f   : > { %2052 = vmatmul.mubr.bf16.gmra.mrb[28].mxu0 %v1911_v19  ;;  %v1901_v27 = vsel %vm1899_vm3, %v1900_v20, %v1898_v18 }
 0x1a0   : > { %v1905_v24 = vsel %vm1904_vm1, %v1838_v50, %v1903_v58  ;;  %v1913_v28 = vpack.c.bf16 %v1901_v27, %v1901_v27 }
 0x1a1   : > { %v1908_v25 = vsel %vm1906_vm2, %v1907_v21, %v1905_v24 }
 0x1a2   : > { %v1914_v26 = vpack.c.bf16 %v1908_v25, %v1908_v25 }
 0x1a4   : > { %2059 = vmatprep.mubr.bf16.mxu0 %v1914_v26 }
 0x1a7   : > { %2060 = vmatmul.mubr.bf16.gmra.mrb[32].mxu0 %v1913_v28 }
 0x1fa   : > { %v1618_v29 = vpop.f32.mrb[12].mxu0  ;;  %v1740_v30 = vpop.f32.mrb[12].mxu1 }
 0x1fb   : > { %v2067_v31 = vmul.f32 %v1618_v29, %v1618_v29  ;;  %v2077_v32 = vmul.f32 %v1740_v30, %v1740_v30  ;;  %v1620_v33 = vpop.f32.mrb[13].mxu0  ;;  %v1742_v34 = vpop.f32.mrb[13].mxu1 }
 0x1fc   : > { %v2068_v35 = vmul.f32 %v1620_v33, %v1620_v33  ;;  %v2078_v36 = vmul.f32 %v1742_v34, %v1742_v34  ;;  %v1622_v37 = vpop.f32.mrb[14].mxu0  ;;  %v1744_v38 = vpop.f32.mrb[14].mxu1 }
 0x1fd   : > { %v2087_v39 = vadd.f32 %v2077_v32, %v2067_v31  ;;  %v2069_v40 = vmul.f32 %v1622_v37, %v1622_v37  ;;  %v2079_v41 = vmul.f32 %v1744_v38, %v1744_v38  ;;  %v1624_v42 = vpop.f32.mrb[15].mxu0  ;;  %v1746_v43 = vpop.f32.mrb[15].mxu1 }
 0x1fe   : > { %v2088_v44 = vadd.f32 %v2078_v36, %v2068_v35  ;;  %v2070_v45 = vmul.f32 %v1624_v42, %v1624_v42  ;;  %v2080_v46 = vmul.f32 %v1746_v43, %v1746_v43 }
 0x1ff   : > { %v4478_v47 = vmax.f32 %v2087_v39, 1e-08  ;;  %v2089_v48 = vadd.f32 %v2079_v41, %v2069_v40 }
 0x200   : > { %v4480_v50 = vmax.f32 %v2088_v44, 1e-08  ;;  %v2090_v51 = vadd.f32 %v2080_v46, %v2070_v45 }
 0x201   : > { %3219 = vrsqrt.f32 %v4478_v47  ;;  %v4483_v52 = vmax.f32 %v2089_v48, 1e-08  ;;  %vm2109_vm4 = vcmp.eq.f32.partialorder %v4478_v47, inf  ;;  %vm2111_vm6 = vcmp.eq.f32.partialorder %v4478_v47, 0.0 }
 0x202   : > { %3221 = vrsqrt.f32 %v4480_v50  ;;  %v4486_v53 = vmax.f32 %v2090_v51, 1e-08  ;;  %v1628_v54 = vpop.f32.mrb[16].mxu0  ;;  %v1750_v61 = vpop.f32.mrb[16].mxu1  ;;  %vm2116_vm5 = vcmp.eq.f32.partialorder %v4480_v50, inf  ;;  %vm2118_vm7 = vcmp.eq.f32.partialorder %v4480_v50, 0.0 }
 0x203   : > { %3223 = vrsqrt.f32 %v4483_v52  ;;  %v2071_v59 = vmul.f32 %v1628_v54, %v1628_v54  ;;  %v2081_v62 = vmul.f32 %v1750_v61, %v1750_v61  ;;  %v1630_v3 = vpop.f32.mrb[17].mxu0  ;;  %v1752_v4 = vpop.f32.mrb[17].mxu1  ;;  %v2119_v19 = vand.u32 2147483648, %v4480_v50 }
 0x204   : > { %3225 = vrsqrt.f32 %v4486_v53  ;;  %v2072_v1 = vmul.f32 %v1630_v3, %v1630_v3  ;;  %v2082_v55 = vmul.f32 %v1752_v4, %v1752_v4  ;;  %v1632_v63 = vpop.f32.mrb[18].mxu0  ;;  %v1754_v5 = vpop.f32.mrb[18].mxu1  ;;  %vm2130_vm8 = vcmp.eq.f32.partialorder %v4486_v53, inf }
 0x205   : > { %v2091_v57 = vadd.f32 %v2081_v62, %v2071_v59  ;;  %v2073_v56 = vmul.f32 %v1632_v63, %v1632_v63  ;;  %v2083_v2 = vmul.f32 %v1754_v5, %v1754_v5  ;;  %v1634_v6 = vpop.f32.mrb[19].mxu0  ;;  %v1756_v0 = vpop.f32.mrb[19].mxu1  ;;  %vm2132_vm9 = vcmp.eq.f32.partialorder %v4486_v53, 0.0 }
 0x206   : > { %v2092_v7 = vadd.f32 %v2082_v55, %v2072_v1  ;;  %v2074_v8 = vmul.f32 %v1634_v6, %v1634_v6  ;;  %v2084_v9 = vmul.f32 %v1756_v0, %v1756_v0  ;;  %v2112_v32 = vand.u32 2147483648, %v4478_v47 }
 0x207   : > { %v4490_v10 = vmax.f32 %v2091_v57, 1e-08  ;;  %v2093_v11 = vadd.f32 %v2083_v2, %v2073_v56  ;;  %vm2123_vm10 = vcmp.eq.f32.partialorder %v4483_v52, inf  ;;  %v2126_v40 = vand.u32 2147483648, %v4483_v52 }
 0x208   : > { %v4492_v12 = vmax.f32 %v2092_v7, 1e-08  ;;  %v2094_v13 = vadd.f32 %v2084_v9, %v2074_v8  ;;  %v2133_v42 = vand.u32 2147483648, %v4486_v53  ;;  %vm2125_vm11 = vcmp.eq.f32.partialorder %v4483_v52, 0.0 }
 0x209   : > { %3227 = vrsqrt.f32 %v4490_v10  ;;  %v4496_v14 = vmax.f32 %v2093_v11, 1e-08  ;;  %vm2137_vm12 = vcmp.eq.f32.partialorder %v4490_v10, inf  ;;  %vm2139_vm15 = vcmp.eq.f32.partialorder %v4490_v10, 0.0 }
 0x20a   : > { %3229 = vrsqrt.f32 %v4492_v12  ;;  %v4501_v15 = vmax.f32 %v2094_v13, 1e-08  ;;  %v1638_v16 = vpop.f32.mrb[20].mxu0  ;;  %v1760_v17 = vpop.f32.mrb[20].mxu1  ;;  %vm2144_vm13 = vcmp.eq.f32.partialorder %v4492_v12, inf  ;;  %vm2146_vm14 = vcmp.eq.f32.partialorder %v4492_v12, 0.0 }
 0x20b   : > { %v3220_v49 = vpop.eup %3219  ;;  %3231 = vrsqrt.f32 %v4496_v14  ;;  %v2075_v60 = vmul.f32 %v1638_v16, %v1638_v16  ;;  %v2085_v22 = vmul.f32 %v1760_v17, %v1760_v17  ;;  %v1640_v23 = vpop.f32.mrb[21].mxu0  ;;  %v2140_v1 = vand.u32 2147483648, %v4490_v10 }
 0x20c   : > { %v1762_v58 = vpop.f32.mrb[21].mxu1  ;;  %v3222_v21 = vpop.eup %3221  ;;  %3233 = vrsqrt.f32 %v4501_v15  ;;  %v2076_v18 = vmul.f32 %v1640_v23, %v1640_v23  ;;  %v2108_v26 = vmul.f32 %v3220_v49, %v4478_v47  ;;  %vm2151_vm0 = vcmp.eq.f32.partialorder %v4496_v14, inf }
 0x20d   : > { %v2086_v24 = vmul.f32 %v1762_v58, %v1762_v58  ;;  %v1642_v20 = vpop.f32.mrb[22].mxu0  ;;  %v1764_v25 = vpop.f32.mrb[22].mxu1  ;;  %v2095_v28 = vadd.f32 %v2085_v22, %v2075_v60  ;;  %v2115_v31 = vmul.f32 %v3222_v21, %v4480_v50  ;;  %v2154_v57 = vand.u32 2147483648, %v4496_v14 }
 0x20e   : > { %v3224_v27 = vpop.eup %3223  ;;  %v1643_v29 = vpop.f32.mrb[23].mxu0  ;;  %v2110_v35 = vsel %vm2109_vm4, %v4478_v47, %v2108_v26  ;;  %vm2158_vm1 = vcmp.eq.f32.partialorder %v4501_v15, inf  ;;  %v2161_v56 = vand.u32 2147483648, %v4501_v15  ;;  %vm2153_vm2 = vcmp.eq.f32.partialorder %v4496_v14, 0.0 }
 0x20f   : > { %v1765_v30 = vpop.f32.mrb[23].mxu1  ;;  %v3226_v33 = vpop.eup %3225  ;;  %v2096_v34 = vadd.f32 %v2086_v24, %v2076_v18  ;;  %v2122_v36 = vmul.f32 %v3224_v27, %v4483_v52  ;;  %v4517_v37 = vmax.f32 %v2095_v28, 1e-08  ;;  %v2117_v38 = vsel %vm2116_vm5, %v4480_v50, %v2115_v31 }
 0x210   : > { %v2129_v39 = vmul.f32 %v3226_v33, %v4486_v53  ;;  %v2113_v45 = vsel %vm2111_vm6, %v2112_v32, %v2110_v35  ;;  %v2120_v48 = vsel %vm2118_vm7, %v2119_v19, %v2117_v38  ;;  %vm2160_vm3 = vcmp.eq.f32.partialorder %v4501_v15, 0.0  ;;  %v4579_v38 = vld [vmem:[%s4767_s4] sm:$0x1] }
 0x211   : > { %v2106_v41 = vmax.f32 %v2096_v34, 1e-08  ;;  %v2124_v43 = vsel %vm2123_vm10, %v4483_v52, %v2122_v36  ;;  %3235 = vrsqrt.f32 %v4517_v37  ;;  %vm2165_vm4 = vcmp.eq.f32.partialorder %v4517_v37, inf }
 0x212   : > { %v2131_v44 = vsel %vm2130_vm8, %v4486_v53, %v2129_v39  ;;  %v2127_v46 = vsel %vm2125_vm11, %v2126_v40, %v2124_v43  ;;  %v2147_v53 = vand.u32 2147483648, %v4492_v12  ;;  %vm2167_vm7 = vcmp.eq.f32.partialorder %v4517_v37, 0.0 }
 0x213   : > { %3237 = vrsqrt.f32 %v2106_v41  ;;  %v2134_v51 = vsel %vm2132_vm9, %v2133_v42, %v2131_v44  ;;  %v2177_v54 = vpack.c.bf16 %v2127_v46, %v2113_v45  ;;  %v3228_v61 = vpop.eup %3227  ;;  %vm2172_vm5 = vcmp.eq.f32.partialorder %v2106_v41, inf }
 0x214   : > { %v2178_v52 = vpack.c.bf16 %v2134_v51, %v2120_v48  ;;  %v3230_v59 = vpop.eup %3229  ;;  %v2136_v62 = vmul.f32 %v3228_v61, %v4490_v10  ;;  %vm2174_vm6 = vcmp.eq.f32.partialorder %v2106_v41, 0.0  ;;  %v2240_v39 = vsub.f32 1.0, %v4579_v38 }
 0x215   : > { %v3232_v3 = vpop.eup %3231  ;;  %v2143_v47 = vmul.f32 %v3230_v59, %v4492_v12 }
 0x216   : > { %2215 = vmatprep.mubr.bf16.mxu1 %v2178_v52  ;;  %v3234_v50 = vpop.eup %3233  ;;  %v2138_v4 = vsel %vm2137_vm12, %v4490_v10, %v2136_v62  ;;  %v2150_v55 = vmul.f32 %v3232_v3, %v4496_v14 }
 0x217   : > { %2216 = vmatmul.mubr.bf16.vlgmr.msra.gmra.mrb[24].mxu1 %v2177_v54  ;;  %v2145_v63 = vsel %vm2144_vm13, %v4492_v12, %v2143_v47  ;;  %v2157_v5 = vmul.f32 %v3234_v50, %v4501_v15  ;;  %v2141_v0 = vsel %vm2139_vm15, %v2140_v1, %v2138_v4  ;;  %v2168_v12 = vand.u32 2147483648, %v4517_v37 }
 0x218   : > { %v2152_v2 = vsel %vm2151_vm0, %v4496_v14, %v2150_v55  ;;  %v2148_v8 = vsel %vm2146_vm14, %v2147_v53, %v2145_v63 }
 0x219   : > { %v2159_v6 = vsel %vm2158_vm1, %v4501_v15, %v2157_v5  ;;  %v2155_v7 = vsel %vm2153_vm2, %v2154_v57, %v2152_v2  ;;  %v2175_v15 = vand.u32 2147483648, %v2106_v41 }
 0x21a   : > { %v2162_v9 = vsel %vm2160_vm3, %v2161_v56, %v2159_v6  ;;  %v2179_v11 = vpack.c.bf16 %v2155_v7, %v2141_v0 }
 0x21b   : > { %v3236_v13 = vpop.eup %3235  ;;  %v2180_v16 = vpack.c.bf16 %v2162_v9, %v2148_v8 }
 0x21c   : > { %v2164_v19 = vmul.f32 %v3236_v13, %v4517_v37  ;;  %v2263_v13 = vlaneseq (!%p2790_p9) }
 0x21d   : > { %v3238_v17 = vpop.eup %3237  ;;  %2223 = vmatprep.mubr.bf16.mxu1 %v2180_v16 }
 0x21e   : > { %v2171_v14 = vmul.f32 %v3238_v17, %v2106_v41  ;;  %v2166_v10 = vsel %vm2165_vm4, %v4517_v37, %v2164_v19 }
 0x21f   : > { %2224 = vmatmul.mubr.bf16.gmra.mrb[28].mxu1 %v2179_v11  ;;  %v2169_v23 = vsel %vm2167_vm7, %v2168_v12, %v2166_v10 }
 0x220   : > { %v2173_v49 = vsel %vm2172_vm5, %v2106_v41, %v2171_v14  ;;  %v2181_v58 = vpack.c.bf16 %v2169_v23, %v2169_v23  ;;  %v2328_v23 = vld [vmem:[%s3407_s21] sm:$0xff] (!%p2790_p9) }
 0x221   : > { %v2176_v60 = vsel %vm2174_vm6, %v2175_v15, %v2173_v49  ;;  %v2264_v15 = vshrl.u32 (!%p2790_p9), %v2263_v13, 7  ;;  %v2321_v49 = vld [vmem:[%s3402_s17] sm:$0xff] (!%p2790_p9) }
 0x222   : > { %v2182_v22 = vpack.c.bf16 %v2176_v60, %v2176_v60 }
 0x223   : > { %v2265_v60 = vsub.s32 (!%p2790_p9), 0, %v2264_v15 }
 0x224   : > { %2231 = vmatprep.mubr.bf16.mxu1 %v2182_v22 }
 0x227   : > { %2232 = vmatmul.mubr.bf16.gmra.mrb[32].mxu1 %v2181_v58 }
 0x26a   : > { %v2817_v21 = vpop.f32.mrb[24].mxu0 }
 0x26b   : > { %v2818_v18 = vpop.f32.mrb[25].mxu0 }
 0x26c   : > { %v4566_v24 = vadd.f32 %v2818_v18, %v2817_v21  ;;  %v2820_v20 = vpop.f32.mrb[26].mxu0  ;;  %v2266_v21 = vrot.slane (!%p2790_p9), %v4579_v38, %v2265_v60 }
 0x26d   : > { %v2821_v25 = vpop.f32.mrb[27].mxu0 }
 0x26e   : > { %v4568_v26 = vadd.f32 %v2821_v25, %v2820_v20 }
 0x272   : > { %v2823_v27 = vpop.f32.mrb[28].mxu0 }
 0x273   : > { %v2824_v28 = vpop.f32.mrb[29].mxu0 }
 0x274   : > { %v4570_v29 = vadd.f32 %v2824_v28, %v2823_v27  ;;  %v2826_v30 = vpop.f32.mrb[30].mxu0 }
 0x275   : > { %v2827_v31 = vpop.f32.mrb[31].mxu0 }
 0x276   : > { %v4572_v32 = vadd.f32 %v2827_v31, %v2826_v30 }
 0x27a   : > { %v2829_v33 = vpop.f32.mrb[32].mxu0 }
 0x27b   : > { %v2830_v34 = vpop.f32.mrb[33].mxu0 }
 0x27c   : > { %v4574_v35 = vadd.f32 %v2830_v34, %v2829_v33  ;;  %v2832_v36 = vpop.f32.mrb[34].mxu0  ;;  %v2268_v33 = vadd.f32 (!%p2790_p9), %v4566_v24, %v2266_v21  ;;  %v2269_v34 = vadd.f32 (!%p2790_p9), %v4568_v26, %v2266_v21 }
 0x27d   : > { %v2833_v37 = vpop.f32.mrb[35].mxu0  ;;  %v2270_v36 = vadd.f32 (!%p2790_p9), %v4570_v29, %v2266_v21 }
 0x2ea   : > { %v2851_v40 = vpop.f32.mrb[24].mxu1 }
 0x2eb   : > { %v2852_v41 = vpop.f32.mrb[25].mxu1 }
 0x2ec   : > { %v4583_v42 = vadd.f32 %v2852_v41, %v2851_v40  ;;  %v2854_v43 = vpop.f32.mrb[26].mxu1  ;;  %v2271_v40 = vadd.f32 (!%p2790_p9), %v4572_v32, %v2266_v21 }
 0x2ed   : > { %v2855_v44 = vpop.f32.mrb[27].mxu1 }
 0x2ee   : > { %v2241_v45 = vsub.f32 %v4583_v42, %v4566_v24  ;;  %v4589_v46 = vmul.f32 %v4583_v42, %v4583_v42  ;;  %v4591_v48 = vadd.f32 %v2855_v44, %v2854_v43  ;;  %v2273_v25 = vadd.f32 (!%p2790_p9), %v4583_v42, %v2266_v21 }
 0x2ef   : > { %v2272_v43 = vadd.f32 (!%p2790_p9), %v4574_v35, %v2266_v21 }
 0x2f0   : > { %v4593_v51 = vmul.f32 %v2241_v45, %v2241_v45  ;;  %v2242_v54 = vsub.f32 %v4591_v48, %v4568_v26  ;;  %v4599_v61 = vmul.f32 %v4591_v48, %v4591_v48  ;;  %v2274_v27 = vadd.f32 (!%p2790_p9), %v4591_v48, %v2266_v21 }
 0x2f1   : > { %3239 = vrcp.f32 (!%p2790_p9), %v2273_v25 }
 0x2f2   : > { %v4601_v52 = vmul.f32 %v2242_v54, %v2242_v54  ;;  %v2857_v59 = vpop.f32.mrb[28].mxu1  ;;  %v2329_v19 = vadd.f32 (!%p2790_p9), %v4599_v61, %v4589_v46  ;;  %3241 = vrcp.f32 (!%p2790_p9), %v2274_v27 }
 0x2f3   : > { %v2858_v62 = vpop.f32.mrb[29].mxu1 }
 0x2f4   : > { %v4603_v3 = vadd.f32 %v2858_v62, %v2857_v59  ;;  %v2860_v47 = vpop.f32.mrb[30].mxu1  ;;  %v2322_v16 = vadd.f32 (!%p2790_p9), %v4601_v52, %v4593_v51 }
 0x2f5   : > { %v2861_v50 = vpop.f32.mrb[31].mxu1 }
 0x2f6   : > { %v2243_v53 = vsub.f32 %v4603_v3, %v4570_v29  ;;  %v4609_v4 = vmul.f32 %v4603_v3, %v4603_v3  ;;  %v4611_v1 = vadd.f32 %v2861_v50, %v2860_v47  ;;  %v2275_v28 = vadd.f32 (!%p2790_p9), %v4603_v3, %v2266_v21 }
 0x2f8   : > { %v4613_v55 = vmul.f32 %v2243_v53, %v2243_v53  ;;  %v2244_v63 = vsub.f32 %v4611_v1, %v4572_v32  ;;  %v4619_v5 = vmul.f32 %v4611_v1, %v4611_v1  ;;  %v2276_v30 = vadd.f32 (!%p2790_p9), %v4611_v1, %v2266_v21 }
 0x2f9   : > { %3243 = vrcp.f32 (!%p2790_p9), %v2275_v28  ;;  %v2314_v28 = vld [vmem:[%s3397_s14] sm:$0xff] (!%p2790_p9) }
 0x2fa   : > { %v4621_v57 = vmul.f32 %v2244_v63, %v2244_v63  ;;  %v2863_v56 = vpop.f32.mrb[32].mxu1  ;;  %2261 = sbr.rel (%p2790_p9) target bundleno = 803 (0x323), region = 52  ;;  %v2330_v14 = vadd.f32 (!%p2790_p9), %v4619_v5, %v4609_v4  ;;  %3245 = vrcp.f32 (!%p2790_p9), %v2276_v30 }
 0x2fb   : > { %v2864_v2 = vpop.f32.mrb[33].mxu1  ;;  %v3240_v37 = vpop.eup (!%p2790_p9), %3239 }
 0x2fc   : > { %v4623_v6 = vadd.f32 %v2864_v2, %v2863_v56  ;;  %v2866_v0 = vpop.f32.mrb[34].mxu1  ;;  %v2323_v17 = vadd.f32 (!%p2790_p9), %v4621_v57, %v4613_v55  ;;  %v2331_v12 = vadd.f32 (!%p2790_p9), %v2330_v14, %v2329_v19  ;;  %v3242_v41 = vpop.eup (!%p2790_p9), %3241  ;;  %v2283_v44 = vmul.f32 (!%p2790_p9), %v3240_v37, %v2268_v33 }
 0x2fd   : > { %v2867_v7 = vpop.f32.mrb[35].mxu1  ;;  %v2284_v54 = vmul.f32 (!%p2790_p9), %v3242_v41, %v2269_v34  ;;  %v2307_v0 = vrot.slane (!%p2790_p9), %v2240_v39, %v2265_v60 }
 0x2fe   : > { %v2245_v8 = vsub.f32 %v4623_v6, %v4574_v35  ;;  %v4629_v9 = vmul.f32 %v4623_v6, %v4623_v6  ;;  %v2324_v10 = vadd.f32 (!%p2790_p9), %v2323_v17, %v2322_v16  ;;  %v2277_v31 = vadd.f32 (!%p2790_p9), %v4623_v6, %v2266_v21 }
 0x300   : > { %v4631_v11 = vmul.f32 %v2245_v8, %v2245_v8  ;;  %v2332_v58 = vadd.f32 (!%p2790_p9), %v2331_v12, %v4629_v9  ;;  %3247 = vrcp.f32 (!%p2790_p9), %v2277_v31 }
 0x301   : > { %3249 = vlog2.f32 %v2283_v44 }
 0x302   : > { %v2325_v22 = vadd.f32 %v2324_v10, %v4631_v11  ;;  %v2333_v20 = vadd.f32 %v2332_v58, %v2328_v23  ;;  %3251 = vlog2.f32 %v2284_v54 }
 0x303   : > { %v3244_v45 = vpop.eup %3243 }
 0x304   : > { %v2326_v18 = vadd.f32 %v2325_v22, %v2321_v49  ;;  %2334 = vst [vmem:[%s3407_s21] sm:$0xff] %v2333_v20  ;;  %v3246_v59 = vpop.eup %3245  ;;  %v2285_v62 = vmul.f32 %v3244_v45, %v2270_v36 }
 0x305   : > { %v2286_v50 = vmul.f32 %v3246_v59, %v2271_v40 }
 0x306   : > { %2327 = vst [vmem:[%s3402_s17] sm:$0xff] %v2326_v18  ;;  %3253 = vlog2.f32 %v2285_v62 }
 0x307   : > { %3255 = vlog2.f32 %v2286_v50 }
 0x30a   : > { %v3248_v47 = vpop.eup %3247 }
 0x30b   : > { %v2287_v53 = vmul.f32 %v3248_v47, %v2272_v43  ;;  %v3250_v63 = vpop.eup %3249 }
 0x30c   : > { %v3252_v56 = vpop.eup %3251  ;;  %v2289_v2 = vmul.f32 0.6931472, %v3250_v63 }
 0x30d   : > { %3257 = vlog2.f32 %v2287_v53  ;;  %v2291_v8 = vmul.f32 0.6931472, %v3252_v56 }
 0x30e   : > { %v2298_v17 = vand.u32 2147483647, %v2289_v2 }
 0x30f   : > { %v2299_v15 = vand.u32 2147483647, %v2291_v8 }
 0x310   : > { %v3254_v7 = vpop.eup %3253  ;;  %v2309_v12 = vmul.f32 %v2307_v0, %v2298_v17 }
 0x311   : > { %v3256_v13 = vpop.eup %3255  ;;  %v2293_v16 = vmul.f32 0.6931472, %v3254_v7  ;;  %v2310_v23 = vmul.f32 %v2307_v0, %v2299_v15 }
 0x312   : > { %v2295_v14 = vmul.f32 0.6931472, %v3256_v13 }
 0x313   : > { %v2300_v49 = vand.u32 2147483647, %v2293_v16  ;;  %v2315_v20 = vadd.f32 %v2310_v23, %v2309_v12 }
 0x314   : > { %v2301_v22 = vand.u32 2147483647, %v2295_v14 }
 0x315   : > { %v2311_v21 = vmul.f32 %v2307_v0, %v2300_v49 }
 0x316   : > { %v2312_v18 = vmul.f32 %v2307_v0, %v2301_v22 }
 0x317   : > { %v3258_v19 = vpop.eup %3257 }
 0x318   : > { %v2297_v10 = vmul.f32 0.6931472, %v3258_v19  ;;  %v2316_v25 = vadd.f32 %v2312_v18, %v2311_v21 }
 0x31a   : > { %v2302_v58 = vand.u32 2147483647, %v2297_v10  ;;  %v2317_v27 = vadd.f32 %v2316_v25, %v2315_v20 }
 0x31c   : > { %v2313_v60 = vmul.f32 %v2307_v0, %v2302_v58 }
 0x31e   : > { %v2318_v30 = vadd.f32 %v2317_v27, %v2313_v60 }
 0x320   : > { %v2319_v31 = vadd.f32 %v2318_v30, %v2314_v28 }
 0x322   : > { %2320 = vst [vmem:[%s3397_s14] sm:$0xff] %v2319_v31 }
 0x323 PF: > { %p2791_p10 = scmp.le.s32.totalorder %s2256_s23, 130 }
 0x324   : > { %v2338_v33 = vlaneseq (!%p2791_p10)  ;;  %v2344_v36 = vstv (!%p2791_p10), %s3423_s10  ;;  %v3320_v7 = vmov (!%p2791_p10), 0.0   ;;  %v2439_v18 = vld [vmem:[%s3402_s17] sm:$0xff] (!%p2791_p10) }
 0x325   : > { %2337 = sbr.rel (%p2791_p10) target bundleno = 858 (0x35a), region = 56  ;;  %v2451_v31 = vld [vmem:[%s3407_s21] sm:$0xff] (!%p2791_p10) }
 0x326   : > { %v4666_v34 = vshrl.u32 (!%p2791_p10), %v2338_v33, 7 }
 0x328   : > { %v2340_v37 = vadd.s32 (!%p2791_p10), 8, %v4666_v34  ;;  %v2341_v40 = vadd.s32 (!%p2791_p10), 16, %v4666_v34  ;;  %v2342_v41 = vadd.s32 (!%p2791_p10), 24, %v4666_v34  ;;  %v2343_v43 = vadd.s32 (!%p2791_p10), 32, %v4666_v34 }
 0x329   : > { %v2345_v44 = vadd.s32 (!%p2791_p10), %v2344_v36, %v4666_v34  ;;  %v2373_v45 = vsub.s32 (!%p2791_p10), 0, %v4666_v34 }
 0x32a   : > { %v2346_v54 = vadd.s32 (!%p2791_p10), %v2344_v36, %v2340_v37  ;;  %v2347_v59 = vadd.s32 (!%p2791_p10), %v2344_v36, %v2341_v40  ;;  %v2348_v62 = vadd.s32 (!%p2791_p10), %v2344_v36, %v2342_v41  ;;  %v2349_v47 = vadd.s32 (!%p2791_p10), %v2344_v36, %v2343_v43 }
 0x32b   : > { %vm2350_vm8 = vcmp.lt.s32.totalorder (!%p2791_p10), %v2345_v44, 130  ;;  %v2374_v50 = vrot.slane (!%p2791_p10), %v4579_v38, %v2373_v45 }
 0x32c   : > { %vm2351_vm9 = vcmp.lt.s32.totalorder %v2346_v54, 130  ;;  %vm2352_vm10 = vcmp.lt.s32.totalorder %v2347_v59, 130  ;;  %vm2353_vm11 = vcmp.lt.s32.totalorder %v2348_v62, 130  ;;  %vm2354_vm12 = vcmp.lt.s32.totalorder %v2349_v47, 130 }
 0x32d   : > { %v2381_v53 = vsel %vm2350_vm8, %v4583_v42, 1.0  ;;  %v2382_v63 = vsel %vm2351_vm9, %v4591_v48, 1.0  ;;  %v2383_v56 = vsel %vm2352_vm10, %v4603_v3, 1.0  ;;  %v2384_v2 = vsel %vm2353_vm11, %v4611_v1, 1.0 }
 0x32e   : > { %v2385_v0 = vsel %vm2354_vm12, %v4623_v6, 1.0  ;;  %v4689_v8 = vsel %vm2350_vm8, 1.0, %v3320_v7  ;;  %v2386_v13 = vadd.f32 %v2381_v53, %v2374_v50  ;;  %v2387_v16 = vadd.f32 %v2382_v63, %v2374_v50 }
 0x32f   : > { %v2388_v17 = vadd.f32 %v2383_v56, %v2374_v50  ;;  %v4692_v42 = vsel %vm2351_vm9, 1.0, %v3320_v7  ;;  %v4695_v48 = vsel %vm2352_vm10, 1.0, %v3320_v7  ;;  %v4698_v3 = vsel %vm2353_vm11, 1.0, %v3320_v7 }
 0x330   : > { %v2389_v1 = vadd.f32 %v2384_v2, %v2374_v50  ;;  %v4701_v19 = vsel %vm2354_vm12, 1.0, %v3320_v7  ;;  %v2390_v6 = vadd.f32 %v2385_v0, %v2374_v50  ;;  %3259 = vrcp.f32 %v2386_v13 }
 0x331   : > { %v2440_v14 = vmul.f32 %v4689_v8, %v4593_v51  ;;  %3261 = vrcp.f32 %v2387_v16  ;;  %v2441_v15 = vmul.f32 %v4692_v42, %v4601_v52  ;;  %v2442_v10 = vmul.f32 %v4695_v48, %v4613_v55 }
 0x332   : > { %v2443_v49 = vmul.f32 %v4698_v3, %v4621_v57  ;;  %3263 = vrcp.f32 %v2388_v17  ;;  %v2444_v12 = vmul.f32 %v4701_v19, %v4631_v11  ;;  %v2452_v22 = vmul.f32 %v4689_v8, %v4589_v46 }
 0x333   : > { %v2453_v51 = vmul.f32 %v4692_v42, %v4599_v61  ;;  %3265 = vrcp.f32 %v2389_v1  ;;  %v2445_v23 = vadd.f32 %v2441_v15, %v2440_v14  ;;  %v2454_v55 = vmul.f32 %v4695_v48, %v4609_v4 }
 0x334   : > { %v2446_v52 = vadd.f32 %v2443_v49, %v2442_v10  ;;  %v2365_v57 = vsel %vm2350_vm8, %v4566_v24, 1.0  ;;  %3267 = vrcp.f32 %v2390_v6  ;;  %v2455_v58 = vmul.f32 %v4698_v3, %v4619_v5 }
 0x335   : > { %v2457_v11 = vadd.f32 %v2453_v51, %v2452_v22  ;;  %v2366_v46 = vsel %vm2351_vm9, %v4568_v26, 1.0  ;;  %v2367_v61 = vsel %vm2352_vm10, %v4570_v29, 1.0  ;;  %v2456_v4 = vmul.f32 %v4701_v19, %v4629_v9 }
 0x336   : > { %v2447_v21 = vadd.f32 %v2446_v52, %v2445_v23  ;;  %v2458_v20 = vadd.f32 %v2455_v58, %v2454_v55  ;;  %v2368_v24 = vsel %vm2353_vm11, %v4572_v32, 1.0  ;;  %v2376_v60 = vadd.f32 %v2374_v50, %v2365_v57  ;;  %v2432_v55 = vld [vmem:[%s3397_s14] sm:$0xff] }
 0x337   : > { %v2369_v25 = vsel %vm2354_vm12, %v4574_v35, 1.0  ;;  %v2377_v27 = vadd.f32 %v2374_v50, %v2366_v46  ;;  %v2378_v28 = vadd.f32 %v2374_v50, %v2367_v61  ;;  %v2379_v33 = vadd.f32 %v2374_v50, %v2368_v24 }
 0x338   : > { %v2448_v5 = vadd.f32 %v2447_v21, %v2444_v12  ;;  %v2459_v26 = vadd.f32 %v2458_v20, %v2457_v11  ;;  %v2380_v37 = vadd.f32 %v2374_v50, %v2369_v25  ;;  %v2420_v47 = vrot.slane %v2240_v39, %v2373_v45 }
 0x33a   : > { %v2449_v30 = vadd.f32 %v2448_v5, %v2439_v18  ;;  %v3260_v29 = vpop.eup %3259  ;;  %v2460_v36 = vadd.f32 %v2459_v26, %v2456_v4  ;;  %v2422_v56 = vmul.f32 %v4689_v8, %v2420_v47  ;;  %v2423_v7 = vmul.f32 %v4692_v42, %v2420_v47 }
 0x33b   : > { %v3262_v9 = vpop.eup %3261  ;;  %v2396_v40 = vmul.f32 %v3260_v29, %v2376_v60  ;;  %v2424_v1 = vmul.f32 %v4695_v48, %v2420_v47  ;;  %v2425_v38 = vmul.f32 %v4698_v3, %v2420_v47  ;;  %v2426_v10 = vmul.f32 %v4701_v19, %v2420_v47 }
 0x33c   : > { %2450 = vst [vmem:[%s3402_s17] sm:$0xff] %v2449_v30  ;;  %v3264_v41 = vpop.eup %3263  ;;  %v2397_v32 = vmul.f32 %v3262_v9, %v2377_v27  ;;  %v2461_v43 = vadd.f32 %v2460_v36, %v2451_v31 }
 0x33d   : > { %v3266_v44 = vpop.eup %3265  ;;  %v2398_v54 = vmul.f32 %v3264_v41, %v2378_v28  ;;  %3269 = vlog2.f32 %v2396_v40 }
 0x33e   : > { %v3268_v35 = vpop.eup %3267  ;;  %v2399_v59 = vmul.f32 %v3266_v44, %v2379_v33  ;;  %3271 = vlog2.f32 %v2397_v32  ;;  %2462 = vst [vmem:[%s3407_s21] sm:$0xff] %v2461_v43 }
 0x33f   : > { %v2400_v62 = vmul.f32 %v3268_v35, %v2380_v37  ;;  %3273 = vlog2.f32 %v2398_v54 }
 0x340   : > { %3275 = vlog2.f32 %v2399_v59 }
 0x341   : > { %3277 = vlog2.f32 %v2400_v62 }
 0x347   : > { %v3270_v50 = vpop.eup %3269 }
 0x348   : > { %v3272_v53 = vpop.eup %3271  ;;  %v2402_v63 = vmul.f32 0.6931472, %v3270_v50 }
 0x349   : > { %v3274_v2 = vpop.eup %3273  ;;  %v2404_v0 = vmul.f32 0.6931472, %v3272_v53 }
 0x34a   : > { %v3276_v13 = vpop.eup %3275  ;;  %v2406_v16 = vmul.f32 0.6931472, %v3274_v2  ;;  %v2411_v17 = vand.u32 2147483647, %v2402_v63 }
 0x34b   : > { %v3278_v6 = vpop.eup %3277  ;;  %v2408_v14 = vmul.f32 0.6931472, %v3276_v13  ;;  %v2412_v34 = vand.u32 2147483647, %v2404_v0 }
 0x34c   : > { %v2410_v39 = vmul.f32 0.6931472, %v3278_v6  ;;  %v2413_v45 = vand.u32 2147483647, %v2406_v16  ;;  %v2427_v15 = vmul.f32 %v2422_v56, %v2411_v17 }
 0x34d   : > { %v2414_v8 = vand.u32 2147483647, %v2408_v14  ;;  %v2428_v49 = vmul.f32 %v2423_v7, %v2412_v34 }
 0x34e   : > { %v2415_v42 = vand.u32 2147483647, %v2410_v39  ;;  %v2429_v12 = vmul.f32 %v2424_v1, %v2413_v45 }
 0x34f   : > { %v2430_v22 = vmul.f32 %v2425_v38, %v2414_v8  ;;  %v2433_v51 = vadd.f32 %v2428_v49, %v2427_v15 }
 0x350   : > { %v2431_v23 = vmul.f32 %v2426_v10, %v2415_v42 }
 0x351   : > { %v2434_v48 = vadd.f32 %v2430_v22, %v2429_v12 }
 0x353   : > { %v2435_v52 = vadd.f32 %v2434_v48, %v2433_v51 }
 0x355   : > { %v2436_v57 = vadd.f32 %v2435_v52, %v2431_v23 }
 0x357   : > { %v2437_v58 = vadd.f32 %v2436_v57, %v2432_v55 }
 0x359   : > { %2438 = vst [vmem:[%s3397_s14] sm:$0xff] %v2437_v58 }
 0x35a PF: > { %s18_s28 = sadd.s32 1, %s3317_s28   ;;  %s4975_s24 = smov %s3309_s26 }
 0x35b   : > { %p15_p11 = scmp.ge.s32.totalorder %s18_s28, 6   ;;  %s4976_s25 = smov %s3313_s27 }
 0x35c   : > { %s4977_s26 = smov %s4980_s29  ;;  %s4978_s27 = smov %s4984_s30 }
 0x35d   :  { %17 = sbr.rel (!%p15_p11) target bundleno = 3 (0x3), region = 113 }

// kernel: _forward.3
= control target key start
LH: loop header
LB: loop body
LE: loop exit
PB: predicated region body
PF: predicated region fallthrough
CT: control target
= control target key end

     0   :  { %s2281_s24 = smov 0   ;;  %s2283_s25 = smov 0   ;;  %s3035_s0 = inlined_call_operand.vmem [shape: bf16[288,256], index: 0, kind: input, shape index: {}]   ;;  %s3036_s1 = inlined_call_operand.vmem [shape: bf16[288,256], index: 1, kind: input, shape index: {}]   ;;  %s3037_s2 = inlined_call_operand.vmem [shape: bf16[256,256], index: 2, kind: input, shape index: {}]   ;;  %s3038_s3 = inlined_call_operand.vmem [shape: bf16[128,128], index: 3, kind: input, shape index: {}]   ;;  %s3039_s4 = inlined_call_operand.vmem [shape: f32[1,128], index: 4, kind: input, shape index: {}]   ;;  %s3040_s5 = inlined_call_operand.vmem [shape: f32[16,128], index: 5, kind: output, shape index: {0}]   ;;  %s3041_s6 = inlined_call_operand.vmem [shape: f32[16,128], index: 6, kind: output, shape index: {1}]   ;;  %s3042_s7 = inlined_call_operand.vmem [shape: f32[16,128], index: 7, kind: output, shape index: {2}]  }
   0x1   :  { %s2285_s26 = smov 0   ;;  %s2287_s27 = smov 0  }
   0x2   :  { %s2289_s28 = smov 0  }
   0x3 LB: > { %s27_s29 = sadd.s32 1, %s2227_s26  ;;  %s30_s30 = sadd.s32 1, %s2231_s27  ;;  %s2235_s28 = sphi %s2289_s28, %s18_s28   ;;  %s2231_s27 = sphi %s2287_s27, %s3051_s27   ;;  %s2227_s26 = sphi %s2285_s26, %s3050_s26   ;;  %s2223_s25 = sphi %s2283_s25, %s3049_s25   ;;  %s2219_s24 = sphi %s2281_s24, %s3048_s24  }
   0x4   : > { %p28_p0 = scmp.ge.s32.totalorder %s27_s29, 2  ;;  %p1775_p1 = scmp.ge.s32.totalorder %s2235_s28, 1 }
   0x5   : > { %p284_p2 = scmp.lt.s32.totalorder %s2235_s28, 5 }
   0x6   : > { %s3053_s29 = smov (%p28_p0, %s27_s29), 0  ;;  %s3055_s30 = smov (!%p28_p0, %s30_s30), %s2231_s27 }
   0x7   : > { %p285_p3 = pnand %p1775_p1, %p284_p2  ;;  %p32_p4 = scmp.ge.s32.totalorder %s3055_s30, 2 }
   0x8   : > { %s1776_s8 = sshll.u32 (!%p285_p3), %s2223_s25, 1  ;;  %p356_p5 = scmp.lt.s32.totalorder (!%p285_p3), %s2223_s25, 1 }
   0x9   : > { %s3057_s30 = smov (%p32_p4, %s3055_s30), 0  ;;  %288 = sbr.rel (%p285_p3) target bundleno = 711 (0x2c7), region = 40 }
   0xa   : > { %s335_s9 = sadd.s32 (!%p285_p3), %s2219_s24, %s1776_s8  ;;  %p1785_p7 = scmp.ne.s32.totalorder (!%p285_p3), %s2219_s24, 0 }
   0xb   : > { %s336_s10 = smul.u32 (!%p285_p3), 9, %s335_s9 }
   0xd   : > { %p337_p6 = scmp.lt.s32.totalorder (!%p285_p3), %s336_s10, 35 }
  0x10   : > { %s3059_s25 = smov (!%p356_p5, %s2223_s25), 1  ;;  %s3061_s10 = smov (!%p337_p6, %s336_s10), 35 }
  0x11   : > { %s1782_s11 = sshll.u32 %s3059_s25, 3  ;;  %s1861_s18 = sshll.u32 %s3061_s10, 3  ;;  %v2237_v0 = vmov (!%p1785_p7), 0.0  }
  0x12   : > { %s2317_s14 = scalar_lea.vmem %s3040_s5, %s1782_s11  ;;  %s2322_s17 = scalar_lea.vmem %s3041_s6, %s1782_s11 }
  0x13   : > { %s2327_s21 = scalar_lea.vmem %s3042_s7, %s1782_s11  ;;  %s2332_s25 = scalar_lea.vmem %s3035_s0, %s1861_s18  ;;  %373 = vst [vmem:[%s2317_s14] sm:$0xff] (!%p1785_p7), %v2237_v0  ;;  %374 = vst [vmem:[%s2322_s17] sm:$0xff] (!%p1785_p7), %v2237_v0 }
  0x14   : > { %s2337_s13 = scalar_lea.vmem %s3036_s1, %s1861_s18  ;;  %372 = sbr.rel (%p1785_p7) target bundleno = 27 (0x1b), region = 44  ;;  %375 = vst [vmem:[%s2327_s21] sm:$0xff] (!%p1785_p7), %v2237_v0 }
  0x1b PF: > { %s2343_s10 = smul.u32 72, %s335_s9 }
  0x1d   : > { %p1787_p8 = scmp.ge.s32.totalorder %s2343_s10, 258 }
  0x1f   : > { %382 = sbr.rel (%p1787_p8) target bundleno = 711 (0x2c7), region = 48 }
  0x26   : > { %v2005_v1 = vld [vmem:[%s3037_s2 + $0x4] ss:$8 sps:$4 sm:$0xff]   ;;  %v2007_v2 = vld [vmem:[%s3037_s2] ss:$8 sps:$4 sm:$0xff]   ;;  %v2008_v3 = vld [vmem:[%s3037_s2 + $0x14] ss:$8 sps:$4 sm:$0xff]  }
  0x27   : > { %631 = vmatprep.subr.bf16.mxu0 %v2005_v1  ;;  %768 = vmatprep.subr.bf16.mxu1 %v2005_v1  ;;  %v2010_v4 = vld [vmem:[%s3037_s2 + $0x10] ss:$8 sps:$4 sm:$0xff]   ;;  %v2011_v5 = vld [vmem:[%s3037_s2 + $0x24] ss:$8 sps:$4 sm:$0xff]   ;;  %v2013_v6 = vld [vmem:[%s3037_s2 + $0x20] ss:$8 sps:$4 sm:$0xff]  }
  0x28   : > { %632 = vmatpush1.bf16.msra.mxu0 %v2007_v2  ;;  %769 = vmatpush1.bf16.msra.mxu1 %v2007_v2  ;;  %v2014_v7 = vld [vmem:[%s3037_s2 + $0x34] ss:$8 sps:$4 sm:$0xff]   ;;  %v2016_v8 = vld [vmem:[%s3037_s2 + $0x30] ss:$8 sps:$4 sm:$0xff]   ;;  %v2017_v9 = vld [vmem:[%s3037_s2 + $0x44] ss:$8 sps:$4 sm:$0xff]  }
  0x29   : > { %633 = vmatprep.subr.bf16.mxu0 %v2008_v3  ;;  %770 = vmatprep.subr.bf16.mxu1 %v2008_v3  ;;  %v2019_v10 = vld [vmem:[%s3037_s2 + $0x40] ss:$8 sps:$4 sm:$0xff]   ;;  %v2020_v11 = vld [vmem:[%s3037_s2 + $0x54] ss:$8 sps:$4 sm:$0xff]   ;;  %v2022_v12 = vld [vmem:[%s3037_s2 + $0x50] ss:$8 sps:$4 sm:$0xff]  }
  0x2a   : > { %v2023_v13 = vld [vmem:[%s3037_s2 + $0x64] ss:$8 sps:$4 sm:$0xff]   ;;  %v2025_v15 = vld [vmem:[%s3037_s2 + $0x60] ss:$8 sps:$4 sm:$0xff]   ;;  %v2026_v17 = vld [vmem:[%s3037_s2 + $0x74] ss:$8 sps:$4 sm:$0xff]  }
  0x2b   : > { %v2055_v14 = vld [vmem:[%s2332_s25 + $0x4] ss:$8 sps:$4 sm:$0xff]   ;;  %v2028_v18 = vld [vmem:[%s3037_s2 + $0x70] ss:$8 sps:$4 sm:$0xff]   ;;  %v2031_v20 = vld [vmem:[%s3037_s2 + $0x80] ss:$8 sps:$4 sm:$0xff]  }
  0x2c   : > { %634 = vmatpush1.bf16.msra.mxu0 %v2010_v4  ;;  %771 = vmatpush1.bf16.msra.mxu1 %v2010_v4  ;;  %v2058_v16 = vld [vmem:[%s2337_s13 + $0x4] ss:$8 sps:$4 sm:$0xff]   ;;  %v2032_v21 = vld [vmem:[%s3037_s2 + $0x94] ss:$8 sps:$4 sm:$0xff]   ;;  %v2034_v22 = vld [vmem:[%s3037_s2 + $0x90] ss:$8 sps:$4 sm:$0xff]  }
  0x2d   : > { %635 = vmatprep.subr.bf16.mxu0 %v2011_v5  ;;  %772 = vmatprep.subr.bf16.mxu1 %v2011_v5  ;;  %v2029_v19 = vld [vmem:[%s3037_s2 + $0x84] ss:$8 sps:$4 sm:$0xff]   ;;  %v2037_v24 = vld [vmem:[%s3037_s2 + $0xa0] ss:$8 sps:$4 sm:$0xff]   ;;  %v2038_v25 = vld [vmem:[%s3037_s2 + $0xb4] ss:$8 sps:$4 sm:$0xff]  }
  0x2e   : > { %663 = vmatprep.mubr.bf16.mxu0 %v2055_v14  ;;  %800 = vmatprep.mubr.bf16.mxu1 %v2058_v16  ;;  %v2035_v23 = vld [vmem:[%s3037_s2 + $0xa4] ss:$8 sps:$4 sm:$0xff]   ;;  %v2040_v26 = vld [vmem:[%s3037_s2 + $0xb0] ss:$8 sps:$4 sm:$0xff]   ;;  %v2043_v28 = vld [vmem:[%s3037_s2 + $0xc0] ss:$8 sps:$4 sm:$0xff]  }
  0x2f   : > { %v2041_v27 = vld [vmem:[%s3037_s2 + $0xc4] ss:$8 sps:$4 sm:$0xff]   ;;  %v2044_v29 = vld [vmem:[%s3037_s2 + $0xd4] ss:$8 sps:$4 sm:$0xff]   ;;  %v2046_v30 = vld [vmem:[%s3037_s2 + $0xd0] ss:$8 sps:$4 sm:$0xff]  }
  0x30   : > { %636 = vmatpush1.bf16.msra.mxu0 %v2013_v6  ;;  %773 = vmatpush1.bf16.msra.mxu1 %v2013_v6  ;;  %v2047_v31 = vld [vmem:[%s3037_s2 + $0xe4] ss:$8 sps:$4 sm:$0xff]   ;;  %v2049_v32 = vld [vmem:[%s3037_s2 + $0xe0] ss:$8 sps:$4 sm:$0xff]   ;;  %v2050_v33 = vld [vmem:[%s3037_s2 + $0xf4] ss:$8 sps:$4 sm:$0xff]  }
  0x31   : > { %637 = vmatprep.subr.bf16.mxu0 %v2014_v7  ;;  %774 = vmatprep.subr.bf16.mxu1 %v2014_v7  ;;  %v2052_v34 = vld [vmem:[%s3037_s2 + $0xf0] ss:$8 sps:$4 sm:$0xff]   ;;  %v2053_v35 = vld [vmem:[%s2332_s25] ss:$8 sps:$4 sm:$0xff]   ;;  %v2059_v37 = vld [vmem:[%s2332_s25 + $0x14] ss:$8 sps:$4 sm:$0xff]  }
  0x32   : > { %v2056_v36 = vld [vmem:[%s2337_s13] ss:$8 sps:$4 sm:$0xff]   ;;  %v2061_v38 = vld [vmem:[%s2337_s13 + $0x14] ss:$8 sps:$4 sm:$0xff]   ;;  %v2238_v39 = vmov 0.0   ;;  %vm2239_vm0 = vmmov 0  }
  0x33   : > { %v2081_v40 = vld [vmem:[%s3038_s3] sm:$0xff]   ;;  %v2082_v41 = vld [vmem:[%s3038_s3 + $0x8] sm:$0xff]   ;;  %v2063_v42 = vld [vmem:[%s2332_s25 + $0x10] ss:$8 sps:$4 sm:$0xff]   ;;  %s1294_s22 = sadd.s32 72, %s2343_s10 }
  0x34   : > { %638 = vmatpush1.bf16.msra.mxu0 %v2016_v8  ;;  %775 = vmatpush1.bf16.msra.mxu1 %v2016_v8  ;;  %v2064_v43 = vld [vmem:[%s2337_s13 + $0x10] ss:$8 sps:$4 sm:$0xff]   ;;  %v2065_v44 = vld [vmem:[%s2332_s25 + $0x24] ss:$8 sps:$4 sm:$0xff]   ;;  %v2069_v47 = vld [vmem:[%s2332_s25 + $0x20] ss:$8 sps:$4 sm:$0xff]  }
  0x35   : > { %639 = vmatprep.subr.bf16.mxu0 %v2017_v9  ;;  %776 = vmatprep.subr.bf16.mxu1 %v2017_v9  ;;  %v2067_v45 = vld [vmem:[%s2337_s13 + $0x24] ss:$8 sps:$4 sm:$0xff]   ;;  %v2083_v46 = vld [vmem:[%s3038_s3 + $0x10] sm:$0xff]   ;;  %v2070_v48 = vld [vmem:[%s2337_s13 + $0x20] ss:$8 sps:$4 sm:$0xff]   ;;  %p1848_p9 = scmp.gt.s32.totalorder %s1294_s22, 258 }
  0x36   : > { %v2071_v49 = vld [vmem:[%s2332_s25 + $0x34] ss:$8 sps:$4 sm:$0xff]   ;;  %v423_v51 = vld [vmem:[%s2332_s25 + $0x40] sm:$0xff]  ;;  %v2075_v53 = vld [vmem:[%s2332_s25 + $0x30] ss:$8 sps:$4 sm:$0xff]  }
  0x37   : > { %v2073_v50 = vld [vmem:[%s2337_s13 + $0x34] ss:$8 sps:$4 sm:$0xff]   ;;  %v720_v52 = vld [vmem:[%s2337_s13 + $0x40] sm:$0xff]  ;;  %v2076_v54 = vld [vmem:[%s2337_s13 + $0x30] ss:$8 sps:$4 sm:$0xff]   ;;  %v1797_v55 = vcombine.high %v423_v51, %v423_v51  ;;  %v1796_v57 = vcombine.low %v423_v51, %v423_v51 }
  0x38   : > { %640 = vmatpush1.bf16.msra.mxu0 %v2019_v10  ;;  %777 = vmatpush1.bf16.msra.mxu1 %v2019_v10  ;;  %v1839_v56 = vcombine.high %v720_v52, %v720_v52  ;;  %v1838_v58 = vcombine.low %v720_v52, %v720_v52  ;;  %v2084_v59 = vld [vmem:[%s3038_s3 + $0x18] sm:$0xff]   ;;  %v2085_v60 = vld [vmem:[%s3038_s3 + $0x20] sm:$0xff]   ;;  %v2086_v61 = vld [vmem:[%s3038_s3 + $0x28] sm:$0xff]  }
  0x39   : > { %641 = vmatprep.subr.bf16.mxu0 %v2020_v11  ;;  %778 = vmatprep.subr.bf16.mxu1 %v2020_v11  ;;  %v2087_v62 = vld [vmem:[%s3038_s3 + $0x30] sm:$0xff]   ;;  %v2088_v63 = vld [vmem:[%s3038_s3 + $0x38] sm:$0xff]  }
  0x3c   : > { %642 = vmatpush1.bf16.msra.mxu0 %v2022_v12  ;;  %779 = vmatpush1.bf16.msra.mxu1 %v2022_v12 }
  0x3d   : > { %643 = vmatprep.subr.bf16.mxu0 %v2023_v13  ;;  %780 = vmatprep.subr.bf16.mxu1 %v2023_v13 }
  0x40   : > { %644 = vmatpush1.bf16.msra.mxu0 %v2025_v15  ;;  %781 = vmatpush1.bf16.msra.mxu1 %v2025_v15 }
  0x41   : > { %645 = vmatprep.subr.bf16.mxu0 %v2026_v17  ;;  %782 = vmatprep.subr.bf16.mxu1 %v2026_v17 }
  0x44   : > { %646 = vmatpush1.bf16.msra.mxu0 %v2028_v18  ;;  %783 = vmatpush1.bf16.msra.mxu1 %v2028_v18 }
  0x45   : > { %647 = vmatprep.subr.bf16.mxu0 %v2029_v19  ;;  %784 = vmatprep.subr.bf16.mxu1 %v2029_v19 }
  0x48   : > { %648 = vmatpush1.bf16.msra.mxu0 %v2031_v20  ;;  %785 = vmatpush1.bf16.msra.mxu1 %v2031_v20 }
  0x49   : > { %649 = vmatprep.subr.bf16.mxu0 %v2032_v21  ;;  %786 = vmatprep.subr.bf16.mxu1 %v2032_v21 }
  0x4c   : > { %650 = vmatpush1.bf16.msra.mxu0 %v2034_v22  ;;  %787 = vmatpush1.bf16.msra.mxu1 %v2034_v22 }
  0x4d   : > { %651 = vmatprep.subr.bf16.mxu0 %v2035_v23  ;;  %788 = vmatprep.subr.bf16.mxu1 %v2035_v23 }
  0x50   : > { %652 = vmatpush1.bf16.msra.mxu0 %v2037_v24  ;;  %789 = vmatpush1.bf16.msra.mxu1 %v2037_v24 }
  0x51   : > { %653 = vmatprep.subr.bf16.mxu0 %v2038_v25  ;;  %790 = vmatprep.subr.bf16.mxu1 %v2038_v25 }
  0x54   : > { %654 = vmatpush1.bf16.msra.mxu0 %v2040_v26  ;;  %791 = vmatpush1.bf16.msra.mxu1 %v2040_v26 }
  0x55   : > { %655 = vmatprep.subr.bf16.mxu0 %v2041_v27  ;;  %792 = vmatprep.subr.bf16.mxu1 %v2041_v27 }
  0x58   : > { %656 = vmatpush1.bf16.msra.mxu0 %v2043_v28  ;;  %793 = vmatpush1.bf16.msra.mxu1 %v2043_v28 }
  0x59   : > { %657 = vmatprep.subr.bf16.mxu0 %v2044_v29  ;;  %794 = vmatprep.subr.bf16.mxu1 %v2044_v29 }
  0x5c   : > { %658 = vmatpush1.bf16.msra.mxu0 %v2046_v30  ;;  %795 = vmatpush1.bf16.msra.mxu1 %v2046_v30 }
  0x5d   : > { %659 = vmatprep.subr.bf16.mxu0 %v2047_v31  ;;  %796 = vmatprep.subr.bf16.mxu1 %v2047_v31 }
  0x60   : > { %660 = vmatpush1.bf16.msra.mxu0 %v2049_v32  ;;  %797 = vmatpush1.bf16.msra.mxu1 %v2049_v32 }
  0x61   : > { %661 = vmatprep.subr.bf16.mxu0 %v2050_v33  ;;  %798 = vmatprep.subr.bf16.mxu1 %v2050_v33 }
  0x64   : > { %662 = vmatpush1.bf16.msra.mxu0 %v2052_v34  ;;  %799 = vmatpush1.bf16.msra.mxu1 %v2052_v34 }
  0x65   : > { %1889 = vmatprep.subr.bf16.mxu0 %v2238_v39  ;;  %1925 = vmatprep.subr.bf16.mxu1 %v2238_v39 }
  0x67   : > { %664 = vmatmul.mubr.bf16.vlgmr.msra.gmra.mrb[0].mxu0 %v2053_v35  ;;  %801 = vmatmul.mubr.bf16.vlgmr.msra.gmra.mrb[0].mxu1 %v2056_v36 }
  0x68   : > { %673 = vmatprep.mubr.bf16.mxu0 %v2059_v37  ;;  %810 = vmatprep.mubr.bf16.mxu1 %v2061_v38 }
  0x69   : > { %1890 = vmatpush3.bf16.msra.mxu0 %v2081_v40  ;;  %1926 = vmatpush3.bf16.msra.mxu1 %v2081_v40 }
  0x6a   : > { %1891 = vmatprep.subr.bf16.mxu0 %v2238_v39  ;;  %1927 = vmatprep.subr.bf16.mxu1 %v2238_v39 }
  0x6d   : > { %1892 = vmatpush3.bf16.msra.mxu0 %v2082_v41  ;;  %1928 = vmatpush3.bf16.msra.mxu1 %v2082_v41 }
  0x6e   : > { %1893 = vmatprep.subr.bf16.mxu0 %v2238_v39  ;;  %1929 = vmatprep.subr.bf16.mxu1 %v2238_v39 }
  0x6f   : > { %674 = vmatmul.mubr.bf16.gmra.mrb[4].mxu0 %v2063_v42  ;;  %811 = vmatmul.mubr.bf16.gmra.mrb[4].mxu1 %v2064_v43 }
  0x70   : > { %683 = vmatprep.mubr.bf16.mxu0 %v2065_v44  ;;  %820 = vmatprep.mubr.bf16.mxu1 %v2067_v45 }
  0x71   : > { %1894 = vmatpush3.bf16.msra.mxu0 %v2083_v46  ;;  %1930 = vmatpush3.bf16.msra.mxu1 %v2083_v46 }
  0x72   : > { %1895 = vmatprep.subr.bf16.mxu0 %v2238_v39  ;;  %1931 = vmatprep.subr.bf16.mxu1 %v2238_v39 }
  0x75   : > { %1896 = vmatpush3.bf16.msra.mxu0 %v2084_v59  ;;  %1932 = vmatpush3.bf16.msra.mxu1 %v2084_v59 }
  0x76   : > { %1897 = vmatprep.subr.bf16.mxu0 %v2238_v39  ;;  %1933 = vmatprep.subr.bf16.mxu1 %v2238_v39 }
  0x77   : > { %684 = vmatmul.mubr.bf16.gmra.mrb[8].mxu0 %v2069_v47  ;;  %821 = vmatmul.mubr.bf16.gmra.mrb[8].mxu1 %v2070_v48 }
  0x78   : > { %693 = vmatprep.mubr.bf16.mxu0 %v2071_v49  ;;  %830 = vmatprep.mubr.bf16.mxu1 %v2073_v50 }
  0x79   : > { %1898 = vmatpush3.bf16.msra.mxu0 %v2085_v60  ;;  %1934 = vmatpush3.bf16.msra.mxu1 %v2085_v60 }
  0x7a   : > { %1899 = vmatprep.subr.bf16.mxu0 %v2238_v39  ;;  %1935 = vmatprep.subr.bf16.mxu1 %v2238_v39 }
  0x7d   : > { %1900 = vmatpush3.bf16.msra.mxu0 %v2086_v61  ;;  %1936 = vmatpush3.bf16.msra.mxu1 %v2086_v61 }
  0x7e   : > { %1901 = vmatprep.subr.bf16.mxu0 %v2238_v39  ;;  %1937 = vmatprep.subr.bf16.mxu1 %v2238_v39 }
  0x7f   : > { %694 = vmatmul.mubr.bf16.gmra.mrb[12].mxu0 %v2075_v53  ;;  %831 = vmatmul.mubr.bf16.gmra.mrb[12].mxu1 %v2076_v54 }
  0x80   : > { %703 = vmatprep.mubr.bf16.mxu0 %v1797_v55  ;;  %840 = vmatprep.mubr.bf16.mxu1 %v1839_v56 }
  0x81   : > { %1902 = vmatpush3.bf16.msra.mxu0 %v2087_v62  ;;  %1938 = vmatpush3.bf16.msra.mxu1 %v2087_v62 }
  0x82   : > { %1903 = vmatprep.subr.bf16.mxu0 %v2238_v39  ;;  %1939 = vmatprep.subr.bf16.mxu1 %v2238_v39 }
  0x85   : > { %1904 = vmatpush3.bf16.msra.mxu0 %v2088_v63  ;;  %1940 = vmatpush3.bf16.msra.mxu1 %v2088_v63 }
  0x87   : > { %704 = vmatmul.mubr.bf16.gmra.mrb[16].mxu0 %v1796_v57  ;;  %841 = vmatmul.mubr.bf16.gmra.mrb[16].mxu1 %v1838_v58 }
  0x88   : > { %1905 = vmatprep.mubr.msk.bf16.mxu0 %vm2239_vm0, %v2238_v39  ;;  %1941 = vmatprep.mubr.msk.bf16.mxu1 %vm2239_vm0, %v2238_v39 }
 0x13a   : > { %v665_v0 = vpop.f32.mrb[0].mxu0  ;;  %v802_v1 = vpop.f32.mrb[0].mxu1 }
 0x13b   : > { %v865_v2 = vmul.f32 %v665_v0, %v665_v0  ;;  %v1089_v3 = vmul.f32 %v802_v1, %v802_v1  ;;  %v667_v4 = vpop.f32.mrb[1].mxu0  ;;  %v804_v5 = vpop.f32.mrb[1].mxu1 }
 0x13c   : > { %v874_v6 = vmul.f32 %v667_v4, %v667_v4  ;;  %v1098_v7 = vmul.f32 %v804_v5, %v804_v5  ;;  %v669_v8 = vpop.f32.mrb[2].mxu0  ;;  %v806_v9 = vpop.f32.mrb[2].mxu1 }
 0x13d   : > { %v866_v10 = vmul.f32 %v669_v8, %v669_v8  ;;  %v1090_v11 = vmul.f32 %v806_v9, %v806_v9  ;;  %v671_v12 = vpop.f32.mrb[3].mxu0  ;;  %v808_v13 = vpop.f32.mrb[3].mxu1 }
 0x13e   : > { %v883_v14 = vadd.f32 %v874_v6, %v865_v2  ;;  %v1107_v15 = vadd.f32 %v1098_v7, %v1089_v3  ;;  %v875_v16 = vmul.f32 %v671_v12, %v671_v12  ;;  %v1099_v17 = vmul.f32 %v808_v13, %v808_v13 }
 0x140   : > { %v2504_v18 = vmax.f32 %v883_v14, 1e-08  ;;  %v2506_v19 = vmax.f32 %v1107_v15, 1e-08  ;;  %v884_v20 = vadd.f32 %v875_v16, %v866_v10  ;;  %v1108_v21 = vadd.f32 %v1099_v17, %v1090_v11 }
 0x142   : > { %2089 = vrsqrt.f32 %v2504_v18  ;;  %v2509_v22 = vmax.f32 %v884_v20, 1e-08  ;;  %v2511_v23 = vmax.f32 %v1108_v21, 1e-08  ;;  %v675_v24 = vpop.f32.mrb[4].mxu0  ;;  %v812_v25 = vpop.f32.mrb[4].mxu1 }
 0x143   : > { %2091 = vrsqrt.f32 %v2506_v19  ;;  %v867_v26 = vmul.f32 %v675_v24, %v675_v24  ;;  %v1091_v27 = vmul.f32 %v812_v25, %v812_v25  ;;  %v677_v28 = vpop.f32.mrb[5].mxu0  ;;  %v814_v29 = vpop.f32.mrb[5].mxu1  ;;  %vm903_vm1 = vcmp.eq.f32.partialorder %v2504_v18, inf }
 0x144   : > { %2093 = vrsqrt.f32 %v2509_v22  ;;  %v876_v30 = vmul.f32 %v677_v28, %v677_v28  ;;  %v1100_v31 = vmul.f32 %v814_v29, %v814_v29  ;;  %v679_v32 = vpop.f32.mrb[6].mxu0  ;;  %v816_v33 = vpop.f32.mrb[6].mxu1  ;;  %vm905_vm2 = vcmp.eq.f32.partialorder %v2504_v18, 0.0 }
 0x145   : > { %2095 = vrsqrt.f32 %v2511_v23  ;;  %v868_v34 = vmul.f32 %v679_v32, %v679_v32  ;;  %v1092_v35 = vmul.f32 %v816_v33, %v816_v33  ;;  %v681_v36 = vpop.f32.mrb[7].mxu0  ;;  %v818_v37 = vpop.f32.mrb[7].mxu1  ;;  %v906_v47 = vand.u32 2147483648, %v2504_v18 }
 0x146   : > { %v885_v38 = vadd.f32 %v876_v30, %v867_v26  ;;  %v1109_v40 = vadd.f32 %v1100_v31, %v1091_v27  ;;  %v877_v41 = vmul.f32 %v681_v36, %v681_v36  ;;  %v1101_v42 = vmul.f32 %v818_v37, %v818_v37 }
 0x147   : > { %vm910_vm3 = vcmp.eq.f32.partialorder %v2509_v22, inf  ;;  %vm912_vm4 = vcmp.eq.f32.partialorder %v2509_v22, 0.0  ;;  %v913_v51 = vand.u32 2147483648, %v2509_v22  ;;  %vm1127_vm5 = vcmp.eq.f32.partialorder %v2506_v19, inf }
 0x148   : > { %v2516_v43 = vmax.f32 %v885_v38, 1e-08  ;;  %v886_v44 = vadd.f32 %v877_v41, %v868_v34  ;;  %v1110_v45 = vadd.f32 %v1101_v42, %v1092_v35  ;;  %v2519_v46 = vmax.f32 %v1109_v40, 1e-08 }
 0x149   : > { %v1130_v56 = vand.u32 2147483648, %v2506_v19  ;;  %vm1134_vm6 = vcmp.eq.f32.partialorder %v2511_v23, inf  ;;  %vm1129_vm7 = vcmp.eq.f32.partialorder %v2506_v19, 0.0  ;;  %vm1136_vm8 = vcmp.eq.f32.partialorder %v2511_v23, 0.0 }
 0x14a   : > { %2097 = vrsqrt.f32 %v2516_v43  ;;  %v2525_v48 = vmax.f32 %v886_v44, 1e-08  ;;  %v685_v49 = vpop.f32.mrb[8].mxu0  ;;  %v822_v50 = vpop.f32.mrb[8].mxu1  ;;  %v2532_v58 = vmax.f32 %v1110_v45, 1e-08 }
 0x14b   : > { %v869_v52 = vmul.f32 %v685_v49, %v685_v49  ;;  %v1093_v53 = vmul.f32 %v822_v50, %v822_v50  ;;  %v687_v54 = vpop.f32.mrb[9].mxu0  ;;  %v824_v55 = vpop.f32.mrb[9].mxu1  ;;  %v1137_v14 = vand.u32 2147483648, %v2511_v23  ;;  %vm917_vm9 = vcmp.eq.f32.partialorder %v2516_v43, inf }
 0x14c   : > { %v2090_v57 = vpop.eup %2089  ;;  %2099 = vrsqrt.f32 %v2525_v48  ;;  %v878_v59 = vmul.f32 %v687_v54, %v687_v54  ;;  %v1102_v60 = vmul.f32 %v824_v55, %v824_v55  ;;  %v689_v61 = vpop.f32.mrb[10].mxu0  ;;  %vm919_vm10 = vcmp.eq.f32.partialorder %v2516_v43, 0.0 }
 0x14d   : > { %v826_v62 = vpop.f32.mrb[10].mxu1  ;;  %v2092_v63 = vpop.eup %2091  ;;  %2101 = vrsqrt.f32 %v2519_v46  ;;  %v870_v0 = vmul.f32 %v689_v61, %v689_v61  ;;  %v902_v4 = vmul.f32 %v2090_v57, %v2504_v18  ;;  %vm924_vm11 = vcmp.eq.f32.partialorder %v2525_v48, inf }
 0x14e   : > { %v1094_v1 = vmul.f32 %v826_v62, %v826_v62  ;;  %v691_v2 = vpop.f32.mrb[11].mxu0  ;;  %v828_v3 = vpop.f32.mrb[11].mxu1  ;;  %v887_v6 = vadd.f32 %v878_v59, %v869_v52  ;;  %v1111_v7 = vadd.f32 %v1102_v60, %v1093_v53  ;;  %v1126_v13 = vmul.f32 %v2092_v63, %v2506_v19 }
 0x14f   : > { %v2094_v5 = vpop.eup %2093  ;;  %v879_v8 = vmul.f32 %v691_v2, %v691_v2  ;;  %v1103_v9 = vmul.f32 %v828_v3, %v828_v3  ;;  %v904_v11 = vsel %vm903_vm1, %v2504_v18, %v902_v4  ;;  %2103 = vrsqrt.f32 %v2532_v58 }
 0x150   : > { %v2096_v10 = vpop.eup %2095  ;;  %v909_v12 = vmul.f32 %v2094_v5, %v2509_v22  ;;  %v2545_v15 = vmax.f32 %v887_v6, 1e-08  ;;  %v2547_v16 = vmax.f32 %v1111_v7, 1e-08  ;;  %v907_v28 = vsel %vm905_vm2, %v906_v47, %v904_v11 }
 0x151   : > { %v888_v17 = vadd.f32 %v879_v8, %v870_v0  ;;  %v1112_v20 = vadd.f32 %v1103_v9, %v1094_v1  ;;  %v1133_v24 = vmul.f32 %v2096_v10, %v2511_v23  ;;  %v1128_v30 = vsel %vm1127_vm5, %v2506_v19, %v1126_v13 }
 0x152   : > { %v911_v21 = vsel %vm910_vm3, %v2509_v22, %v909_v12  ;;  %v695_v26 = vpop.f32.mrb[12].mxu0  ;;  %v832_v27 = vpop.f32.mrb[12].mxu1  ;;  %2105 = vrsqrt.f32 %v2545_v15  ;;  %v1131_v55 = vsel %vm1129_vm7, %v1130_v56, %v1128_v30  ;;  %v920_v2 = vand.u32 2147483648, %v2516_v43 }
 0x153   : > { %v2555_v25 = vmax.f32 %v888_v17, 1e-08  ;;  %v914_v29 = vsel %vm912_vm4, %v913_v51, %v911_v21  ;;  %v871_v31 = vmul.f32 %v695_v26, %v695_v26  ;;  %v1095_v32 = vmul.f32 %v832_v27, %v832_v27  ;;  %v697_v33 = vpop.f32.mrb[13].mxu0  ;;  %v834_v34 = vpop.f32.mrb[13].mxu1 }
 0x154   : > { %v964_v35 = vpack.c.bf16 %v914_v29, %v907_v28  ;;  %v2098_v36 = vpop.eup %2097  ;;  %2107 = vrsqrt.f32 %v2547_v16  ;;  %v2566_v37 = vmax.f32 %v1112_v20, 1e-08  ;;  %v880_v18 = vmul.f32 %v697_v33, %v697_v33  ;;  %v699_v22 = vpop.f32.mrb[14].mxu0 }
 0x155   : > { %v1104_v38 = vmul.f32 %v834_v34, %v834_v34  ;;  %v836_v40 = vpop.f32.mrb[14].mxu1  ;;  %2109 = vrsqrt.f32 %v2555_v25  ;;  %v872_v41 = vmul.f32 %v699_v22, %v699_v22  ;;  %v701_v44 = vpop.f32.mrb[15].mxu0  ;;  %v1135_v47 = vsel %vm1134_vm6, %v2511_v23, %v1133_v24 }
 0x156   : > { %v1096_v42 = vmul.f32 %v836_v40, %v836_v40  ;;  %v838_v45 = vpop.f32.mrb[15].mxu1  ;;  %1906 = vmatmul.mubr.bf16.vlgmr.msra.gmra.mrb[20].mxu0 %v964_v35  ;;  %v2100_v49 = vpop.eup %2099  ;;  %v889_v50 = vadd.f32 %v880_v18, %v871_v31  ;;  %v881_v52 = vmul.f32 %v701_v44, %v701_v44  ;;  %v1138_v57 = vsel %vm1136_vm8, %v1137_v14, %v1135_v47 }
 0x157   : > { %v1113_v51 = vadd.f32 %v1104_v38, %v1095_v32  ;;  %v1105_v53 = vmul.f32 %v838_v45, %v838_v45  ;;  %1909 = vmatprep.mubr.msk.bf16.mxu0 %vm2239_vm0, %v2238_v39  ;;  %v2102_v54 = vpop.eup %2101  ;;  %v916_v59 = vmul.f32 %v2098_v36, %v2516_v43  ;;  %v923_v60 = vmul.f32 %v2100_v49, %v2525_v48 }
 0x158   : > { %v2583_v61 = vmax.f32 %v889_v50, 1e-08  ;;  %v890_v63 = vadd.f32 %v881_v52, %v872_v41  ;;  %2111 = vrsqrt.f32 %v2566_v37  ;;  %v1188_v1 = vpack.c.bf16 %v1138_v57, %v1131_v55 }
 0x159   : > { %v2585_v62 = vmax.f32 %v1113_v51, 1e-08  ;;  %v1114_v0 = vadd.f32 %v1105_v53, %v1096_v42  ;;  %v918_v4 = vsel %vm917_vm9, %v2516_v43, %v916_v59  ;;  %v2104_v5 = vpop.eup %2103  ;;  %v925_v10 = vsel %vm924_vm11, %v2525_v48, %v923_v60 }
 0x15a   : > { %2113 = vrsqrt.f32 %v2583_v61  ;;  %v2591_v19 = vmax.f32 %v890_v63, 1e-08  ;;  %v705_v56 = vpop.f32.mrb[16].mxu0  ;;  %v842_v3 = vpop.f32.mrb[16].mxu1  ;;  %1942 = vmatmul.mubr.bf16.vlgmr.msra.gmra.mrb[20].mxu1 %v1188_v1  ;;  %v927_v17 = vand.u32 2147483648, %v2525_v48  ;;  %v921_v26 = vsel %vm919_vm10, %v920_v2, %v918_v4 }
 0x15b   : > { %v2593_v23 = vmax.f32 %v1114_v0, 1e-08  ;;  %2115 = vrsqrt.f32 %v2585_v62  ;;  %v873_v6 = vmul.f32 %v705_v56, %v705_v56  ;;  %v1097_v7 = vmul.f32 %v842_v3, %v842_v3  ;;  %v707_v8 = vpop.f32.mrb[17].mxu0  ;;  %v844_v9 = vpop.f32.mrb[17].mxu1  ;;  %1945 = vmatprep.mubr.msk.bf16.mxu1 %vm2239_vm0, %v2238_v39 }
 0x15c   : > { %2117 = vrsqrt.f32 %v2591_v19  ;;  %v882_v11 = vmul.f32 %v707_v8, %v707_v8  ;;  %v1106_v12 = vmul.f32 %v844_v9, %v844_v9  ;;  %v709_v13 = vpop.f32.mrb[18].mxu0  ;;  %v846_v14 = vpop.f32.mrb[18].mxu1  ;;  %vm926_vm12 = vcmp.eq.f32.partialorder %v2525_v48, 0.0 }
 0x15d   : > { %v2106_v20 = vpop.eup %2105  ;;  %2119 = vrsqrt.f32 %v2593_v23  ;;  %v710_v21 = vpop.f32.mrb[19].mxu0  ;;  %v1140_v27 = vmul.f32 %v2102_v54, %v2519_v46  ;;  %v928_v31 = vsel %vm926_vm12, %v927_v17, %v925_v10  ;;  %vm1141_vm13 = vcmp.eq.f32.partialorder %v2519_v46, inf }
 0x15e   : > { %v847_v24 = vpop.f32.mrb[19].mxu1  ;;  %v2108_v28 = vpop.eup %2107  ;;  %v891_v29 = vadd.f32 %v882_v11, %v873_v6  ;;  %v1115_v30 = vadd.f32 %v1106_v12, %v1097_v7  ;;  %v965_v33 = vpack.c.bf16 %v928_v31, %v921_v26  ;;  %v1144_v35 = vand.u32 2147483648, %v2519_v46 }
 0x15f   : > { %v2110_v32 = vpop.eup %2109  ;;  %v1142_v34 = vsel %vm1141_vm13, %v2519_v46, %v1140_v27  ;;  %v1147_v36 = vmul.f32 %v2104_v5, %v2532_v58  ;;  %vm1143_vm14 = vcmp.eq.f32.partialorder %v2519_v46, 0.0  ;;  %vm1148_vm15 = vcmp.eq.f32.partialorder %v2532_v58, inf }
 0x160   : > { %v2613_v43 = vmax.f32 %v891_v29, 1e-08  ;;  %v2615_v18 = vmax.f32 %v1115_v30, 1e-08  ;;  %1910 = vmatmul.mubr.bf16.gmra.mrb[24].mxu0 %v965_v33  ;;  %v1145_v48 = vsel %vm1143_vm14, %v1144_v35, %v1142_v34  ;;  %v1151_v22 = vand.u32 2147483648, %v2532_v58 }
 0x161   : > { %v1149_v38 = vsel %vm1148_vm15, %v2532_v58, %v1147_v36  ;;  %v930_v40 = vmul.f32 %v2106_v20, %v2545_v15  ;;  %vm1150_vm1 = vcmp.eq.f32.partialorder %v2532_v58, 0.0  ;;  %1913 = vmatprep.mubr.msk.bf16.mxu0 %vm2239_vm0, %v2238_v39  ;;  %vm931_vm2 = vcmp.eq.f32.partialorder %v2545_v15, inf  ;;  %v2689_v34 = vld [vmem:[%s3039_s4] sm:$0x1] }
 0x162   : > { %2121 = vrsqrt.f32 %v2613_v43  ;;  %v937_v46 = vmul.f32 %v2110_v32, %v2555_v25  ;;  %v2112_v41 = vpop.eup %2111  ;;  %v1152_v42 = vsel %vm1150_vm1, %v1151_v22, %v1149_v38  ;;  %v934_v45 = vand.u32 2147483648, %v2545_v15 }
 0x163   : > { %v932_v44 = vsel %vm931_vm2, %v2545_v15, %v930_v40  ;;  %vm938_vm3 = vcmp.eq.f32.partialorder %v2555_v25, inf  ;;  %2123 = vrsqrt.f32 %v2615_v18  ;;  %v1189_v49 = vpack.c.bf16 %v1152_v42, %v1145_v48 }
 0x164   : > { %v2114_v47 = vpop.eup %2113  ;;  %vm933_vm4 = vcmp.eq.f32.partialorder %v2545_v15, 0.0  ;;  %v939_v58 = vsel %vm938_vm3, %v2555_v25, %v937_v46  ;;  %vm940_vm5 = vcmp.eq.f32.partialorder %v2555_v25, 0.0  ;;  %v941_v52 = vand.u32 2147483648, %v2555_v25 }
 0x165   : > { %v2116_v50 = vpop.eup %2115  ;;  %v935_v51 = vsel %vm933_vm4, %v934_v45, %v932_v44  ;;  %v1154_v53 = vmul.f32 %v2108_v28, %v2547_v16  ;;  %1946 = vmatmul.mubr.bf16.gmra.mrb[24].mxu1 %v1189_v49  ;;  %vm1155_vm6 = vcmp.eq.f32.partialorder %v2547_v16, inf  ;;  %v1158_v55 = vand.u32 2147483648, %v2547_v16 }
 0x166   : > { %v2118_v54 = vpop.eup %2117  ;;  %v1161_v57 = vmul.f32 %v2112_v41, %v2566_v37  ;;  %vm1162_vm7 = vcmp.eq.f32.partialorder %v2566_v37, inf  ;;  %1949 = vmatprep.mubr.msk.bf16.mxu1 %vm2239_vm0, %v2238_v39  ;;  %v942_v59 = vsel %vm940_vm5, %v941_v52, %v939_v58  ;;  %v1165_v25 = vand.u32 2147483648, %v2566_v37 }
 0x167   : > { %v2120_v15 = vpop.eup %2119  ;;  %v1156_v60 = vsel %vm1155_vm6, %v2547_v16, %v1154_v53  ;;  %v944_v63 = vmul.f32 %v2114_v47, %v2583_v61  ;;  %v966_v0 = vpack.c.bf16 %v942_v59, %v935_v51  ;;  %vm1157_vm8 = vcmp.eq.f32.partialorder %v2547_v16, 0.0 }
 0x168   : > { %v1163_v1 = vsel %vm1162_vm7, %v2566_v37, %v1161_v57  ;;  %vm1164_vm9 = vcmp.eq.f32.partialorder %v2566_v37, 0.0  ;;  %v1159_v2 = vsel %vm1157_vm8, %v1158_v55, %v1156_v60  ;;  %vm945_vm10 = vcmp.eq.f32.partialorder %v2583_v61, inf }
 0x169   : > { %v1166_v56 = vsel %vm1164_vm9, %v1165_v25, %v1163_v1  ;;  %1914 = vmatmul.mubr.bf16.gmra.mrb[28].mxu0 %v966_v0  ;;  %v946_v4 = vsel %vm945_vm10, %v2583_v61, %v944_v63  ;;  %vm947_vm11 = vcmp.eq.f32.partialorder %v2583_v61, 0.0  ;;  %v951_v5 = vmul.f32 %v2118_v54, %v2591_v19 }
 0x16a   : > { %v1190_v3 = vpack.c.bf16 %v1166_v56, %v1159_v2  ;;  %1917 = vmatprep.mubr.msk.bf16.mxu0 %vm2239_vm0, %v2238_v39  ;;  %v948_v16 = vand.u32 2147483648, %v2583_v61  ;;  %vm952_vm12 = vcmp.eq.f32.partialorder %v2591_v19, inf  ;;  %v955_v37 = vand.u32 2147483648, %v2591_v19 }
 0x16b   : > { %v1168_v6 = vmul.f32 %v2116_v50, %v2585_v62  ;;  %v953_v8 = vsel %vm952_vm12, %v2591_v19, %v951_v5  ;;  %vm954_vm13 = vcmp.eq.f32.partialorder %v2591_v19, 0.0  ;;  %vm1169_vm14 = vcmp.eq.f32.partialorder %v2585_v62, inf }
 0x16c   : > { %v2122_v7 = vpop.eup %2121  ;;  %v1175_v9 = vmul.f32 %v2120_v15, %v2593_v23  ;;  %v949_v10 = vsel %vm947_vm11, %v948_v16, %v946_v4  ;;  %v956_v11 = vsel %vm954_vm13, %v955_v37, %v953_v8  ;;  %vm1176_vm15 = vcmp.eq.f32.partialorder %v2593_v23, inf }
 0x16d   : > { %v1170_v12 = vsel %vm1169_vm14, %v2585_v62, %v1168_v6  ;;  %v2124_v61 = vpop.eup %2123  ;;  %1950 = vmatmul.mubr.bf16.gmra.mrb[28].mxu1 %v1190_v3  ;;  %v967_v13 = vpack.c.bf16 %v956_v11, %v949_v10  ;;  %v1172_v14 = vand.u32 2147483648, %v2585_v62  ;;  %v1179_v20 = vand.u32 2147483648, %v2593_v23 }
 0x16e   : > { %v1177_v17 = vsel %vm1176_vm15, %v2593_v23, %v1175_v9  ;;  %1953 = vmatprep.mubr.msk.bf16.mxu1 %vm2239_vm0, %v2238_v39  ;;  %vm1171_vm1 = vcmp.eq.f32.partialorder %v2585_v62, 0.0  ;;  %vm1178_vm2 = vcmp.eq.f32.partialorder %v2593_v23, 0.0  ;;  %v958_v19 = vmul.f32 %v2122_v7, %v2613_v43 }
 0x16f   : > { %v1173_v21 = vsel %vm1171_vm1, %v1172_v14, %v1170_v12  ;;  %v1180_v24 = vsel %vm1178_vm2, %v1179_v20, %v1177_v17  ;;  %vm959_vm3 = vcmp.eq.f32.partialorder %v2613_v43, inf  ;;  %v1182_v28 = vmul.f32 %v2124_v61, %v2615_v18 }
 0x170   : > { %v1191_v26 = vpack.c.bf16 %v1180_v24, %v1173_v21  ;;  %v960_v27 = vsel %vm959_vm3, %v2613_v43, %v958_v19  ;;  %v962_v62 = vand.u32 2147483648, %v2613_v43  ;;  %vm961_vm4 = vcmp.eq.f32.partialorder %v2613_v43, 0.0 }
 0x171   : > { %1918 = vmatmul.mubr.bf16.gmra.mrb[32].mxu0 %v967_v13  ;;  %vm1183_vm5 = vcmp.eq.f32.partialorder %v2615_v18, inf  ;;  %v1186_v30 = vand.u32 2147483648, %v2615_v18  ;;  %vm1185_vm6 = vcmp.eq.f32.partialorder %v2615_v18, 0.0  ;;  %v3043_v35 = vsub.f32 1.0, %v2689_v34 }
 0x172   : > { %1921 = vmatprep.mubr.msk.bf16.mxu0 %vm2239_vm0, %v2238_v39  ;;  %v963_v23 = vsel %vm961_vm4, %v962_v62, %v960_v27  ;;  %v1184_v29 = vsel %vm1183_vm5, %v2615_v18, %v1182_v28 }
 0x173   : > { %v968_v31 = vpack.c.bf16 %v963_v23, %v963_v23  ;;  %v1187_v32 = vsel %vm1185_vm6, %v1186_v30, %v1184_v29 }
 0x174   : > { %v1192_v33 = vpack.c.bf16 %v1187_v32, %v1187_v32 }
 0x175   : > { %1954 = vmatmul.mubr.bf16.gmra.mrb[32].mxu1 %v1191_v26 }
 0x176   : > { %1957 = vmatprep.mubr.msk.bf16.mxu1 %vm2239_vm0, %v2238_v39 }
 0x179   : > { %1922 = vmatmul.mubr.bf16.gmra.mrb[36].mxu0 %v968_v31 }
 0x17d   : > { %1958 = vmatmul.mubr.bf16.gmra.mrb[36].mxu1 %v1192_v33 }
 0x229   : > { %v2693_v36 = vpop.f32.mrb[20].mxu0 }
 0x22a   : > { %v1907_v39 = vpop.f32.mrb[21].mxu0 }
 0x22b   : > { %v2695_v43 = vpop.f32.mrb[22].mxu0 }
 0x22c   : > { %v1908_v48 = vpop.f32.mrb[23].mxu0 }
 0x22d   : > { %v2697_v38 = vpop.f32.mrb[20].mxu1 }
 0x22e   : > { %v1267_v18 = vsub.f32 %v2697_v38, %v2693_v36  ;;  %v2703_v22 = vmul.f32 %v2697_v38, %v2697_v38  ;;  %v1943_v40 = vpop.f32.mrb[21].mxu1 }
 0x22f   : > { %v2705_v46 = vpop.f32.mrb[22].mxu1 }
 0x230   : > { %v2707_v41 = vmul.f32 %v1267_v18, %v1267_v18  ;;  %v1268_v42 = vsub.f32 %v2705_v46, %v2695_v43  ;;  %v2713_v44 = vmul.f32 %v2705_v46, %v2705_v46  ;;  %v1944_v45 = vpop.f32.mrb[23].mxu1 }
 0x231   : > { %v1301_v45 = vlaneseq (!%p1848_p9) }
 0x232   : > { %v2715_v47 = vmul.f32 %v1268_v42, %v1268_v42 }
 0x233   : > { %v2717_v49 = vpop.f32.mrb[24].mxu0 }
 0x234   : > { %v1911_v58 = vpop.f32.mrb[25].mxu0 }
 0x235   : > { %v2719_v50 = vpop.f32.mrb[26].mxu0  ;;  %v1396_v58 = vadd.f32 (!%p1848_p9), %v2715_v47, %v2707_v41 }
 0x236   : > { %v1912_v51 = vpop.f32.mrb[27].mxu0 }
 0x238   : > { %v2721_v52 = vpop.f32.mrb[24].mxu1 }
 0x239   : > { %v1269_v53 = vsub.f32 %v2721_v52, %v2717_v49  ;;  %v2727_v54 = vmul.f32 %v2721_v52, %v2721_v52  ;;  %v1947_v55 = vpop.f32.mrb[25].mxu1 }
 0x23a   : > { %v2729_v57 = vpop.f32.mrb[26].mxu1 }
 0x23b   : > { %v2731_v15 = vmul.f32 %v1269_v53, %v1269_v53  ;;  %v1270_v59 = vsub.f32 %v2729_v57, %v2719_v50  ;;  %v2737_v60 = vmul.f32 %v2729_v57, %v2729_v57  ;;  %v1948_v25 = vpop.f32.mrb[27].mxu1 }
 0x23c   : > { %v2739_v63 = vpop.f32.mrb[28].mxu0 }
 0x23d   : > { %v2741_v0 = vmul.f32 %v1270_v59, %v1270_v59  ;;  %v1915_v1 = vpop.f32.mrb[29].mxu0  ;;  %v1407_v59 = vadd.f32 (!%p1848_p9), %v2713_v44, %v2703_v22  ;;  %v1408_v25 = vadd.f32 (!%p1848_p9), %v2737_v60, %v2727_v54 }
 0x23e   : > { %v2743_v2 = vpop.f32.mrb[30].mxu0 }
 0x23f   : > { %v1916_v56 = vpop.f32.mrb[31].mxu0  ;;  %v1397_v51 = vadd.f32 (!%p1848_p9), %v2741_v0, %v2731_v15 }
 0x240   : > { %v2745_v3 = vpop.f32.mrb[28].mxu1  ;;  %v2817_v56 = vshrl.u32 (!%p1848_p9), %v1301_v45, 7  ;;  %v1406_v45 = vld [vmem:[%s2327_s21] sm:$0xff] (!%p1848_p9) }
 0x241   : > { %v1271_v4 = vsub.f32 %v2745_v3, %v2739_v63  ;;  %v2751_v5 = vmul.f32 %v2745_v3, %v2745_v3  ;;  %v1951_v16 = vpop.f32.mrb[29].mxu1 }
 0x242   : > { %v2753_v37 = vpop.f32.mrb[30].mxu1 }
 0x243   : > { %v2755_v6 = vmul.f32 %v1271_v4, %v1271_v4  ;;  %v1272_v7 = vsub.f32 %v2753_v37, %v2743_v2  ;;  %v2761_v8 = vmul.f32 %v2753_v37, %v2753_v37  ;;  %v1952_v9 = vpop.f32.mrb[31].mxu1  ;;  %v1400_v4 = vadd.f32 (!%p1848_p9), %v1397_v51, %v1396_v58 }
 0x244   : > { %v2763_v10 = vpop.f32.mrb[32].mxu0  ;;  %v1303_v9 = vsub.s32 (!%p1848_p9), 0, %v2817_v56 }
 0x245   : > { %v2765_v11 = vmul.f32 %v1272_v7, %v1272_v7  ;;  %v1919_v12 = vpop.f32.mrb[33].mxu0  ;;  %v1409_v1 = vadd.f32 (!%p1848_p9), %v2761_v8, %v2751_v5 }
 0x246   : > { %v2767_v61 = vpop.f32.mrb[34].mxu0 }
 0x247   : > { %v1920_v13 = vpop.f32.mrb[35].mxu0  ;;  %v1398_v53 = vadd.f32 (!%p1848_p9), %v2765_v11, %v2755_v6 }
 0x248   : > { %v2769_v14 = vpop.f32.mrb[32].mxu1  ;;  %v1411_v13 = vadd.f32 (!%p1848_p9), %v1408_v25, %v1407_v59 }
 0x249   : > { %v1273_v17 = vsub.f32 %v2769_v14, %v2763_v10  ;;  %v2775_v20 = vmul.f32 %v2769_v14, %v2769_v14  ;;  %v1955_v19 = vpop.f32.mrb[33].mxu1 }
 0x24a   : > { %v2777_v21 = vpop.f32.mrb[34].mxu1  ;;  %v1304_v19 = vrot.slane (!%p1848_p9), %v2689_v34, %v1303_v9 }
 0x24b   : > { %v2779_v24 = vmul.f32 %v1273_v17, %v1273_v17  ;;  %v1274_v26 = vsub.f32 %v2777_v21, %v2767_v61  ;;  %v2785_v27 = vmul.f32 %v2777_v21, %v2777_v21  ;;  %v1956_v28 = vpop.f32.mrb[35].mxu1 }
 0x24c   : > { %v2787_v62 = vpop.f32.mrb[36].mxu0  ;;  %v1395_v28 = vld [vmem:[%s2322_s17] sm:$0xff] (!%p1848_p9)  ;;  %v1320_v58 = vadd.f32 (!%p1848_p9), %v1304_v19, %v2753_v37 }
 0x24d   : > { %v2789_v23 = vmul.f32 %v1274_v26, %v1274_v26  ;;  %v1923_v29 = vpop.f32.mrb[37].mxu0  ;;  %1299 = sbr.rel (%p1848_p9) target bundleno = 643 (0x283), region = 52  ;;  %v1410_v16 = vadd.f32 (!%p1848_p9), %v2785_v27, %v2775_v20 }
 0x24e   : > { %v1086_v30 = vpop.f32.mrb[38].mxu0 }
 0x24f   : > { %v1924_v31 = vpop.f32.mrb[39].mxu0  ;;  %v1399_v55 = vadd.f32 (!%p1848_p9), %v2789_v23, %v2779_v24  ;;  %v1412_v17 = vadd.f32 (!%p1848_p9), %v1410_v16, %v1409_v1  ;;  %v1315_v30 = vadd.f32 (!%p1848_p9), %v1304_v19, %v2697_v38  ;;  %v1306_v1 = vadd.f32 (!%p1848_p9), %v1304_v19, %v2693_v36 }
 0x250   : > { %v2791_v32 = vpop.f32.mrb[36].mxu1  ;;  %v1316_v31 = vadd.f32 (!%p1848_p9), %v1304_v19, %v2705_v46  ;;  %v1308_v16 = vadd.f32 (!%p1848_p9), %v1304_v19, %v2717_v49 }
 0x251   : > { %v1275_v33 = vsub.f32 %v2791_v32, %v2787_v62  ;;  %v2797_v39 = vmul.f32 %v2791_v32, %v2791_v32  ;;  %v1959_v48 = vpop.f32.mrb[37].mxu1  ;;  %v1401_v7 = vadd.f32 (!%p1848_p9), %v1399_v55, %v1398_v53  ;;  %v1413_v29 = vadd.f32 (!%p1848_p9), %v1412_v17, %v1411_v13 }
 0x252   : > { %v1262_v18 = vpop.f32.mrb[38].mxu1  ;;  %v1318_v48 = vadd.f32 (!%p1848_p9), %v1304_v19, %v2729_v57  ;;  %2125 = vrcp.f32 (!%p1848_p9), %v1315_v30  ;;  %v1321_v53 = vadd.f32 (!%p1848_p9), %v1304_v19, %v2769_v14  ;;  %v1322_v55 = vadd.f32 (!%p1848_p9), %v1304_v19, %v2777_v21 }
 0x253   : > { %3045 = vst [vmem:[#allocation2_spill] sm:$0xff] %v2797_v39  ;;  %v2799_v40 = vmul.f32 %v1275_v33, %v1275_v33  ;;  %v1960_v42 = vpop.f32.mrb[39].mxu1  ;;  %v1402_v12 = vadd.f32 (!%p1848_p9), %v1401_v7, %v1400_v4  ;;  %v1317_v33 = vadd.f32 (!%p1848_p9), %v1304_v19, %v2721_v52  ;;  %v1319_v18 = vadd.f32 (!%p1848_p9), %v1304_v19, %v2745_v3 }
 0x254   : > { %2127 = vrcp.f32 %v1316_v31  ;;  %v1414_v51 = vadd.f32 %v1413_v29, %v2797_v39  ;;  %v1323_v25 = vadd.f32 %v1304_v19, %v2791_v32  ;;  %v1307_v4 = vadd.f32 %v1304_v19, %v2695_v43 }
 0x255   : > { %v1403_v26 = vadd.f32 %v1402_v12, %v2799_v40  ;;  %2129 = vrcp.f32 %v1317_v33  ;;  %v1309_v12 = vadd.f32 %v1304_v19, %v2719_v50  ;;  %v1310_v17 = vadd.f32 %v1304_v19, %v2739_v63 }
 0x256   : > { %2131 = vrcp.f32 %v1318_v48  ;;  %v1415_v59 = vadd.f32 %v1414_v51, %v1406_v45  ;;  %v1311_v29 = vadd.f32 %v1304_v19, %v2743_v2  ;;  %v1312_v33 = vadd.f32 %v1304_v19, %v2763_v10 }
 0x257   : > { %v1404_v42 = vadd.f32 %v1403_v26, %v1395_v28  ;;  %2133 = vrcp.f32 %v1319_v18  ;;  %v1314_v51 = vadd.f32 %v1304_v19, %v2787_v62 }
 0x258   : > { %2135 = vrcp.f32 %v1320_v58  ;;  %1416 = vst [vmem:[%s2327_s21] sm:$0xff] %v1415_v59 }
 0x259   : > { %1405 = vst [vmem:[%s2322_s17] sm:$0xff] %v1404_v42  ;;  %2137 = vrcp.f32 %v1321_v53  ;;  %v1313_v42 = vadd.f32 %v1304_v19, %v2767_v61 }
 0x25a   : > { %2139 = vrcp.f32 %v1322_v55 }
 0x25b   : > { %2141 = vrcp.f32 %v1323_v25 }
 0x25c   : > { %v2126_v7 = vpop.eup %2125 }
 0x25d   : > { %v1333_v26 = vmul.f32 %v2126_v7, %v1306_v1 }
 0x25e   : > { %v2128_v13 = vpop.eup %2127 }
 0x25f   : > { %v2130_v28 = vpop.eup %2129  ;;  %v1334_v30 = vmul.f32 %v2128_v13, %v1307_v4  ;;  %2143 = vlog2.f32 %v1333_v26 }
 0x260   : > { %v2132_v31 = vpop.eup %2131  ;;  %v1335_v48 = vmul.f32 %v2130_v28, %v1308_v16 }
 0x261   : > { %v2134_v18 = vpop.eup %2133  ;;  %v1336_v45 = vmul.f32 %v2132_v31, %v1309_v12  ;;  %2145 = vlog2.f32 %v1334_v30 }
 0x262   : > { %v2136_v58 = vpop.eup %2135  ;;  %v1337_v53 = vmul.f32 %v2134_v18, %v1310_v17  ;;  %2147 = vlog2.f32 %v1335_v48  ;;  %v1373_v17 = vrot.slane %v3043_v35, %v1303_v9 }
 0x263   : > { %v2138_v55 = vpop.eup %2137  ;;  %v1338_v59 = vmul.f32 %v2136_v58, %v1311_v29  ;;  %2149 = vlog2.f32 %v1336_v45 }
 0x264   : > { %v2140_v25 = vpop.eup %2139  ;;  %v1339_v1 = vmul.f32 %v2138_v55, %v1312_v33  ;;  %2151 = vlog2.f32 %v1337_v53 }
 0x265   : > { %v2142_v4 = vpop.eup %2141  ;;  %v1340_v7 = vmul.f32 %v2140_v25, %v1313_v42  ;;  %2153 = vlog2.f32 %v1338_v59 }
 0x266   : > { %v1341_v16 = vmul.f32 %v2142_v4, %v1314_v51  ;;  %2155 = vlog2.f32 %v1339_v1 }
 0x267   : > { %2157 = vlog2.f32 %v1340_v7 }
 0x268   : > { %2159 = vlog2.f32 %v1341_v16 }
 0x269   : > { %v2144_v12 = vpop.eup %2143 }
 0x26a   : > { %v1343_v26 = vmul.f32 0.6931472, %v2144_v12 }
 0x26b   : > { %v2146_v13 = vpop.eup %2145 }
 0x26c   : > { %v2148_v28 = vpop.eup %2147  ;;  %v1345_v19 = vmul.f32 0.6931472, %v2146_v13  ;;  %v1360_v31 = vand.u32 2147483647, %v1343_v26 }
 0x26d   : > { %v2150_v29 = vpop.eup %2149  ;;  %v1347_v30 = vmul.f32 0.6931472, %v2148_v28 }
 0x26e   : > { %v2152_v33 = vpop.eup %2151  ;;  %v1349_v48 = vmul.f32 0.6931472, %v2150_v29  ;;  %v1361_v18 = vand.u32 2147483647, %v1345_v19  ;;  %v1375_v59 = vmul.f32 %v1373_v17, %v1360_v31 }
 0x26f   : > { %v2154_v42 = vpop.eup %2153  ;;  %v1351_v45 = vmul.f32 0.6931472, %v2152_v33  ;;  %v1362_v58 = vand.u32 2147483647, %v1347_v30 }
 0x270   : > { %v2156_v51 = vpop.eup %2155  ;;  %v1353_v53 = vmul.f32 0.6931472, %v2154_v42  ;;  %v1363_v55 = vand.u32 2147483647, %v1349_v48  ;;  %v1376_v25 = vmul.f32 %v1373_v17, %v1361_v18 }
 0x271   : > { %v2158_v1 = vpop.eup %2157  ;;  %v1355_v4 = vmul.f32 0.6931472, %v2156_v51  ;;  %v1364_v56 = vand.u32 2147483647, %v1351_v45  ;;  %v1377_v7 = vmul.f32 %v1373_v17, %v1362_v58 }
 0x272   : > { %v2160_v16 = vpop.eup %2159  ;;  %v1357_v9 = vmul.f32 0.6931472, %v2158_v1  ;;  %v1365_v12 = vand.u32 2147483647, %v1353_v53  ;;  %v1378_v13 = vmul.f32 %v1373_v17, %v1363_v55  ;;  %v1385_v33 = vadd.f32 %v1376_v25, %v1375_v59  ;;  %v1384_v53 = vld [vmem:[%s2317_s14] sm:$0xff] }
 0x273   : > { %v1359_v26 = vmul.f32 0.6931472, %v2160_v16  ;;  %v1366_v28 = vand.u32 2147483647, %v1355_v4  ;;  %v1379_v19 = vmul.f32 %v1373_v17, %v1364_v56 }
 0x274   : > { %v1367_v29 = vand.u32 2147483647, %v1357_v9  ;;  %v1380_v30 = vmul.f32 %v1373_v17, %v1365_v12  ;;  %v1386_v42 = vadd.f32 %v1378_v13, %v1377_v7 }
 0x275   : > { %v1381_v48 = vmul.f32 %v1373_v17, %v1366_v28  ;;  %v1368_v31 = vand.u32 2147483647, %v1359_v26 }
 0x276   : > { %v1382_v18 = vmul.f32 %v1373_v17, %v1367_v29  ;;  %v1387_v35 = vadd.f32 %v1380_v30, %v1379_v19  ;;  %v1389_v45 = vadd.f32 %v1386_v42, %v1385_v33 }
 0x277   : > { %v1383_v58 = vmul.f32 %v1373_v17, %v1368_v31 }
 0x278   : > { %v1388_v51 = vadd.f32 %v1382_v18, %v1381_v48 }
 0x27a   : > { %v1390_v39 = vadd.f32 %v1388_v51, %v1387_v35 }
 0x27c   : > { %v1391_v1 = vadd.f32 %v1390_v39, %v1389_v45 }
 0x27e   : > { %v1392_v55 = vadd.f32 %v1391_v1, %v1383_v58 }
 0x280   : > { %v1393_v16 = vadd.f32 %v1392_v55, %v1384_v53 }
 0x282   : > { %1394 = vst [vmem:[%s2317_s14] sm:$0xff] %v1393_v16 }
 0x283 PF: > { %p1849_p10 = scmp.le.s32.totalorder %s1294_s22, 258 }
 0x284   : > { %v1420_v59 = vlaneseq (!%p1849_p10)  ;;  %v1430_v17 = vstv (!%p1849_p10), %s2343_s10  ;;  %v2240_v18 = vmov (!%p1849_p10), 0.0  }
 0x285   : > { %1419 = sbr.rel (%p1849_p10) target bundleno = 711 (0x2c7), region = 56 }
 0x286   : > { %v2857_v25 = vshrl.u32 (!%p1849_p10), %v1420_v59, 7 }
 0x288   : > { %v1422_v4 = vadd.s32 (!%p1849_p10), 8, %v2857_v25  ;;  %v1423_v56 = vadd.s32 (!%p1849_p10), 16, %v2857_v25  ;;  %v1424_v35 = vadd.s32 (!%p1849_p10), 24, %v2857_v25  ;;  %v1425_v39 = vadd.s32 (!%p1849_p10), 32, %v2857_v25 }
 0x289   : > { %v1426_v7 = vadd.s32 (!%p1849_p10), 40, %v2857_v25  ;;  %v1427_v9 = vadd.s32 (!%p1849_p10), 48, %v2857_v25  ;;  %v1428_v12 = vadd.s32 (!%p1849_p10), 56, %v2857_v25  ;;  %v1429_v13 = vadd.s32 (!%p1849_p10), 64, %v2857_v25 }
 0x28a   : > { %v1431_v26 = vadd.s32 (!%p1849_p10), %v1430_v17, %v2857_v25  ;;  %v1432_v28 = vadd.s32 (!%p1849_p10), %v1430_v17, %v1422_v4  ;;  %v1433_v19 = vadd.s32 (!%p1849_p10), %v1430_v17, %v1423_v56  ;;  %v1434_v29 = vadd.s32 (!%p1849_p10), %v1430_v17, %v1424_v35 }
 0x28b   : > { %v1435_v30 = vadd.s32 (!%p1849_p10), %v1430_v17, %v1425_v39  ;;  %v1436_v33 = vadd.s32 (!%p1849_p10), %v1430_v17, %v1426_v7  ;;  %v1437_v42 = vadd.s32 (!%p1849_p10), %v1430_v17, %v1427_v9  ;;  %v1438_v48 = vadd.s32 (!%p1849_p10), %v1430_v17, %v1428_v12 }
 0x28c   : > { %v1439_v31 = vadd.s32 %v1430_v17, %v1429_v13  ;;  %vm1440_vm0 = vcmp.lt.s32.totalorder %v1431_v26, 258  ;;  %vm1441_vm7 = vcmp.lt.s32.totalorder %v1432_v28, 258  ;;  %vm1442_vm8 = vcmp.lt.s32.totalorder %v1433_v19, 258 }
 0x28d   : > { %vm1443_vm9 = vcmp.lt.s32.totalorder %v1434_v29, 258  ;;  %vm1444_vm10 = vcmp.lt.s32.totalorder %v1435_v30, 258  ;;  %vm1445_vm11 = vcmp.lt.s32.totalorder %v1436_v33, 258  ;;  %vm1446_vm12 = vcmp.lt.s32.totalorder %v1437_v42, 258 }
 0x28e   : > { %vm1447_vm13 = vcmp.lt.s32.totalorder %v1438_v48, 258  ;;  %vm1448_vm14 = vcmp.lt.s32.totalorder %v1439_v31, 258  ;;  %v2870_v51 = vsel %vm1440_vm0, 1.0, %v2240_v18  ;;  %v2873_v45 = vsel %vm1441_vm7, 1.0, %v2240_v18 }
 0x28f   : > { %v2876_v58 = vsel %vm1442_vm8, 1.0, %v2240_v18  ;;  %v2879_v1 = vsel %vm1443_vm9, 1.0, %v2240_v18  ;;  %v2882_v53 = vsel %vm1444_vm10, 1.0, %v2240_v18  ;;  %v1479_v55 = vsub.s32 0, %v2857_v25 }
 0x290   : > { %v2886_v16 = vsel %vm1445_vm11, 1.0, %v2240_v18  ;;  %v2889_v59 = vsel %vm1446_vm12, 1.0, %v2240_v18  ;;  %v2892_v4 = vsel %vm1447_vm13, 1.0, %v2240_v18  ;;  %v2895_v56 = vsel %vm1448_vm14, 1.0, %v2240_v18 }
 0x291   : > { %v1467_v17 = vsel %vm1440_vm0, %v2693_v36, 1.0  ;;  %v1468_v35 = vsel %vm1441_vm7, %v2695_v43, 1.0  ;;  %v1469_v39 = vsel %vm1442_vm8, %v2717_v49, 1.0  ;;  %v2906_v7 = vrot.slane %v2689_v34, %v1479_v55 }
 0x292   : > { %v1470_v9 = vsel %vm1443_vm9, %v2719_v50, 1.0  ;;  %v1491_v12 = vsel %vm1440_vm0, %v2697_v38, 1.0  ;;  %v1492_v36 = vsel %vm1441_vm7, %v2705_v46, 1.0  ;;  %v1493_v43 = vsel %vm1442_vm8, %v2721_v52, 1.0 }
 0x293   : > { %v1471_v49 = vsel %vm1444_vm10, %v2739_v63, 1.0  ;;  %v1472_v13 = vsel %vm1445_vm11, %v2743_v2, 1.0  ;;  %v2922_v18 = vsel %vm1446_vm12, %v2763_v10, 1.0  ;;  %v1494_v50 = vsel %vm1443_vm9, %v2729_v57, 1.0 }
 0x294   : > { %v2928_v38 = vsel %vm1447_vm13, %v2767_v61, 1.0  ;;  %v2932_v46 = vsel %vm1448_vm14, %v2787_v62, 1.0  ;;  %v1495_v52 = vsel %vm1444_vm10, %v2745_v3, 1.0  ;;  %v1496_v63 = vsel %vm1445_vm11, %v2753_v37, 1.0 }
 0x295   : > { %v1497_v2 = vsel %vm1446_vm12, %v2769_v14, 1.0  ;;  %v1500_v10 = vadd.f32 %v1491_v12, %v2906_v7  ;;  %v1501_v57 = vadd.f32 %v1492_v36, %v2906_v7  ;;  %v1502_v61 = vadd.f32 %v1493_v43, %v2906_v7 }
 0x296   : > { %v1498_v26 = vsel %vm1447_vm13, %v2777_v21, 1.0  ;;  %v1499_v62 = vsel %vm1448_vm14, %v2791_v32, 1.0  ;;  %v1503_v3 = vadd.f32 %v1494_v50, %v2906_v7  ;;  %v1590_v37 = vmul.f32 %v2870_v51, %v2707_v41 }
 0x297   : > { %v1504_v28 = vadd.f32 %v1495_v52, %v2906_v7  ;;  %2161 = vrcp.f32 %v1500_v10  ;;  %v1591_v14 = vmul.f32 %v2873_v45, %v2715_v47  ;;  %v1592_v19 = vmul.f32 %v2876_v58, %v2731_v15 }
 0x298   : > { %v1482_v29 = vadd.f32 %v2906_v7, %v1467_v17  ;;  %v1505_v21 = vadd.f32 %v1496_v63, %v2906_v7  ;;  %2163 = vrcp.f32 %v1501_v57  ;;  %v1593_v32 = vmul.f32 %v2879_v1, %v2741_v0 }
 0x299   : > { %v1483_v30 = vadd.f32 %v2906_v7, %v1468_v35  ;;  %v1484_v41 = vadd.f32 %v2906_v7, %v1469_v39  ;;  %v1506_v33 = vadd.f32 %v1497_v2, %v2906_v7  ;;  %2165 = vrcp.f32 %v1502_v61 }
 0x29a   : > { %v1507_v47 = vadd.f32 %v1498_v26, %v2906_v7  ;;  %v1508_v42 = vadd.f32 %v1499_v62, %v2906_v7  ;;  %2167 = vrcp.f32 %v1503_v3  ;;  %v1594_v15 = vmul.f32 %v2882_v53, %v2755_v6 }
 0x29b   : > { %2169 = vrcp.f32 %v1504_v28  ;;  %v1595_v48 = vmul.f32 %v2886_v16, %v2765_v11  ;;  %v1596_v0 = vmul.f32 %v2889_v59, %v2779_v24  ;;  %v1597_v31 = vmul.f32 %v2892_v4, %v2789_v23 }
 0x29c   : > { %2171 = vrcp.f32 %v1505_v21  ;;  %v1598_v17 = vmul.f32 %v2895_v56, %v2799_v40  ;;  %v1599_v35 = vadd.f32 %v1591_v14, %v1590_v37  ;;  %v1600_v39 = vadd.f32 %v1593_v32, %v1592_v19 }
 0x29d   : > { %2173 = vrcp.f32 %v1506_v33  ;;  %v1601_v12 = vadd.f32 %v1595_v48, %v1594_v15  ;;  %v1602_v36 = vadd.f32 %v1597_v31, %v1596_v0  ;;  %v1610_v6 = vmul.f32 %v2870_v51, %v2703_v22  ;;  %v1609_v0 = vld [vmem:[%s2327_s21] sm:$0xff] }
 0x29e   : > { %2175 = vrcp.f32 %v1507_v47  ;;  %v1603_v11 = vadd.f32 %v1600_v39, %v1599_v35  ;;  %v1611_v24 = vmul.f32 %v2873_v45, %v2713_v44  ;;  %v1612_v23 = vmul.f32 %v2876_v58, %v2727_v54 }
 0x29f   : > { %2177 = vrcp.f32 %v1508_v42  ;;  %v1604_v43 = vadd.f32 %v1602_v36, %v1601_v12  ;;  %v1613_v40 = vmul.f32 %v2879_v1, %v2737_v60  ;;  %v1614_v50 = vmul.f32 %v2882_v53, %v2751_v5 }
 0x2a0   : > { %v1485_v52 = vadd.f32 %v2906_v7, %v1470_v9  ;;  %v1615_v22 = vmul.f32 %v2886_v16, %v2761_v8  ;;  %v1616_v44 = vmul.f32 %v2889_v59, %v2775_v20  ;;  %v1617_v54 = vmul.f32 %v2892_v4, %v2785_v27  ;;  %v1589_v9 = vld [vmem:[%s2322_s17] sm:$0xff] }
 0x2a1   : > { %v2162_v63 = vpop.eup %2161  ;;  %v1486_v2 = vadd.f32 %v2906_v7, %v1471_v49  ;;  %v1605_v10 = vadd.f32 %v1604_v43, %v1603_v11  ;;  %v1619_v57 = vadd.f32 %v1611_v24, %v1610_v6  ;;  %v1620_v60 = vadd.f32 %v1613_v40, %v1612_v23  ;;  %v3046_v49 = vld [vmem:[#allocation2_spill] sm:$0xff] }
 0x2a2   : > { %v2164_v61 = vpop.eup %2163  ;;  %v1487_v5 = vadd.f32 %v2906_v7, %v1472_v13  ;;  %v1518_v26 = vmul.f32 %v2162_v63, %v1482_v29  ;;  %v1621_v62 = vadd.f32 %v1615_v22, %v1614_v50  ;;  %v1622_v3 = vadd.f32 %v1617_v54, %v1616_v44 }
 0x2a3   : > { %v2166_v8 = vpop.eup %2165  ;;  %v1488_v20 = vadd.f32 %v2906_v7, %v2922_v18  ;;  %v1519_v37 = vmul.f32 %v2164_v61, %v1483_v30  ;;  %v1606_v28 = vadd.f32 %v1605_v10, %v1598_v17  ;;  %v1623_v27 = vadd.f32 %v1620_v60, %v1619_v57 }
 0x2a4   : > { %v2168_v14 = vpop.eup %2167  ;;  %v1520_v19 = vmul.f32 %v2166_v8, %v1484_v41  ;;  %2179 = vlog2.f32 %v1518_v26  ;;  %v1618_v21 = vmul.f32 %v2895_v56, %v3046_v49  ;;  %v1624_v13 = vadd.f32 %v1622_v3, %v1621_v62 }
 0x2a5   : > { %v2170_v29 = vpop.eup %2169  ;;  %v1489_v32 = vadd.f32 %v2906_v7, %v2928_v38  ;;  %v1521_v33 = vmul.f32 %v2168_v14, %v1485_v52  ;;  %2181 = vlog2.f32 %v1519_v37  ;;  %v1607_v47 = vadd.f32 %v1606_v28, %v1589_v9 }
 0x2a6   : > { %v2172_v18 = vpop.eup %2171  ;;  %v1490_v30 = vadd.f32 %v2906_v7, %v2932_v46  ;;  %v1522_v42 = vmul.f32 %v2170_v29, %v1486_v2  ;;  %2183 = vlog2.f32 %v1520_v19  ;;  %v1625_v41 = vadd.f32 %v1624_v13, %v1623_v27 }
 0x2a7   : > { %v2174_v15 = vpop.eup %2173  ;;  %v1523_v48 = vmul.f32 %v2172_v18, %v1487_v5  ;;  %2185 = vlog2.f32 %v1521_v33  ;;  %1608 = vst [vmem:[%s2322_s17] sm:$0xff] %v1607_v47  ;;  %v3047_v7 = vsub.f32 1.0, %v2689_v34 }
 0x2a8   : > { %v2176_v31 = vpop.eup %2175  ;;  %v1524_v17 = vmul.f32 %v2174_v15, %v1488_v20  ;;  %2187 = vlog2.f32 %v1522_v42  ;;  %v1626_v38 = vadd.f32 %v1625_v41, %v1618_v21 }
 0x2a9   : > { %v2178_v35 = vpop.eup %2177  ;;  %v1525_v39 = vmul.f32 %v2176_v31, %v1489_v32  ;;  %2189 = vlog2.f32 %v1523_v48  ;;  %v1558_v46 = vrot.slane %v3047_v7, %v1479_v55  ;;  %v1578_v48 = vld [vmem:[%s2317_s14] sm:$0xff] }
 0x2aa   : > { %v1526_v12 = vmul.f32 %v2178_v35, %v1490_v30  ;;  %2191 = vlog2.f32 %v1524_v17  ;;  %v1627_v36 = vadd.f32 %v1626_v38, %v1609_v0 }
 0x2ab   : > { %2193 = vlog2.f32 %v1525_v39  ;;  %v1560_v40 = vmul.f32 %v2870_v51, %v1558_v46  ;;  %v1561_v50 = vmul.f32 %v2873_v45, %v1558_v46  ;;  %v1562_v54 = vmul.f32 %v2876_v58, %v1558_v46 }
 0x2ac   : > { %2195 = vlog2.f32 %v1526_v12  ;;  %1628 = vst [vmem:[%s2327_s21] sm:$0xff] %v1627_v36  ;;  %v1563_v34 = vmul.f32 %v2879_v1, %v1558_v46  ;;  %v1564_v60 = vmul.f32 %v2882_v53, %v1558_v46  ;;  %v1565_v61 = vmul.f32 %v2886_v16, %v1558_v46 }
 0x2ad   : > { %v1566_v8 = vmul.f32 %v2889_v59, %v1558_v46  ;;  %v1567_v27 = vmul.f32 %v2892_v4, %v1558_v46  ;;  %v1568_v59 = vmul.f32 %v2895_v56, %v1558_v46 }
 0x2ae   : > { %v2180_v6 = vpop.eup %2179 }
 0x2af   : > { %v2182_v11 = vpop.eup %2181  ;;  %v1528_v24 = vmul.f32 0.6931472, %v2180_v6 }
 0x2b0   : > { %v2184_v23 = vpop.eup %2183  ;;  %v1530_v43 = vmul.f32 0.6931472, %v2182_v11 }
 0x2b1   : > { %v2186_v52 = vpop.eup %2185  ;;  %v1532_v22 = vmul.f32 0.6931472, %v2184_v23  ;;  %v1545_v44 = vand.u32 2147483647, %v1528_v24 }
 0x2b2   : > { %v2188_v63 = vpop.eup %2187  ;;  %v1534_v25 = vmul.f32 0.6931472, %v2186_v52  ;;  %v1546_v2 = vand.u32 2147483647, %v1530_v43 }
 0x2b3   : > { %v2190_v55 = vpop.eup %2189  ;;  %v1536_v10 = vmul.f32 0.6931472, %v2188_v63  ;;  %v1547_v57 = vand.u32 2147483647, %v1532_v22  ;;  %v1569_v26 = vmul.f32 %v1560_v40, %v1545_v44 }
 0x2b4   : > { %v2192_v51 = vpop.eup %2191  ;;  %v1538_v5 = vmul.f32 0.6931472, %v2190_v55  ;;  %v1548_v45 = vand.u32 2147483647, %v1534_v25  ;;  %v1570_v9 = vmul.f32 %v1561_v50, %v1546_v2 }
 0x2b5   : > { %v2194_v62 = vpop.eup %2193  ;;  %v1540_v3 = vmul.f32 0.6931472, %v2192_v51  ;;  %v1549_v58 = vand.u32 2147483647, %v1536_v10  ;;  %v1571_v20 = vmul.f32 %v1562_v54, %v1547_v57 }
 0x2b6   : > { %v2196_v37 = vpop.eup %2195  ;;  %v1542_v1 = vmul.f32 0.6931472, %v2194_v62  ;;  %v1550_v28 = vand.u32 2147483647, %v1538_v5  ;;  %v1572_v14 = vmul.f32 %v1563_v34, %v1548_v45  ;;  %v1579_v13 = vadd.f32 %v1570_v9, %v1569_v26 }
 0x2b7   : > { %v1544_v53 = vmul.f32 0.6931472, %v2196_v37  ;;  %v1551_v19 = vand.u32 2147483647, %v1540_v3  ;;  %v1573_v16 = vmul.f32 %v1564_v60, %v1549_v58 }
 0x2b8   : > { %v1552_v49 = vand.u32 2147483647, %v1542_v1  ;;  %v1574_v21 = vmul.f32 %v1565_v61, %v1550_v28  ;;  %v1580_v29 = vadd.f32 %v1572_v14, %v1571_v20 }
 0x2b9   : > { %v1575_v32 = vmul.f32 %v1566_v8, %v1551_v19  ;;  %v1553_v33 = vand.u32 2147483647, %v1544_v53 }
 0x2ba   : > { %v1576_v47 = vmul.f32 %v1567_v27, %v1552_v49  ;;  %v1581_v18 = vadd.f32 %v1574_v21, %v1573_v16  ;;  %v1583_v42 = vadd.f32 %v1580_v29, %v1579_v13 }
 0x2bb   : > { %v1577_v41 = vmul.f32 %v1568_v59, %v1553_v33 }
 0x2bc   : > { %v1582_v30 = vadd.f32 %v1576_v47, %v1575_v32 }
 0x2be   : > { %v1584_v4 = vadd.f32 %v1582_v30, %v1581_v18 }
 0x2c0   : > { %v1585_v15 = vadd.f32 %v1584_v4, %v1583_v42 }
 0x2c2   : > { %v1586_v0 = vadd.f32 %v1585_v15, %v1577_v41 }
 0x2c4   : > { %v1587_v31 = vadd.f32 %v1586_v0, %v1578_v48 }
 0x2c6   : > { %1588 = vst [vmem:[%s2317_s14] sm:$0xff] %v1587_v31 }
 0x2c7 PF: > { %s18_s28 = sadd.s32 1, %s2235_s28   ;;  %s3048_s24 = smov %s2227_s26 }
 0x2c8   : > { %p15_p11 = scmp.ge.s32.totalorder %s18_s28, 6   ;;  %s3049_s25 = smov %s2231_s27 }
 0x2c9   : > { %s3050_s26 = smov %s3053_s29  ;;  %s3051_s27 = smov %s3057_s30 }
 0x2ca   :  { %17 = sbr.rel (!%p15_p11) target bundleno = 3 (0x3), region = 113 }

// kernel: _forward.5
= control target key start
LH: loop header
LB: loop body
LE: loop exit
PB: predicated region body
PF: predicated region fallthrough
CT: control target
= control target key end

     0   :  { %s2903_s24 = smov 0   ;;  %s2905_s25 = smov 0   ;;  %s4343_s0 = inlined_call_operand.vmem [shape: bf16[544,128], index: 0, kind: input, shape index: {}]   ;;  %s4344_s1 = inlined_call_operand.vmem [shape: bf16[544,128], index: 1, kind: input, shape index: {}]   ;;  %s4345_s2 = inlined_call_operand.vmem [shape: bf16[128,256], index: 2, kind: input, shape index: {}]   ;;  %s4346_s3 = inlined_call_operand.vmem [shape: bf16[128,128], index: 3, kind: input, shape index: {}]   ;;  %s4347_s4 = inlined_call_operand.vmem [shape: f32[1,128], index: 4, kind: input, shape index: {}]   ;;  %s4348_s5 = inlined_call_operand.vmem [shape: f32[16,128], index: 5, kind: output, shape index: {0}]   ;;  %s4349_s6 = inlined_call_operand.vmem [shape: f32[16,128], index: 6, kind: output, shape index: {1}]   ;;  %s4350_s7 = inlined_call_operand.vmem [shape: f32[16,128], index: 7, kind: output, shape index: {2}]  }
   0x1   :  { %s2907_s26 = smov 0   ;;  %s2909_s27 = smov 0  }
   0x2   :  { %s2911_s28 = smov 0  }
   0x3 LB: > { %s27_s29 = sadd.s32 1, %s2848_s26  ;;  %s30_s30 = sadd.s32 1, %s2852_s27  ;;  %s2856_s28 = sphi %s2911_s28, %s18_s28   ;;  %s2852_s27 = sphi %s2909_s27, %s4601_s27   ;;  %s2848_s26 = sphi %s2907_s26, %s4600_s26   ;;  %s2844_s25 = sphi %s2905_s25, %s4599_s25   ;;  %s2840_s24 = sphi %s2903_s24, %s4598_s24  }
   0x4   : > { %p28_p0 = scmp.ge.s32.totalorder %s27_s29, 2  ;;  %p2307_p1 = scmp.ge.s32.totalorder %s2856_s28, 1 }
   0x5   : > { %p282_p2 = scmp.lt.s32.totalorder %s2856_s28, 5 }
   0x6   : > { %s4603_s29 = smov (%p28_p0, %s27_s29), 0  ;;  %s4605_s30 = smov (!%p28_p0, %s30_s30), %s2852_s27 }
   0x7   : > { %p283_p3 = pnand %p2307_p1, %p282_p2  ;;  %p32_p4 = scmp.ge.s32.totalorder %s4605_s30, 2 }
   0x8   : > { %s2308_s8 = sshll.u32 (!%p283_p3), %s2844_s25, 1  ;;  %p350_p5 = scmp.lt.s32.totalorder (!%p283_p3), %s2844_s25, 1 }
   0x9   : > { %s4607_s30 = smov (%p32_p4, %s4605_s30), 0  ;;  %286 = sbr.rel (%p283_p3) target bundleno = 791 (0x317), region = 40 }
   0xa   : > { %s331_s9 = sadd.s32 (!%p283_p3), %s2840_s24, %s2308_s8  ;;  %p2315_p7 = scmp.ne.s32.totalorder (!%p283_p3), %s2840_s24, 0 }
   0xb   : > { %s332_s10 = smul.u32 (!%p283_p3), 17, %s331_s9 }
   0xd   : > { %p333_p6 = scmp.lt.s32.totalorder (!%p283_p3), %s332_s10, 67 }
  0x10   : > { %s4609_s25 = smov (!%p350_p5, %s2844_s25), 1  ;;  %s4611_s10 = smov (!%p333_p6, %s332_s10), 67 }
  0x11   : > { %s2312_s11 = sshll.u32 %s4609_s25, 3  ;;  %s2309_s18 = sshll.u32 %s4611_s10, 2  ;;  %v2858_v0 = vmov (!%p2315_p7), 0.0  }
  0x12   : > { %s2939_s14 = scalar_lea.vmem %s4348_s5, %s2312_s11  ;;  %s2944_s17 = scalar_lea.vmem %s4349_s6, %s2312_s11 }
  0x13   : > { %s2949_s21 = scalar_lea.vmem %s4350_s7, %s2312_s11  ;;  %s2954_s25 = scalar_lea.vmem %s4343_s0, %s2309_s18  ;;  %367 = vst [vmem:[%s2939_s14] sm:$0xff] (!%p2315_p7), %v2858_v0  ;;  %368 = vst [vmem:[%s2944_s17] sm:$0xff] (!%p2315_p7), %v2858_v0 }
  0x14   : > { %s2959_s13 = scalar_lea.vmem %s4344_s1, %s2309_s18  ;;  %366 = sbr.rel (%p2315_p7) target bundleno = 27 (0x1b), region = 44  ;;  %369 = vst [vmem:[%s2949_s21] sm:$0xff] (!%p2315_p7), %v2858_v0 }
  0x1b PF: > { %s2965_s10 = smul.u32 136, %s331_s9 }
  0x1d   : > { %p2317_p8 = scmp.ge.s32.totalorder %s2965_s10, 514 }
  0x1f   : > { %376 = sbr.rel (%p2317_p8) target bundleno = 791 (0x317), region = 48 }
  0x26   : > { %v2564_v1 = vld [vmem:[%s4345_s2 + $0x4] ss:$8 sps:$4 sm:$0xff]   ;;  %v2566_v2 = vld [vmem:[%s4345_s2] ss:$8 sps:$4 sm:$0xff]   ;;  %v2859_v3 = vmov 0   ;;  %v2860_v20 = vmov 0.0  }
  0x27   : > { %574 = vmatprep.mubr.bf16.mxu0 %v2859_v3  ;;  %764 = vmatprep.mubr.bf16.mxu1 %v2859_v3  ;;  %v2567_v4 = vld [vmem:[%s4345_s2 + $0x14] ss:$8 sps:$4 sm:$0xff]   ;;  %v2569_v5 = vld [vmem:[%s4345_s2 + $0x10] ss:$8 sps:$4 sm:$0xff]   ;;  %v2570_v6 = vld [vmem:[%s4345_s2 + $0x24] ss:$8 sps:$4 sm:$0xff]  }
  0x28   : > { %542 = vmatprep.subr.bf16.mxu0 %v2564_v1  ;;  %732 = vmatprep.subr.bf16.mxu1 %v2564_v1  ;;  %v2572_v7 = vld [vmem:[%s4345_s2 + $0x20] ss:$8 sps:$4 sm:$0xff]   ;;  %v2573_v8 = vld [vmem:[%s4345_s2 + $0x34] ss:$8 sps:$4 sm:$0xff]   ;;  %v2575_v9 = vld [vmem:[%s4345_s2 + $0x30] ss:$8 sps:$4 sm:$0xff]  }
  0x29   : > { %543 = vmatpush1.bf16.msra.mxu0 %v2566_v2  ;;  %733 = vmatpush1.bf16.msra.mxu1 %v2566_v2  ;;  %v2576_v10 = vld [vmem:[%s4345_s2 + $0x44] ss:$8 sps:$4 sm:$0xff]   ;;  %v2578_v11 = vld [vmem:[%s4345_s2 + $0x40] ss:$8 sps:$4 sm:$0xff]   ;;  %v2579_v12 = vld [vmem:[%s4345_s2 + $0x54] ss:$8 sps:$4 sm:$0xff]  }
  0x2a   : > { %544 = vmatprep.subr.bf16.mxu0 %v2567_v4  ;;  %734 = vmatprep.subr.bf16.mxu1 %v2567_v4  ;;  %v2581_v13 = vld [vmem:[%s4345_s2 + $0x50] ss:$8 sps:$4 sm:$0xff]   ;;  %v2582_v14 = vld [vmem:[%s4345_s2 + $0x64] ss:$8 sps:$4 sm:$0xff]   ;;  %v2584_v15 = vld [vmem:[%s4345_s2 + $0x60] ss:$8 sps:$4 sm:$0xff]  }
  0x2b   : > { %v2585_v16 = vld [vmem:[%s4345_s2 + $0x74] ss:$8 sps:$4 sm:$0xff]   ;;  %v2587_v17 = vld [vmem:[%s4345_s2 + $0x70] ss:$8 sps:$4 sm:$0xff]   ;;  %v2588_v18 = vld [vmem:[%s2954_s25] sm:$0xff]   ;;  %vm2861_vm0 = vmmov 0  }
  0x2c   : > { %v2589_v19 = vld [vmem:[%s2959_s13] sm:$0xff]   ;;  %v2607_v22 = vld [vmem:[%s4346_s3 + $0x8] sm:$0xff]   ;;  %v2608_v25 = vld [vmem:[%s4346_s3 + $0x10] sm:$0xff]   ;;  %s1570_s11 = sadd.s32 136, %s2965_s10 }
  0x2d   : > { %545 = vmatpush1.bf16.msra.mxu0 %v2569_v5  ;;  %735 = vmatpush1.bf16.msra.mxu1 %v2569_v5  ;;  %v2606_v21 = vld [vmem:[%s4346_s3] sm:$0xff]   ;;  %v2590_v23 = vld [vmem:[%s2954_s25 + $0x8] sm:$0xff]   ;;  %v2609_v26 = vld [vmem:[%s4346_s3 + $0x18] sm:$0xff]   ;;  %p2360_p9 = scmp.gt.s32.totalorder %s1570_s11, 514 }
  0x2e   : > { %546 = vmatprep.subr.bf16.mxu0 %v2570_v6  ;;  %736 = vmatprep.subr.bf16.mxu1 %v2570_v6  ;;  %v2591_v24 = vld [vmem:[%s2959_s13 + $0x8] sm:$0xff]   ;;  %v2592_v27 = vld [vmem:[%s2954_s25 + $0x10] sm:$0xff]   ;;  %v2610_v29 = vld [vmem:[%s4346_s3 + $0x20] sm:$0xff]  }
  0x2f   : > { %v2593_v28 = vld [vmem:[%s2959_s13 + $0x10] sm:$0xff]   ;;  %v2594_v30 = vld [vmem:[%s2954_s25 + $0x18] sm:$0xff]   ;;  %v2596_v32 = vld [vmem:[%s2954_s25 + $0x20] sm:$0xff]  }
  0x30   : > { %v2595_v31 = vld [vmem:[%s2959_s13 + $0x18] sm:$0xff]   ;;  %v2597_v33 = vld [vmem:[%s2959_s13 + $0x20] sm:$0xff]   ;;  %v2598_v34 = vld [vmem:[%s2954_s25 + $0x28] sm:$0xff]  }
  0x31   : > { %547 = vmatpush1.bf16.msra.mxu0 %v2572_v7  ;;  %737 = vmatpush1.bf16.msra.mxu1 %v2572_v7  ;;  %v2599_v35 = vld [vmem:[%s2959_s13 + $0x28] sm:$0xff]   ;;  %v2600_v36 = vld [vmem:[%s2954_s25 + $0x30] sm:$0xff]   ;;  %v2602_v38 = vld [vmem:[%s2954_s25 + $0x38] sm:$0xff]  }
  0x32   : > { %548 = vmatprep.subr.bf16.mxu0 %v2573_v8  ;;  %738 = vmatprep.subr.bf16.mxu1 %v2573_v8  ;;  %v2601_v37 = vld [vmem:[%s2959_s13 + $0x30] sm:$0xff]   ;;  %v2603_v39 = vld [vmem:[%s2959_s13 + $0x38] sm:$0xff]   ;;  %v2604_v40 = vld [vmem:[%s2954_s25 + $0x40] ss:$0 sps:$4 sm:$0xff]  }
  0x33   : > { %v2605_v41 = vld [vmem:[%s2959_s13 + $0x40] ss:$0 sps:$4 sm:$0xff]   ;;  %v2611_v42 = vld [vmem:[%s4346_s3 + $0x28] sm:$0xff]   ;;  %v2612_v43 = vld [vmem:[%s4346_s3 + $0x30] sm:$0xff]  }
  0x34   : > { %v2613_v44 = vld [vmem:[%s4346_s3 + $0x38] sm:$0xff]  }
  0x35   : > { %549 = vmatpush1.bf16.msra.mxu0 %v2575_v9  ;;  %739 = vmatpush1.bf16.msra.mxu1 %v2575_v9 }
  0x36   : > { %550 = vmatprep.subr.bf16.mxu0 %v2576_v10  ;;  %740 = vmatprep.subr.bf16.mxu1 %v2576_v10 }
  0x39   : > { %551 = vmatpush1.bf16.msra.mxu0 %v2578_v11  ;;  %741 = vmatpush1.bf16.msra.mxu1 %v2578_v11 }
  0x3a   : > { %552 = vmatprep.subr.bf16.mxu0 %v2579_v12  ;;  %742 = vmatprep.subr.bf16.mxu1 %v2579_v12 }
  0x3d   : > { %553 = vmatpush1.bf16.msra.mxu0 %v2581_v13  ;;  %743 = vmatpush1.bf16.msra.mxu1 %v2581_v13 }
  0x3e   : > { %554 = vmatprep.subr.bf16.mxu0 %v2582_v14  ;;  %744 = vmatprep.subr.bf16.mxu1 %v2582_v14 }
  0x41   : > { %555 = vmatpush1.bf16.msra.mxu0 %v2584_v15  ;;  %745 = vmatpush1.bf16.msra.mxu1 %v2584_v15 }
  0x42   : > { %556 = vmatprep.subr.bf16.mxu0 %v2585_v16  ;;  %746 = vmatprep.subr.bf16.mxu1 %v2585_v16 }
  0x45   : > { %557 = vmatpush1.bf16.msra.mxu0 %v2587_v17  ;;  %747 = vmatpush1.bf16.msra.mxu1 %v2587_v17 }
  0x46   : > { %2415 = vmatprep.subr.bf16.mxu0 %v2860_v20  ;;  %2467 = vmatprep.subr.bf16.mxu1 %v2860_v20 }
  0x48   : > { %575 = vmatmul.mubr.bf16.vlgmr.msra.gmra.mrb[0].mxu0 %v2588_v18  ;;  %765 = vmatmul.mubr.bf16.vlgmr.msra.gmra.mrb[0].mxu1 %v2589_v19 }
  0x49   : > { %584 = vmatprep.mubr.bf16.mxu0 %v2859_v3  ;;  %774 = vmatprep.mubr.bf16.mxu1 %v2859_v3 }
  0x4a   : > { %2416 = vmatpush3.bf16.msra.mxu0 %v2606_v21  ;;  %2468 = vmatpush3.bf16.msra.mxu1 %v2606_v21 }
  0x4b   : > { %2417 = vmatprep.subr.bf16.mxu0 %v2860_v20  ;;  %2469 = vmatprep.subr.bf16.mxu1 %v2860_v20 }
  0x4e   : > { %2418 = vmatpush3.bf16.msra.mxu0 %v2607_v22  ;;  %2470 = vmatpush3.bf16.msra.mxu1 %v2607_v22 }
  0x4f   : > { %2419 = vmatprep.subr.bf16.mxu0 %v2860_v20  ;;  %2471 = vmatprep.subr.bf16.mxu1 %v2860_v20 }
  0x50   : > { %585 = vmatmul.mubr.bf16.gmra.mrb[4].mxu0 %v2590_v23  ;;  %775 = vmatmul.mubr.bf16.gmra.mrb[4].mxu1 %v2591_v24 }
  0x51   : > { %594 = vmatprep.mubr.bf16.mxu0 %v2859_v3  ;;  %784 = vmatprep.mubr.bf16.mxu1 %v2859_v3 }
  0x52   : > { %2420 = vmatpush3.bf16.msra.mxu0 %v2608_v25  ;;  %2472 = vmatpush3.bf16.msra.mxu1 %v2608_v25 }
  0x53   : > { %2421 = vmatprep.subr.bf16.mxu0 %v2860_v20  ;;  %2473 = vmatprep.subr.bf16.mxu1 %v2860_v20 }
  0x56   : > { %2422 = vmatpush3.bf16.msra.mxu0 %v2609_v26  ;;  %2474 = vmatpush3.bf16.msra.mxu1 %v2609_v26 }
  0x57   : > { %2423 = vmatprep.subr.bf16.mxu0 %v2860_v20  ;;  %2475 = vmatprep.subr.bf16.mxu1 %v2860_v20 }
  0x58   : > { %595 = vmatmul.mubr.bf16.gmra.mrb[8].mxu0 %v2592_v27  ;;  %785 = vmatmul.mubr.bf16.gmra.mrb[8].mxu1 %v2593_v28 }
  0x59   : > { %604 = vmatprep.mubr.bf16.mxu0 %v2859_v3  ;;  %794 = vmatprep.mubr.bf16.mxu1 %v2859_v3 }
  0x5a   : > { %2424 = vmatpush3.bf16.msra.mxu0 %v2610_v29  ;;  %2476 = vmatpush3.bf16.msra.mxu1 %v2610_v29 }
  0x5b   : > { %2425 = vmatprep.subr.bf16.mxu0 %v2860_v20  ;;  %2477 = vmatprep.subr.bf16.mxu1 %v2860_v20 }
  0x5e   : > { %2426 = vmatpush3.bf16.msra.mxu0 %v2611_v42  ;;  %2478 = vmatpush3.bf16.msra.mxu1 %v2611_v42 }
  0x5f   : > { %2427 = vmatprep.subr.bf16.mxu0 %v2860_v20  ;;  %2479 = vmatprep.subr.bf16.mxu1 %v2860_v20 }
  0x60   : > { %605 = vmatmul.mubr.bf16.gmra.mrb[12].mxu0 %v2594_v30  ;;  %795 = vmatmul.mubr.bf16.gmra.mrb[12].mxu1 %v2595_v31 }
  0x61   : > { %614 = vmatprep.mubr.bf16.mxu0 %v2859_v3  ;;  %804 = vmatprep.mubr.bf16.mxu1 %v2859_v3 }
  0x62   : > { %2428 = vmatpush3.bf16.msra.mxu0 %v2612_v43  ;;  %2480 = vmatpush3.bf16.msra.mxu1 %v2612_v43 }
  0x63   : > { %2429 = vmatprep.subr.bf16.mxu0 %v2860_v20  ;;  %2481 = vmatprep.subr.bf16.mxu1 %v2860_v20 }
  0x66   : > { %2430 = vmatpush3.bf16.msra.mxu0 %v2613_v44  ;;  %2482 = vmatpush3.bf16.msra.mxu1 %v2613_v44 }
  0x68   : > { %615 = vmatmul.mubr.bf16.gmra.mrb[16].mxu0 %v2596_v32  ;;  %805 = vmatmul.mubr.bf16.gmra.mrb[16].mxu1 %v2597_v33 }
  0x69   : > { %624 = vmatprep.mubr.bf16.mxu0 %v2859_v3  ;;  %814 = vmatprep.mubr.bf16.mxu1 %v2859_v3 }
  0x70   : > { %625 = vmatmul.mubr.bf16.gmra.mrb[20].mxu0 %v2598_v34  ;;  %815 = vmatmul.mubr.bf16.gmra.mrb[20].mxu1 %v2599_v35 }
  0x71   : > { %634 = vmatprep.mubr.bf16.mxu0 %v2859_v3  ;;  %824 = vmatprep.mubr.bf16.mxu1 %v2859_v3 }
  0x78   : > { %635 = vmatmul.mubr.bf16.gmra.mrb[24].mxu0 %v2600_v36  ;;  %825 = vmatmul.mubr.bf16.gmra.mrb[24].mxu1 %v2601_v37 }
  0x79   : > { %644 = vmatprep.mubr.bf16.mxu0 %v2859_v3  ;;  %834 = vmatprep.mubr.bf16.mxu1 %v2859_v3 }
  0x80   : > { %645 = vmatmul.mubr.bf16.gmra.mrb[28].mxu0 %v2602_v38  ;;  %835 = vmatmul.mubr.bf16.gmra.mrb[28].mxu1 %v2603_v39 }
  0x81   : > { %654 = vmatprep.mubr.bf16.mxu0 %v2859_v3  ;;  %844 = vmatprep.mubr.bf16.mxu1 %v2859_v3 }
  0x88   : > { %655 = vmatmul.mubr.bf16.gmra.mrb[32].mxu0 %v2604_v40  ;;  %845 = vmatmul.mubr.bf16.gmra.mrb[32].mxu1 %v2605_v41 }
  0x89   : > { %2431 = vmatprep.mubr.msk.bf16.mxu0 %vm2861_vm0, %v2860_v20  ;;  %2483 = vmatprep.mubr.msk.bf16.mxu1 %vm2861_vm0, %v2860_v20 }
 0x11b   : > { %v576_v45 = vpop.f32.mrb[0].mxu0  ;;  %v766_v46 = vpop.f32.mrb[0].mxu1 }
 0x11c   : > { %v869_v47 = vmul.f32 %v576_v45, %v576_v45  ;;  %v1217_v48 = vmul.f32 %v766_v46, %v766_v46  ;;  %v578_v49 = vpop.f32.mrb[1].mxu0  ;;  %v768_v50 = vpop.f32.mrb[1].mxu1 }
 0x11d   : > { %v886_v51 = vmul.f32 %v578_v49, %v578_v49  ;;  %v1234_v52 = vmul.f32 %v768_v50, %v768_v50  ;;  %v580_v53 = vpop.f32.mrb[2].mxu0  ;;  %v770_v54 = vpop.f32.mrb[2].mxu1 }
 0x11e   : > { %v870_v55 = vmul.f32 %v580_v53, %v580_v53  ;;  %v1218_v56 = vmul.f32 %v770_v54, %v770_v54  ;;  %v582_v57 = vpop.f32.mrb[3].mxu0  ;;  %v772_v58 = vpop.f32.mrb[3].mxu1 }
 0x11f   : > { %v903_v59 = vadd.f32 %v886_v51, %v869_v47  ;;  %v1251_v60 = vadd.f32 %v1234_v52, %v1217_v48  ;;  %v887_v61 = vmul.f32 %v582_v57, %v582_v57  ;;  %v1235_v62 = vmul.f32 %v772_v58, %v772_v58 }
 0x121   : > { %v3096_v63 = vmax.f32 %v903_v59, 1e-08  ;;  %v3098_v0 = vmax.f32 %v1251_v60, 1e-08  ;;  %v904_v1 = vadd.f32 %v887_v61, %v870_v55  ;;  %v1252_v2 = vadd.f32 %v1235_v62, %v1218_v56 }
 0x123   : > { %2614 = vrsqrt.f32 %v3096_v63  ;;  %v3101_v3 = vmax.f32 %v904_v1, 1e-08  ;;  %v3103_v4 = vmax.f32 %v1252_v2, 1e-08  ;;  %v586_v5 = vpop.f32.mrb[4].mxu0  ;;  %v776_v6 = vpop.f32.mrb[4].mxu1 }
 0x124   : > { %2616 = vrsqrt.f32 %v3098_v0  ;;  %v871_v7 = vmul.f32 %v586_v5, %v586_v5  ;;  %v1219_v8 = vmul.f32 %v776_v6, %v776_v6  ;;  %v588_v9 = vpop.f32.mrb[5].mxu0  ;;  %v778_v10 = vpop.f32.mrb[5].mxu1  ;;  %vm939_vm1 = vcmp.eq.f32.partialorder %v3096_v63, inf }
 0x125   : > { %2618 = vrsqrt.f32 %v3101_v3  ;;  %v888_v11 = vmul.f32 %v588_v9, %v588_v9  ;;  %v1236_v12 = vmul.f32 %v778_v10, %v778_v10  ;;  %v590_v13 = vpop.f32.mrb[6].mxu0  ;;  %v780_v14 = vpop.f32.mrb[6].mxu1  ;;  %vm941_vm2 = vcmp.eq.f32.partialorder %v3096_v63, 0.0 }
 0x126   : > { %2620 = vrsqrt.f32 %v3103_v4  ;;  %v872_v15 = vmul.f32 %v590_v13, %v590_v13  ;;  %v1220_v16 = vmul.f32 %v780_v14, %v780_v14  ;;  %v592_v17 = vpop.f32.mrb[7].mxu0  ;;  %v782_v18 = vpop.f32.mrb[7].mxu1  ;;  %v942_v28 = vand.u32 2147483648, %v3096_v63 }
 0x127   : > { %v905_v19 = vadd.f32 %v888_v11, %v871_v7  ;;  %v1253_v21 = vadd.f32 %v1236_v12, %v1219_v8  ;;  %v889_v22 = vmul.f32 %v592_v17, %v592_v17  ;;  %v1237_v23 = vmul.f32 %v782_v18, %v782_v18 }
 0x128   : > { %vm946_vm3 = vcmp.eq.f32.partialorder %v3101_v3, inf  ;;  %vm948_vm4 = vcmp.eq.f32.partialorder %v3101_v3, 0.0  ;;  %v949_v29 = vand.u32 2147483648, %v3101_v3  ;;  %vm1287_vm5 = vcmp.eq.f32.partialorder %v3098_v0, inf }
 0x129   : > { %v3109_v24 = vmax.f32 %v905_v19, 1e-08  ;;  %v3111_v25 = vmax.f32 %v1253_v21, 1e-08  ;;  %v906_v26 = vadd.f32 %v889_v22, %v872_v15  ;;  %v1254_v27 = vadd.f32 %v1237_v23, %v1220_v16 }
 0x12a   : > { %v1290_v33 = vand.u32 2147483648, %v3098_v0  ;;  %vm1289_vm6 = vcmp.eq.f32.partialorder %v3098_v0, 0.0  ;;  %vm1294_vm7 = vcmp.eq.f32.partialorder %v3103_v4, inf  ;;  %v1297_v50 = vand.u32 2147483648, %v3103_v4 }
 0x12b   : > { %2622 = vrsqrt.f32 %v3109_v24  ;;  %v3119_v30 = vmax.f32 %v906_v26, 1e-08  ;;  %v596_v31 = vpop.f32.mrb[8].mxu0  ;;  %v786_v32 = vpop.f32.mrb[8].mxu1  ;;  %v3124_v34 = vmax.f32 %v1254_v27, 1e-08 }
 0x12c   : > { %2624 = vrsqrt.f32 %v3111_v25  ;;  %v873_v35 = vmul.f32 %v596_v31, %v596_v31  ;;  %v1221_v36 = vmul.f32 %v786_v32, %v786_v32  ;;  %v598_v37 = vpop.f32.mrb[9].mxu0  ;;  %v788_v38 = vpop.f32.mrb[9].mxu1  ;;  %vm1296_vm8 = vcmp.eq.f32.partialorder %v3103_v4, 0.0 }
 0x12d   : > { %v2615_v39 = vpop.eup %2614  ;;  %2626 = vrsqrt.f32 %v3119_v30  ;;  %v890_v40 = vmul.f32 %v598_v37, %v598_v37  ;;  %v1238_v41 = vmul.f32 %v788_v38, %v788_v38  ;;  %v600_v42 = vpop.f32.mrb[10].mxu0  ;;  %vm953_vm9 = vcmp.eq.f32.partialorder %v3109_v24, inf }
 0x12e   : > { %v790_v43 = vpop.f32.mrb[10].mxu1  ;;  %v2617_v44 = vpop.eup %2616  ;;  %v874_v45 = vmul.f32 %v600_v42, %v600_v42  ;;  %v938_v49 = vmul.f32 %v2615_v39, %v3096_v63  ;;  %2628 = vrsqrt.f32 %v3124_v34  ;;  %vm955_vm10 = vcmp.eq.f32.partialorder %v3109_v24, 0.0 }
 0x12f   : > { %v1222_v46 = vmul.f32 %v790_v43, %v790_v43  ;;  %v602_v47 = vpop.f32.mrb[11].mxu0  ;;  %v792_v48 = vpop.f32.mrb[11].mxu1  ;;  %v907_v52 = vadd.f32 %v890_v40, %v873_v35  ;;  %v1255_v53 = vadd.f32 %v1238_v41, %v1221_v36  ;;  %v1286_v59 = vmul.f32 %v2617_v44, %v3098_v0 }
 0x130   : > { %v2619_v51 = vpop.eup %2618  ;;  %v891_v54 = vmul.f32 %v602_v47, %v602_v47  ;;  %v1239_v55 = vmul.f32 %v792_v48, %v792_v48  ;;  %v940_v57 = vsel %vm939_vm1, %v3096_v63, %v938_v49  ;;  %v956_v39 = vand.u32 2147483648, %v3109_v24 }
 0x131   : > { %v2621_v56 = vpop.eup %2620  ;;  %v945_v58 = vmul.f32 %v2619_v51, %v3101_v3  ;;  %v3138_v60 = vmax.f32 %v907_v52, 1e-08  ;;  %v3140_v61 = vmax.f32 %v1255_v53, 1e-08  ;;  %v943_v2 = vsel %vm941_vm2, %v942_v28, %v940_v57 }
 0x132   : > { %v908_v62 = vadd.f32 %v891_v54, %v874_v45  ;;  %v1256_v1 = vadd.f32 %v1239_v55, %v1222_v46  ;;  %v1288_v6 = vsel %vm1287_vm5, %v3098_v0, %v1286_v59  ;;  %v1293_v7 = vmul.f32 %v2621_v56, %v3103_v4 }
 0x133   : > { %v947_v5 = vsel %vm946_vm3, %v3101_v3, %v945_v58  ;;  %2630 = vrsqrt.f32 %v3138_v60  ;;  %v606_v63 = vpop.f32.mrb[12].mxu0  ;;  %v796_v10 = vpop.f32.mrb[12].mxu1  ;;  %v1291_v23 = vsel %vm1289_vm6, %v1290_v33, %v1288_v6  ;;  %vm960_vm11 = vcmp.eq.f32.partialorder %v3119_v30, inf }
 0x134   : > { %v3154_v8 = vmax.f32 %v908_v62, 1e-08  ;;  %v3156_v9 = vmax.f32 %v1256_v1, 1e-08  ;;  %v950_v11 = vsel %vm948_vm4, %v949_v29, %v947_v5  ;;  %2632 = vrsqrt.f32 %v3140_v61  ;;  %v608_v14 = vpop.f32.mrb[13].mxu0  ;;  %v798_v15 = vpop.f32.mrb[13].mxu1 }
 0x135   : > { %v875_v12 = vmul.f32 %v606_v63, %v606_v63  ;;  %v1223_v13 = vmul.f32 %v796_v10, %v796_v10  ;;  %v1056_v16 = vpack.c.bf16 %v950_v11, %v943_v2  ;;  %v2623_v17 = vpop.eup %2622  ;;  %v892_v18 = vmul.f32 %v608_v14, %v608_v14  ;;  %v610_v21 = vpop.f32.mrb[14].mxu0 }
 0x136   : > { %2634 = vrsqrt.f32 %v3154_v8  ;;  %v1240_v19 = vmul.f32 %v798_v15, %v798_v15  ;;  %v800_v22 = vpop.f32.mrb[14].mxu1  ;;  %v2625_v26 = vpop.eup %2624  ;;  %v876_v3 = vmul.f32 %v610_v21, %v610_v21  ;;  %v1295_v31 = vsel %vm1294_vm7, %v3103_v4, %v1293_v7 }
 0x137   : > { %2636 = vrsqrt.f32 %v3156_v9  ;;  %v1224_v27 = vmul.f32 %v800_v22, %v800_v22  ;;  %v612_v28 = vpop.f32.mrb[15].mxu0  ;;  %v802_v29 = vpop.f32.mrb[15].mxu1  ;;  %2432 = vmatmul.mubr.bf16.vlgmr.msra.gmra.mrb[36].mxu0 %v1056_v16  ;;  %v909_v35 = vadd.f32 %v892_v18, %v875_v12  ;;  %v1298_v0 = vsel %vm1296_vm8, %v1297_v50, %v1295_v31 }
 0x138   : > { %v2627_v32 = vpop.eup %2626  ;;  %v1257_v36 = vadd.f32 %v1240_v19, %v1223_v13  ;;  %v893_v37 = vmul.f32 %v612_v28, %v612_v28  ;;  %v1241_v38 = vmul.f32 %v802_v29, %v802_v29  ;;  %2435 = vmatprep.mubr.msk.bf16.mxu0 %vm2861_vm0, %v2860_v20  ;;  %v952_v33 = vmul.f32 %v2623_v17, %v3109_v24 }
 0x139   : > { %v959_v40 = vmul.f32 %v2627_v32, %v3119_v30  ;;  %v3175_v41 = vmax.f32 %v909_v35, 1e-08  ;;  %v2629_v45 = vpop.eup %2628  ;;  %v1404_v46 = vpack.c.bf16 %v1298_v0, %v1291_v23  ;;  %vm962_vm12 = vcmp.eq.f32.partialorder %v3119_v30, 0.0 }
 0x13a   : > { %v3177_v42 = vmax.f32 %v1257_v36, 1e-08  ;;  %v910_v43 = vadd.f32 %v893_v37, %v876_v3  ;;  %v1258_v44 = vadd.f32 %v1241_v38, %v1224_v27  ;;  %v954_v47 = vsel %vm953_vm9, %v3109_v24, %v952_v33 }
 0x13b   : > { %2638 = vrsqrt.f32 %v3175_v41  ;;  %v616_v49 = vpop.f32.mrb[16].mxu0  ;;  %v806_v50 = vpop.f32.mrb[16].mxu1  ;;  %v957_v51 = vsel %vm955_vm10, %v956_v39, %v954_v47  ;;  %2484 = vmatmul.mubr.bf16.vlgmr.msra.gmra.mrb[36].mxu1 %v1404_v46  ;;  %v961_v56 = vsel %vm960_vm11, %v3119_v30, %v959_v40  ;;  %v963_v24 = vand.u32 2147483648, %v3119_v30 }
 0x13c   : > { %v3185_v4 = vmax.f32 %v910_v43, 1e-08  ;;  %v3187_v48 = vmax.f32 %v1258_v44, 1e-08  ;;  %2640 = vrsqrt.f32 %v3177_v42  ;;  %v877_v52 = vmul.f32 %v616_v49, %v616_v49  ;;  %v618_v54 = vpop.f32.mrb[17].mxu0  ;;  %v808_v55 = vpop.f32.mrb[17].mxu1  ;;  %2487 = vmatprep.mubr.msk.bf16.mxu1 %vm2861_vm0, %v2860_v20 }
 0x13d   : > { %v1225_v53 = vmul.f32 %v806_v50, %v806_v50  ;;  %v3193_v57 = vpop.eup %2630  ;;  %v894_v58 = vmul.f32 %v618_v54, %v618_v54  ;;  %v1242_v59 = vmul.f32 %v808_v55, %v808_v55  ;;  %v620_v62 = vpop.f32.mrb[18].mxu0  ;;  %v1300_v10 = vmul.f32 %v2625_v26, %v3111_v25 }
 0x13e   : > { %2642 = vrsqrt.f32 %v3185_v4  ;;  %v810_v1 = vpop.f32.mrb[18].mxu1  ;;  %v3199_v2 = vpop.eup %2632  ;;  %v878_v5 = vmul.f32 %v620_v62, %v620_v62  ;;  %v964_v17 = vsel %vm962_vm12, %v963_v24, %v961_v56  ;;  %vm1301_vm13 = vcmp.eq.f32.partialorder %v3111_v25, inf }
 0x13f   : > { %2644 = vrsqrt.f32 %v3187_v48  ;;  %v1226_v6 = vmul.f32 %v810_v1, %v810_v1  ;;  %v622_v7 = vpop.f32.mrb[19].mxu0  ;;  %v812_v63 = vpop.f32.mrb[19].mxu1  ;;  %v911_v12 = vadd.f32 %v894_v58, %v877_v52  ;;  %v1259_v13 = vadd.f32 %v1242_v59, %v1225_v53 }
 0x140   : > { %v3203_v11 = vpop.eup %2634  ;;  %v895_v14 = vmul.f32 %v622_v7, %v622_v7  ;;  %v1243_v15 = vmul.f32 %v812_v63, %v812_v63  ;;  %vm1303_vm14 = vcmp.eq.f32.partialorder %v3111_v25, 0.0  ;;  %v1304_v18 = vand.u32 2147483648, %v3111_v25 }
 0x141   : > { %v3205_v16 = vpop.eup %2636  ;;  %v3212_v19 = vmax.f32 %v911_v12, 1e-08  ;;  %v3214_v21 = vmax.f32 %v1259_v13, 1e-08  ;;  %v1057_v26 = vpack.c.bf16 %v964_v17, %v957_v51  ;;  %v1302_v3 = vsel %vm1301_vm13, %v3111_v25, %v1300_v10 }
 0x142   : > { %v912_v22 = vadd.f32 %v895_v14, %v878_v5  ;;  %v1260_v23 = vadd.f32 %v1243_v15, %v1226_v6  ;;  %v1307_v27 = vmul.f32 %v2629_v45, %v3124_v34  ;;  %vm1308_vm15 = vcmp.eq.f32.partialorder %v3124_v34, inf }
 0x143   : > { %2646 = vrsqrt.f32 %v3212_v19  ;;  %v626_v29 = vpop.f32.mrb[20].mxu0  ;;  %v816_v31 = vpop.f32.mrb[20].mxu1  ;;  %2436 = vmatmul.mubr.bf16.gmra.mrb[40].mxu0 %v1057_v26  ;;  %v1305_v32 = vsel %vm1303_vm14, %v1304_v18, %v1302_v3  ;;  %v1311_v36 = vand.u32 2147483648, %v3124_v34  ;;  %vm1310_vm1 = vcmp.eq.f32.partialorder %v3124_v34, 0.0 }
 0x144   : > { %v3220_v30 = vmax.f32 %v912_v22, 1e-08  ;;  %v3222_v28 = vmax.f32 %v1260_v23, 1e-08  ;;  %2648 = vrsqrt.f32 %v3214_v21  ;;  %v1309_v35 = vsel %vm1308_vm15, %v3124_v34, %v1307_v27  ;;  %v628_v37 = vpop.f32.mrb[21].mxu0  ;;  %v818_v38 = vpop.f32.mrb[21].mxu1  ;;  %2439 = vmatprep.mubr.msk.bf16.mxu0 %vm2861_vm0, %v2860_v20 }
 0x145   : > { %v3229_v0 = vpop.eup %2638  ;;  %v879_v33 = vmul.f32 %v626_v29, %v626_v29  ;;  %v1227_v39 = vmul.f32 %v816_v31, %v816_v31  ;;  %v896_v40 = vmul.f32 %v628_v37, %v628_v37  ;;  %v630_v43 = vpop.f32.mrb[22].mxu0  ;;  %v1312_v45 = vsel %vm1310_vm1, %v1311_v36, %v1309_v35 }
 0x146   : > { %v820_v44 = vpop.f32.mrb[22].mxu1  ;;  %v3234_v25 = vpop.eup %2640  ;;  %2650 = vrsqrt.f32 %v3220_v30  ;;  %v1244_v46 = vmul.f32 %v818_v38, %v818_v38  ;;  %v880_v47 = vmul.f32 %v630_v43, %v630_v43  ;;  %v1405_v34 = vpack.c.bf16 %v1312_v45, %v1305_v32 }
 0x147   : > { %v632_v49 = vpop.f32.mrb[23].mxu0  ;;  %v822_v50 = vpop.f32.mrb[23].mxu1  ;;  %v913_v52 = vadd.f32 %v896_v40, %v879_v33  ;;  %v1228_v53 = vmul.f32 %v820_v44, %v820_v44  ;;  %2652 = vrsqrt.f32 %v3222_v28  ;;  %v966_v59 = vmul.f32 %v3193_v57, %v3138_v60 }
 0x148   : > { %v3237_v51 = vpop.eup %2642  ;;  %v897_v54 = vmul.f32 %v632_v49, %v632_v49  ;;  %v1261_v56 = vadd.f32 %v1244_v46, %v1227_v39  ;;  %v1245_v58 = vmul.f32 %v822_v50, %v822_v50  ;;  %2488 = vmatmul.mubr.bf16.gmra.mrb[40].mxu1 %v1405_v34  ;;  %vm967_vm2 = vcmp.eq.f32.partialorder %v3138_v60, inf }
 0x149   : > { %v3239_v55 = vpop.eup %2644  ;;  %v3244_v62 = vmax.f32 %v913_v52, 1e-08  ;;  %v970_v24 = vand.u32 2147483648, %v3138_v60  ;;  %2491 = vmatprep.mubr.msk.bf16.mxu1 %vm2861_vm0, %v2860_v20  ;;  %v968_v7 = vsel %vm967_vm2, %v3138_v60, %v966_v59  ;;  %v973_v63 = vmul.f32 %v3203_v11, %v3154_v8 }
 0x14a   : > { %v914_v1 = vadd.f32 %v897_v54, %v880_v47  ;;  %v3248_v5 = vmax.f32 %v1261_v56, 1e-08  ;;  %v1262_v6 = vadd.f32 %v1245_v58, %v1228_v53  ;;  %vm969_vm3 = vcmp.eq.f32.partialorder %v3138_v60, 0.0 }
 0x14b   : > { %2654 = vrsqrt.f32 %v3244_v62  ;;  %vm974_vm4 = vcmp.eq.f32.partialorder %v3154_v8, inf  ;;  %v636_v10 = vpop.f32.mrb[24].mxu0  ;;  %v826_v12 = vpop.f32.mrb[24].mxu1  ;;  %v971_v14 = vsel %vm969_vm3, %v970_v24, %v968_v7  ;;  %vm976_vm5 = vcmp.eq.f32.partialorder %v3154_v8, 0.0 }
 0x14c   : > { %v3256_v57 = vmax.f32 %v914_v1, 1e-08  ;;  %2656 = vrsqrt.f32 %v3248_v5  ;;  %v3261_v13 = vmax.f32 %v1262_v6, 1e-08  ;;  %v975_v15 = vsel %vm974_vm4, %v3154_v8, %v973_v63  ;;  %v638_v17 = vpop.f32.mrb[25].mxu0  ;;  %v828_v18 = vpop.f32.mrb[25].mxu1 }
 0x14d   : > { %v3264_v11 = vpop.eup %2646  ;;  %v977_v60 = vand.u32 2147483648, %v3154_v8  ;;  %v1314_v22 = vmul.f32 %v3199_v2, %v3140_v61  ;;  %v640_v23 = vpop.f32.mrb[26].mxu0  ;;  %vm1315_vm6 = vcmp.eq.f32.partialorder %v3140_v61, inf  ;;  %vm1317_vm7 = vcmp.eq.f32.partialorder %v3140_v61, 0.0 }
 0x14e   : > { %2658 = vrsqrt.f32 %v3256_v57  ;;  %v830_v26 = vpop.f32.mrb[26].mxu1  ;;  %v3271_v3 = vpop.eup %2648  ;;  %v1318_v27 = vand.u32 2147483648, %v3140_v61  ;;  %v1321_v29 = vmul.f32 %v3205_v16, %v3156_v9  ;;  %vm1322_vm8 = vcmp.eq.f32.partialorder %v3156_v9, inf }
 0x14f   : > { %v642_v31 = vpop.f32.mrb[27].mxu0  ;;  %v832_v32 = vpop.f32.mrb[27].mxu1  ;;  %v978_v35 = vsel %vm976_vm5, %v977_v60, %v975_v15  ;;  %v1316_v8 = vsel %vm1315_vm6, %v3140_v61, %v1314_v22  ;;  %vm1324_vm9 = vcmp.eq.f32.partialorder %v3156_v9, 0.0  ;;  %v1325_v33 = vand.u32 2147483648, %v3156_v9 }
 0x150   : > { %v3281_v2 = vpop.eup %2650  ;;  %v1058_v36 = vpack.c.bf16 %v978_v35, %v971_v14  ;;  %v1319_v37 = vsel %vm1317_vm7, %v1318_v27, %v1316_v8  ;;  %v1323_v38 = vsel %vm1322_vm8, %v3156_v9, %v1321_v29  ;;  %v881_v39 = vmul.f32 %v636_v10, %v636_v10 }
 0x151   : > { %v1229_v40 = vmul.f32 %v826_v12, %v826_v12  ;;  %v898_v16 = vmul.f32 %v638_v17, %v638_v17  ;;  %v1246_v43 = vmul.f32 %v828_v18, %v828_v18  ;;  %v3285_v44 = vpop.eup %2652  ;;  %v1326_v61 = vsel %vm1324_vm9, %v1325_v33, %v1323_v38 }
 0x152   : > { %2440 = vmatmul.mubr.bf16.gmra.mrb[44].mxu0 %v1058_v36  ;;  %v882_v45 = vmul.f32 %v640_v23, %v640_v23  ;;  %v1230_v46 = vmul.f32 %v830_v26, %v830_v26  ;;  %v899_v47 = vmul.f32 %v642_v31, %v642_v31  ;;  %v1406_v49 = vpack.c.bf16 %v1326_v61, %v1319_v37 }
 0x153   : > { %v915_v50 = vadd.f32 %v898_v16, %v881_v39  ;;  %v1263_v34 = vadd.f32 %v1246_v43, %v1229_v40  ;;  %2443 = vmatprep.mubr.msk.bf16.mxu0 %vm2861_vm0, %v2860_v20  ;;  %v1247_v52 = vmul.f32 %v832_v32, %v832_v32  ;;  %v646_v53 = vpop.f32.mrb[28].mxu0  ;;  %v836_v9 = vpop.f32.mrb[28].mxu1  ;;  %2660 = vrsqrt.f32 %v3261_v13 }
 0x154   : > { %v916_v54 = vadd.f32 %v899_v47, %v882_v45  ;;  %v980_v56 = vmul.f32 %v3229_v0, %v3175_v41  ;;  %v648_v58 = vpop.f32.mrb[29].mxu0  ;;  %v838_v59 = vpop.f32.mrb[29].mxu1  ;;  %2492 = vmatmul.mubr.bf16.gmra.mrb[44].mxu1 %v1406_v49  ;;  %vm981_vm10 = vcmp.eq.f32.partialorder %v3175_v41, inf  ;;  %vm983_vm11 = vcmp.eq.f32.partialorder %v3175_v41, 0.0 }
 0x155   : > { %v3292_v1 = vpop.eup %2654  ;;  %v3294_v24 = vmax.f32 %v915_v50, 1e-08  ;;  %v3296_v6 = vmax.f32 %v1263_v34, 1e-08  ;;  %v1264_v7 = vadd.f32 %v1247_v52, %v1230_v46  ;;  %v650_v63 = vpop.f32.mrb[30].mxu0  ;;  %2495 = vmatprep.mubr.msk.bf16.mxu1 %vm2861_vm0, %v2860_v20  ;;  %v984_v12 = vand.u32 2147483648, %v3175_v41 }
 0x156   : > { %v3299_v10 = vpop.eup %2656  ;;  %v982_v0 = vsel %vm981_vm10, %v3175_v41, %v980_v56  ;;  %v987_v14 = vmul.f32 %v3237_v51, %v3185_v4  ;;  %v840_v15 = vpop.f32.mrb[30].mxu1  ;;  %v3311_v60 = vmax.f32 %v916_v54, 1e-08  ;;  %vm988_vm12 = vcmp.eq.f32.partialorder %v3185_v4, inf }
 0x157   : > { %v652_v17 = vpop.f32.mrb[31].mxu0  ;;  %2662 = vrsqrt.f32 %v3294_v24  ;;  %v3313_v22 = vmax.f32 %v1264_v7, 1e-08  ;;  %v842_v23 = vpop.f32.mrb[31].mxu1  ;;  %v985_v26 = vsel %vm983_vm11, %v984_v12, %v982_v0  ;;  %v991_v41 = vand.u32 2147483648, %v3185_v4 }
 0x158   : > { %v3308_v18 = vpop.eup %2658  ;;  %v989_v27 = vsel %vm988_vm12, %v3185_v4, %v987_v14  ;;  %v1328_v51 = vmul.f32 %v3234_v25, %v3177_v42  ;;  %2664 = vrsqrt.f32 %v3296_v6  ;;  %vm990_vm13 = vcmp.eq.f32.partialorder %v3185_v4, 0.0 }
 0x159   : > { %vm1329_vm14 = vcmp.eq.f32.partialorder %v3177_v42, inf  ;;  %v1332_v29 = vand.u32 2147483648, %v3177_v42  ;;  %v992_v31 = vsel %vm990_vm13, %v991_v41, %v989_v27  ;;  %vm1331_vm15 = vcmp.eq.f32.partialorder %v3177_v42, 0.0 }
 0x15a   : > { %v1330_v32 = vsel %vm1329_vm14, %v3177_v42, %v1328_v51  ;;  %v1335_v35 = vmul.f32 %v3239_v55, %v3187_v48  ;;  %v1059_v8 = vpack.c.bf16 %v992_v31, %v985_v26  ;;  %vm1336_vm1 = vcmp.eq.f32.partialorder %v3187_v48, inf }
 0x15b   : > { %v1333_v36 = vsel %vm1331_vm15, %v1332_v29, %v1330_v32  ;;  %vm1338_vm2 = vcmp.eq.f32.partialorder %v3187_v48, 0.0  ;;  %v3330_v25 = vpop.f32.mrb[32].mxu0  ;;  %v3332_v4 = vpop.f32.mrb[32].mxu1  ;;  %v1339_v38 = vand.u32 2147483648, %v3187_v48  ;;  %v883_v33 = vmul.f32 %v646_v53, %v646_v53 }
 0x15c   : > { %v1337_v37 = vsel %vm1336_vm1, %v3187_v48, %v1335_v35  ;;  %v1231_v39 = vmul.f32 %v836_v9, %v836_v9  ;;  %v658_v42 = vpop.f32.mrb[33].mxu0  ;;  %v848_v40 = vpop.f32.mrb[33].mxu1  ;;  %2444 = vmatmul.mubr.bf16.gmra.mrb[48].mxu0 %v1059_v8  ;;  %v900_v55 = vmul.f32 %v648_v58, %v648_v58  ;;  %v1248_v16 = vmul.f32 %v838_v59, %v838_v59 }
 0x15d   : > { %v884_v43 = vmul.f32 %v650_v63, %v650_v63  ;;  %v1232_v61 = vmul.f32 %v840_v15, %v840_v15  ;;  %v660_v45 = vpop.f32.mrb[34].mxu0  ;;  %v850_v46 = vpop.f32.mrb[34].mxu1  ;;  %v1340_v49 = vsel %vm1338_vm2, %v1339_v38, %v1337_v37  ;;  %2447 = vmatprep.mubr.msk.bf16.mxu0 %vm2861_vm0, %v2860_v20  ;;  %v901_v50 = vmul.f32 %v652_v17, %v652_v17 }
 0x15e   : > { %v3336_v47 = vpop.eup %2660  ;;  %v1249_v34 = vmul.f32 %v842_v23, %v842_v23  ;;  %v994_v52 = vmul.f32 %v3264_v11, %v3212_v19  ;;  %v661_v53 = vpop.f32.mrb[35].mxu0  ;;  %2666 = vrsqrt.f32 %v3311_v60  ;;  %v1407_v54 = vpack.c.bf16 %v1340_v49, %v1333_v36 }
 0x15f   : > { %v851_v9 = vpop.f32.mrb[35].mxu1  ;;  %v917_v56 = vadd.f32 %v900_v55, %v883_v33  ;;  %v1265_v58 = vadd.f32 %v1248_v16, %v1231_v39  ;;  %2668 = vrsqrt.f32 %v3313_v22  ;;  %v918_v59 = vadd.f32 %v901_v50, %v884_v43 }
 0x160   : > { %v1266_v48 = vadd.f32 %v1249_v34, %v1232_v61  ;;  %vm995_vm3 = vcmp.eq.f32.partialorder %v3212_v19, inf  ;;  %2496 = vmatmul.mubr.bf16.gmra.mrb[48].mxu1 %v1407_v54  ;;  %v1001_v12 = vmul.f32 %v3281_v2, %v3220_v30  ;;  %vm997_vm4 = vcmp.eq.f32.partialorder %v3212_v19, 0.0 }
 0x161   : > { %v3347_v7 = vpop.eup %2662  ;;  %v3349_v63 = vmax.f32 %v917_v56, 1e-08  ;;  %v3351_v0 = vmax.f32 %v1265_v58, 1e-08  ;;  %v996_v11 = vsel %vm995_vm3, %v3212_v19, %v994_v52  ;;  %2499 = vmatprep.mubr.msk.bf16.mxu1 %vm2861_vm0, %v2860_v20  ;;  %v3358_v14 = vmax.f32 %v918_v59, 1e-08 }
 0x162   : > { %v998_v15 = vand.u32 2147483648, %v3212_v19  ;;  %vm1002_vm5 = vcmp.eq.f32.partialorder %v3220_v30, inf  ;;  %v3363_v17 = vpop.eup %2664  ;;  %v3366_v23 = vmax.f32 %v1266_v48, 1e-08  ;;  %v1005_v2 = vand.u32 2147483648, %v3220_v30 }
 0x163   : > { %2670 = vrsqrt.f32 %v3349_v63  ;;  %v1003_v26 = vsel %vm1002_vm5, %v3220_v30, %v1001_v12  ;;  %vm1004_vm6 = vcmp.eq.f32.partialorder %v3220_v30, 0.0  ;;  %v1342_v19 = vmul.f32 %v3271_v3, %v3214_v21 }
 0x164   : > { %2672 = vrsqrt.f32 %v3351_v0  ;;  %v999_v27 = vsel %vm997_vm4, %v998_v15, %v996_v11  ;;  %v1006_v41 = vsel %vm1004_vm6, %v1005_v2, %v1003_v26  ;;  %vm1343_vm7 = vcmp.eq.f32.partialorder %v3214_v21, inf }
 0x165   : > { %vm1345_vm8 = vcmp.eq.f32.partialorder %v3214_v21, 0.0  ;;  %v1349_v51 = vmul.f32 %v3285_v44, %v3222_v28  ;;  %2674 = vrsqrt.f32 %v3358_v14  ;;  %v1060_v29 = vpack.c.bf16 %v1006_v41, %v999_v27 }
 0x166   : > { %v1344_v31 = vsel %vm1343_vm7, %v3214_v21, %v1342_v19  ;;  %vm1350_vm9 = vcmp.eq.f32.partialorder %v3222_v28, inf  ;;  %v1346_v30 = vand.u32 2147483648, %v3214_v21  ;;  %vm1352_vm10 = vcmp.eq.f32.partialorder %v3222_v28, 0.0 }
 0x167   : > { %v1351_v32 = vsel %vm1350_vm9, %v3222_v28, %v1349_v51  ;;  %v1353_v3 = vand.u32 2147483648, %v3222_v28  ;;  %2448 = vmatmul.mubr.bf16.gmra.mrb[52].mxu0 %v1060_v29  ;;  %v885_v35 = vmul.f32 %v3330_v25, %v3330_v25  ;;  %v1233_v44 = vmul.f32 %v3332_v4, %v3332_v4 }
 0x168   : > { %v902_v8 = vmul.f32 %v658_v42, %v658_v42  ;;  %v1250_v36 = vmul.f32 %v848_v40, %v848_v40  ;;  %v2667_v37 = vpop.eup %2666  ;;  %2676 = vrsqrt.f32 %v3366_v23  ;;  %v1347_v38 = vsel %vm1345_vm8, %v1346_v30, %v1344_v31  ;;  %2451 = vmatprep.mubr.msk.bf16.mxu0 %vm2861_vm0, %v2860_v20 }
 0x169   : > { %v1354_v33 = vsel %vm1352_vm10, %v1353_v3, %v1351_v32  ;;  %v1008_v28 = vmul.f32 %v3292_v1, %v3244_v62  ;;  %v2669_v39 = vpop.eup %2668  ;;  %vm1009_vm11 = vcmp.eq.f32.partialorder %v3244_v62, inf  ;;  %vm1011_vm12 = vcmp.eq.f32.partialorder %v3244_v62, 0.0 }
 0x16a   : > { %v1408_v25 = vpack.c.bf16 %v1354_v33, %v1347_v38  ;;  %v919_v55 = vadd.f32 %v902_v8, %v885_v35  ;;  %v1267_v16 = vadd.f32 %v1250_v36, %v1233_v44  ;;  %v1012_v21 = vand.u32 2147483648, %v3244_v62 }
 0x16b   : > { %v1010_v4 = vsel %vm1009_vm11, %v3244_v62, %v1008_v28  ;;  %v1015_v42 = vmul.f32 %v3308_v18, %v3256_v57  ;;  %vm1016_vm13 = vcmp.eq.f32.partialorder %v3256_v57, inf  ;;  %v1019_v1 = vand.u32 2147483648, %v3256_v57 }
 0x16c   : > { %2500 = vmatmul.mubr.bf16.gmra.mrb[52].mxu1 %v1408_v25  ;;  %v3402_v40 = vmax.f32 %v919_v55, 1e-08  ;;  %v3404_v43 = vmax.f32 %v1267_v16, 1e-08  ;;  %v1013_v45 = vsel %vm1011_vm12, %v1012_v21, %v1010_v4  ;;  %vm1018_vm14 = vcmp.eq.f32.partialorder %v3256_v57, 0.0 }
 0x16d   : > { %v2671_v61 = vpop.eup %2670  ;;  %2503 = vmatprep.mubr.msk.bf16.mxu1 %vm2861_vm0, %v2860_v20  ;;  %v1017_v46 = vsel %vm1016_vm13, %v3256_v57, %v1015_v42  ;;  %v1356_v62 = vmul.f32 %v3299_v10, %v3248_v5  ;;  %vm1357_vm15 = vcmp.eq.f32.partialorder %v3248_v5, inf  ;;  %v1363_v50 = vmul.f32 %v3336_v47, %v3261_v13 }
 0x16e   : > { %v2673_v18 = vpop.eup %2672  ;;  %2678 = vrsqrt.f32 %v3402_v40  ;;  %v1020_v49 = vsel %vm1018_vm14, %v1019_v1, %v1017_v46  ;;  %v1360_v53 = vand.u32 2147483648, %v3248_v5  ;;  %vm1364_vm1 = vcmp.eq.f32.partialorder %v3261_v13, inf }
 0x16f   : > { %v1061_v34 = vpack.c.bf16 %v1020_v49, %v1013_v45  ;;  %v1358_v52 = vsel %vm1357_vm15, %v3248_v5, %v1356_v62  ;;  %v2675_v57 = vpop.eup %2674  ;;  %2680 = vrsqrt.f32 %v3404_v43  ;;  %vm1359_vm2 = vcmp.eq.f32.partialorder %v3248_v5, 0.0 }
 0x170   : > { %v1365_v10 = vsel %vm1364_vm1, %v3261_v13, %v1363_v50  ;;  %v1367_v9 = vand.u32 2147483648, %v3261_v13  ;;  %v1361_v54 = vsel %vm1359_vm2, %v1360_v53, %v1358_v52  ;;  %vm1366_vm3 = vcmp.eq.f32.partialorder %v3261_v13, 0.0 }
 0x171   : > { %2452 = vmatmul.mubr.bf16.gmra.mrb[56].mxu0 %v1061_v34  ;;  %v1022_v47 = vmul.f32 %v3347_v7, %v3294_v24  ;;  %vm1023_vm4 = vcmp.eq.f32.partialorder %v3294_v24, inf  ;;  %v1026_v58 = vand.u32 2147483648, %v3294_v24  ;;  %v1029_v5 = vmul.f32 %v2667_v37, %v3311_v60 }
 0x172   : > { %v1368_v56 = vsel %vm1366_vm3, %v1367_v9, %v1365_v10  ;;  %2455 = vmatprep.mubr.msk.bf16.mxu0 %vm2861_vm0, %v2860_v20  ;;  %vm1030_vm5 = vcmp.eq.f32.partialorder %v3311_v60, inf  ;;  %v2677_v59 = vpop.eup %2676  ;;  %v1033_v13 = vand.u32 2147483648, %v3311_v60  ;;  %v1370_v7 = vmul.f32 %v3363_v17, %v3296_v6 }
 0x173   : > { %v1409_v48 = vpack.c.bf16 %v1368_v56, %v1361_v54  ;;  %v1024_v11 = vsel %vm1023_vm4, %v3294_v24, %v1022_v47  ;;  %vm1025_vm6 = vcmp.eq.f32.partialorder %v3294_v24, 0.0  ;;  %v1031_v12 = vsel %vm1030_vm5, %v3311_v60, %v1029_v5 }
 0x174   : > { %vm1032_vm7 = vcmp.eq.f32.partialorder %v3311_v60, 0.0  ;;  %vm1371_vm8 = vcmp.eq.f32.partialorder %v3296_v6, inf  ;;  %v1027_v15 = vsel %vm1025_vm6, %v1026_v58, %v1024_v11  ;;  %v1377_v27 = vmul.f32 %v2669_v39, %v3313_v22 }
 0x175   : > { %2504 = vmatmul.mubr.bf16.gmra.mrb[56].mxu1 %v1409_v48  ;;  %v1034_v26 = vsel %vm1032_vm7, %v1033_v13, %v1031_v12  ;;  %v1372_v2 = vsel %vm1371_vm8, %v3296_v6, %v1370_v7  ;;  %v1374_v17 = vand.u32 2147483648, %v3296_v6  ;;  %vm1378_vm9 = vcmp.eq.f32.partialorder %v3313_v22, inf }
 0x176   : > { %2507 = vmatprep.mubr.msk.bf16.mxu1 %vm2861_vm0, %v2860_v20  ;;  %v1062_v19 = vpack.c.bf16 %v1034_v26, %v1027_v15  ;;  %v1381_v24 = vand.u32 2147483648, %v3313_v22  ;;  %vm1373_vm10 = vcmp.eq.f32.partialorder %v3296_v6, 0.0  ;;  %v1379_v60 = vsel %vm1378_vm9, %v3313_v22, %v1377_v27 }
 0x177   : > { %vm1380_vm11 = vcmp.eq.f32.partialorder %v3313_v22, 0.0  ;;  %v1036_v41 = vmul.f32 %v2671_v61, %v3349_v63  ;;  %v1375_v29 = vsel %vm1373_vm10, %v1374_v17, %v1372_v2  ;;  %vm1037_vm12 = vcmp.eq.f32.partialorder %v3349_v63, inf }
 0x178   : > { %v2679_v51 = vpop.eup %2678  ;;  %v1382_v31 = vsel %vm1380_vm11, %v1381_v24, %v1379_v60  ;;  %v1043_v30 = vmul.f32 %v2675_v57, %v3358_v14  ;;  %vm1044_vm13 = vcmp.eq.f32.partialorder %v3358_v14, inf  ;;  %v1040_v22 = vand.u32 2147483648, %v3349_v63 }
 0x179   : > { %2456 = vmatmul.mubr.bf16.gmra.mrb[60].mxu0 %v1062_v19  ;;  %v1410_v32 = vpack.c.bf16 %v1382_v31, %v1375_v29  ;;  %v1038_v3 = vsel %vm1037_vm12, %v3349_v63, %v1036_v41  ;;  %v2681_v6 = vpop.eup %2680  ;;  %v1047_v44 = vand.u32 2147483648, %v3358_v14  ;;  %v1384_v8 = vmul.f32 %v2673_v18, %v3351_v0 }
 0x17a   : > { %2459 = vmatprep.mubr.msk.bf16.mxu0 %vm2861_vm0, %v2860_v20  ;;  %v1045_v35 = vsel %vm1044_vm13, %v3358_v14, %v1043_v30  ;;  %vm1039_vm14 = vcmp.eq.f32.partialorder %v3349_v63, 0.0  ;;  %vm1046_vm15 = vcmp.eq.f32.partialorder %v3358_v14, 0.0  ;;  %vm1385_vm1 = vcmp.eq.f32.partialorder %v3351_v0, inf }
 0x17b   : > { %v1391_v36 = vmul.f32 %v2677_v59, %v3366_v23  ;;  %v1041_v37 = vsel %vm1039_vm14, %v1040_v22, %v1038_v3  ;;  %v1048_v38 = vsel %vm1046_vm15, %v1047_v44, %v1045_v35  ;;  %v1386_v33 = vsel %vm1385_vm1, %v3351_v0, %v1384_v8 }
 0x17c   : > { %vm1392_vm2 = vcmp.eq.f32.partialorder %v3366_v23, inf  ;;  %v1063_v28 = vpack.c.bf16 %v1048_v38, %v1041_v37  ;;  %v1388_v39 = vand.u32 2147483648, %v3351_v0  ;;  %v1395_v63 = vand.u32 2147483648, %v3366_v23 }
 0x17d   : > { %2508 = vmatmul.mubr.bf16.gmra.mrb[60].mxu1 %v1410_v32  ;;  %v1393_v25 = vsel %vm1392_vm2, %v3366_v23, %v1391_v36  ;;  %vm1387_vm3 = vcmp.eq.f32.partialorder %v3351_v0, 0.0  ;;  %vm1394_vm4 = vcmp.eq.f32.partialorder %v3366_v23, 0.0  ;;  %v1050_v14 = vmul.f32 %v2679_v51, %v3402_v40 }
 0x17e   : > { %2511 = vmatprep.mubr.msk.bf16.mxu1 %vm2861_vm0, %v2860_v20  ;;  %v1389_v55 = vsel %vm1387_vm3, %v1388_v39, %v1386_v33  ;;  %v1396_v16 = vsel %vm1394_vm4, %v1395_v63, %v1393_v25  ;;  %vm1051_vm5 = vcmp.eq.f32.partialorder %v3402_v40, inf  ;;  %v1398_v42 = vmul.f32 %v2681_v6, %v3404_v43 }
 0x17f   : > { %v1411_v4 = vpack.c.bf16 %v1396_v16, %v1389_v55  ;;  %v1052_v21 = vsel %vm1051_vm5, %v3402_v40, %v1050_v14  ;;  %v1054_v0 = vand.u32 2147483648, %v3402_v40  ;;  %vm1053_vm6 = vcmp.eq.f32.partialorder %v3402_v40, 0.0  ;;  %v3493_v40 = vld [vmem:[%s4347_s4] sm:$0x1] }
 0x180   : > { %vm1399_vm7 = vcmp.eq.f32.partialorder %v3404_v43, inf  ;;  %v1402_v61 = vand.u32 2147483648, %v3404_v43  ;;  %vm1401_vm8 = vcmp.eq.f32.partialorder %v3404_v43, 0.0 }
 0x181   : > { %2460 = vmatmul.mubr.bf16.gmra.mrb[64].mxu0 %v1063_v28  ;;  %v1055_v23 = vsel %vm1053_vm6, %v1054_v0, %v1052_v21  ;;  %v1400_v1 = vsel %vm1399_vm7, %v3404_v43, %v1398_v42 }
 0x182   : > { %2463 = vmatprep.mubr.msk.bf16.mxu0 %vm2861_vm0, %v2860_v20  ;;  %v1064_v45 = vpack.c.bf16 %v1055_v23, %v1055_v23  ;;  %v1403_v46 = vsel %vm1401_vm8, %v1402_v61, %v1400_v1 }
 0x183   : > { %v1412_v62 = vpack.c.bf16 %v1403_v46, %v1403_v46 }
 0x185   : > { %2512 = vmatmul.mubr.bf16.gmra.mrb[64].mxu1 %v1411_v4 }
 0x186   : > { %2515 = vmatprep.mubr.msk.bf16.mxu1 %vm2861_vm0, %v2860_v20 }
 0x189   : > { %2464 = vmatmul.mubr.bf16.gmra.mrb[68].mxu0 %v1064_v45 }
 0x18d   : > { %2516 = vmatmul.mubr.bf16.gmra.mrb[68].mxu1 %v1412_v62 }
 0x20a   : > { %v3497_v49 = vpop.f32.mrb[36].mxu0 }
 0x20b   : > { %v2433_v20 = vpop.f32.mrb[37].mxu0 }
 0x20c   : > { %v3499_v50 = vpop.f32.mrb[38].mxu0 }
 0x20d   : > { %v2434_v34 = vpop.f32.mrb[39].mxu0 }
 0x20e   : > { %v3501_v52 = vpop.f32.mrb[36].mxu1 }
 0x20f   : > { %v1519_v43 = vsub.f32 %v3501_v52, %v3497_v49  ;;  %v3507_v53 = vmul.f32 %v3501_v52, %v3501_v52  ;;  %v2485_v57 = vpop.f32.mrb[37].mxu1 }
 0x210   : > { %v3509_v10 = vpop.f32.mrb[38].mxu1 }
 0x211   : > { %4418 = vst [vmem:[#allocation2_spill] sm:$0xff] %v3507_v53  ;;  %v3511_v9 = vmul.f32 %v1519_v43, %v1519_v43  ;;  %v1520_v54 = vsub.f32 %v3509_v10, %v3499_v50  ;;  %v3517_v47 = vmul.f32 %v3509_v10, %v3509_v10  ;;  %v2486_v56 = vpop.f32.mrb[39].mxu1 }
 0x213   : > { %4419 = vst [vmem:[#allocation3_spill] sm:$0xff] %v3511_v9  ;;  %4420 = vst [vmem:[#allocation4_spill] sm:$0xff] %v3517_v47  ;;  %v3519_v58 = vmul.f32 %v1520_v54, %v1520_v54 }
 0x215   : > { %4421 = vst [vmem:[#allocation5_spill] sm:$0xff] %v3519_v58 }
 0x216   : > { %v3521_v5 = vpop.f32.mrb[40].mxu0 }
 0x217   : > { %v2437_v59 = vpop.f32.mrb[41].mxu0 }
 0x218   : > { %v3523_v48 = vpop.f32.mrb[42].mxu0 }
 0x219   : > { %4422 = vst [vmem:[#allocation6_spill] sm:$0xff] %v3523_v48  ;;  %v2438_v11 = vpop.f32.mrb[43].mxu0 }
 0x21b   : > { %v3525_v13 = vpop.f32.mrb[40].mxu1 }
 0x21c   : > { %v1521_v7 = vsub.f32 %v3525_v13, %v3521_v5  ;;  %v3531_v12 = vmul.f32 %v3525_v13, %v3525_v13  ;;  %v2489_v15 = vpop.f32.mrb[41].mxu1 }
 0x21d   : > { %v3533_v26 = vpop.f32.mrb[42].mxu1 }
 0x21e   : > { %4423 = vst [vmem:[#allocation7_spill] sm:$0xff] %v3531_v12  ;;  %v3535_v2 = vmul.f32 %v1521_v7, %v1521_v7  ;;  %v1522_v27 = vsub.f32 %v3533_v26, %v3523_v48  ;;  %v3541_v19 = vmul.f32 %v3533_v26, %v3533_v26  ;;  %v2490_v17 = vpop.f32.mrb[43].mxu1 }
 0x220   : > { %4424 = vst [vmem:[#allocation8_spill] sm:$0xff] %v3535_v2  ;;  %4425 = vst [vmem:[#allocation9_spill] sm:$0xff] %v3541_v19  ;;  %v3543_v24 = vmul.f32 %v1522_v27, %v1522_v27 }
 0x222   : > { %4426 = vst [vmem:[#allocation10_spill] sm:$0xff] %v3543_v24 }
 0x225   : > { %v3545_v60 = vpop.f32.mrb[44].mxu0 }
 0x226   : > { %4427 = vst [vmem:[#allocation11_spill] sm:$0xff] %v3545_v60  ;;  %v2441_v41 = vpop.f32.mrb[45].mxu0 }
 0x227   : > { %v3547_v51 = vpop.f32.mrb[46].mxu0  ;;  %v3549_v29 = vpop.f32.mrb[44].mxu1 }
 0x228   : > { %4428 = vst [vmem:[#allocation12_spill] sm:$0xff] %v3547_v51  ;;  %v2442_v31 = vpop.f32.mrb[47].mxu0  ;;  %v1523_v30 = vsub.f32 %v3549_v29, %v3545_v60  ;;  %v3555_v32 = vmul.f32 %v3549_v29, %v3549_v29  ;;  %v2493_v3 = vpop.f32.mrb[45].mxu1 }
 0x229   : > { %v3557_v6 = vpop.f32.mrb[46].mxu1 }
 0x22a   : > { %4429 = vst [vmem:[#allocation13_spill] sm:$0xff] %v3555_v32  ;;  %v3559_v22 = vmul.f32 %v1523_v30, %v1523_v30  ;;  %v1524_v35 = vsub.f32 %v3557_v6, %v3547_v51  ;;  %v3565_v44 = vmul.f32 %v3557_v6, %v3557_v6  ;;  %v2494_v8 = vpop.f32.mrb[47].mxu1 }
 0x22c   : > { %4430 = vst [vmem:[#allocation14_spill] sm:$0xff] %v3559_v22  ;;  %4431 = vst [vmem:[#allocation15_spill] sm:$0xff] %v3565_v44  ;;  %v3567_v36 = vmul.f32 %v1524_v35, %v1524_v35 }
 0x22e   : > { %4432 = vst [vmem:[#allocation16_spill] sm:$0xff] %v3567_v36 }
 0x22f   : > { %v3569_v37 = vpop.f32.mrb[48].mxu0 }
 0x230   : > { %4433 = vst [vmem:[#allocation17_spill] sm:$0xff] %v3569_v37  ;;  %v2445_v38 = vpop.f32.mrb[49].mxu0 }
 0x231   : > { %v3571_v33 = vpop.f32.mrb[50].mxu0 }
 0x232   : > { %4434 = vst [vmem:[#allocation18_spill] sm:$0xff] %v3571_v33  ;;  %v2446_v28 = vpop.f32.mrb[51].mxu0 }
 0x233   : > { %v3573_v39 = vpop.f32.mrb[48].mxu1 }
 0x234   : > { %v1525_v25 = vsub.f32 %v3573_v39, %v3569_v37  ;;  %v3579_v63 = vmul.f32 %v3573_v39, %v3573_v39  ;;  %v2497_v14 = vpop.f32.mrb[49].mxu1 }
 0x235   : > { %v3581_v55 = vpop.f32.mrb[50].mxu1 }
 0x236   : > { %4435 = vst [vmem:[#allocation19_spill] sm:$0xff] %v3579_v63  ;;  %v3583_v16 = vmul.f32 %v1525_v25, %v1525_v25  ;;  %v1526_v4 = vsub.f32 %v3581_v55, %v3571_v33  ;;  %v3589_v21 = vmul.f32 %v3581_v55, %v3581_v55  ;;  %v2498_v42 = vpop.f32.mrb[51].mxu1 }
 0x238   : > { %4436 = vst [vmem:[#allocation20_spill] sm:$0xff] %v3583_v16  ;;  %4437 = vst [vmem:[#allocation21_spill] sm:$0xff] %v3589_v21  ;;  %v3591_v0 = vmul.f32 %v1526_v4, %v1526_v4 }
 0x23a   : > { %4438 = vst [vmem:[#allocation22_spill] sm:$0xff] %v3591_v0  ;;  %v3593_v23 = vpop.f32.mrb[52].mxu0 }
 0x23b   : > { %4439 = vst [vmem:[#allocation23_spill] sm:$0xff] %v3593_v23  ;;  %v2449_v1 = vpop.f32.mrb[53].mxu0 }
 0x23c   : > { %v3595_v61 = vpop.f32.mrb[54].mxu0 }
 0x23d   : > { %4440 = vst [vmem:[#allocation24_spill] sm:$0xff] %v3595_v61  ;;  %v2450_v45 = vpop.f32.mrb[55].mxu0 }
 0x23f   : > { %v3597_v46 = vpop.f32.mrb[52].mxu1 }
 0x240   : > { %v1527_v62 = vsub.f32 %v3597_v46, %v3593_v23  ;;  %v3603_v20 = vmul.f32 %v3597_v46, %v3597_v46  ;;  %v2501_v34 = vpop.f32.mrb[53].mxu1 }
 0x241   : > { %v3605_v43 = vpop.f32.mrb[54].mxu1 }
 0x242   : > { %4441 = vst [vmem:[#allocation25_spill] sm:$0xff] %v3603_v20  ;;  %v3607_v57 = vmul.f32 %v1527_v62, %v1527_v62  ;;  %v1528_v54 = vsub.f32 %v3605_v43, %v3595_v61  ;;  %v3613_v56 = vmul.f32 %v3605_v43, %v3605_v43  ;;  %v2502_v59 = vpop.f32.mrb[55].mxu1 }
 0x244   : > { %4442 = vst [vmem:[#allocation26_spill] sm:$0xff] %v3607_v57  ;;  %4443 = vst [vmem:[#allocation27_spill] sm:$0xff] %v3613_v56  ;;  %v3615_v11 = vmul.f32 %v1528_v54, %v1528_v54  ;;  %v3617_v7 = vpop.f32.mrb[56].mxu0 }
 0x245   : > { %4445 = vst [vmem:[#allocation29_spill] sm:$0xff] %v3617_v7  ;;  %v2453_v15 = vpop.f32.mrb[57].mxu0 }
 0x246   : > { %4444 = vst [vmem:[#allocation28_spill] sm:$0xff] %v3615_v11  ;;  %v3619_v27 = vpop.f32.mrb[58].mxu0 }
 0x247   : > { %4446 = vst [vmem:[#allocation30_spill] sm:$0xff] %v3619_v27  ;;  %v2454_v17 = vpop.f32.mrb[59].mxu0 }
 0x248   : > { %v3621_v41 = vpop.f32.mrb[56].mxu1 }
 0x249   : > { %v1529_v31 = vsub.f32 %v3621_v41, %v3617_v7  ;;  %v3627_v30 = vmul.f32 %v3621_v41, %v3621_v41  ;;  %v2505_v3 = vpop.f32.mrb[57].mxu1 }
 0x24a   : > { %v3629_v35 = vpop.f32.mrb[58].mxu1 }
 0x24b   : > { %4447 = vst [vmem:[#allocation31_spill] sm:$0xff] %v3627_v30  ;;  %v3631_v8 = vmul.f32 %v1529_v31, %v1529_v31  ;;  %v1530_v38 = vsub.f32 %v3629_v35, %v3619_v27  ;;  %v3637_v28 = vmul.f32 %v3629_v35, %v3629_v35  ;;  %v2506_v25 = vpop.f32.mrb[59].mxu1 }
 0x24c   : > { %v3639_v14 = vpop.f32.mrb[60].mxu0 }
 0x24d   : > { %4448 = vst [vmem:[#allocation32_spill] sm:$0xff] %v3631_v8  ;;  %4449 = vst [vmem:[#allocation33_spill] sm:$0xff] %v3637_v28  ;;  %v3641_v4 = vmul.f32 %v1530_v38, %v1530_v38  ;;  %v2457_v42 = vpop.f32.mrb[61].mxu0 }
 0x24e   : > { %4450 = vst [vmem:[#allocation34_spill] sm:$0xff] %v3639_v14  ;;  %v3643_v1 = vpop.f32.mrb[62].mxu0 }
 0x24f   : > { %4451 = vst [vmem:[#allocation35_spill] sm:$0xff] %v3641_v4  ;;  %4452 = vst [vmem:[#allocation36_spill] sm:$0xff] %v3643_v1  ;;  %v2458_v45 = vpop.f32.mrb[63].mxu0 }
 0x250   : > { %v3645_v62 = vpop.f32.mrb[60].mxu1 }
 0x251   : > { %v1531_v34 = vsub.f32 %v3645_v62, %v3639_v14  ;;  %v3651_v54 = vmul.f32 %v3645_v62, %v3645_v62  ;;  %v2509_v59 = vpop.f32.mrb[61].mxu1 }
 0x252   : > { %v3653_v15 = vpop.f32.mrb[62].mxu1 }
 0x253   : > { %4453 = vst [vmem:[#allocation37_spill] sm:$0xff] %v3651_v54  ;;  %v3655_v17 = vmul.f32 %v1531_v34, %v1531_v34  ;;  %v1532_v31 = vsub.f32 %v3653_v15, %v3643_v1  ;;  %v3661_v3 = vmul.f32 %v3653_v15, %v3653_v15  ;;  %v2510_v38 = vpop.f32.mrb[63].mxu1 }
 0x254   : > { %v3663_v25 = vpop.f32.mrb[64].mxu0 }
 0x255   : > { %4454 = vst [vmem:[#allocation38_spill] sm:$0xff] %v3655_v17  ;;  %4455 = vst [vmem:[#allocation39_spill] sm:$0xff] %v3661_v3  ;;  %v3665_v42 = vmul.f32 %v1532_v31, %v1532_v31  ;;  %v2461_v45 = vpop.f32.mrb[65].mxu0 }
 0x256   : > { %4456 = vst [vmem:[#allocation40_spill] sm:$0xff] %v3663_v25  ;;  %v3667_v18 = vpop.f32.mrb[66].mxu0 }
 0x257   : > { %4457 = vst [vmem:[#allocation41_spill] sm:$0xff] %v3665_v42  ;;  %4458 = vst [vmem:[#allocation42_spill] sm:$0xff] %v3667_v18  ;;  %v2462_v59 = vpop.f32.mrb[67].mxu0 }
 0x258   : > { %v3669_v14 = vpop.f32.mrb[64].mxu1 }
 0x259   : > { %v1533_v34 = vsub.f32 %v3669_v14, %v3663_v25  ;;  %v3675_v1 = vmul.f32 %v3669_v14, %v3669_v14  ;;  %v2513_v27 = vpop.f32.mrb[65].mxu1 }
 0x25a   : > { %v3677_v7 = vpop.f32.mrb[66].mxu1 }
 0x25b   : > { %4459 = vst [vmem:[#allocation43_spill] sm:$0xff] %v3675_v1  ;;  %v3679_v38 = vmul.f32 %v1533_v34, %v1533_v34  ;;  %v1534_v31 = vsub.f32 %v3677_v7, %v3667_v18  ;;  %v3685_v45 = vmul.f32 %v3677_v7, %v3677_v7  ;;  %v2514_v59 = vpop.f32.mrb[67].mxu1 }
 0x25c   : > { %v3687_v61 = vpop.f32.mrb[68].mxu0 }
 0x25d   : > { %4460 = vst [vmem:[#allocation44_spill] sm:$0xff] %v3679_v38  ;;  %4461 = vst [vmem:[#allocation45_spill] sm:$0xff] %v3685_v45  ;;  %v3689_v25 = vmul.f32 %v1534_v31, %v1534_v31  ;;  %v2465_v23 = vpop.f32.mrb[69].mxu0  ;;  %v1745_v31 = vadd.f32 (!%p2360_p9), %v3543_v24, %v3535_v2 }
 0x25e   : > { %v1214_v33 = vpop.f32.mrb[70].mxu0  ;;  %v1744_v23 = vadd.f32 (!%p2360_p9), %v3519_v58, %v3511_v9  ;;  %v1750_v58 = vadd.f32 (!%p2360_p9), %v3665_v42, %v3655_v17  ;;  %v1765_v42 = vadd.f32 (!%p2360_p9), %v3565_v44, %v3555_v32 }
 0x25f   : > { %4462 = vst [vmem:[#allocation46_spill] sm:$0xff] %v3689_v25  ;;  %v2466_v37 = vpop.f32.mrb[71].mxu0  ;;  %1575 = sbr.rel (%p2360_p9) target bundleno = 679 (0x2a7), region = 52  ;;  %v1577_v33 = vlaneseq (!%p2360_p9)  ;;  %v1751_v24 = vadd.f32 (!%p2360_p9), %v3689_v25, %v3679_v38 }
 0x260   : > { %v3691_v27 = vpop.f32.mrb[68].mxu1  ;;  %v1752_v2 = vadd.f32 (!%p2360_p9), %v1745_v31, %v1744_v23  ;;  %v1766_v23 = vadd.f32 (!%p2360_p9), %v3589_v21, %v3579_v63  ;;  %v1767_v31 = vadd.f32 (!%p2360_p9), %v3613_v56, %v3603_v20 }
 0x261   : > { %v1535_v34 = vsub.f32 %v3691_v27, %v3687_v61  ;;  %v3697_v18 = vmul.f32 %v3691_v27, %v3691_v27  ;;  %v2517_v51 = vpop.f32.mrb[69].mxu1  ;;  %v3703_v37 = vshrl.u32 (!%p2360_p9), %v1577_v33, 7 }
 0x262   : > { %v1514_v60 = vpop.f32.mrb[70].mxu1  ;;  %v1746_v51 = vadd.f32 (!%p2360_p9), %v3567_v36, %v3559_v22  ;;  %v1772_v56 = vadd.f32 (!%p2360_p9), %v1766_v23, %v1765_v42 }
 0x263   : > { %4463 = vst [vmem:[#allocation47_spill] sm:$0xff] %v3697_v18  ;;  %v3699_v48 = vmul.f32 %v1535_v34, %v1535_v34  ;;  %v2518_v59 = vpop.f32.mrb[71].mxu1  ;;  %v1747_v60 = vadd.f32 (!%p2360_p9), %v3591_v0, %v3583_v16  ;;  %v1748_v34 = vadd.f32 (!%p2360_p9), %v3615_v11, %v3607_v57  ;;  %v4374_v33 = vsub.s32 (!%p2360_p9), 0, %v3703_v37 }
 0x264   : > { %v1749_v59 = vadd.f32 (!%p2360_p9), %v3641_v4, %v3631_v8  ;;  %v1763_v0 = vadd.f32 (!%p2360_p9), %v3517_v47, %v3507_v53  ;;  %v1764_v11 = vadd.f32 (!%p2360_p9), %v3541_v19, %v3531_v12  ;;  %v1755_v8 = vadd.f32 (!%p2360_p9), %v1751_v24, %v1750_v58 }
 0x265   : > { %4464 = vst [vmem:[#allocation48_spill] sm:$0xff] %v3699_v48  ;;  %v1753_v9 = vadd.f32 (!%p2360_p9), %v1747_v60, %v1746_v51  ;;  %v3729_v4 = vrot.slane (!%p2360_p9), %v3493_v40, %v4374_v33  ;;  %v1768_v51 = vadd.f32 (!%p2360_p9), %v3637_v28, %v3627_v30  ;;  %v1769_v60 = vadd.f32 (!%p2360_p9), %v3661_v3, %v3651_v54 }
 0x266   : > { %v1754_v36 = vadd.f32 %v1749_v59, %v1748_v34  ;;  %v1770_v34 = vadd.f32 %v3685_v45, %v3675_v1  ;;  %v1771_v33 = vadd.f32 %v1764_v11, %v1763_v0 }
 0x267   : > { %v1599_v58 = vadd.f32 %v3729_v4, %v3501_v52  ;;  %v1756_v24 = vadd.f32 %v1753_v9, %v1752_v2  ;;  %v1600_v21 = vadd.f32 %v3729_v4, %v3509_v10  ;;  %v1773_v20 = vadd.f32 %v1768_v51, %v1767_v31 }
 0x268   : > { %v1757_v59 = vadd.f32 %v1755_v8, %v1754_v36  ;;  %v1774_v63 = vadd.f32 %v1770_v34, %v1769_v60  ;;  %v1601_v28 = vadd.f32 %v3729_v4, %v3525_v13  ;;  %v1602_v3 = vadd.f32 %v3729_v4, %v3533_v26  ;;  %v1743_v36 = vld [vmem:[%s2944_s17] sm:$0xff] }
 0x269   : > { %v1603_v45 = vadd.f32 %v3729_v4, %v3549_v29  ;;  %2682 = vrcp.f32 %v1599_v58  ;;  %v1604_v2 = vadd.f32 %v3729_v4, %v3557_v6  ;;  %v1775_v0 = vadd.f32 %v1772_v56, %v1771_v33  ;;  %v1762_v56 = vld [vmem:[%s2949_s21] sm:$0xff] }
 0x26a   : > { %v1758_v9 = vadd.f32 %v1757_v59, %v1756_v24  ;;  %2684 = vrcp.f32 %v1600_v21  ;;  %v1776_v11 = vadd.f32 %v1774_v63, %v1773_v20  ;;  %v1605_v8 = vadd.f32 %v3729_v4, %v3573_v39 }
 0x26b   : > { %2686 = vrcp.f32 %v1601_v28  ;;  %v1606_v23 = vadd.f32 %v3729_v4, %v3581_v55  ;;  %v1607_v51 = vadd.f32 %v3729_v4, %v3597_v46  ;;  %v1608_v63 = vadd.f32 %v3729_v4, %v3605_v43 }
 0x26c   : > { %v1759_v42 = vadd.f32 %v1758_v9, %v3699_v48  ;;  %2688 = vrcp.f32 %v1602_v3  ;;  %v1777_v31 = vadd.f32 %v1776_v11, %v1775_v0  ;;  %v1609_v28 = vadd.f32 %v3729_v4, %v3621_v41  ;;  %v4465_v11 = vld [vmem:[#allocation6_spill] sm:$0xff] }
 0x26d   : > { %2690 = vrcp.f32 %v1603_v45  ;;  %v1610_v3 = vadd.f32 %v3729_v4, %v3629_v35  ;;  %v1611_v45 = vadd.f32 %v3729_v4, %v3645_v62  ;;  %v1582_v60 = vadd.f32 %v3729_v4, %v3497_v49 }
 0x26e   : > { %v1760_v21 = vadd.f32 %v1759_v42, %v1743_v36  ;;  %2692 = vrcp.f32 %v1604_v2  ;;  %v1778_v20 = vadd.f32 %v1777_v31, %v3697_v18  ;;  %v1612_v34 = vadd.f32 %v3729_v4, %v3653_v15  ;;  %v4466_v31 = vld [vmem:[#allocation11_spill] sm:$0xff] }
 0x26f   : > { %2694 = vrcp.f32 %v1605_v8  ;;  %v1583_v24 = vadd.f32 %v3729_v4, %v3499_v50  ;;  %v1613_v59 = vadd.f32 %v3729_v4, %v3669_v14  ;;  %v1584_v2 = vadd.f32 %v3729_v4, %v3521_v5 }
 0x270   : > { %1761 = vst [vmem:[%s2944_s17] sm:$0xff] %v1760_v21  ;;  %2696 = vrcp.f32 %v1606_v23  ;;  %v1779_v33 = vadd.f32 %v1778_v20, %v1762_v56  ;;  %v1614_v36 = vadd.f32 %v3729_v4, %v3677_v7  ;;  %v1585_v8 = vadd.f32 %v3729_v4, %v4465_v11 }
 0x271   : > { %2698 = vrcp.f32 %v1607_v51  ;;  %v1615_v42 = vadd.f32 %v3729_v4, %v3691_v27  ;;  %v1586_v51 = vadd.f32 %v3729_v4, %v4466_v31 }
 0x272   : > { %2700 = vrcp.f32 %v1608_v63  ;;  %1780 = vst [vmem:[%s2949_s21] sm:$0xff] %v1779_v33  ;;  %v4467_v63 = vld [vmem:[#allocation12_spill] sm:$0xff]  ;;  %v4468_v33 = vld [vmem:[#allocation17_spill] sm:$0xff] }
 0x273   : > { %v2683_v58 = vpop.eup %2682  ;;  %2702 = vrcp.f32 %v1609_v28  ;;  %v1587_v20 = vadd.f32 %v3729_v4, %v4467_v63  ;;  %v1588_v11 = vadd.f32 %v3729_v4, %v4468_v33 }
 0x274   : > { %v2685_v9 = vpop.eup %2684  ;;  %2704 = vrcp.f32 %v1610_v3  ;;  %v1633_v21 = vmul.f32 %v2683_v58, %v1582_v60  ;;  %v4470_v60 = vld [vmem:[#allocation23_spill] sm:$0xff] }
 0x275   : > { %v2687_v0 = vpop.eup %2686  ;;  %2706 = vrcp.f32 %v1611_v45  ;;  %v1634_v28 = vmul.f32 %v2685_v9, %v1583_v24  ;;  %v4469_v45 = vld [vmem:[#allocation18_spill] sm:$0xff]  ;;  %v1590_v58 = vadd.f32 %v3729_v4, %v4470_v60  ;;  %v4471_v24 = vld [vmem:[#allocation24_spill] sm:$0xff] }
 0x276   : > { %v2689_v23 = vpop.eup %2688  ;;  %2708 = vrcp.f32 %v1612_v34  ;;  %v1635_v18 = vmul.f32 %v2687_v0, %v1584_v2  ;;  %v1589_v54 = vadd.f32 %v3729_v4, %v4469_v45  ;;  %v1591_v9 = vadd.f32 %v3729_v4, %v4471_v24  ;;  %v4472_v2 = vld [vmem:[#allocation29_spill] sm:$0xff] }
 0x277   : > { %v2691_v56 = vpop.eup %2690  ;;  %2710 = vrcp.f32 %v1613_v59  ;;  %v1636_v31 = vmul.f32 %v2689_v23, %v1585_v8  ;;  %v1592_v0 = vadd.f32 %v3729_v4, %v4472_v2  ;;  %v4473_v8 = vld [vmem:[#allocation30_spill] sm:$0xff] }
 0x278   : > { %v2693_v3 = vpop.eup %2692  ;;  %2712 = vrcp.f32 %v1614_v36  ;;  %v1637_v30 = vmul.f32 %v2691_v56, %v1586_v51  ;;  %v1593_v23 = vadd.f32 %v3729_v4, %v4473_v8 }
 0x279   : > { %v2695_v1 = vpop.eup %2694  ;;  %2714 = vrcp.f32 %v1615_v42  ;;  %v1638_v63 = vmul.f32 %v2693_v3, %v1587_v20 }
 0x27a   : > { %v2697_v34 = vpop.eup %2696  ;;  %2716 = vlog2.f32 %v1633_v21  ;;  %v1639_v33 = vmul.f32 %v2695_v1, %v1588_v11  ;;  %v4474_v21 = vld [vmem:[#allocation34_spill] sm:$0xff] }
 0x27b   : > { %v2699_v59 = vpop.eup %2698  ;;  %2718 = vlog2.f32 %v1634_v28  ;;  %v1640_v45 = vmul.f32 %v2697_v34, %v1589_v54  ;;  %v1594_v56 = vadd.f32 %v3729_v4, %v4474_v21  ;;  %v4475_v28 = vld [vmem:[#allocation36_spill] sm:$0xff] }
 0x27c   : > { %v2701_v36 = vpop.eup %2700  ;;  %2720 = vlog2.f32 %v1635_v18  ;;  %v1641_v60 = vmul.f32 %v2699_v59, %v1590_v58  ;;  %v1595_v3 = vadd.f32 %v3729_v4, %v4475_v28  ;;  %v4476_v18 = vld [vmem:[#allocation40_spill] sm:$0xff] }
 0x27d   : > { %v2703_v42 = vpop.eup %2702  ;;  %2722 = vlog2.f32 %v1636_v31  ;;  %v1642_v24 = vmul.f32 %v2701_v36, %v1591_v9  ;;  %v1596_v11 = vadd.f32 %v3729_v4, %v4476_v18  ;;  %v4477_v31 = vld [vmem:[#allocation42_spill] sm:$0xff] }
 0x27e   : > { %v2705_v51 = vpop.eup %2704  ;;  %2724 = vlog2.f32 %v1637_v30  ;;  %v1643_v2 = vmul.f32 %v2703_v42, %v1592_v0  ;;  %v1597_v34 = vadd.f32 %v3729_v4, %v4477_v31  ;;  %v1598_v30 = vadd.f32 %v3729_v4, %v3687_v61 }
 0x27f   : > { %v2707_v20 = vpop.eup %2706  ;;  %2726 = vlog2.f32 %v1638_v63  ;;  %v1644_v8 = vmul.f32 %v2705_v51, %v1593_v23 }
 0x280   : > { %v2709_v1 = vpop.eup %2708  ;;  %2728 = vlog2.f32 %v1639_v33  ;;  %v1645_v59 = vmul.f32 %v2707_v20, %v1594_v56  ;;  %v4479_v20 = vsub.f32 1.0, %v3493_v40 }
 0x281   : > { %v2711_v54 = vpop.eup %2710  ;;  %2730 = vlog2.f32 %v1640_v45  ;;  %v1646_v63 = vmul.f32 %v2709_v1, %v1595_v3 }
 0x282   : > { %v2713_v58 = vpop.eup %2712  ;;  %2732 = vlog2.f32 %v1641_v60  ;;  %v1647_v21 = vmul.f32 %v2711_v54, %v1596_v11  ;;  %v4478_v60 = vsub.s32 0, %v3703_v37 }
 0x283   : > { %v2715_v9 = vpop.eup %2714  ;;  %2734 = vlog2.f32 %v1642_v24  ;;  %v1648_v33 = vmul.f32 %v2713_v58, %v1597_v34 }
 0x284   : > { %v2717_v36 = vpop.eup %2716  ;;  %2736 = vlog2.f32 %v1643_v2  ;;  %v1649_v18 = vmul.f32 %v2715_v9, %v1598_v30  ;;  %v3821_v3 = vrot.slane %v4479_v20, %v4478_v60 }
 0x285   : > { %v2719_v0 = vpop.eup %2718  ;;  %v1651_v42 = vmul.f32 0.6931472, %v2717_v36  ;;  %2738 = vlog2.f32 %v1644_v8 }
 0x286   : > { %v2721_v28 = vpop.eup %2720  ;;  %v1653_v23 = vmul.f32 0.6931472, %v2719_v0  ;;  %2740 = vlog2.f32 %v1645_v59 }
 0x287   : > { %v2723_v45 = vpop.eup %2722  ;;  %v1655_v51 = vmul.f32 0.6931472, %v2721_v28  ;;  %2742 = vlog2.f32 %v1646_v63  ;;  %v1684_v11 = vand.u32 2147483647, %v1651_v42 }
 0x288   : > { %v2725_v4 = vpop.eup %2724  ;;  %v1657_v56 = vmul.f32 0.6931472, %v2723_v45  ;;  %2744 = vlog2.f32 %v1647_v21  ;;  %v1685_v2 = vand.u32 2147483647, %v1653_v23 }
 0x289   : > { %v2727_v24 = vpop.eup %2726  ;;  %v1659_v1 = vmul.f32 0.6931472, %v2725_v4  ;;  %2746 = vlog2.f32 %v1648_v33  ;;  %v1686_v34 = vand.u32 2147483647, %v1655_v51  ;;  %v1707_v28 = vmul.f32 %v3821_v3, %v1684_v11 }
 0x28a   : > { %v2729_v54 = vpop.eup %2728  ;;  %v1661_v31 = vmul.f32 0.6931472, %v2727_v24  ;;  %2748 = vlog2.f32 %v1649_v18  ;;  %v1687_v8 = vand.u32 2147483647, %v1657_v56  ;;  %v1708_v33 = vmul.f32 %v3821_v3, %v1685_v2 }
 0x28b   : > { %v2731_v58 = vpop.eup %2730  ;;  %v1663_v30 = vmul.f32 0.6931472, %v2729_v54  ;;  %v1688_v59 = vand.u32 2147483647, %v1659_v1  ;;  %v1709_v18 = vmul.f32 %v3821_v3, %v1686_v34 }
 0x28c   : > { %v2733_v9 = vpop.eup %2732  ;;  %v1665_v63 = vmul.f32 0.6931472, %v2731_v58  ;;  %v1689_v37 = vand.u32 2147483647, %v1661_v31  ;;  %v1710_v51 = vmul.f32 %v3821_v3, %v1687_v8  ;;  %v1725_v8 = vadd.f32 %v1708_v33, %v1707_v28 }
 0x28d   : > { %v2735_v36 = vpop.eup %2734  ;;  %v1667_v21 = vmul.f32 0.6931472, %v2733_v9  ;;  %v1690_v0 = vand.u32 2147483647, %v1663_v30  ;;  %v1711_v20 = vmul.f32 %v3821_v3, %v1688_v59 }
 0x28e   : > { %v2737_v42 = vpop.eup %2736  ;;  %v1669_v23 = vmul.f32 0.6931472, %v2735_v36  ;;  %v1691_v45 = vand.u32 2147483647, %v1665_v63  ;;  %v1712_v24 = vmul.f32 %v3821_v3, %v1689_v37 }
 0x28f   : > { %v2739_v4 = vpop.eup %2738  ;;  %v1671_v56 = vmul.f32 0.6931472, %v2737_v42  ;;  %v1692_v60 = vand.u32 2147483647, %v1667_v21  ;;  %v1713_v11 = vmul.f32 %v3821_v3, %v1690_v0  ;;  %v1726_v42 = vadd.f32 %v1710_v51, %v1709_v18 }
 0x290   : > { %v2741_v1 = vpop.eup %2740  ;;  %v1673_v54 = vmul.f32 0.6931472, %v2739_v4  ;;  %v1693_v31 = vand.u32 2147483647, %v1669_v23  ;;  %v1714_v2 = vmul.f32 %v3821_v3, %v1691_v45  ;;  %v1727_v0 = vadd.f32 %v1712_v24, %v1711_v20 }
 0x291   : > { %v2743_v58 = vpop.eup %2742  ;;  %v1675_v30 = vmul.f32 0.6931472, %v2741_v1  ;;  %v1694_v9 = vand.u32 2147483647, %v1671_v56  ;;  %v1715_v34 = vmul.f32 %v3821_v3, %v1692_v60 }
 0x292   : > { %v2745_v63 = vpop.eup %2744  ;;  %v1677_v36 = vmul.f32 0.6931472, %v2743_v58  ;;  %v1695_v21 = vand.u32 2147483647, %v1673_v54  ;;  %v1716_v59 = vmul.f32 %v3821_v3, %v1693_v31  ;;  %v1728_v1 = vadd.f32 %v1714_v2, %v1713_v11 }
 0x293   : > { %v2747_v37 = vpop.eup %2746  ;;  %v1679_v44 = vmul.f32 0.6931472, %v2745_v63  ;;  %v1696_v4 = vand.u32 2147483647, %v1675_v30  ;;  %v1717_v23 = vmul.f32 %v3821_v3, %v1694_v9  ;;  %v1733_v30 = vadd.f32 %v1726_v42, %v1725_v8 }
 0x294   : > { %v2749_v32 = vpop.eup %2748  ;;  %v1681_v45 = vmul.f32 0.6931472, %v2747_v37  ;;  %v1697_v19 = vand.u32 2147483647, %v1677_v36  ;;  %v1718_v56 = vmul.f32 %v3821_v3, %v1695_v21  ;;  %v1729_v33 = vadd.f32 %v1716_v59, %v1715_v34  ;;  %v1724_v59 = vld [vmem:[%s2939_s14] sm:$0xff] }
 0x295   : > { %v1698_v60 = vand.u32 2147483647, %v1679_v44  ;;  %v1719_v28 = vmul.f32 %v3821_v3, %v1696_v4  ;;  %v1683_v54 = vmul.f32 0.6931472, %v2749_v32  ;;  %v1734_v9 = vadd.f32 %v1728_v1, %v1727_v0 }
 0x296   : > { %v1699_v58 = vand.u32 2147483647, %v1681_v45  ;;  %v1720_v18 = vmul.f32 %v3821_v3, %v1697_v19  ;;  %v1730_v51 = vadd.f32 %v1718_v56, %v1717_v23 }
 0x297   : > { %v1721_v31 = vmul.f32 %v3821_v3, %v1698_v60  ;;  %v1700_v63 = vand.u32 2147483647, %v1683_v54  ;;  %v1737_v36 = vadd.f32 %v1734_v9, %v1733_v30 }
 0x298   : > { %v1722_v20 = vmul.f32 %v3821_v3, %v1699_v58  ;;  %v1731_v24 = vadd.f32 %v1720_v18, %v1719_v28  ;;  %v1735_v44 = vadd.f32 %v1730_v51, %v1729_v33 }
 0x299   : > { %v1723_v32 = vmul.f32 %v3821_v3, %v1700_v63 }
 0x29a   : > { %v1732_v11 = vadd.f32 %v1722_v20, %v1721_v31 }
 0x29c   : > { %v1736_v2 = vadd.f32 %v1732_v11, %v1731_v24 }
 0x29e   : > { %v1738_v34 = vadd.f32 %v1736_v2, %v1735_v44 }
 0x2a0   : > { %v1739_v21 = vadd.f32 %v1738_v34, %v1737_v36 }
 0x2a2   : > { %v1740_v19 = vadd.f32 %v1739_v21, %v1723_v32 }
 0x2a4   : > { %v1741_v37 = vadd.f32 %v1740_v19, %v1724_v59 }
 0x2a6   : > { %1742 = vst [vmem:[%s2939_s14] sm:$0xff] %v1741_v37 }
 0x2a7 PF: > { %p2361_p10 = scmp.le.s32.totalorder %s1570_s11, 514 }
 0x2a9   : > { %1783 = sbr.rel (%p2361_p10) target bundleno = 791 (0x317), region = 56 }
 0x2b0   : > { %v1784_v8 = vlaneseq  ;;  %v1802_v4 = vstv %s2965_s10  ;;  %v4494_v57 = vld [vmem:[#allocation6_spill] sm:$0xff]  ;;  %v4495_v22 = vld [vmem:[#allocation11_spill] sm:$0xff] }
 0x2b2   : > { %v3844_v42 = vshrl.u32 %v1784_v8, 7 }
 0x2b4   : > { %v1786_v23 = vadd.s32 8, %v3844_v42  ;;  %v1787_v3 = vadd.s32 16, %v3844_v42  ;;  %v1788_v0 = vadd.s32 24, %v3844_v42  ;;  %v1789_v45 = vadd.s32 32, %v3844_v42 }
 0x2b5   : > { %v1790_v56 = vadd.s32 40, %v3844_v42  ;;  %v1791_v1 = vadd.s32 48, %v3844_v42  ;;  %v1792_v60 = vadd.s32 56, %v3844_v42  ;;  %v1793_v28 = vadd.s32 64, %v3844_v42 }
 0x2b6   : > { %v1794_v33 = vadd.s32 72, %v3844_v42  ;;  %v1795_v54 = vadd.s32 80, %v3844_v42  ;;  %v1796_v58 = vadd.s32 88, %v3844_v42  ;;  %v1797_v18 = vadd.s32 96, %v3844_v42 }
 0x2b7   : > { %v1798_v51 = vadd.s32 104, %v3844_v42  ;;  %v1799_v31 = vadd.s32 112, %v3844_v42  ;;  %v1800_v20 = vadd.s32 120, %v3844_v42  ;;  %v1801_v24 = vadd.s32 128, %v3844_v42 }
 0x2b8   : > { %v3864_v30 = vadd.s32 %v1802_v4, %v3844_v42  ;;  %v3866_v9 = vadd.s32 %v1802_v4, %v1786_v23  ;;  %v3868_v63 = vadd.s32 %v1802_v4, %v1787_v3  ;;  %v3870_v11 = vadd.s32 %v1802_v4, %v1788_v0 }
 0x2b9   : > { %v3872_v44 = vadd.s32 %v1802_v4, %v1789_v45  ;;  %v3874_v2 = vadd.s32 %v1802_v4, %v1790_v56  ;;  %v3876_v36 = vadd.s32 %v1802_v4, %v1791_v1  ;;  %v3878_v32 = vadd.s32 %v1802_v4, %v1792_v60 }
 0x2ba   : > { %v3880_v34 = vadd.s32 %v1802_v4, %v1793_v28  ;;  %v3882_v21 = vadd.s32 %v1802_v4, %v1794_v33  ;;  %v3884_v59 = vadd.s32 %v1802_v4, %v1795_v54  ;;  %v3886_v19 = vadd.s32 %v1802_v4, %v1796_v58 }
 0x2bb   : > { %v3888_v37 = vadd.s32 %v1802_v4, %v1797_v18  ;;  %v3890_v8 = vadd.s32 %v1802_v4, %v1798_v51  ;;  %v3892_v23 = vadd.s32 %v1802_v4, %v1799_v31  ;;  %v3894_v3 = vadd.s32 %v1802_v4, %v1800_v20 }
 0x2bc   : > { %v3896_v0 = vadd.s32 %v1802_v4, %v1801_v24  ;;  %vm4389_vm0 = vcmp.lt.s32.totalorder %v3864_v30, 514  ;;  %vm1821_vm9 = vcmp.lt.s32.totalorder %v3866_v9, 514  ;;  %vm1822_vm10 = vcmp.lt.s32.totalorder %v3868_v63, 514 }
 0x2bd   : > { %vm1823_vm11 = vcmp.lt.s32.totalorder %v3870_v11, 514  ;;  %vm1824_vm12 = vcmp.lt.s32.totalorder %v3872_v44, 514  ;;  %vm1825_vm13 = vcmp.lt.s32.totalorder %v3874_v2, 514  ;;  %vm1827_vm15 = vcmp.lt.s32.totalorder %v3878_v32, 514 }
 0x2be   : > { %vm1828_vm1 = vcmp.lt.s32.totalorder %v3880_v34, 514  ;;  %vm1829_vm2 = vcmp.lt.s32.totalorder %v3882_v21, 514  ;;  %vm1830_vm3 = vcmp.lt.s32.totalorder %v3884_v59, 514  ;;  %vm1831_vm4 = vcmp.lt.s32.totalorder %v3886_v19, 514 }
 0x2bf   : > { %vm1832_vm5 = vcmp.lt.s32.totalorder %v3888_v37, 514  ;;  %vm1833_vm6 = vcmp.lt.s32.totalorder %v3890_v8, 514  ;;  %vm1834_vm7 = vcmp.lt.s32.totalorder %v3892_v23, 514  ;;  %vm1835_vm8 = vcmp.lt.s32.totalorder %v3894_v3, 514 }
 0x2c0   : > { %vm1836_vm14 = vcmp.lt.s32.totalorder %v3896_v0, 514  ;;  %v2862_v4 = vmov 0.0   ;;  %v1872_v38 = vsel %vm1821_vm9, %v3499_v50, 1.0  ;;  %v1873_v17 = vsel %vm1822_vm10, %v3521_v5, 1.0 }
 0x2c1   : > { %v3917_v45 = vsel %vm4389_vm0, 1.0, %v2862_v4  ;;  %v3921_v56 = vsel %vm1821_vm9, 1.0, %v2862_v4  ;;  %v3925_v1 = vsel %vm1822_vm10, 1.0, %v2862_v4  ;;  %v3929_v60 = vsel %vm1823_vm11, 1.0, %v2862_v4 }
 0x2c2   : > { %v3933_v28 = vsel %vm1824_vm12, 1.0, %v2862_v4  ;;  %v3937_v33 = vsel %vm1825_vm13, 1.0, %v2862_v4  ;;  %vm4481_vm0 = vcmp.lt.s32.totalorder %v3876_v36, 514  ;;  %v3945_v58 = vsel %vm1827_vm15, 1.0, %v2862_v4 }
 0x2c3   : > { %4480 = vst [vmem:[#allocation49_spill] sm:$0xff] %v3937_v33  ;;  %v3941_v54 = vsel %vm4481_vm0, 1.0, %v2862_v4  ;;  %4483 = vst [vmem:[#allocation51_spill] sm:$0xff] %v3945_v58  ;;  %v3949_v18 = vsel %vm1828_vm1, 1.0, %v2862_v4  ;;  %v3953_v51 = vsel %vm1829_vm2, 1.0, %v2862_v4  ;;  %v3957_v31 = vsel %vm1830_vm3, 1.0, %v2862_v4 }
 0x2c4   : > { %4482 = vst [vmem:[#allocation50_spill] sm:$0xff] %v3941_v54  ;;  %4484 = vst [vmem:[#allocation52_spill] sm:$0xff] %v3949_v18  ;;  %v3961_v20 = vsel %vm1831_vm4, 1.0, %v2862_v4  ;;  %v3965_v24 = vsel %vm1832_vm5, 1.0, %v2862_v4  ;;  %v3969_v12 = vsel %vm1833_vm6, 1.0, %v2862_v4  ;;  %v3973_v47 = vsel %vm1834_vm7, 1.0, %v2862_v4 }
 0x2c5   : > { %4485 = vst [vmem:[#allocation53_spill] sm:$0xff] %v3953_v51  ;;  %4486 = vst [vmem:[#allocation54_spill] sm:$0xff] %v3957_v31  ;;  %v3977_v53 = vsel %vm1835_vm8, 1.0, %v2862_v4  ;;  %v3981_v48 = vsel %vm1836_vm14, 1.0, %v2862_v4  ;;  %vm4493_vm0 = vcmp.lt.s32.totalorder %v3864_v30, 514  ;;  %v1874_v16 = vsel %vm1823_vm11, %v4494_v57, 1.0 }
 0x2c6   : > { %4487 = vst [vmem:[#allocation55_spill] sm:$0xff] %v3961_v20  ;;  %4488 = vst [vmem:[#allocation56_spill] sm:$0xff] %v3965_v24  ;;  %v1871_v25 = vsel %vm4493_vm0, %v3497_v49, 1.0  ;;  %v1875_v4 = vsel %vm1824_vm12, %v4495_v22, 1.0  ;;  %vm4498_vm0 = vcmp.lt.s32.totalorder %v3876_v36, 514  ;;  %v4501_v24 = vld [vmem:[#allocation24_spill] sm:$0xff] }
 0x2c7   : > { %4489 = vst [vmem:[#allocation57_spill] sm:$0xff] %v3969_v12  ;;  %4490 = vst [vmem:[#allocation58_spill] sm:$0xff] %v3973_v47  ;;  %v4499_v47 = vld [vmem:[#allocation18_spill] sm:$0xff]  ;;  %v4500_v12 = vld [vmem:[#allocation23_spill] sm:$0xff]  ;;  %v1880_v22 = vsel %vm1829_vm2, %v4501_v24, 1.0  ;;  %v1891_v33 = vsub.s32 0, %v3844_v42 }
 0x2c8   : > { %4491 = vst [vmem:[#allocation59_spill] sm:$0xff] %v3977_v53  ;;  %4492 = vst [vmem:[#allocation60_spill] sm:$0xff] %v3981_v48  ;;  %v4496_v48 = vld [vmem:[#allocation12_spill] sm:$0xff]  ;;  %v4497_v53 = vld [vmem:[#allocation17_spill] sm:$0xff]  ;;  %v1878_v5 = vsel %vm1827_vm15, %v4499_v47, 1.0  ;;  %v1879_v57 = vsel %vm1828_vm1, %v4500_v12, 1.0 }
 0x2c9   : > { %v1876_v49 = vsel %vm1825_vm13, %v4496_v48, 1.0  ;;  %v1877_v50 = vsel %vm4498_vm0, %v4497_v53, 1.0  ;;  %v4502_v20 = vld [vmem:[#allocation29_spill] sm:$0xff]  ;;  %v4503_v31 = vld [vmem:[#allocation30_spill] sm:$0xff]  ;;  %v4505_v18 = vld [vmem:[#allocation36_spill] sm:$0xff]  ;;  %vm4508_vm0 = vcmp.lt.s32.totalorder %v3864_v30, 514  ;;  %v1892_v30 = vrot.slane %v3493_v40, %v1891_v33 }
 0x2ca   : > { %v1881_v48 = vsel %vm1830_vm3, %v4502_v20, 1.0  ;;  %v1882_v53 = vsel %vm1831_vm4, %v4503_v31, 1.0  ;;  %v4504_v51 = vld [vmem:[#allocation34_spill] sm:$0xff]  ;;  %v1884_v12 = vsel %vm1833_vm6, %v4505_v18, 1.0  ;;  %v4506_v58 = vld [vmem:[#allocation40_spill] sm:$0xff]  ;;  %v1887_v31 = vsel %vm1836_vm14, %v3687_v61, 1.0 }
 0x2cb   : > { %v1883_v47 = vsel %vm1832_vm5, %v4504_v51, 1.0  ;;  %v1885_v24 = vsel %vm1834_vm7, %v4506_v58, 1.0  ;;  %v4507_v54 = vld [vmem:[#allocation42_spill] sm:$0xff]  ;;  %v1911_v51 = vsel %vm4508_vm0, %v3501_v52, 1.0  ;;  %v1912_v18 = vsel %vm1821_vm9, %v3509_v10, 1.0 }
 0x2cc   : > { %v1886_v20 = vsel %vm1835_vm8, %v4507_v54, 1.0  ;;  %v1913_v58 = vsel %vm1822_vm10, %v3525_v13, 1.0  ;;  %v1914_v42 = vsel %vm1823_vm11, %v3533_v26, 1.0  ;;  %v1915_v61 = vsel %vm1824_vm12, %v3549_v29, 1.0 }
 0x2cd   : > { %v1916_v52 = vsel %vm1825_vm13, %v3557_v6, 1.0  ;;  %vm4509_vm0 = vcmp.lt.s32.totalorder %v3876_v36, 514  ;;  %v1918_v13 = vsel %vm1827_vm15, %v3581_v55, 1.0  ;;  %v1919_v26 = vsel %vm1828_vm1, %v3597_v46, 1.0 }
 0x2ce   : > { %v1917_v10 = vsel %vm4509_vm0, %v3573_v39, 1.0  ;;  %v1920_v29 = vsel %vm1829_vm2, %v3605_v43, 1.0  ;;  %v1921_v6 = vsel %vm1830_vm3, %v3621_v41, 1.0  ;;  %v1922_v39 = vsel %vm1831_vm4, %v3629_v35, 1.0 }
 0x2cf   : > { %v1923_v55 = vsel %vm1832_vm5, %v3645_v62, 1.0  ;;  %v1924_v46 = vsel %vm1833_vm6, %v3653_v15, 1.0  ;;  %v4078_v9 = vadd.f32 %v1892_v30, %v1871_v25  ;;  %v4080_v63 = vadd.f32 %v1892_v30, %v1872_v38 }
 0x2d0   : > { %v4082_v43 = vadd.f32 %v1892_v30, %v1873_v17  ;;  %v4084_v11 = vadd.f32 %v1892_v30, %v1874_v16  ;;  %v4086_v41 = vadd.f32 %v1892_v30, %v1875_v4  ;;  %v4088_v44 = vadd.f32 %v1892_v30, %v1876_v49 }
 0x2d1   : > { %v4090_v35 = vadd.f32 %v1892_v30, %v1877_v50  ;;  %v4092_v2 = vadd.f32 %v1892_v30, %v1878_v5  ;;  %v4094_v62 = vadd.f32 %v1892_v30, %v1879_v57  ;;  %v4096_v36 = vadd.f32 %v1892_v30, %v1880_v22 }
 0x2d2   : > { %v4098_v15 = vadd.f32 %v1892_v30, %v1881_v48  ;;  %v4100_v25 = vadd.f32 %v1892_v30, %v1882_v53  ;;  %v4102_v17 = vadd.f32 %v1892_v30, %v1883_v47  ;;  %v4104_v16 = vadd.f32 %v1892_v30, %v1884_v12 }
 0x2d3   : > { %v4106_v38 = vadd.f32 %v1892_v30, %v1885_v24  ;;  %v4108_v32 = vadd.f32 %v1892_v30, %v1886_v20  ;;  %v4110_v34 = vadd.f32 %v1892_v30, %v1887_v31  ;;  %v1925_v21 = vsel %vm1834_vm7, %v3669_v14, 1.0  ;;  %v4513_v24 = vld [vmem:[#allocation3_spill] sm:$0xff]  ;;  %v4514_v31 = vld [vmem:[#allocation5_spill] sm:$0xff] }
 0x2d4   : > { %v1926_v59 = vsel %vm1835_vm8, %v3677_v7, 1.0  ;;  %v1928_v19 = vadd.f32 %v1911_v51, %v1892_v30  ;;  %v1927_v37 = vsel %vm1836_vm14, %v3691_v27, 1.0  ;;  %v1929_v8 = vadd.f32 %v1912_v18, %v1892_v30  ;;  %v4515_v18 = vld [vmem:[#allocation8_spill] sm:$0xff] }
 0x2d5   : > { %4510 = vst [vmem:[#allocation61_spill] sm:$0xff] %v4110_v34  ;;  %v1930_v54 = vadd.f32 %v1913_v58, %v1892_v30  ;;  %v1931_v4 = vadd.f32 %v1914_v42, %v1892_v30  ;;  %v1932_v49 = vadd.f32 %v1915_v61, %v1892_v30  ;;  %v1933_v50 = vadd.f32 %v1916_v52, %v1892_v30  ;;  %v4518_v42 = vld [vmem:[#allocation10_spill] sm:$0xff] }
 0x2d6   : > { %v1934_v5 = vadd.f32 %v1917_v10, %v1892_v30  ;;  %v1935_v57 = vadd.f32 %v1918_v13, %v1892_v30  ;;  %v1936_v22 = vadd.f32 %v1919_v26, %v1892_v30  ;;  %v1937_v48 = vadd.f32 %v1920_v29, %v1892_v30  ;;  %v4522_v13 = vld [vmem:[#allocation49_spill] sm:$0xff]  ;;  %v4524_v29 = vld [vmem:[#allocation50_spill] sm:$0xff] }
 0x2d7   : > { %v1938_v23 = vadd.f32 %v1921_v6, %v1892_v30  ;;  %v1939_v14 = vadd.f32 %v1922_v39, %v1892_v30  ;;  %v1940_v53 = vadd.f32 %v1923_v55, %v1892_v30  ;;  %v1941_v47 = vadd.f32 %v1924_v46, %v1892_v30  ;;  %v4526_v39 = vld [vmem:[#allocation51_spill] sm:$0xff]  ;;  %v4528_v46 = vld [vmem:[#allocation52_spill] sm:$0xff] }
 0x2d8   : > { %2750 = vrcp.f32 %v1928_v19  ;;  %v4511_v7 = vsub.f32 1.0, %v3493_v40  ;;  %v1942_v0 = vadd.f32 %v1925_v21, %v1892_v30  ;;  %v1943_v27 = vadd.f32 %v1926_v59, %v1892_v30  ;;  %v4530_v59 = vld [vmem:[#allocation53_spill] sm:$0xff] }
 0x2d9   : > { %v4125_v12 = vadd.f32 %v1927_v37, %v1892_v30  ;;  %2752 = vrcp.f32 %v1929_v8  ;;  %v2090_v20 = vmul.f32 %v3917_v45, %v4513_v24  ;;  %v2091_v51 = vmul.f32 %v3921_v56, %v4514_v31  ;;  %v4532_v37 = vld [vmem:[#allocation54_spill] sm:$0xff] }
 0x2da   : > { %v4123_v3 = vrot.slane %v4511_v7, %v1891_v33  ;;  %2754 = vrcp.f32 %v1930_v54  ;;  %v2092_v58 = vmul.f32 %v3925_v1, %v4515_v18  ;;  %v2093_v61 = vmul.f32 %v3929_v60, %v4518_v42  ;;  %v4534_v54 = vld [vmem:[#allocation55_spill] sm:$0xff]  ;;  %v4540_v24 = vld [vmem:[#allocation58_spill] sm:$0xff] }
 0x2db   : > { %2756 = vrcp.f32 %v1931_v4  ;;  %v4542_v18 = vld [vmem:[#allocation59_spill] sm:$0xff]  ;;  %v4544_v42 = vld [vmem:[#allocation14_spill] sm:$0xff] }
 0x2dc   : > { %4512 = vst [vmem:[#allocation62_spill] sm:$0xff] %v4123_v3  ;;  %v4135_v40 = vmul.f32 %v3917_v45, %v4123_v3  ;;  %v4139_v33 = vmul.f32 %v3921_v56, %v4123_v3  ;;  %2758 = vrcp.f32 %v1932_v49  ;;  %v4145_v52 = vmul.f32 %v3925_v1, %v4123_v3  ;;  %v4536_v49 = vld [vmem:[#allocation56_spill] sm:$0xff] }
 0x2dd   : > { %v4149_v10 = vmul.f32 %v3929_v60, %v4123_v3  ;;  %v4153_v30 = vmul.f32 %v3933_v28, %v4123_v3  ;;  %2760 = vrcp.f32 %v1933_v50  ;;  %v4157_v26 = vmul.f32 %v4522_v13, %v4123_v3 }
 0x2de   : > { %4516 = vst [vmem:[#allocation63_spill] sm:$0xff] %v4135_v40  ;;  %4517 = vst [vmem:[#allocation64_spill] sm:$0xff] %v4139_v33  ;;  %v4161_v6 = vmul.f32 %v4524_v29, %v4123_v3  ;;  %v4165_v55 = vmul.f32 %v4526_v39, %v4123_v3  ;;  %2762 = vrcp.f32 %v1934_v5  ;;  %v4169_v21 = vmul.f32 %v4528_v46, %v4123_v3  ;;  %v4538_v5 = vld [vmem:[#allocation57_spill] sm:$0xff] }
 0x2df   : > { %4519 = vst [vmem:[#allocation65_spill] sm:$0xff] %v4145_v52  ;;  %4520 = vst [vmem:[#allocation66_spill] sm:$0xff] %v4149_v10  ;;  %v4173_v19 = vmul.f32 %v4530_v59, %v4123_v3  ;;  %v4177_v8 = vmul.f32 %v4532_v37, %v4123_v3  ;;  %2764 = vrcp.f32 %v1935_v57  ;;  %v4181_v4 = vmul.f32 %v4534_v54, %v4123_v3 }
 0x2e0   : > { %4521 = vst [vmem:[#allocation67_spill] sm:$0xff] %v4153_v30  ;;  %4523 = vst [vmem:[#allocation49_spill] sm:$0xff] %v4157_v26  ;;  %v4185_v50 = vmul.f32 %v4536_v49, %v4123_v3  ;;  %v4189_v7 = vmul.f32 %v4538_v5, %v4123_v3  ;;  %2766 = vrcp.f32 %v1936_v22  ;;  %v4193_v31 = vmul.f32 %v4540_v24, %v4123_v3  ;;  %v4550_v26 = vld [vmem:[#allocation32_spill] sm:$0xff] }
 0x2e1   : > { %4525 = vst [vmem:[#allocation50_spill] sm:$0xff] %v4161_v6  ;;  %4527 = vst [vmem:[#allocation51_spill] sm:$0xff] %v4165_v55  ;;  %v4197_v57 = vmul.f32 %v4542_v18, %v4123_v3  ;;  %2768 = vrcp.f32 %v1937_v48  ;;  %v4549_v3 = vld [vmem:[#allocation28_spill] sm:$0xff]  ;;  %v2100_v48 = vmul.f32 %v4532_v37, %v4550_v26  ;;  %v2107_v26 = vadd.f32 %v2091_v51, %v2090_v20 }
 0x2e2   : > { %4529 = vst [vmem:[#allocation52_spill] sm:$0xff] %v4169_v21  ;;  %4531 = vst [vmem:[#allocation53_spill] sm:$0xff] %v4173_v19  ;;  %v4546_v19 = vld [vmem:[#allocation20_spill] sm:$0xff]  ;;  %v2751_v55 = vpop.eup %2750  ;;  %2770 = vrcp.f32 %v1938_v23 }
 0x2e3   : > { %4533 = vst [vmem:[#allocation68_spill] sm:$0xff] %v4177_v8  ;;  %4535 = vst [vmem:[#allocation69_spill] sm:$0xff] %v4181_v4  ;;  %v2094_v4 = vmul.f32 %v3933_v28, %v4544_v42  ;;  %v4545_v8 = vld [vmem:[#allocation16_spill] sm:$0xff]  ;;  %v2096_v21 = vmul.f32 %v4524_v29, %v4546_v19  ;;  %v2753_v42 = vpop.eup %2752  ;;  %2772 = vrcp.f32 %v1939_v14  ;;  %v4552_v19 = vld [vmem:[#allocation38_spill] sm:$0xff]  ;;  %v1962_v14 = vmul.f32 %v2751_v55, %v4078_v9 }
 0x2e4   : > { %4537 = vst [vmem:[#allocation70_spill] sm:$0xff] %v4185_v50  ;;  %4539 = vst [vmem:[#allocation71_spill] sm:$0xff] %v4189_v7  ;;  %v2095_v50 = vmul.f32 %v4522_v13, %v4545_v8  ;;  %v4547_v7 = vld [vmem:[#allocation22_spill] sm:$0xff]  ;;  %v4551_v8 = vld [vmem:[#allocation35_spill] sm:$0xff]  ;;  %v2102_v10 = vmul.f32 %v4536_v49, %v4552_v19  ;;  %v2755_v52 = vpop.eup %2754  ;;  %2774 = vrcp.f32 %v1940_v53  ;;  %v1963_v19 = vmul.f32 %v2753_v42, %v4080_v63 }
 0x2e5   : > { %4541 = vst [vmem:[#allocation72_spill] sm:$0xff] %v4193_v31  ;;  %4543 = vst [vmem:[#allocation59_spill] sm:$0xff] %v4197_v57  ;;  %v2097_v22 = vmul.f32 %v4526_v39, %v4547_v7  ;;  %v4548_v31 = vld [vmem:[#allocation26_spill] sm:$0xff]  ;;  %v2099_v57 = vmul.f32 %v4530_v59, %v4549_v3  ;;  %v2101_v30 = vmul.f32 %v4534_v54, %v4551_v8  ;;  %v4553_v7 = vld [vmem:[#allocation41_spill] sm:$0xff]  ;;  %v2757_v34 = vpop.eup %2756  ;;  %2776 = vrcp.f32 %v1941_v47 }
 0x2e6   : > { %v2098_v6 = vmul.f32 %v4528_v46, %v4548_v31  ;;  %v2103_v23 = vmul.f32 %v4538_v5, %v4553_v7  ;;  %v4554_v31 = vld [vmem:[#allocation44_spill] sm:$0xff]  ;;  %v4555_v3 = vld [vmem:[#allocation46_spill] sm:$0xff]  ;;  %v2108_v8 = vadd.f32 %v2093_v61, %v2092_v58  ;;  %v2109_v54 = vadd.f32 %v2095_v50, %v2094_v4  ;;  %v2759_v37 = vpop.eup %2758  ;;  %v4560_v4 = vld [vmem:[#allocation7_spill] sm:$0xff] }
 0x2e7   : > { %v2104_v33 = vmul.f32 %v4540_v24, %v4554_v31  ;;  %v2105_v40 = vmul.f32 %v4542_v18, %v4555_v3  ;;  %2778 = vrcp.f32 %v1942_v0  ;;  %v2110_v7 = vadd.f32 %v2097_v22, %v2096_v21  ;;  %v2761_v53 = vpop.eup %2760  ;;  %v4558_v55 = vld [vmem:[#allocation2_spill] sm:$0xff]  ;;  %v4562_v22 = vld [vmem:[#allocation13_spill] sm:$0xff] }
 0x2e8   : > { %v2111_v5 = vadd.f32 %v2099_v57, %v2098_v6  ;;  %2780 = vrcp.f32 %v1943_v27  ;;  %v1964_v31 = vmul.f32 %v2755_v52, %v4082_v43  ;;  %v2112_v24 = vadd.f32 %v2101_v30, %v2100_v48  ;;  %v2763_v3 = vpop.eup %2762  ;;  %v4556_v43 = vld [vmem:[#allocation48_spill] sm:$0xff]  ;;  %v4563_v48 = vld [vmem:[#allocation15_spill] sm:$0xff] }
 0x2e9   : > { %v2113_v49 = vadd.f32 %v2103_v23, %v2102_v10  ;;  %2782 = vrcp.f32 %v4125_v12  ;;  %v1965_v47 = vmul.f32 %v2757_v34, %v4084_v11  ;;  %v2114_v9 = vadd.f32 %v2105_v40, %v2104_v33  ;;  %v2765_v51 = vpop.eup %2764  ;;  %v4557_v52 = vld [vmem:[#allocation60_spill] sm:$0xff] }
 0x2ea   : > { %v2115_v20 = vadd.f32 %v2108_v8, %v2107_v26  ;;  %v1966_v0 = vmul.f32 %v2759_v37, %v4086_v41  ;;  %2784 = vlog2.f32 %v1962_v14  ;;  %v2116_v63 = vadd.f32 %v2110_v7, %v2109_v54  ;;  %v2767_v61 = vpop.eup %2766  ;;  %v4559_v54 = vld [vmem:[#allocation4_spill] sm:$0xff]  ;;  %v4564_v26 = vld [vmem:[#allocation19_spill] sm:$0xff]  ;;  %v4566_v7 = vld [vmem:[#allocation25_spill] sm:$0xff] }
 0x2eb   : > { %v2117_v58 = vadd.f32 %v2112_v24, %v2111_v5  ;;  %v1967_v27 = vmul.f32 %v2761_v53, %v4088_v44  ;;  %2786 = vlog2.f32 %v1963_v19  ;;  %v2106_v10 = vmul.f32 %v4557_v52, %v4556_v43  ;;  %v2769_v6 = vpop.eup %2768  ;;  %v4561_v5 = vld [vmem:[#allocation9_spill] sm:$0xff] }
 0x2ec   : > { %v2118_v30 = vadd.f32 %v2114_v9, %v2113_v49  ;;  %v1968_v12 = vmul.f32 %v2763_v3, %v4090_v35  ;;  %v1969_v11 = vmul.f32 %v2765_v51, %v4092_v2  ;;  %2788 = vlog2.f32 %v1964_v31  ;;  %v2771_v40 = vpop.eup %2770  ;;  %v4567_v31 = vld [vmem:[#allocation27_spill] sm:$0xff]  ;;  %v4569_v9 = vld [vmem:[#allocation54_spill] sm:$0xff] }
 0x2ed   : > { %v2119_v34 = vadd.f32 %v2116_v63, %v2115_v20  ;;  %v1970_v41 = vmul.f32 %v2767_v61, %v4094_v62  ;;  %2790 = vlog2.f32 %v1965_v47  ;;  %v2126_v44 = vmul.f32 %v3917_v45, %v4558_v55  ;;  %v2773_v21 = vpop.eup %2772  ;;  %v4568_v47 = vld [vmem:[#allocation31_spill] sm:$0xff]  ;;  %v4570_v20 = vld [vmem:[#allocation33_spill] sm:$0xff] }
 0x2ee   : > { %v2120_v33 = vadd.f32 %v2118_v30, %v2117_v58  ;;  %v1971_v37 = vmul.f32 %v2769_v6, %v4096_v36  ;;  %2792 = vlog2.f32 %v1966_v0  ;;  %v2127_v35 = vmul.f32 %v3921_v56, %v4559_v54  ;;  %v2775_v49 = vpop.eup %2774  ;;  %v2089_v36 = vld [vmem:[%s2944_s17] sm:$0xff]  ;;  %v4571_v51 = vld [vmem:[#allocation55_spill] sm:$0xff]  ;;  %v4572_v63 = vld [vmem:[#allocation61_spill] sm:$0xff] }
 0x2ef   : > { %v4242_v2 = vmul.f32 %v3925_v1, %v4560_v4  ;;  %v1972_v62 = vmul.f32 %v2771_v40, %v4098_v15  ;;  %2794 = vlog2.f32 %v1967_v27  ;;  %v2129_v24 = vmul.f32 %v3929_v60, %v4561_v5  ;;  %v2777_v45 = vpop.eup %2776  ;;  %v4573_v61 = vld [vmem:[#allocation37_spill] sm:$0xff] }
 0x2f0   : > { %v2121_v50 = vadd.f32 %v2120_v33, %v2119_v34  ;;  %v1973_v57 = vmul.f32 %v2773_v21, %v4100_v25  ;;  %2796 = vlog2.f32 %v1968_v12  ;;  %v2130_v56 = vmul.f32 %v3933_v28, %v4562_v22  ;;  %v4565_v25 = vld [vmem:[#allocation21_spill] sm:$0xff]  ;;  %v4577_v12 = vld [vmem:[#allocation43_spill] sm:$0xff] }
 0x2f1   : > { %v2131_v1 = vmul.f32 %v4522_v13, %v4563_v48  ;;  %v2779_v42 = vpop.eup %2778  ;;  %v1974_v23 = vmul.f32 %v2775_v49, %v4102_v17  ;;  %2798 = vlog2.f32 %v1969_v11  ;;  %v2132_v14 = vmul.f32 %v4524_v29, %v4564_v26  ;;  %v4576_v30 = vld [vmem:[#allocation57_spill] sm:$0xff]  ;;  %v4578_v11 = vld [vmem:[#allocation58_spill] sm:$0xff] }
 0x2f2   : > { %v2122_v15 = vadd.f32 %v2121_v50, %v2106_v10  ;;  %v2781_v60 = vpop.eup %2780  ;;  %v1975_v8 = vmul.f32 %v2777_v45, %v4104_v16  ;;  %2800 = vlog2.f32 %v1970_v41  ;;  %v2133_v19 = vmul.f32 %v4526_v39, %v4565_v25  ;;  %v4575_v10 = vld [vmem:[#allocation39_spill] sm:$0xff]  ;;  %v4579_v55 = vld [vmem:[#allocation45_spill] sm:$0xff] }
 0x2f3   : > { %v4261_v28 = vmul.f32 %v4528_v46, %v4566_v7  ;;  %v2783_v13 = vpop.eup %2782  ;;  %v1976_v17 = vmul.f32 %v2779_v42, %v4106_v38  ;;  %2802 = vlog2.f32 %v1971_v37  ;;  %v2135_v29 = vmul.f32 %v4530_v59, %v4567_v31  ;;  %v4574_v59 = vld [vmem:[#allocation56_spill] sm:$0xff]  ;;  %v4580_v45 = vld [vmem:[#allocation63_spill] sm:$0xff]  ;;  %v4582_v7 = vld [vmem:[#allocation65_spill] sm:$0xff] }
 0x2f4   : > { %v2123_v53 = vadd.f32 %v2122_v15, %v2089_v36  ;;  %v2785_v3 = vpop.eup %2784  ;;  %v1977_v16 = vmul.f32 %v2781_v60, %v4108_v32  ;;  %2804 = vlog2.f32 %v1972_v62  ;;  %v4269_v39 = vmul.f32 %v4569_v9, %v4568_v47  ;;  %v4581_v42 = vld [vmem:[#allocation64_spill] sm:$0xff] }
 0x2f5   : > { %v4273_v46 = vmul.f32 %v4571_v51, %v4570_v20  ;;  %v2787_v0 = vpop.eup %2786  ;;  %v1978_v38 = vmul.f32 %v2783_v13, %v4572_v63  ;;  %v1980_v58 = vmul.f32 0.6931472, %v2785_v3  ;;  %2806 = vlog2.f32 %v1973_v57  ;;  %v4584_v63 = vld [vmem:[#allocation67_spill] sm:$0xff] }
 0x2f6   : > { %2124 = vst [vmem:[%s2944_s17] sm:$0xff] %v2123_v53  ;;  %v4279_v27 = vmul.f32 %v4574_v59, %v4573_v61  ;;  %v2789_v32 = vpop.eup %2788  ;;  %v1982_v43 = vmul.f32 0.6931472, %v2787_v0  ;;  %2808 = vlog2.f32 %v1974_v23  ;;  %v4283_v6 = vmul.f32 %v4576_v30, %v4575_v10  ;;  %v4586_v61 = vld [vmem:[#allocation50_spill] sm:$0xff] }
 0x2f7   : > { %v4287_v34 = vmul.f32 %v4578_v11, %v4577_v12  ;;  %v2791_v40 = vpop.eup %2790  ;;  %v1984_v41 = vmul.f32 0.6931472, %v2789_v32  ;;  %2810 = vlog2.f32 %v1975_v8  ;;  %v2013_v33 = vand.u32 2147483647, %v1980_v58  ;;  %v4585_v58 = vld [vmem:[#allocation49_spill] sm:$0xff]  ;;  %v4587_v12 = vld [vmem:[#allocation51_spill] sm:$0xff] }
 0x2f8   : > { %v4291_v21 = vmul.f32 %v4542_v18, %v4579_v55  ;;  %v2793_v37 = vpop.eup %2792  ;;  %v1986_v54 = vmul.f32 0.6931472, %v2791_v40  ;;  %2812 = vlog2.f32 %v1976_v17  ;;  %v2014_v4 = vand.u32 2147483647, %v1982_v43  ;;  %v4583_v17 = vld [vmem:[#allocation66_spill] sm:$0xff] }
 0x2f9   : > { %v4293_v49 = vadd.f32 %v2127_v35, %v2126_v44  ;;  %v2795_v62 = vpop.eup %2794  ;;  %v1988_v50 = vmul.f32 0.6931472, %v2793_v37  ;;  %2814 = vlog2.f32 %v1977_v16  ;;  %v2015_v5 = vand.u32 2147483647, %v1984_v41 }
 0x2fa   : > { %v2053_v57 = vmul.f32 %v4580_v45, %v2013_v33  ;;  %v2797_v36 = vpop.eup %2796  ;;  %v1990_v22 = vmul.f32 0.6931472, %v2795_v62  ;;  %2816 = vlog2.f32 %v1978_v38  ;;  %v2016_v48 = vand.u32 2147483647, %v1986_v54  ;;  %v4588_v33 = vld [vmem:[#allocation52_spill] sm:$0xff] }
 0x2fb   : > { %v2054_v23 = vmul.f32 %v4581_v42, %v2014_v4  ;;  %v2799_v18 = vpop.eup %2798  ;;  %v1992_v15 = vmul.f32 0.6931472, %v2797_v36  ;;  %v2017_v26 = vand.u32 2147483647, %v1988_v50  ;;  %v2144_v60 = vadd.f32 %v2129_v24, %v4242_v2  ;;  %v4589_v50 = vld [vmem:[#allocation53_spill] sm:$0xff]  ;;  %v4590_v36 = vld [vmem:[#allocation68_spill] sm:$0xff] }
 0x2fc   : > { %v2145_v8 = vadd.f32 %v2131_v1, %v2130_v56  ;;  %v2801_v44 = vpop.eup %2800  ;;  %v1994_v35 = vmul.f32 0.6931472, %v2799_v18  ;;  %v2018_v25 = vand.u32 2147483647, %v1990_v22  ;;  %v2055_v13 = vmul.f32 %v4582_v7, %v2015_v5 }
 0x2fd   : > { %v2056_v53 = vmul.f32 %v4583_v17, %v2016_v48  ;;  %v2803_v31 = vpop.eup %2802  ;;  %v1996_v3 = vmul.f32 0.6931472, %v2801_v44  ;;  %v2019_v16 = vand.u32 2147483647, %v1992_v15  ;;  %v2071_v47 = vadd.f32 %v2054_v23, %v2053_v57  ;;  %v4591_v15 = vld [vmem:[#allocation69_spill] sm:$0xff]  ;;  %v4593_v17 = vld [vmem:[#allocation71_spill] sm:$0xff] }
 0x2fe   : > { %v2146_v9 = vadd.f32 %v2133_v19, %v2132_v14  ;;  %v2805_v20 = vpop.eup %2804  ;;  %v1998_v51 = vmul.f32 0.6931472, %v2803_v31  ;;  %v2020_v0 = vand.u32 2147483647, %v1994_v35  ;;  %v2057_v38 = vmul.f32 %v4584_v63, %v2017_v26  ;;  %v4592_v35 = vld [vmem:[#allocation70_spill] sm:$0xff]  ;;  %v4595_v63 = vld [vmem:[#allocation59_spill] sm:$0xff] }
 0x2ff   : > { %v2058_v2 = vmul.f32 %v4585_v58, %v2018_v25  ;;  %v2807_v24 = vpop.eup %2806  ;;  %v2000_v56 = vmul.f32 0.6931472, %v2805_v20  ;;  %v2021_v1 = vand.u32 2147483647, %v1996_v3  ;;  %v2059_v59 = vmul.f32 %v4586_v61, %v2019_v16  ;;  %v4594_v16 = vld [vmem:[#allocation72_spill] sm:$0xff] }
 0x300   : > { %v2147_v32 = vadd.f32 %v2135_v29, %v4261_v28  ;;  %v2809_v43 = vpop.eup %2808  ;;  %v2002_v10 = vmul.f32 0.6931472, %v2807_v24  ;;  %v2022_v30 = vand.u32 2147483647, %v1998_v51  ;;  %v2060_v11 = vmul.f32 %v4587_v12, %v2020_v0  ;;  %v2125_v12 = vld [vmem:[%s2949_s21] sm:$0xff] }
 0x301   : > { %v2072_v14 = vadd.f32 %v2056_v53, %v2055_v13  ;;  %v2811_v19 = vpop.eup %2810  ;;  %v2004_v40 = vmul.f32 0.6931472, %v2809_v43  ;;  %v2023_v41 = vand.u32 2147483647, %v2000_v56  ;;  %v2061_v55 = vmul.f32 %v4588_v33, %v2021_v1 }
 0x302   : > { %v2148_v37 = vadd.f32 %v4273_v46, %v4269_v39  ;;  %v2813_v54 = vpop.eup %2812  ;;  %v2006_v4 = vmul.f32 0.6931472, %v2811_v19  ;;  %v2024_v62 = vand.u32 2147483647, %v2002_v10  ;;  %v2062_v5 = vmul.f32 %v4589_v50, %v2022_v30 }
 0x303   : > { %v2073_v28 = vadd.f32 %v2058_v2, %v2057_v38  ;;  %v2815_v29 = vpop.eup %2814  ;;  %v2008_v45 = vmul.f32 0.6931472, %v2813_v54  ;;  %v2025_v57 = vand.u32 2147483647, %v2004_v40  ;;  %v2063_v22 = vmul.f32 %v4590_v36, %v2023_v41  ;;  %v4596_v2 = vld [vmem:[#allocation62_spill] sm:$0xff] }
 0x304   : > { %v2074_v48 = vadd.f32 %v2060_v11, %v2059_v59  ;;  %v2817_v42 = vpop.eup %2816  ;;  %v2010_v23 = vmul.f32 0.6931472, %v2815_v29  ;;  %v2026_v18 = vand.u32 2147483647, %v2006_v4  ;;  %v2064_v26 = vmul.f32 %v4591_v15, %v2024_v62 }
 0x305   : > { %v2149_v39 = vadd.f32 %v4283_v6, %v4279_v27  ;;  %v2012_v46 = vmul.f32 0.6931472, %v2817_v42  ;;  %v2027_v44 = vand.u32 2147483647, %v2008_v45  ;;  %v2065_v25 = vmul.f32 %v4592_v35, %v2025_v57 }
 0x306   : > { %v2075_v7 = vadd.f32 %v2062_v5, %v2061_v55  ;;  %v2028_v13 = vand.u32 2147483647, %v2010_v23  ;;  %v2066_v53 = vmul.f32 %v4593_v17, %v2026_v18  ;;  %v2076_v31 = vadd.f32 %v2064_v26, %v2063_v22 }
 0x307   : > { %v2150_v3 = vadd.f32 %v4291_v21, %v4287_v34  ;;  %v2067_v20 = vmul.f32 %v4594_v16, %v2027_v44  ;;  %v2079_v51 = vadd.f32 %v2072_v14, %v2071_v47  ;;  %v2151_v0 = vadd.f32 %v2144_v60, %v4293_v49  ;;  %v4597_v47 = vld [vmem:[#allocation47_spill] sm:$0xff]  ;;  %v2070_v14 = vld [vmem:[%s2939_s14] sm:$0xff] }
 0x308   : > { %v2068_v38 = vmul.f32 %v4595_v63, %v2028_v13  ;;  %v2077_v27 = vadd.f32 %v2066_v53, %v2065_v25  ;;  %v2080_v6 = vadd.f32 %v2074_v48, %v2073_v28  ;;  %v2152_v58 = vadd.f32 %v2146_v9, %v2145_v8 }
 0x309   : > { %v2052_v24 = vmul.f32 %v4557_v52, %v4596_v2  ;;  %v2153_v56 = vadd.f32 %v2148_v37, %v2147_v32  ;;  %v2154_v1 = vadd.f32 %v2150_v3, %v2149_v39  ;;  %v2029_v61 = vand.u32 2147483647, %v2012_v46 }
 0x30a   : > { %v2078_v59 = vadd.f32 %v2068_v38, %v2067_v20  ;;  %v2081_v34 = vadd.f32 %v2076_v31, %v2075_v7  ;;  %v2155_v21 = vadd.f32 %v2152_v58, %v2151_v0  ;;  %v2142_v49 = vmul.f32 %v4557_v52, %v4597_v47 }
 0x30b   : > { %v2156_v60 = vadd.f32 %v2154_v1, %v2153_v56  ;;  %v2083_v10 = vadd.f32 %v2080_v6, %v2079_v51  ;;  %v2069_v8 = vmul.f32 %v2052_v24, %v2029_v61 }
 0x30c   : > { %v2082_v43 = vadd.f32 %v2078_v59, %v2077_v27 }
 0x30d   : > { %v2157_v30 = vadd.f32 %v2156_v60, %v2155_v21 }
 0x30e   : > { %v2084_v9 = vadd.f32 %v2082_v43, %v2081_v34 }
 0x30f   : > { %v2158_v11 = vadd.f32 %v2157_v30, %v2142_v49 }
 0x310   : > { %v2085_v32 = vadd.f32 %v2084_v9, %v2083_v10 }
 0x311   : > { %v2159_v19 = vadd.f32 %v2158_v11, %v2125_v12 }
 0x312   : > { %v2086_v40 = vadd.f32 %v2085_v32, %v2069_v8 }
 0x313   : > { %2160 = vst [vmem:[%s2949_s21] sm:$0xff] %v2159_v19 }
 0x314   : > { %v2087_v41 = vadd.f32 %v2086_v40, %v2070_v14 }
 0x316   : > { %2088 = vst [vmem:[%s2939_s14] sm:$0xff] %v2087_v41 }
 0x317 PF: > { %s18_s28 = sadd.s32 1, %s2856_s28   ;;  %s4598_s24 = smov %s2848_s26 }
 0x318   : > { %p15_p11 = scmp.ge.s32.totalorder %s18_s28, 6   ;;  %s4599_s25 = smov %s2852_s27 }
 0x319   : > { %s4600_s26 = smov %s4603_s29  ;;  %s4601_s27 = smov %s4607_s30 }
 0x31a   :  { %17 = sbr.rel (!%p15_p11) target bundleno = 3 (0x3), region = 113 }

</bundles_post_ra>
